<compile_context>
chip_gen: v6e
topology: v6e:2x2x1
jax: 0.10.0
libtpu: 0.0.40
codegen_flags: <defaults>
</compile_context>

<pallas_src>
import jax
import jax.numpy as jnp
from jax import lax
from jax.experimental import pallas as pl
from jax.experimental.pallas import tpu as pltpu

INPUT_DIM = 300
D_PAD = 384            # 300 zero-padded to a multiple of 128
HIDDEN = 128
NUM_LAYERS = 3
NUM_CLASSES = 2
HEAD_PAD = 128         # fused head padded to one lane tile
TC = 8                 # timesteps per grid step (time chunk)
B_MIN = 8              # sublane width


# ----------------------------------------------------------------------------
# Fused Pallas kernel: 3 LSTM layers + last-valid-step select + head.
# Grid iterates over time chunks; h/c/h_last persist in VMEM scratch.
# ----------------------------------------------------------------------------
def _fused_lstm_head_kernel(len_ref, xp0_ref,
                            whh0_ref, wih1_ref, b1_ref, whh1_ref,
                            wih2_ref, b2_ref, whh2_ref,
                            wh_ref, bh_ref,
                            out_ref,
                            h0_ref, c0_ref, h1_ref, c1_ref, h2_ref, c2_ref,
                            hlast_ref, hseq_ref, xp_ref):
    chunk = pl.program_id(0)
    B, H = h0_ref.shape
    tc = hseq_ref.shape[0] // B

    @pl.when(chunk == 0)
    def _init():
        for r in (h0_ref, c0_ref, h1_ref, c1_ref, h2_ref, c2_ref, hlast_ref):
            r[...] = jnp.zeros_like(r)

    def cell(gates, c_prev):
        i = jax.nn.sigmoid(gates[:, 0 * H:1 * H])
        f = jax.nn.sigmoid(gates[:, 1 * H:2 * H])
        g = jnp.tanh(gates[:, 2 * H:3 * H])
        o = jax.nn.sigmoid(gates[:, 3 * H:4 * H])
        c_new = f * c_prev + i * g
        return o * jnp.tanh(c_new), c_new

    # ---- layer 0: input projection precomputed outside the kernel; only the
    #      (B,H)@(H,4H) recurrent matmul + gate math remains per step.
    h, c = h0_ref[...], c0_ref[...]
    for s in range(tc):
        gates = xp0_ref[s * B:(s + 1) * B, :] + jnp.dot(
            h, whh0_ref[...], preferred_element_type=jnp.float32)
        h, c = cell(gates, c)
        hseq_ref[s * B:(s + 1) * B, :] = h
    h0_ref[...] = h
    c0_ref[...] = c

    # ---- layer 1: per-chunk hoisted input projection, then recurrence.
    xp_ref[...] = jnp.dot(hseq_ref[...], wih1_ref[...],
                          preferred_element_type=jnp.float32) + b1_ref[...]
    h, c = h1_ref[...], c1_ref[...]
    for s in range(tc):
        gates = xp_ref[s * B:(s + 1) * B, :] + jnp.dot(
            h, whh1_ref[...], preferred_element_type=jnp.float32)
        h, c = cell(gates, c)
        hseq_ref[s * B:(s + 1) * B, :] = h
    h1_ref[...] = h
    c1_ref[...] = c

    # ---- layer 2: same, plus masked capture of the last valid timestep.
    xp_ref[...] = jnp.dot(hseq_ref[...], wih2_ref[...],
                          preferred_element_type=jnp.float32) + b2_ref[...]
    h, c = h2_ref[...], c2_ref[...]
    hlast = hlast_ref[...]
    for s in range(tc):
        gates = xp_ref[s * B:(s + 1) * B, :] + jnp.dot(
            h, whh2_ref[...], preferred_element_type=jnp.float32)
        h, c = cell(gates, c)
        t_global = chunk * tc + s
        mask = (len_ref[...] == t_global + 1)          # (B, 1)
        hlast = jnp.where(mask, h, hlast)
    h2_ref[...] = h
    c2_ref[...] = c
    hlast_ref[...] = hlast

    # ---- epilogue (last chunk only): fused head matmul + log_softmax.
    #      Padding lanes of the head have weight 0 and bias -1e9, so full-lane
    #      max / sum-exp reductions are exact for the 2 real classes.
    @pl.when(chunk == pl.num_programs(0) - 1)
    def _finish():
        z = jnp.dot(hlast_ref[...], wh_ref[...],
                    preferred_element_type=jnp.float32) + bh_ref[...]
        m = jnp.max(z, axis=1, keepdims=True)
        lse = m + jnp.log(jnp.sum(jnp.exp(z - m), axis=1, keepdims=True))
        logp = z - lse
        out_ref[...] = logp[:, :out_ref.shape[1]]


def _fused_call(lens, xp0, params, w_head, b_head, T_pad, B_pad):
    G = 4 * HIDDEN
    rows = TC * B_pad
    n_chunks = T_pad // TC
    return pl.pallas_call(
        _fused_lstm_head_kernel,
        out_shape=jax.ShapeDtypeStruct((B_pad, NUM_CLASSES), jnp.float32),
        grid_spec=pltpu.PrefetchScalarGridSpec(
            num_scalar_prefetch=0,
            grid=(n_chunks,),
            in_specs=[
                pl.BlockSpec((B_pad, 1), lambda c: (0, 0)),           # lengths
                pl.BlockSpec((rows, G), lambda c: (c, 0)),            # xproj layer0
                pl.BlockSpec((HIDDEN, G), lambda c: (0, 0)),          # whh0
                pl.BlockSpec((HIDDEN, G), lambda c: (0, 0)),          # wih1
                pl.BlockSpec((1, G), lambda c: (0, 0)),               # b1
                pl.BlockSpec((HIDDEN, G), lambda c: (0, 0)),          # whh1
                pl.BlockSpec((HIDDEN, G), lambda c: (0, 0)),          # wih2
                pl.BlockSpec((1, G), lambda c: (0, 0)),               # b2
                pl.BlockSpec((HIDDEN, G), lambda c: (0, 0)),          # whh2
                pl.BlockSpec((HIDDEN, HEAD_PAD), lambda c: (0, 0)),   # fused head W
                pl.BlockSpec((1, HEAD_PAD), lambda c: (0, 0)),        # fused head b
            ],
            out_specs=pl.BlockSpec((B_pad, NUM_CLASSES), lambda c: (0, 0)),
            scratch_shapes=[
                pltpu.VMEM((B_pad, HIDDEN), jnp.float32),   # h0
                pltpu.VMEM((B_pad, HIDDEN), jnp.float32),   # c0
                pltpu.VMEM((B_pad, HIDDEN), jnp.float32),   # h1
                pltpu.VMEM((B_pad, HIDDEN), jnp.float32),   # c1
                pltpu.VMEM((B_pad, HIDDEN), jnp.float32),   # h2
                pltpu.VMEM((B_pad, HIDDEN), jnp.float32),   # c2
                pltpu.VMEM((B_pad, HIDDEN), jnp.float32),   # h_last
                pltpu.VMEM((rows, HIDDEN), jnp.float32),    # per-chunk hidden seq
                pltpu.VMEM((rows, G), jnp.float32),         # per-chunk input proj
            ],
        ),
        compiler_params=pltpu.CompilerParams(
            dimension_semantics=("arbitrary",)),
    )(lens, xp0, params["whh0"], params["wih1"], params["b1"],
      params["whh1"], params["wih2"], params["b2"], params["whh2"],
      w_head, b_head)


# ----------------------------------------------------------------------------
# Full forward pass (eval mode).
# ----------------------------------------------------------------------------
@jax.jit
def lstm_classifier_forward(x_btd, lengths, params):
    """x_btd: (B, T, 300) padded sequences; lengths: (B,) int32 valid lengths."""
    B, T, D = x_btd.shape
    B_pad = max(B_MIN, ((B + 7) // 8) * 8)
    T_pad = ((T + TC - 1) // TC) * TC

    x = x_btd.astype(jnp.float32)
    x = jnp.pad(x, ((0, B_pad - B), (0, T_pad - T), (0, D_PAD - D)))
    lens = jnp.pad(lengths.astype(jnp.int32), (0, B_pad - B)).reshape(B_pad, 1)

    # Hoisted layer-0 input projection + bias as one big batched matmul,
    # produced directly in time-major layout.
    xp0 = jnp.einsum("btd,dg->tbg", x, params["wih0"]) + params["b0"]
    xp0 = xp0.reshape(T_pad * B_pad, 4 * HIDDEN)

    # Collapse fcn1 -> fcn2 -> fcn3 (no nonlinearity between them; dropout is
    # identity in eval) into a single (128, 2) affine, padded to 128 lanes.
    w_h = params["fc1_w"] @ params["fc2_w"] @ params["fc3_w"]
    b_h = (params["fc1_b"] @ params["fc2_w"] @ params["fc3_w"]
           + params["fc2_b"] @ params["fc3_w"] + params["fc3_b"])
    w_head = jnp.zeros((HIDDEN, HEAD_PAD), jnp.float32).at[:, :NUM_CLASSES].set(w_h)
    b_head = jnp.full((1, HEAD_PAD), -1e9, jnp.float32).at[:, :NUM_CLASSES].set(b_h)

    out = _fused_call(lens, xp0, params, w_head, b_head, T_pad, B_pad)
    return out[:B]


# ----------------------------------------------------------------------------
# PyTorch-style init (uniform(-1/sqrt(fan), 1/sqrt(fan))), distinct key names.
# ----------------------------------------------------------------------------
def init_params(key):
    k = 1.0 / jnp.sqrt(jnp.float32(HIDDEN))
    params = {}
    dims_in = [INPUT_DIM, HIDDEN, HIDDEN]
    for l in range(NUM_LAYERS):
        key, k1, k2, k3, k4 = jax.random.split(key, 5)
        wih = jax.random.uniform(k1, (4 * HIDDEN, dims_in[l]), jnp.float32, -k, k)
        whh = jax.random.uniform(k2, (4 * HIDDEN, HIDDEN), jnp.float32, -k, k)
        bih = jax.random.uniform(k3, (4 * HIDDEN,), jnp.float32, -k, k)
        bhh = jax.random.uniform(k4, (4 * HIDDEN,), jnp.float32, -k, k)
        wih_t = wih.T                                        # (D_in, 4H)
        if l == 0:   # zero-pad the 300 feature rows to 384 (aligned contraction)
            wih_t = jnp.zeros((D_PAD, 4 * HIDDEN), jnp.float32).at[:INPUT_DIM].set(wih_t)
        params[f"wih{l}"] = wih_t
        params[f"whh{l}"] = whh.T                            # (H, 4H)
        params[f"b{l}"] = (bih + bhh)[None, :]               # (1, 4H)

    def linear(key, din, dout):
        kk = 1.0 / jnp.sqrt(jnp.float32(din))
        k1, k2 = jax.random.split(key)
        w = jax.random.uniform(k1, (dout, din), jnp.float32, -kk, kk)
        b = jax.random.uniform(k2, (dout,), jnp.float32, -kk, kk)
        return w.T, b[None, :]

    key, k1, k2, k3 = jax.random.split(key, 4)
    params["fc1_w"], params["fc1_b"] = linear(k1, HIDDEN, 64)
    params["fc2_w"], params["fc2_b"] = linear(k2, 64, 32)
    params["fc3_w"], params["fc3_b"] = linear(k3, 32, NUM_CLASSES)
    return params


# ----------------------------------------------------------------------------
# Pure-JAX reference (lax.scan LSTM + explicit 3-linear head) for validation.
# ----------------------------------------------------------------------------
def _reference_forward(x_btd, lengths, p):
    x = jnp.transpose(x_btd.astype(jnp.float32), (1, 0, 2))   # (T, B, 300)

    def layer(seq, wih_t, whh_t, b):
        H = whh_t.shape[0]
        Bq = seq.shape[1]

        def step(carry, x_t):
            h_prev, c_prev = carry
            g = x_t @ wih_t + h_prev @ whh_t + b
            i = jax.nn.sigmoid(g[:, :H])
            f = jax.nn.sigmoid(g[:, H:2 * H])
            gg = jnp.tanh(g[:, 2 * H:3 * H])
            o = jax.nn.sigmoid(g[:, 3 * H:])
            c_new = f * c_prev + i * gg
            h_new = o * jnp.tanh(c_new)
            return (h_new, c_new), h_new

        init = (jnp.zeros((Bq, H), jnp.float32), jnp.zeros((Bq, H), jnp.float32))
        _, hs = lax.scan(step, init, seq)
        return hs

    h = layer(x, p["wih0"][:INPUT_DIM], p["whh0"], p["b0"])
    h = layer(h, p["wih1"], p["whh1"], p["b1"])
    h = layer(h, p["wih2"], p["whh2"], p["b2"])
    B = x.shape[1]
    h_last = h[lengths - 1, jnp.arange(B)]
    z = h_last @ p["fc1_w"] + p["fc1_b"]
    z = z @ p["fc2_w"] + p["fc2_b"]
    z = z @ p["fc3_w"] + p["fc3_b"]
    return jax.nn.log_softmax(z, axis=1)


if __name__ == "__main__":
    key = jax.random.PRNGKey(0)
    key, pkey, xkey = jax.random.split(key, 3)

    B, T = 2, 8
    params = init_params(pkey)
    x = jax.random.normal(xkey, (B, T, INPUT_DIM), jnp.float32)
    lengths = jnp.array([8, 5], dtype=jnp.int32)

    out = lstm_classifier_forward(x, lengths, params)
    out = jax.block_until_ready(out)

    # Sanity checks: shape, finiteness, log_softmax normalization, parity.
    assert out.shape == (B, NUM_CLASSES), out.shape
    assert bool(jnp.all(jnp.isfinite(out))), out
    row_sums = jnp.sum(jnp.exp(out), axis=1)
    assert bool(jnp.allclose(row_sums, 1.0, atol=1e-3)), row_sums

    ref = _reference_forward(x, lengths, params)
    assert bool(jnp.allclose(out, ref, atol=1e-3, rtol=1e-3)), (out, ref)

    print("KERNEL_OK")
</pallas_src>

<mosaic_0001>
module attributes {stable_mosaic.version = 11 : i64} {
  func.func @_fused_lstm_head_kernel(%arg0: i32, %arg1: memref<8x1xi32, #tpu.memory_space<vmem>>, %arg2: memref<64x512xf32, #tpu.memory_space<vmem>>, %arg3: memref<128x512xf32, #tpu.memory_space<vmem>>, %arg4: memref<128x512xf32, #tpu.memory_space<vmem>>, %arg5: memref<1x512xf32, #tpu.memory_space<vmem>>, %arg6: memref<128x512xf32, #tpu.memory_space<vmem>>, %arg7: memref<128x512xf32, #tpu.memory_space<vmem>>, %arg8: memref<1x512xf32, #tpu.memory_space<vmem>>, %arg9: memref<128x512xf32, #tpu.memory_space<vmem>>, %arg10: memref<128x128xf32, #tpu.memory_space<vmem>>, %arg11: memref<1x128xf32, #tpu.memory_space<vmem>>, %arg12: memref<8x2xf32, #tpu.memory_space<vmem>>, %arg13: memref<8x128xf32, #tpu.memory_space<vmem>>, %arg14: memref<8x128xf32, #tpu.memory_space<vmem>>, %arg15: memref<8x128xf32, #tpu.memory_space<vmem>>, %arg16: memref<8x128xf32, #tpu.memory_space<vmem>>, %arg17: memref<8x128xf32, #tpu.memory_space<vmem>>, %arg18: memref<8x128xf32, #tpu.memory_space<vmem>>, %arg19: memref<8x128xf32, #tpu.memory_space<vmem>>, %arg20: memref<64x128xf32, #tpu.memory_space<vmem>>, %arg21: memref<64x512xf32, #tpu.memory_space<vmem>>) attributes {dimension_semantics = [#tpu.dimension_semantics<arbitrary>], iteration_bounds = array<i64: 1>, scalar_prefetch = 0 : i64, scratch_operands = 9 : i64, tpu.core_type = #tpu.core_type<tc>, window_params = [{pipeline_mode = #tpu.pipeline_mode<synchronous>, transform_indices = @transform_0, window_bounds = array<i64: 8, 1>}, {transform_indices = @transform_1, window_bounds = array<i64: 64, 512>}, {pipeline_mode = #tpu.pipeline_mode<synchronous>, transform_indices = @transform_2, window_bounds = array<i64: 128, 512>}, {pipeline_mode = #tpu.pipeline_mode<synchronous>, transform_indices = @transform_3, window_bounds = array<i64: 128, 512>}, {pipeline_mode = #tpu.pipeline_mode<synchronous>, transform_indices = @transform_4, window_bounds = array<i64: 1, 512>}, {pipeline_mode = #tpu.pipeline_mode<synchronous>, transform_indices = @transform_5, window_bounds = array<i64: 128, 512>}, {pipeline_mode = #tpu.pipeline_mode<synchronous>, transform_indices = @transform_6, window_bounds = array<i64: 128, 512>}, {pipeline_mode = #tpu.pipeline_mode<synchronous>, transform_indices = @transform_7, window_bounds = array<i64: 1, 512>}, {pipeline_mode = #tpu.pipeline_mode<synchronous>, transform_indices = @transform_8, window_bounds = array<i64: 128, 512>}, {pipeline_mode = #tpu.pipeline_mode<synchronous>, transform_indices = @transform_9, window_bounds = array<i64: 128, 128>}, {pipeline_mode = #tpu.pipeline_mode<synchronous>, transform_indices = @transform_10, window_bounds = array<i64: 1, 128>}, {pipeline_mode = #tpu.pipeline_mode<synchronous>, transform_indices = @transform_11, window_bounds = array<i64: 8, 2>}]} {
    %c0_i32 = arith.constant 0 : i32
    %0 = arith.cmpi eq, %arg0, %c0_i32 : i32
    %1 = arith.extui %0 : i1 to i32
    %c0_i32_0 = arith.constant 0 : i32
    %2 = arith.cmpi ne, %1, %c0_i32_0 : i32
    scf.if %2 {
      %cst_296 = arith.constant 0.000000e+00 : f32
      %818 = vector.broadcast %cst_296 : f32 to vector<8x128xf32>
      %c0_297 = arith.constant 0 : index
      %c0_298 = arith.constant 0 : index
      %819 = vector.load %arg13[%c0_297, %c0_298] : memref<8x128xf32, #tpu.memory_space<vmem>>, vector<8x128xf32>
      tpu.vector_store %arg13[%c0_297, %c0_298], %818 {strides = array<i32>} : memref<8x128xf32, #tpu.memory_space<vmem>>, vector<8x128xf32>,
      %cst_299 = arith.constant 0.000000e+00 : f32
      %820 = vector.broadcast %cst_299 : f32 to vector<8x128xf32>
      %c0_300 = arith.constant 0 : index
      %c0_301 = arith.constant 0 : index
      %821 = vector.load %arg14[%c0_300, %c0_301] : memref<8x128xf32, #tpu.memory_space<vmem>>, vector<8x128xf32>
      tpu.vector_store %arg14[%c0_300, %c0_301], %820 {strides = array<i32>} : memref<8x128xf32, #tpu.memory_space<vmem>>, vector<8x128xf32>,
      %cst_302 = arith.constant 0.000000e+00 : f32
      %822 = vector.broadcast %cst_302 : f32 to vector<8x128xf32>
      %c0_303 = arith.constant 0 : index
      %c0_304 = arith.constant 0 : index
      %823 = vector.load %arg15[%c0_303, %c0_304] : memref<8x128xf32, #tpu.memory_space<vmem>>, vector<8x128xf32>
      tpu.vector_store %arg15[%c0_303, %c0_304], %822 {strides = array<i32>} : memref<8x128xf32, #tpu.memory_space<vmem>>, vector<8x128xf32>,
      %cst_305 = arith.constant 0.000000e+00 : f32
      %824 = vector.broadcast %cst_305 : f32 to vector<8x128xf32>
      %c0_306 = arith.constant 0 : index
      %c0_307 = arith.constant 0 : index
      %825 = vector.load %arg16[%c0_306, %c0_307] : memref<8x128xf32, #tpu.memory_space<vmem>>, vector<8x128xf32>
      tpu.vector_store %arg16[%c0_306, %c0_307], %824 {strides = array<i32>} : memref<8x128xf32, #tpu.memory_space<vmem>>, vector<8x128xf32>,
      %cst_308 = arith.constant 0.000000e+00 : f32
      %826 = vector.broadcast %cst_308 : f32 to vector<8x128xf32>
      %c0_309 = arith.constant 0 : index
      %c0_310 = arith.constant 0 : index
      %827 = vector.load %arg17[%c0_309, %c0_310] : memref<8x128xf32, #tpu.memory_space<vmem>>, vector<8x128xf32>
      tpu.vector_store %arg17[%c0_309, %c0_310], %826 {strides = array<i32>} : memref<8x128xf32, #tpu.memory_space<vmem>>, vector<8x128xf32>,
      %cst_311 = arith.constant 0.000000e+00 : f32
      %828 = vector.broadcast %cst_311 : f32 to vector<8x128xf32>
      %c0_312 = arith.constant 0 : index
      %c0_313 = arith.constant 0 : index
      %829 = vector.load %arg18[%c0_312, %c0_313] : memref<8x128xf32, #tpu.memory_space<vmem>>, vector<8x128xf32>
      tpu.vector_store %arg18[%c0_312, %c0_313], %828 {strides = array<i32>} : memref<8x128xf32, #tpu.memory_space<vmem>>, vector<8x128xf32>,
      %cst_314 = arith.constant 0.000000e+00 : f32
      %830 = vector.broadcast %cst_314 : f32 to vector<8x128xf32>
      %c0_315 = arith.constant 0 : index
      %c0_316 = arith.constant 0 : index
      %831 = vector.load %arg19[%c0_315, %c0_316] : memref<8x128xf32, #tpu.memory_space<vmem>>, vector<8x128xf32>
      tpu.vector_store %arg19[%c0_315, %c0_316], %830 {strides = array<i32>} : memref<8x128xf32, #tpu.memory_space<vmem>>, vector<8x128xf32>,
    } else {
    }
    %c0 = arith.constant 0 : index
    %c0_1 = arith.constant 0 : index
    %3 = vector.load %arg13[%c0, %c0_1] : memref<8x128xf32, #tpu.memory_space<vmem>>, vector<8x128xf32>
    %c0_2 = arith.constant 0 : index
    %c0_3 = arith.constant 0 : index
    %4 = vector.load %arg14[%c0_2, %c0_3] : memref<8x128xf32, #tpu.memory_space<vmem>>, vector<8x128xf32>
    %c0_4 = arith.constant 0 : index
    %c0_5 = arith.constant 0 : index
    %5 = vector.load %arg2[%c0_4, %c0_5] : memref<64x512xf32, #tpu.memory_space<vmem>>, vector<8x512xf32>
    %c0_6 = arith.constant 0 : index
    %c0_7 = arith.constant 0 : index
    %6 = vector.load %arg3[%c0_6, %c0_7] : memref<128x512xf32, #tpu.memory_space<vmem>>, vector<128x512xf32>
    %cst = arith.constant dense<0.000000e+00> : vector<8x512xf32>
    %7 = tpu.matmul %3, %6, %cst {dimension_numbers = #tpu.dot_dimension_numbers<[1], [0], [0], [1], [0, 0, 1, 1], [], []>} : vector<8x128xf32>, vector<128x512xf32>, vector<8x512xf32> -> vector<8x512xf32>
    %8 = arith.addf %5, %7 : vector<8x512xf32>
    %9 = vector.extract_strided_slice %8 {offsets = [0, 0], sizes = [8, 128], strides = [1, 1]} : vector<8x512xf32> to vector<8x128xf32>
    %10 = arith.negf %9 : vector<8x128xf32>
    %11 = math.exp %10 : vector<8x128xf32>
    %cst_8 = arith.constant 1.000000e+00 : f32
    %12 = vector.broadcast %cst_8 : f32 to vector<8x128xf32>
    %13 = arith.addf %12, %11 : vector<8x128xf32>
    %14 = arith.divf %12, %13 : vector<8x128xf32>
    %15 = vector.extract_strided_slice %8 {offsets = [0, 128], sizes = [8, 128], strides = [1, 1]} : vector<8x512xf32> to vector<8x128xf32>
    %16 = arith.negf %15 : vector<8x128xf32>
    %17 = math.exp %16 : vector<8x128xf32>
    %cst_9 = arith.constant 1.000000e+00 : f32
    %18 = vector.broadcast %cst_9 : f32 to vector<8x128xf32>
    %19 = arith.addf %18, %17 : vector<8x128xf32>
    %20 = arith.divf %18, %19 : vector<8x128xf32>
    %21 = vector.extract_strided_slice %8 {offsets = [0, 256], sizes = [8, 128], strides = [1, 1]} : vector<8x512xf32> to vector<8x128xf32>
    %22 = math.tanh %21 : vector<8x128xf32>
    %23 = vector.extract_strided_slice %8 {offsets = [0, 384], sizes = [8, 128], strides = [1, 1]} : vector<8x512xf32> to vector<8x128xf32>
    %24 = arith.negf %23 : vector<8x128xf32>
    %25 = math.exp %24 : vector<8x128xf32>
    %cst_10 = arith.constant 1.000000e+00 : f32
    %26 = vector.broadcast %cst_10 : f32 to vector<8x128xf32>
    %27 = arith.addf %26, %25 : vector<8x128xf32>
    %28 = arith.divf %26, %27 : vector<8x128xf32>
    %29 = arith.mulf %20, %4 : vector<8x128xf32>
    %30 = arith.mulf %14, %22 : vector<8x128xf32>
    %31 = arith.addf %29, %30 : vector<8x128xf32>
    %32 = math.tanh %31 : vector<8x128xf32>
    %33 = arith.mulf %28, %32 : vector<8x128xf32>
    %c0_11 = arith.constant 0 : index
    %c0_12 = arith.constant 0 : index
    %34 = vector.load %arg20[%c0_11, %c0_12] : memref<64x128xf32, #tpu.memory_space<vmem>>, vector<8x128xf32>
    tpu.vector_store %arg20[%c0_11, %c0_12], %33 {strides = array<i32>} : memref<64x128xf32, #tpu.memory_space<vmem>>, vector<8x128xf32>,
    %c8 = arith.constant 8 : index
    %c0_13 = arith.constant 0 : index
    %35 = vector.load %arg2[%c8, %c0_13] : memref<64x512xf32, #tpu.memory_space<vmem>>, vector<8x512xf32>
    %c0_14 = arith.constant 0 : index
    %c0_15 = arith.constant 0 : index
    %36 = vector.load %arg3[%c0_14, %c0_15] : memref<128x512xf32, #tpu.memory_space<vmem>>, vector<128x512xf32>
    %cst_16 = arith.constant dense<0.000000e+00> : vector<8x512xf32>
    %37 = tpu.matmul %33, %36, %cst_16 {dimension_numbers = #tpu.dot_dimension_numbers<[1], [0], [0], [1], [0, 0, 1, 1], [], []>} : vector<8x128xf32>, vector<128x512xf32>, vector<8x512xf32> -> vector<8x512xf32>
    %38 = arith.addf %35, %37 : vector<8x512xf32>
    %39 = vector.extract_strided_slice %38 {offsets = [0, 0], sizes = [8, 128], strides = [1, 1]} : vector<8x512xf32> to vector<8x128xf32>
    %40 = arith.negf %39 : vector<8x128xf32>
    %41 = math.exp %40 : vector<8x128xf32>
    %cst_17 = arith.constant 1.000000e+00 : f32
    %42 = vector.broadcast %cst_17 : f32 to vector<8x128xf32>
    %43 = arith.addf %42, %41 : vector<8x128xf32>
    %44 = arith.divf %42, %43 : vector<8x128xf32>
    %45 = vector.extract_strided_slice %38 {offsets = [0, 128], sizes = [8, 128], strides = [1, 1]} : vector<8x512xf32> to vector<8x128xf32>
    %46 = arith.negf %45 : vector<8x128xf32>
    %47 = math.exp %46 : vector<8x128xf32>
    %cst_18 = arith.constant 1.000000e+00 : f32
    %48 = vector.broadcast %cst_18 : f32 to vector<8x128xf32>
    %49 = arith.addf %48, %47 : vector<8x128xf32>
    %50 = arith.divf %48, %49 : vector<8x128xf32>
    %51 = vector.extract_strided_slice %38 {offsets = [0, 256], sizes = [8, 128], strides = [1, 1]} : vector<8x512xf32> to vector<8x128xf32>
    %52 = math.tanh %51 : vector<8x128xf32>
    %53 = vector.extract_strided_slice %38 {offsets = [0, 384], sizes = [8, 128], strides = [1, 1]} : vector<8x512xf32> to vector<8x128xf32>
    %54 = arith.negf %53 : vector<8x128xf32>
    %55 = math.exp %54 : vector<8x128xf32>
    %cst_19 = arith.constant 1.000000e+00 : f32
    %56 = vector.broadcast %cst_19 : f32 to vector<8x128xf32>
    %57 = arith.addf %56, %55 : vector<8x128xf32>
    %58 = arith.divf %56, %57 : vector<8x128xf32>
    %59 = arith.mulf %50, %31 : vector<8x128xf32>
    %60 = arith.mulf %44, %52 : vector<8x128xf32>
    %61 = arith.addf %59, %60 : vector<8x128xf32>
    %62 = math.tanh %61 : vector<8x128xf32>
    %63 = arith.mulf %58, %62 : vector<8x128xf32>
    %c8_20 = arith.constant 8 : index
    %c0_21 = arith.constant 0 : index
    %64 = vector.load %arg20[%c8_20, %c0_21] : memref<64x128xf32, #tpu.memory_space<vmem>>, vector<8x128xf32>
    tpu.vector_store %arg20[%c8_20, %c0_21], %63 {strides = array<i32>} : memref<64x128xf32, #tpu.memory_space<vmem>>, vector<8x128xf32>,
    %c16 = arith.constant 16 : index
    %c0_22 = arith.constant 0 : index
    %65 = vector.load %arg2[%c16, %c0_22] : memref<64x512xf32, #tpu.memory_space<vmem>>, vector<8x512xf32>
    %c0_23 = arith.constant 0 : index
    %c0_24 = arith.constant 0 : index
    %66 = vector.load %arg3[%c0_23, %c0_24] : memref<128x512xf32, #tpu.memory_space<vmem>>, vector<128x512xf32>
    %cst_25 = arith.constant dense<0.000000e+00> : vector<8x512xf32>
    %67 = tpu.matmul %63, %66, %cst_25 {dimension_numbers = #tpu.dot_dimension_numbers<[1], [0], [0], [1], [0, 0, 1, 1], [], []>} : vector<8x128xf32>, vector<128x512xf32>, vector<8x512xf32> -> vector<8x512xf32>
    %68 = arith.addf %65, %67 : vector<8x512xf32>
    %69 = vector.extract_strided_slice %68 {offsets = [0, 0], sizes = [8, 128], strides = [1, 1]} : vector<8x512xf32> to vector<8x128xf32>
    %70 = arith.negf %69 : vector<8x128xf32>
    %71 = math.exp %70 : vector<8x128xf32>
    %cst_26 = arith.constant 1.000000e+00 : f32
    %72 = vector.broadcast %cst_26 : f32 to vector<8x128xf32>
    %73 = arith.addf %72, %71 : vector<8x128xf32>
    %74 = arith.divf %72, %73 : vector<8x128xf32>
    %75 = vector.extract_strided_slice %68 {offsets = [0, 128], sizes = [8, 128], strides = [1, 1]} : vector<8x512xf32> to vector<8x128xf32>
    %76 = arith.negf %75 : vector<8x128xf32>
    %77 = math.exp %76 : vector<8x128xf32>
    %cst_27 = arith.constant 1.000000e+00 : f32
    %78 = vector.broadcast %cst_27 : f32 to vector<8x128xf32>
    %79 = arith.addf %78, %77 : vector<8x128xf32>
    %80 = arith.divf %78, %79 : vector<8x128xf32>
    %81 = vector.extract_strided_slice %68 {offsets = [0, 256], sizes = [8, 128], strides = [1, 1]} : vector<8x512xf32> to vector<8x128xf32>
    %82 = math.tanh %81 : vector<8x128xf32>
    %83 = vector.extract_strided_slice %68 {offsets = [0, 384], sizes = [8, 128], strides = [1, 1]} : vector<8x512xf32> to vector<8x128xf32>
    %84 = arith.negf %83 : vector<8x128xf32>
    %85 = math.exp %84 : vector<8x128xf32>
    %cst_28 = arith.constant 1.000000e+00 : f32
    %86 = vector.broadcast %cst_28 : f32 to vector<8x128xf32>
    %87 = arith.addf %86, %85 : vector<8x128xf32>
    %88 = arith.divf %86, %87 : vector<8x128xf32>
    %89 = arith.mulf %80, %61 : vector<8x128xf32>
    %90 = arith.mulf %74, %82 : vector<8x128xf32>
    %91 = arith.addf %89, %90 : vector<8x128xf32>
    %92 = math.tanh %91 : vector<8x128xf32>
    %93 = arith.mulf %88, %92 : vector<8x128xf32>
    %c16_29 = arith.constant 16 : index
    %c0_30 = arith.constant 0 : index
    %94 = vector.load %arg20[%c16_29, %c0_30] : memref<64x128xf32, #tpu.memory_space<vmem>>, vector<8x128xf32>
    tpu.vector_store %arg20[%c16_29, %c0_30], %93 {strides = array<i32>} : memref<64x128xf32, #tpu.memory_space<vmem>>, vector<8x128xf32>,
    %c24 = arith.constant 24 : index
    %c0_31 = arith.constant 0 : index
    %95 = vector.load %arg2[%c24, %c0_31] : memref<64x512xf32, #tpu.memory_space<vmem>>, vector<8x512xf32>
    %c0_32 = arith.constant 0 : index
    %c0_33 = arith.constant 0 : index
    %96 = vector.load %arg3[%c0_32, %c0_33] : memref<128x512xf32, #tpu.memory_space<vmem>>, vector<128x512xf32>
    %cst_34 = arith.constant dense<0.000000e+00> : vector<8x512xf32>
    %97 = tpu.matmul %93, %96, %cst_34 {dimension_numbers = #tpu.dot_dimension_numbers<[1], [0], [0], [1], [0, 0, 1, 1], [], []>} : vector<8x128xf32>, vector<128x512xf32>, vector<8x512xf32> -> vector<8x512xf32>
    %98 = arith.addf %95, %97 : vector<8x512xf32>
    %99 = vector.extract_strided_slice %98 {offsets = [0, 0], sizes = [8, 128], strides = [1, 1]} : vector<8x512xf32> to vector<8x128xf32>
    %100 = arith.negf %99 : vector<8x128xf32>
    %101 = math.exp %100 : vector<8x128xf32>
    %cst_35 = arith.constant 1.000000e+00 : f32
    %102 = vector.broadcast %cst_35 : f32 to vector<8x128xf32>
    %103 = arith.addf %102, %101 : vector<8x128xf32>
    %104 = arith.divf %102, %103 : vector<8x128xf32>
    %105 = vector.extract_strided_slice %98 {offsets = [0, 128], sizes = [8, 128], strides = [1, 1]} : vector<8x512xf32> to vector<8x128xf32>
    %106 = arith.negf %105 : vector<8x128xf32>
    %107 = math.exp %106 : vector<8x128xf32>
    %cst_36 = arith.constant 1.000000e+00 : f32
    %108 = vector.broadcast %cst_36 : f32 to vector<8x128xf32>
    %109 = arith.addf %108, %107 : vector<8x128xf32>
    %110 = arith.divf %108, %109 : vector<8x128xf32>
    %111 = vector.extract_strided_slice %98 {offsets = [0, 256], sizes = [8, 128], strides = [1, 1]} : vector<8x512xf32> to vector<8x128xf32>
    %112 = math.tanh %111 : vector<8x128xf32>
    %113 = vector.extract_strided_slice %98 {offsets = [0, 384], sizes = [8, 128], strides = [1, 1]} : vector<8x512xf32> to vector<8x128xf32>
    %114 = arith.negf %113 : vector<8x128xf32>
    %115 = math.exp %114 : vector<8x128xf32>
    %cst_37 = arith.constant 1.000000e+00 : f32
    %116 = vector.broadcast %cst_37 : f32 to vector<8x128xf32>
    %117 = arith.addf %116, %115 : vector<8x128xf32>
    %118 = arith.divf %116, %117 : vector<8x128xf32>
    %119 = arith.mulf %110, %91 : vector<8x128xf32>
    %120 = arith.mulf %104, %112 : vector<8x128xf32>
    %121 = arith.addf %119, %120 : vector<8x128xf32>
    %122 = math.tanh %121 : vector<8x128xf32>
    %123 = arith.mulf %118, %122 : vector<8x128xf32>
    %c24_38 = arith.constant 24 : index
    %c0_39 = arith.constant 0 : index
    %124 = vector.load %arg20[%c24_38, %c0_39] : memref<64x128xf32, #tpu.memory_space<vmem>>, vector<8x128xf32>
    tpu.vector_store %arg20[%c24_38, %c0_39], %123 {strides = array<i32>} : memref<64x128xf32, #tpu.memory_space<vmem>>, vector<8x128xf32>,
    %c32 = arith.constant 32 : index
    %c0_40 = arith.constant 0 : index
    %125 = vector.load %arg2[%c32, %c0_40] : memref<64x512xf32, #tpu.memory_space<vmem>>, vector<8x512xf32>
    %c0_41 = arith.constant 0 : index
    %c0_42 = arith.constant 0 : index
    %126 = vector.load %arg3[%c0_41, %c0_42] : memref<128x512xf32, #tpu.memory_space<vmem>>, vector<128x512xf32>
    %cst_43 = arith.constant dense<0.000000e+00> : vector<8x512xf32>
    %127 = tpu.matmul %123, %126, %cst_43 {dimension_numbers = #tpu.dot_dimension_numbers<[1], [0], [0], [1], [0, 0, 1, 1], [], []>} : vector<8x128xf32>, vector<128x512xf32>, vector<8x512xf32> -> vector<8x512xf32>
    %128 = arith.addf %125, %127 : vector<8x512xf32>
    %129 = vector.extract_strided_slice %128 {offsets = [0, 0], sizes = [8, 128], strides = [1, 1]} : vector<8x512xf32> to vector<8x128xf32>
    %130 = arith.negf %129 : vector<8x128xf32>
    %131 = math.exp %130 : vector<8x128xf32>
    %cst_44 = arith.constant 1.000000e+00 : f32
    %132 = vector.broadcast %cst_44 : f32 to vector<8x128xf32>
    %133 = arith.addf %132, %131 : vector<8x128xf32>
    %134 = arith.divf %132, %133 : vector<8x128xf32>
    %135 = vector.extract_strided_slice %128 {offsets = [0, 128], sizes = [8, 128], strides = [1, 1]} : vector<8x512xf32> to vector<8x128xf32>
    %136 = arith.negf %135 : vector<8x128xf32>
    %137 = math.exp %136 : vector<8x128xf32>
    %cst_45 = arith.constant 1.000000e+00 : f32
    %138 = vector.broadcast %cst_45 : f32 to vector<8x128xf32>
    %139 = arith.addf %138, %137 : vector<8x128xf32>
    %140 = arith.divf %138, %139 : vector<8x128xf32>
    %141 = vector.extract_strided_slice %128 {offsets = [0, 256], sizes = [8, 128], strides = [1, 1]} : vector<8x512xf32> to vector<8x128xf32>
    %142 = math.tanh %141 : vector<8x128xf32>
    %143 = vector.extract_strided_slice %128 {offsets = [0, 384], sizes = [8, 128], strides = [1, 1]} : vector<8x512xf32> to vector<8x128xf32>
    %144 = arith.negf %143 : vector<8x128xf32>
    %145 = math.exp %144 : vector<8x128xf32>
    %cst_46 = arith.constant 1.000000e+00 : f32
    %146 = vector.broadcast %cst_46 : f32 to vector<8x128xf32>
    %147 = arith.addf %146, %145 : vector<8x128xf32>
    %148 = arith.divf %146, %147 : vector<8x128xf32>
    %149 = arith.mulf %140, %121 : vector<8x128xf32>
    %150 = arith.mulf %134, %142 : vector<8x128xf32>
    %151 = arith.addf %149, %150 : vector<8x128xf32>
    %152 = math.tanh %151 : vector<8x128xf32>
    %153 = arith.mulf %148, %152 : vector<8x128xf32>
    %c32_47 = arith.constant 32 : index
    %c0_48 = arith.constant 0 : index
    %154 = vector.load %arg20[%c32_47, %c0_48] : memref<64x128xf32, #tpu.memory_space<vmem>>, vector<8x128xf32>
    tpu.vector_store %arg20[%c32_47, %c0_48], %153 {strides = array<i32>} : memref<64x128xf32, #tpu.memory_space<vmem>>, vector<8x128xf32>,
    %c40 = arith.constant 40 : index
    %c0_49 = arith.constant 0 : index
    %155 = vector.load %arg2[%c40, %c0_49] : memref<64x512xf32, #tpu.memory_space<vmem>>, vector<8x512xf32>
    %c0_50 = arith.constant 0 : index
    %c0_51 = arith.constant 0 : index
    %156 = vector.load %arg3[%c0_50, %c0_51] : memref<128x512xf32, #tpu.memory_space<vmem>>, vector<128x512xf32>
    %cst_52 = arith.constant dense<0.000000e+00> : vector<8x512xf32>
    %157 = tpu.matmul %153, %156, %cst_52 {dimension_numbers = #tpu.dot_dimension_numbers<[1], [0], [0], [1], [0, 0, 1, 1], [], []>} : vector<8x128xf32>, vector<128x512xf32>, vector<8x512xf32> -> vector<8x512xf32>
    %158 = arith.addf %155, %157 : vector<8x512xf32>
    %159 = vector.extract_strided_slice %158 {offsets = [0, 0], sizes = [8, 128], strides = [1, 1]} : vector<8x512xf32> to vector<8x128xf32>
    %160 = arith.negf %159 : vector<8x128xf32>
    %161 = math.exp %160 : vector<8x128xf32>
    %cst_53 = arith.constant 1.000000e+00 : f32
    %162 = vector.broadcast %cst_53 : f32 to vector<8x128xf32>
    %163 = arith.addf %162, %161 : vector<8x128xf32>
    %164 = arith.divf %162, %163 : vector<8x128xf32>
    %165 = vector.extract_strided_slice %158 {offsets = [0, 128], sizes = [8, 128], strides = [1, 1]} : vector<8x512xf32> to vector<8x128xf32>
    %166 = arith.negf %165 : vector<8x128xf32>
    %167 = math.exp %166 : vector<8x128xf32>
    %cst_54 = arith.constant 1.000000e+00 : f32
    %168 = vector.broadcast %cst_54 : f32 to vector<8x128xf32>
    %169 = arith.addf %168, %167 : vector<8x128xf32>
    %170 = arith.divf %168, %169 : vector<8x128xf32>
    %171 = vector.extract_strided_slice %158 {offsets = [0, 256], sizes = [8, 128], strides = [1, 1]} : vector<8x512xf32> to vector<8x128xf32>
    %172 = math.tanh %171 : vector<8x128xf32>
    %173 = vector.extract_strided_slice %158 {offsets = [0, 384], sizes = [8, 128], strides = [1, 1]} : vector<8x512xf32> to vector<8x128xf32>
    %174 = arith.negf %173 : vector<8x128xf32>
    %175 = math.exp %174 : vector<8x128xf32>
    %cst_55 = arith.constant 1.000000e+00 : f32
    %176 = vector.broadcast %cst_55 : f32 to vector<8x128xf32>
    %177 = arith.addf %176, %175 : vector<8x128xf32>
    %178 = arith.divf %176, %177 : vector<8x128xf32>
    %179 = arith.mulf %170, %151 : vector<8x128xf32>
    %180 = arith.mulf %164, %172 : vector<8x128xf32>
    %181 = arith.addf %179, %180 : vector<8x128xf32>
    %182 = math.tanh %181 : vector<8x128xf32>
    %183 = arith.mulf %178, %182 : vector<8x128xf32>
    %c40_56 = arith.constant 40 : index
    %c0_57 = arith.constant 0 : index
    %184 = vector.load %arg20[%c40_56, %c0_57] : memref<64x128xf32, #tpu.memory_space<vmem>>, vector<8x128xf32>
    tpu.vector_store %arg20[%c40_56, %c0_57], %183 {strides = array<i32>} : memref<64x128xf32, #tpu.memory_space<vmem>>, vector<8x128xf32>,
    %c48 = arith.constant 48 : index
    %c0_58 = arith.constant 0 : index
    %185 = vector.load %arg2[%c48, %c0_58] : memref<64x512xf32, #tpu.memory_space<vmem>>, vector<8x512xf32>
    %c0_59 = arith.constant 0 : index
    %c0_60 = arith.constant 0 : index
    %186 = vector.load %arg3[%c0_59, %c0_60] : memref<128x512xf32, #tpu.memory_space<vmem>>, vector<128x512xf32>
    %cst_61 = arith.constant dense<0.000000e+00> : vector<8x512xf32>
    %187 = tpu.matmul %183, %186, %cst_61 {dimension_numbers = #tpu.dot_dimension_numbers<[1], [0], [0], [1], [0, 0, 1, 1], [], []>} : vector<8x128xf32>, vector<128x512xf32>, vector<8x512xf32> -> vector<8x512xf32>
    %188 = arith.addf %185, %187 : vector<8x512xf32>
    %189 = vector.extract_strided_slice %188 {offsets = [0, 0], sizes = [8, 128], strides = [1, 1]} : vector<8x512xf32> to vector<8x128xf32>
    %190 = arith.negf %189 : vector<8x128xf32>
    %191 = math.exp %190 : vector<8x128xf32>
    %cst_62 = arith.constant 1.000000e+00 : f32
    %192 = vector.broadcast %cst_62 : f32 to vector<8x128xf32>
    %193 = arith.addf %192, %191 : vector<8x128xf32>
    %194 = arith.divf %192, %193 : vector<8x128xf32>
    %195 = vector.extract_strided_slice %188 {offsets = [0, 128], sizes = [8, 128], strides = [1, 1]} : vector<8x512xf32> to vector<8x128xf32>
    %196 = arith.negf %195 : vector<8x128xf32>
    %197 = math.exp %196 : vector<8x128xf32>
    %cst_63 = arith.constant 1.000000e+00 : f32
    %198 = vector.broadcast %cst_63 : f32 to vector<8x128xf32>
    %199 = arith.addf %198, %197 : vector<8x128xf32>
    %200 = arith.divf %198, %199 : vector<8x128xf32>
    %201 = vector.extract_strided_slice %188 {offsets = [0, 256], sizes = [8, 128], strides = [1, 1]} : vector<8x512xf32> to vector<8x128xf32>
    %202 = math.tanh %201 : vector<8x128xf32>
    %203 = vector.extract_strided_slice %188 {offsets = [0, 384], sizes = [8, 128], strides = [1, 1]} : vector<8x512xf32> to vector<8x128xf32>
    %204 = arith.negf %203 : vector<8x128xf32>
    %205 = math.exp %204 : vector<8x128xf32>
    %cst_64 = arith.constant 1.000000e+00 : f32
    %206 = vector.broadcast %cst_64 : f32 to vector<8x128xf32>
    %207 = arith.addf %206, %205 : vector<8x128xf32>
    %208 = arith.divf %206, %207 : vector<8x128xf32>
    %209 = arith.mulf %200, %181 : vector<8x128xf32>
    %210 = arith.mulf %194, %202 : vector<8x128xf32>
    %211 = arith.addf %209, %210 : vector<8x128xf32>
    %212 = math.tanh %211 : vector<8x128xf32>
    %213 = arith.mulf %208, %212 : vector<8x128xf32>
    %c48_65 = arith.constant 48 : index
    %c0_66 = arith.constant 0 : index
    %214 = vector.load %arg20[%c48_65, %c0_66] : memref<64x128xf32, #tpu.memory_space<vmem>>, vector<8x128xf32>
    tpu.vector_store %arg20[%c48_65, %c0_66], %213 {strides = array<i32>} : memref<64x128xf32, #tpu.memory_space<vmem>>, vector<8x128xf32>,
    %c56 = arith.constant 56 : index
    %c0_67 = arith.constant 0 : index
    %215 = vector.load %arg2[%c56, %c0_67] : memref<64x512xf32, #tpu.memory_space<vmem>>, vector<8x512xf32>
    %c0_68 = arith.constant 0 : index
    %c0_69 = arith.constant 0 : index
    %216 = vector.load %arg3[%c0_68, %c0_69] : memref<128x512xf32, #tpu.memory_space<vmem>>, vector<128x512xf32>
    %cst_70 = arith.constant dense<0.000000e+00> : vector<8x512xf32>
    %217 = tpu.matmul %213, %216, %cst_70 {dimension_numbers = #tpu.dot_dimension_numbers<[1], [0], [0], [1], [0, 0, 1, 1], [], []>} : vector<8x128xf32>, vector<128x512xf32>, vector<8x512xf32> -> vector<8x512xf32>
    %218 = arith.addf %215, %217 : vector<8x512xf32>
    %219 = vector.extract_strided_slice %218 {offsets = [0, 0], sizes = [8, 128], strides = [1, 1]} : vector<8x512xf32> to vector<8x128xf32>
    %220 = arith.negf %219 : vector<8x128xf32>
    %221 = math.exp %220 : vector<8x128xf32>
    %cst_71 = arith.constant 1.000000e+00 : f32
    %222 = vector.broadcast %cst_71 : f32 to vector<8x128xf32>
    %223 = arith.addf %222, %221 : vector<8x128xf32>
    %224 = arith.divf %222, %223 : vector<8x128xf32>
    %225 = vector.extract_strided_slice %218 {offsets = [0, 128], sizes = [8, 128], strides = [1, 1]} : vector<8x512xf32> to vector<8x128xf32>
    %226 = arith.negf %225 : vector<8x128xf32>
    %227 = math.exp %226 : vector<8x128xf32>
    %cst_72 = arith.constant 1.000000e+00 : f32
    %228 = vector.broadcast %cst_72 : f32 to vector<8x128xf32>
    %229 = arith.addf %228, %227 : vector<8x128xf32>
    %230 = arith.divf %228, %229 : vector<8x128xf32>
    %231 = vector.extract_strided_slice %218 {offsets = [0, 256], sizes = [8, 128], strides = [1, 1]} : vector<8x512xf32> to vector<8x128xf32>
    %232 = math.tanh %231 : vector<8x128xf32>
    %233 = vector.extract_strided_slice %218 {offsets = [0, 384], sizes = [8, 128], strides = [1, 1]} : vector<8x512xf32> to vector<8x128xf32>
    %234 = arith.negf %233 : vector<8x128xf32>
    %235 = math.exp %234 : vector<8x128xf32>
    %cst_73 = arith.constant 1.000000e+00 : f32
    %236 = vector.broadcast %cst_73 : f32 to vector<8x128xf32>
    %237 = arith.addf %236, %235 : vector<8x128xf32>
    %238 = arith.divf %236, %237 : vector<8x128xf32>
    %239 = arith.mulf %230, %211 : vector<8x128xf32>
    %240 = arith.mulf %224, %232 : vector<8x128xf32>
    %241 = arith.addf %239, %240 : vector<8x128xf32>
    %242 = math.tanh %241 : vector<8x128xf32>
    %243 = arith.mulf %238, %242 : vector<8x128xf32>
    %c56_74 = arith.constant 56 : index
    %c0_75 = arith.constant 0 : index
    %244 = vector.load %arg20[%c56_74, %c0_75] : memref<64x128xf32, #tpu.memory_space<vmem>>, vector<8x128xf32>
    tpu.vector_store %arg20[%c56_74, %c0_75], %243 {strides = array<i32>} : memref<64x128xf32, #tpu.memory_space<vmem>>, vector<8x128xf32>,
    %c0_76 = arith.constant 0 : index
    %c0_77 = arith.constant 0 : index
    %245 = vector.load %arg13[%c0_76, %c0_77] : memref<8x128xf32, #tpu.memory_space<vmem>>, vector<8x128xf32>
    tpu.vector_store %arg13[%c0_76, %c0_77], %243 {strides = array<i32>} : memref<8x128xf32, #tpu.memory_space<vmem>>, vector<8x128xf32>,
    %c0_78 = arith.constant 0 : index
    %c0_79 = arith.constant 0 : index
    %246 = vector.load %arg14[%c0_78, %c0_79] : memref<8x128xf32, #tpu.memory_space<vmem>>, vector<8x128xf32>
    tpu.vector_store %arg14[%c0_78, %c0_79], %241 {strides = array<i32>} : memref<8x128xf32, #tpu.memory_space<vmem>>, vector<8x128xf32>,
    %c0_80 = arith.constant 0 : index
    %c0_81 = arith.constant 0 : index
    %247 = vector.load %arg20[%c0_80, %c0_81] : memref<64x128xf32, #tpu.memory_space<vmem>>, vector<64x128xf32>
    %c0_82 = arith.constant 0 : index
    %c0_83 = arith.constant 0 : index
    %248 = vector.load %arg4[%c0_82, %c0_83] : memref<128x512xf32, #tpu.memory_space<vmem>>, vector<128x512xf32>
    %cst_84 = arith.constant dense<0.000000e+00> : vector<64x512xf32>
    %249 = tpu.matmul %247, %248, %cst_84 {dimension_numbers = #tpu.dot_dimension_numbers<[1], [0], [0], [1], [0, 0, 1, 1], [], []>} : vector<64x128xf32>, vector<128x512xf32>, vector<64x512xf32> -> vector<64x512xf32>
    %c0_85 = arith.constant 0 : index
    %c0_86 = arith.constant 0 : index
    %250 = vector.load %arg5[%c0_85, %c0_86] : memref<1x512xf32, #tpu.memory_space<vmem>>, vector<1x512xf32>
    %251 = vector.broadcast %250 : vector<1x512xf32> to vector<64x512xf32>
    %252 = arith.addf %249, %251 : vector<64x512xf32>
    %c0_87 = arith.constant 0 : index
    %c0_88 = arith.constant 0 : index
    %253 = vector.load %arg21[%c0_87, %c0_88] : memref<64x512xf32, #tpu.memory_space<vmem>>, vector<64x512xf32>
    tpu.vector_store %arg21[%c0_87, %c0_88], %252 {strides = array<i32>} : memref<64x512xf32, #tpu.memory_space<vmem>>, vector<64x512xf32>,
    %c0_89 = arith.constant 0 : index
    %c0_90 = arith.constant 0 : index
    %254 = vector.load %arg15[%c0_89, %c0_90] : memref<8x128xf32, #tpu.memory_space<vmem>>, vector<8x128xf32>
    %c0_91 = arith.constant 0 : index
    %c0_92 = arith.constant 0 : index
    %255 = vector.load %arg16[%c0_91, %c0_92] : memref<8x128xf32, #tpu.memory_space<vmem>>, vector<8x128xf32>
    %c0_93 = arith.constant 0 : index
    %c0_94 = arith.constant 0 : index
    %256 = vector.load %arg21[%c0_93, %c0_94] : memref<64x512xf32, #tpu.memory_space<vmem>>, vector<8x512xf32>
    %c0_95 = arith.constant 0 : index
    %c0_96 = arith.constant 0 : index
    %257 = vector.load %arg6[%c0_95, %c0_96] : memref<128x512xf32, #tpu.memory_space<vmem>>, vector<128x512xf32>
    %cst_97 = arith.constant dense<0.000000e+00> : vector<8x512xf32>
    %258 = tpu.matmul %254, %257, %cst_97 {dimension_numbers = #tpu.dot_dimension_numbers<[1], [0], [0], [1], [0, 0, 1, 1], [], []>} : vector<8x128xf32>, vector<128x512xf32>, vector<8x512xf32> -> vector<8x512xf32>
    %259 = arith.addf %256, %258 : vector<8x512xf32>
    %260 = vector.extract_strided_slice %259 {offsets = [0, 0], sizes = [8, 128], strides = [1, 1]} : vector<8x512xf32> to vector<8x128xf32>
    %261 = arith.negf %260 : vector<8x128xf32>
    %262 = math.exp %261 : vector<8x128xf32>
    %cst_98 = arith.constant 1.000000e+00 : f32
    %263 = vector.broadcast %cst_98 : f32 to vector<8x128xf32>
    %264 = arith.addf %263, %262 : vector<8x128xf32>
    %265 = arith.divf %263, %264 : vector<8x128xf32>
    %266 = vector.extract_strided_slice %259 {offsets = [0, 128], sizes = [8, 128], strides = [1, 1]} : vector<8x512xf32> to vector<8x128xf32>
    %267 = arith.negf %266 : vector<8x128xf32>
    %268 = math.exp %267 : vector<8x128xf32>
    %cst_99 = arith.constant 1.000000e+00 : f32
    %269 = vector.broadcast %cst_99 : f32 to vector<8x128xf32>
    %270 = arith.addf %269, %268 : vector<8x128xf32>
    %271 = arith.divf %269, %270 : vector<8x128xf32>
    %272 = vector.extract_strided_slice %259 {offsets = [0, 256], sizes = [8, 128], strides = [1, 1]} : vector<8x512xf32> to vector<8x128xf32>
    %273 = math.tanh %272 : vector<8x128xf32>
    %274 = vector.extract_strided_slice %259 {offsets = [0, 384], sizes = [8, 128], strides = [1, 1]} : vector<8x512xf32> to vector<8x128xf32>
    %275 = arith.negf %274 : vector<8x128xf32>
    %276 = math.exp %275 : vector<8x128xf32>
    %cst_100 = arith.constant 1.000000e+00 : f32
    %277 = vector.broadcast %cst_100 : f32 to vector<8x128xf32>
    %278 = arith.addf %277, %276 : vector<8x128xf32>
    %279 = arith.divf %277, %278 : vector<8x128xf32>
    %280 = arith.mulf %271, %255 : vector<8x128xf32>
    %281 = arith.mulf %265, %273 : vector<8x128xf32>
    %282 = arith.addf %280, %281 : vector<8x128xf32>
    %283 = math.tanh %282 : vector<8x128xf32>
    %284 = arith.mulf %279, %283 : vector<8x128xf32>
    %c0_101 = arith.constant 0 : index
    %c0_102 = arith.constant 0 : index
    %285 = vector.load %arg20[%c0_101, %c0_102] : memref<64x128xf32, #tpu.memory_space<vmem>>, vector<8x128xf32>
    tpu.vector_store %arg20[%c0_101, %c0_102], %284 {strides = array<i32>} : memref<64x128xf32, #tpu.memory_space<vmem>>, vector<8x128xf32>,
    %c8_103 = arith.constant 8 : index
    %c0_104 = arith.constant 0 : index
    %286 = vector.load %arg21[%c8_103, %c0_104] : memref<64x512xf32, #tpu.memory_space<vmem>>, vector<8x512xf32>
    %c0_105 = arith.constant 0 : index
    %c0_106 = arith.constant 0 : index
    %287 = vector.load %arg6[%c0_105, %c0_106] : memref<128x512xf32, #tpu.memory_space<vmem>>, vector<128x512xf32>
    %cst_107 = arith.constant dense<0.000000e+00> : vector<8x512xf32>
    %288 = tpu.matmul %284, %287, %cst_107 {dimension_numbers = #tpu.dot_dimension_numbers<[1], [0], [0], [1], [0, 0, 1, 1], [], []>} : vector<8x128xf32>, vector<128x512xf32>, vector<8x512xf32> -> vector<8x512xf32>
    %289 = arith.addf %286, %288 : vector<8x512xf32>
    %290 = vector.extract_strided_slice %289 {offsets = [0, 0], sizes = [8, 128], strides = [1, 1]} : vector<8x512xf32> to vector<8x128xf32>
    %291 = arith.negf %290 : vector<8x128xf32>
    %292 = math.exp %291 : vector<8x128xf32>
    %cst_108 = arith.constant 1.000000e+00 : f32
    %293 = vector.broadcast %cst_108 : f32 to vector<8x128xf32>
    %294 = arith.addf %293, %292 : vector<8x128xf32>
    %295 = arith.divf %293, %294 : vector<8x128xf32>
    %296 = vector.extract_strided_slice %289 {offsets = [0, 128], sizes = [8, 128], strides = [1, 1]} : vector<8x512xf32> to vector<8x128xf32>
    %297 = arith.negf %296 : vector<8x128xf32>
    %298 = math.exp %297 : vector<8x128xf32>
    %cst_109 = arith.constant 1.000000e+00 : f32
    %299 = vector.broadcast %cst_109 : f32 to vector<8x128xf32>
    %300 = arith.addf %299, %298 : vector<8x128xf32>
    %301 = arith.divf %299, %300 : vector<8x128xf32>
    %302 = vector.extract_strided_slice %289 {offsets = [0, 256], sizes = [8, 128], strides = [1, 1]} : vector<8x512xf32> to vector<8x128xf32>
    %303 = math.tanh %302 : vector<8x128xf32>
    %304 = vector.extract_strided_slice %289 {offsets = [0, 384], sizes = [8, 128], strides = [1, 1]} : vector<8x512xf32> to vector<8x128xf32>
    %305 = arith.negf %304 : vector<8x128xf32>
    %306 = math.exp %305 : vector<8x128xf32>
    %cst_110 = arith.constant 1.000000e+00 : f32
    %307 = vector.broadcast %cst_110 : f32 to vector<8x128xf32>
    %308 = arith.addf %307, %306 : vector<8x128xf32>
    %309 = arith.divf %307, %308 : vector<8x128xf32>
    %310 = arith.mulf %301, %282 : vector<8x128xf32>
    %311 = arith.mulf %295, %303 : vector<8x128xf32>
    %312 = arith.addf %310, %311 : vector<8x128xf32>
    %313 = math.tanh %312 : vector<8x128xf32>
    %314 = arith.mulf %309, %313 : vector<8x128xf32>
    %c8_111 = arith.constant 8 : index
    %c0_112 = arith.constant 0 : index
    %315 = vector.load %arg20[%c8_111, %c0_112] : memref<64x128xf32, #tpu.memory_space<vmem>>, vector<8x128xf32>
    tpu.vector_store %arg20[%c8_111, %c0_112], %314 {strides = array<i32>} : memref<64x128xf32, #tpu.memory_space<vmem>>, vector<8x128xf32>,
    %c16_113 = arith.constant 16 : index
    %c0_114 = arith.constant 0 : index
    %316 = vector.load %arg21[%c16_113, %c0_114] : memref<64x512xf32, #tpu.memory_space<vmem>>, vector<8x512xf32>
    %c0_115 = arith.constant 0 : index
    %c0_116 = arith.constant 0 : index
    %317 = vector.load %arg6[%c0_115, %c0_116] : memref<128x512xf32, #tpu.memory_space<vmem>>, vector<128x512xf32>
    %cst_117 = arith.constant dense<0.000000e+00> : vector<8x512xf32>
    %318 = tpu.matmul %314, %317, %cst_117 {dimension_numbers = #tpu.dot_dimension_numbers<[1], [0], [0], [1], [0, 0, 1, 1], [], []>} : vector<8x128xf32>, vector<128x512xf32>, vector<8x512xf32> -> vector<8x512xf32>
    %319 = arith.addf %316, %318 : vector<8x512xf32>
    %320 = vector.extract_strided_slice %319 {offsets = [0, 0], sizes = [8, 128], strides = [1, 1]} : vector<8x512xf32> to vector<8x128xf32>
    %321 = arith.negf %320 : vector<8x128xf32>
    %322 = math.exp %321 : vector<8x128xf32>
    %cst_118 = arith.constant 1.000000e+00 : f32
    %323 = vector.broadcast %cst_118 : f32 to vector<8x128xf32>
    %324 = arith.addf %323, %322 : vector<8x128xf32>
    %325 = arith.divf %323, %324 : vector<8x128xf32>
    %326 = vector.extract_strided_slice %319 {offsets = [0, 128], sizes = [8, 128], strides = [1, 1]} : vector<8x512xf32> to vector<8x128xf32>
    %327 = arith.negf %326 : vector<8x128xf32>
    %328 = math.exp %327 : vector<8x128xf32>
    %cst_119 = arith.constant 1.000000e+00 : f32
    %329 = vector.broadcast %cst_119 : f32 to vector<8x128xf32>
    %330 = arith.addf %329, %328 : vector<8x128xf32>
    %331 = arith.divf %329, %330 : vector<8x128xf32>
    %332 = vector.extract_strided_slice %319 {offsets = [0, 256], sizes = [8, 128], strides = [1, 1]} : vector<8x512xf32> to vector<8x128xf32>
    %333 = math.tanh %332 : vector<8x128xf32>
    %334 = vector.extract_strided_slice %319 {offsets = [0, 384], sizes = [8, 128], strides = [1, 1]} : vector<8x512xf32> to vector<8x128xf32>
    %335 = arith.negf %334 : vector<8x128xf32>
    %336 = math.exp %335 : vector<8x128xf32>
    %cst_120 = arith.constant 1.000000e+00 : f32
    %337 = vector.broadcast %cst_120 : f32 to vector<8x128xf32>
    %338 = arith.addf %337, %336 : vector<8x128xf32>
    %339 = arith.divf %337, %338 : vector<8x128xf32>
    %340 = arith.mulf %331, %312 : vector<8x128xf32>
    %341 = arith.mulf %325, %333 : vector<8x128xf32>
    %342 = arith.addf %340, %341 : vector<8x128xf32>
    %343 = math.tanh %342 : vector<8x128xf32>
    %344 = arith.mulf %339, %343 : vector<8x128xf32>
    %c16_121 = arith.constant 16 : index
    %c0_122 = arith.constant 0 : index
    %345 = vector.load %arg20[%c16_121, %c0_122] : memref<64x128xf32, #tpu.memory_space<vmem>>, vector<8x128xf32>
    tpu.vector_store %arg20[%c16_121, %c0_122], %344 {strides = array<i32>} : memref<64x128xf32, #tpu.memory_space<vmem>>, vector<8x128xf32>,
    %c24_123 = arith.constant 24 : index
    %c0_124 = arith.constant 0 : index
    %346 = vector.load %arg21[%c24_123, %c0_124] : memref<64x512xf32, #tpu.memory_space<vmem>>, vector<8x512xf32>
    %c0_125 = arith.constant 0 : index
    %c0_126 = arith.constant 0 : index
    %347 = vector.load %arg6[%c0_125, %c0_126] : memref<128x512xf32, #tpu.memory_space<vmem>>, vector<128x512xf32>
    %cst_127 = arith.constant dense<0.000000e+00> : vector<8x512xf32>
    %348 = tpu.matmul %344, %347, %cst_127 {dimension_numbers = #tpu.dot_dimension_numbers<[1], [0], [0], [1], [0, 0, 1, 1], [], []>} : vector<8x128xf32>, vector<128x512xf32>, vector<8x512xf32> -> vector<8x512xf32>
    %349 = arith.addf %346, %348 : vector<8x512xf32>
    %350 = vector.extract_strided_slice %349 {offsets = [0, 0], sizes = [8, 128], strides = [1, 1]} : vector<8x512xf32> to vector<8x128xf32>
    %351 = arith.negf %350 : vector<8x128xf32>
    %352 = math.exp %351 : vector<8x128xf32>
    %cst_128 = arith.constant 1.000000e+00 : f32
    %353 = vector.broadcast %cst_128 : f32 to vector<8x128xf32>
    %354 = arith.addf %353, %352 : vector<8x128xf32>
    %355 = arith.divf %353, %354 : vector<8x128xf32>
    %356 = vector.extract_strided_slice %349 {offsets = [0, 128], sizes = [8, 128], strides = [1, 1]} : vector<8x512xf32> to vector<8x128xf32>
    %357 = arith.negf %356 : vector<8x128xf32>
    %358 = math.exp %357 : vector<8x128xf32>
    %cst_129 = arith.constant 1.000000e+00 : f32
    %359 = vector.broadcast %cst_129 : f32 to vector<8x128xf32>
    %360 = arith.addf %359, %358 : vector<8x128xf32>
    %361 = arith.divf %359, %360 : vector<8x128xf32>
    %362 = vector.extract_strided_slice %349 {offsets = [0, 256], sizes = [8, 128], strides = [1, 1]} : vector<8x512xf32> to vector<8x128xf32>
    %363 = math.tanh %362 : vector<8x128xf32>
    %364 = vector.extract_strided_slice %349 {offsets = [0, 384], sizes = [8, 128], strides = [1, 1]} : vector<8x512xf32> to vector<8x128xf32>
    %365 = arith.negf %364 : vector<8x128xf32>
    %366 = math.exp %365 : vector<8x128xf32>
    %cst_130 = arith.constant 1.000000e+00 : f32
    %367 = vector.broadcast %cst_130 : f32 to vector<8x128xf32>
    %368 = arith.addf %367, %366 : vector<8x128xf32>
    %369 = arith.divf %367, %368 : vector<8x128xf32>
    %370 = arith.mulf %361, %342 : vector<8x128xf32>
    %371 = arith.mulf %355, %363 : vector<8x128xf32>
    %372 = arith.addf %370, %371 : vector<8x128xf32>
    %373 = math.tanh %372 : vector<8x128xf32>
    %374 = arith.mulf %369, %373 : vector<8x128xf32>
    %c24_131 = arith.constant 24 : index
    %c0_132 = arith.constant 0 : index
    %375 = vector.load %arg20[%c24_131, %c0_132] : memref<64x128xf32, #tpu.memory_space<vmem>>, vector<8x128xf32>
    tpu.vector_store %arg20[%c24_131, %c0_132], %374 {strides = array<i32>} : memref<64x128xf32, #tpu.memory_space<vmem>>, vector<8x128xf32>,
    %c32_133 = arith.constant 32 : index
    %c0_134 = arith.constant 0 : index
    %376 = vector.load %arg21[%c32_133, %c0_134] : memref<64x512xf32, #tpu.memory_space<vmem>>, vector<8x512xf32>
    %c0_135 = arith.constant 0 : index
    %c0_136 = arith.constant 0 : index
    %377 = vector.load %arg6[%c0_135, %c0_136] : memref<128x512xf32, #tpu.memory_space<vmem>>, vector<128x512xf32>
    %cst_137 = arith.constant dense<0.000000e+00> : vector<8x512xf32>
    %378 = tpu.matmul %374, %377, %cst_137 {dimension_numbers = #tpu.dot_dimension_numbers<[1], [0], [0], [1], [0, 0, 1, 1], [], []>} : vector<8x128xf32>, vector<128x512xf32>, vector<8x512xf32> -> vector<8x512xf32>
    %379 = arith.addf %376, %378 : vector<8x512xf32>
    %380 = vector.extract_strided_slice %379 {offsets = [0, 0], sizes = [8, 128], strides = [1, 1]} : vector<8x512xf32> to vector<8x128xf32>
    %381 = arith.negf %380 : vector<8x128xf32>
    %382 = math.exp %381 : vector<8x128xf32>
    %cst_138 = arith.constant 1.000000e+00 : f32
    %383 = vector.broadcast %cst_138 : f32 to vector<8x128xf32>
    %384 = arith.addf %383, %382 : vector<8x128xf32>
    %385 = arith.divf %383, %384 : vector<8x128xf32>
    %386 = vector.extract_strided_slice %379 {offsets = [0, 128], sizes = [8, 128], strides = [1, 1]} : vector<8x512xf32> to vector<8x128xf32>
    %387 = arith.negf %386 : vector<8x128xf32>
    %388 = math.exp %387 : vector<8x128xf32>
    %cst_139 = arith.constant 1.000000e+00 : f32
    %389 = vector.broadcast %cst_139 : f32 to vector<8x128xf32>
    %390 = arith.addf %389, %388 : vector<8x128xf32>
    %391 = arith.divf %389, %390 : vector<8x128xf32>
    %392 = vector.extract_strided_slice %379 {offsets = [0, 256], sizes = [8, 128], strides = [1, 1]} : vector<8x512xf32> to vector<8x128xf32>
    %393 = math.tanh %392 : vector<8x128xf32>
    %394 = vector.extract_strided_slice %379 {offsets = [0, 384], sizes = [8, 128], strides = [1, 1]} : vector<8x512xf32> to vector<8x128xf32>
    %395 = arith.negf %394 : vector<8x128xf32>
    %396 = math.exp %395 : vector<8x128xf32>
    %cst_140 = arith.constant 1.000000e+00 : f32
    %397 = vector.broadcast %cst_140 : f32 to vector<8x128xf32>
    %398 = arith.addf %397, %396 : vector<8x128xf32>
    %399 = arith.divf %397, %398 : vector<8x128xf32>
    %400 = arith.mulf %391, %372 : vector<8x128xf32>
    %401 = arith.mulf %385, %393 : vector<8x128xf32>
    %402 = arith.addf %400, %401 : vector<8x128xf32>
    %403 = math.tanh %402 : vector<8x128xf32>
    %404 = arith.mulf %399, %403 : vector<8x128xf32>
    %c32_141 = arith.constant 32 : index
    %c0_142 = arith.constant 0 : index
    %405 = vector.load %arg20[%c32_141, %c0_142] : memref<64x128xf32, #tpu.memory_space<vmem>>, vector<8x128xf32>
    tpu.vector_store %arg20[%c32_141, %c0_142], %404 {strides = array<i32>} : memref<64x128xf32, #tpu.memory_space<vmem>>, vector<8x128xf32>,
    %c40_143 = arith.constant 40 : index
    %c0_144 = arith.constant 0 : index
    %406 = vector.load %arg21[%c40_143, %c0_144] : memref<64x512xf32, #tpu.memory_space<vmem>>, vector<8x512xf32>
    %c0_145 = arith.constant 0 : index
    %c0_146 = arith.constant 0 : index
    %407 = vector.load %arg6[%c0_145, %c0_146] : memref<128x512xf32, #tpu.memory_space<vmem>>, vector<128x512xf32>
    %cst_147 = arith.constant dense<0.000000e+00> : vector<8x512xf32>
    %408 = tpu.matmul %404, %407, %cst_147 {dimension_numbers = #tpu.dot_dimension_numbers<[1], [0], [0], [1], [0, 0, 1, 1], [], []>} : vector<8x128xf32>, vector<128x512xf32>, vector<8x512xf32> -> vector<8x512xf32>
    %409 = arith.addf %406, %408 : vector<8x512xf32>
    %410 = vector.extract_strided_slice %409 {offsets = [0, 0], sizes = [8, 128], strides = [1, 1]} : vector<8x512xf32> to vector<8x128xf32>
    %411 = arith.negf %410 : vector<8x128xf32>
    %412 = math.exp %411 : vector<8x128xf32>
    %cst_148 = arith.constant 1.000000e+00 : f32
    %413 = vector.broadcast %cst_148 : f32 to vector<8x128xf32>
    %414 = arith.addf %413, %412 : vector<8x128xf32>
    %415 = arith.divf %413, %414 : vector<8x128xf32>
    %416 = vector.extract_strided_slice %409 {offsets = [0, 128], sizes = [8, 128], strides = [1, 1]} : vector<8x512xf32> to vector<8x128xf32>
    %417 = arith.negf %416 : vector<8x128xf32>
    %418 = math.exp %417 : vector<8x128xf32>
    %cst_149 = arith.constant 1.000000e+00 : f32
    %419 = vector.broadcast %cst_149 : f32 to vector<8x128xf32>
    %420 = arith.addf %419, %418 : vector<8x128xf32>
    %421 = arith.divf %419, %420 : vector<8x128xf32>
    %422 = vector.extract_strided_slice %409 {offsets = [0, 256], sizes = [8, 128], strides = [1, 1]} : vector<8x512xf32> to vector<8x128xf32>
    %423 = math.tanh %422 : vector<8x128xf32>
    %424 = vector.extract_strided_slice %409 {offsets = [0, 384], sizes = [8, 128], strides = [1, 1]} : vector<8x512xf32> to vector<8x128xf32>
    %425 = arith.negf %424 : vector<8x128xf32>
    %426 = math.exp %425 : vector<8x128xf32>
    %cst_150 = arith.constant 1.000000e+00 : f32
    %427 = vector.broadcast %cst_150 : f32 to vector<8x128xf32>
    %428 = arith.addf %427, %426 : vector<8x128xf32>
    %429 = arith.divf %427, %428 : vector<8x128xf32>
    %430 = arith.mulf %421, %402 : vector<8x128xf32>
    %431 = arith.mulf %415, %423 : vector<8x128xf32>
    %432 = arith.addf %430, %431 : vector<8x128xf32>
    %433 = math.tanh %432 : vector<8x128xf32>
    %434 = arith.mulf %429, %433 : vector<8x128xf32>
    %c40_151 = arith.constant 40 : index
    %c0_152 = arith.constant 0 : index
    %435 = vector.load %arg20[%c40_151, %c0_152] : memref<64x128xf32, #tpu.memory_space<vmem>>, vector<8x128xf32>
    tpu.vector_store %arg20[%c40_151, %c0_152], %434 {strides = array<i32>} : memref<64x128xf32, #tpu.memory_space<vmem>>, vector<8x128xf32>,
    %c48_153 = arith.constant 48 : index
    %c0_154 = arith.constant 0 : index
    %436 = vector.load %arg21[%c48_153, %c0_154] : memref<64x512xf32, #tpu.memory_space<vmem>>, vector<8x512xf32>
    %c0_155 = arith.constant 0 : index
    %c0_156 = arith.constant 0 : index
    %437 = vector.load %arg6[%c0_155, %c0_156] : memref<128x512xf32, #tpu.memory_space<vmem>>, vector<128x512xf32>
    %cst_157 = arith.constant dense<0.000000e+00> : vector<8x512xf32>
    %438 = tpu.matmul %434, %437, %cst_157 {dimension_numbers = #tpu.dot_dimension_numbers<[1], [0], [0], [1], [0, 0, 1, 1], [], []>} : vector<8x128xf32>, vector<128x512xf32>, vector<8x512xf32> -> vector<8x512xf32>
    %439 = arith.addf %436, %438 : vector<8x512xf32>
    %440 = vector.extract_strided_slice %439 {offsets = [0, 0], sizes = [8, 128], strides = [1, 1]} : vector<8x512xf32> to vector<8x128xf32>
    %441 = arith.negf %440 : vector<8x128xf32>
    %442 = math.exp %441 : vector<8x128xf32>
    %cst_158 = arith.constant 1.000000e+00 : f32
    %443 = vector.broadcast %cst_158 : f32 to vector<8x128xf32>
    %444 = arith.addf %443, %442 : vector<8x128xf32>
    %445 = arith.divf %443, %444 : vector<8x128xf32>
    %446 = vector.extract_strided_slice %439 {offsets = [0, 128], sizes = [8, 128], strides = [1, 1]} : vector<8x512xf32> to vector<8x128xf32>
    %447 = arith.negf %446 : vector<8x128xf32>
    %448 = math.exp %447 : vector<8x128xf32>
    %cst_159 = arith.constant 1.000000e+00 : f32
    %449 = vector.broadcast %cst_159 : f32 to vector<8x128xf32>
    %450 = arith.addf %449, %448 : vector<8x128xf32>
    %451 = arith.divf %449, %450 : vector<8x128xf32>
    %452 = vector.extract_strided_slice %439 {offsets = [0, 256], sizes = [8, 128], strides = [1, 1]} : vector<8x512xf32> to vector<8x128xf32>
    %453 = math.tanh %452 : vector<8x128xf32>
    %454 = vector.extract_strided_slice %439 {offsets = [0, 384], sizes = [8, 128], strides = [1, 1]} : vector<8x512xf32> to vector<8x128xf32>
    %455 = arith.negf %454 : vector<8x128xf32>
    %456 = math.exp %455 : vector<8x128xf32>
    %cst_160 = arith.constant 1.000000e+00 : f32
    %457 = vector.broadcast %cst_160 : f32 to vector<8x128xf32>
    %458 = arith.addf %457, %456 : vector<8x128xf32>
    %459 = arith.divf %457, %458 : vector<8x128xf32>
    %460 = arith.mulf %451, %432 : vector<8x128xf32>
    %461 = arith.mulf %445, %453 : vector<8x128xf32>
    %462 = arith.addf %460, %461 : vector<8x128xf32>
    %463 = math.tanh %462 : vector<8x128xf32>
    %464 = arith.mulf %459, %463 : vector<8x128xf32>
    %c48_161 = arith.constant 48 : index
    %c0_162 = arith.constant 0 : index
    %465 = vector.load %arg20[%c48_161, %c0_162] : memref<64x128xf32, #tpu.memory_space<vmem>>, vector<8x128xf32>
    tpu.vector_store %arg20[%c48_161, %c0_162], %464 {strides = array<i32>} : memref<64x128xf32, #tpu.memory_space<vmem>>, vector<8x128xf32>,
    %c56_163 = arith.constant 56 : index
    %c0_164 = arith.constant 0 : index
    %466 = vector.load %arg21[%c56_163, %c0_164] : memref<64x512xf32, #tpu.memory_space<vmem>>, vector<8x512xf32>
    %c0_165 = arith.constant 0 : index
    %c0_166 = arith.constant 0 : index
    %467 = vector.load %arg6[%c0_165, %c0_166] : memref<128x512xf32, #tpu.memory_space<vmem>>, vector<128x512xf32>
    %cst_167 = arith.constant dense<0.000000e+00> : vector<8x512xf32>
    %468 = tpu.matmul %464, %467, %cst_167 {dimension_numbers = #tpu.dot_dimension_numbers<[1], [0], [0], [1], [0, 0, 1, 1], [], []>} : vector<8x128xf32>, vector<128x512xf32>, vector<8x512xf32> -> vector<8x512xf32>
    %469 = arith.addf %466, %468 : vector<8x512xf32>
    %470 = vector.extract_strided_slice %469 {offsets = [0, 0], sizes = [8, 128], strides = [1, 1]} : vector<8x512xf32> to vector<8x128xf32>
    %471 = arith.negf %470 : vector<8x128xf32>
    %472 = math.exp %471 : vector<8x128xf32>
    %cst_168 = arith.constant 1.000000e+00 : f32
    %473 = vector.broadcast %cst_168 : f32 to vector<8x128xf32>
    %474 = arith.addf %473, %472 : vector<8x128xf32>
    %475 = arith.divf %473, %474 : vector<8x128xf32>
    %476 = vector.extract_strided_slice %469 {offsets = [0, 128], sizes = [8, 128], strides = [1, 1]} : vector<8x512xf32> to vector<8x128xf32>
    %477 = arith.negf %476 : vector<8x128xf32>
    %478 = math.exp %477 : vector<8x128xf32>
    %cst_169 = arith.constant 1.000000e+00 : f32
    %479 = vector.broadcast %cst_169 : f32 to vector<8x128xf32>
    %480 = arith.addf %479, %478 : vector<8x128xf32>
    %481 = arith.divf %479, %480 : vector<8x128xf32>
    %482 = vector.extract_strided_slice %469 {offsets = [0, 256], sizes = [8, 128], strides = [1, 1]} : vector<8x512xf32> to vector<8x128xf32>
    %483 = math.tanh %482 : vector<8x128xf32>
    %484 = vector.extract_strided_slice %469 {offsets = [0, 384], sizes = [8, 128], strides = [1, 1]} : vector<8x512xf32> to vector<8x128xf32>
    %485 = arith.negf %484 : vector<8x128xf32>
    %486 = math.exp %485 : vector<8x128xf32>
    %cst_170 = arith.constant 1.000000e+00 : f32
    %487 = vector.broadcast %cst_170 : f32 to vector<8x128xf32>
    %488 = arith.addf %487, %486 : vector<8x128xf32>
    %489 = arith.divf %487, %488 : vector<8x128xf32>
    %490 = arith.mulf %481, %462 : vector<8x128xf32>
    %491 = arith.mulf %475, %483 : vector<8x128xf32>
    %492 = arith.addf %490, %491 : vector<8x128xf32>
    %493 = math.tanh %492 : vector<8x128xf32>
    %494 = arith.mulf %489, %493 : vector<8x128xf32>
    %c56_171 = arith.constant 56 : index
    %c0_172 = arith.constant 0 : index
    %495 = vector.load %arg20[%c56_171, %c0_172] : memref<64x128xf32, #tpu.memory_space<vmem>>, vector<8x128xf32>
    tpu.vector_store %arg20[%c56_171, %c0_172], %494 {strides = array<i32>} : memref<64x128xf32, #tpu.memory_space<vmem>>, vector<8x128xf32>,
    %c0_173 = arith.constant 0 : index
    %c0_174 = arith.constant 0 : index
    %496 = vector.load %arg15[%c0_173, %c0_174] : memref<8x128xf32, #tpu.memory_space<vmem>>, vector<8x128xf32>
    tpu.vector_store %arg15[%c0_173, %c0_174], %494 {strides = array<i32>} : memref<8x128xf32, #tpu.memory_space<vmem>>, vector<8x128xf32>,
    %c0_175 = arith.constant 0 : index
    %c0_176 = arith.constant 0 : index
    %497 = vector.load %arg16[%c0_175, %c0_176] : memref<8x128xf32, #tpu.memory_space<vmem>>, vector<8x128xf32>
    tpu.vector_store %arg16[%c0_175, %c0_176], %492 {strides = array<i32>} : memref<8x128xf32, #tpu.memory_space<vmem>>, vector<8x128xf32>,
    %c0_177 = arith.constant 0 : index
    %c0_178 = arith.constant 0 : index
    %498 = vector.load %arg20[%c0_177, %c0_178] : memref<64x128xf32, #tpu.memory_space<vmem>>, vector<64x128xf32>
    %c0_179 = arith.constant 0 : index
    %c0_180 = arith.constant 0 : index
    %499 = vector.load %arg7[%c0_179, %c0_180] : memref<128x512xf32, #tpu.memory_space<vmem>>, vector<128x512xf32>
    %cst_181 = arith.constant dense<0.000000e+00> : vector<64x512xf32>
    %500 = tpu.matmul %498, %499, %cst_181 {dimension_numbers = #tpu.dot_dimension_numbers<[1], [0], [0], [1], [0, 0, 1, 1], [], []>} : vector<64x128xf32>, vector<128x512xf32>, vector<64x512xf32> -> vector<64x512xf32>
    %c0_182 = arith.constant 0 : index
    %c0_183 = arith.constant 0 : index
    %501 = vector.load %arg8[%c0_182, %c0_183] : memref<1x512xf32, #tpu.memory_space<vmem>>, vector<1x512xf32>
    %502 = vector.broadcast %501 : vector<1x512xf32> to vector<64x512xf32>
    %503 = arith.addf %500, %502 : vector<64x512xf32>
    %c0_184 = arith.constant 0 : index
    %c0_185 = arith.constant 0 : index
    %504 = vector.load %arg21[%c0_184, %c0_185] : memref<64x512xf32, #tpu.memory_space<vmem>>, vector<64x512xf32>
    tpu.vector_store %arg21[%c0_184, %c0_185], %503 {strides = array<i32>} : memref<64x512xf32, #tpu.memory_space<vmem>>, vector<64x512xf32>,
    %c0_186 = arith.constant 0 : index
    %c0_187 = arith.constant 0 : index
    %505 = vector.load %arg17[%c0_186, %c0_187] : memref<8x128xf32, #tpu.memory_space<vmem>>, vector<8x128xf32>
    %c0_188 = arith.constant 0 : index
    %c0_189 = arith.constant 0 : index
    %506 = vector.load %arg18[%c0_188, %c0_189] : memref<8x128xf32, #tpu.memory_space<vmem>>, vector<8x128xf32>
    %c0_190 = arith.constant 0 : index
    %c0_191 = arith.constant 0 : index
    %507 = vector.load %arg19[%c0_190, %c0_191] : memref<8x128xf32, #tpu.memory_space<vmem>>, vector<8x128xf32>
    %c0_192 = arith.constant 0 : index
    %c0_193 = arith.constant 0 : index
    %508 = vector.load %arg21[%c0_192, %c0_193] : memref<64x512xf32, #tpu.memory_space<vmem>>, vector<8x512xf32>
    %c0_194 = arith.constant 0 : index
    %c0_195 = arith.constant 0 : index
    %509 = vector.load %arg9[%c0_194, %c0_195] : memref<128x512xf32, #tpu.memory_space<vmem>>, vector<128x512xf32>
    %cst_196 = arith.constant dense<0.000000e+00> : vector<8x512xf32>
    %510 = tpu.matmul %505, %509, %cst_196 {dimension_numbers = #tpu.dot_dimension_numbers<[1], [0], [0], [1], [0, 0, 1, 1], [], []>} : vector<8x128xf32>, vector<128x512xf32>, vector<8x512xf32> -> vector<8x512xf32>
    %511 = arith.addf %508, %510 : vector<8x512xf32>
    %512 = vector.extract_strided_slice %511 {offsets = [0, 0], sizes = [8, 128], strides = [1, 1]} : vector<8x512xf32> to vector<8x128xf32>
    %513 = arith.negf %512 : vector<8x128xf32>
    %514 = math.exp %513 : vector<8x128xf32>
    %cst_197 = arith.constant 1.000000e+00 : f32
    %515 = vector.broadcast %cst_197 : f32 to vector<8x128xf32>
    %516 = arith.addf %515, %514 : vector<8x128xf32>
    %517 = arith.divf %515, %516 : vector<8x128xf32>
    %518 = vector.extract_strided_slice %511 {offsets = [0, 128], sizes = [8, 128], strides = [1, 1]} : vector<8x512xf32> to vector<8x128xf32>
    %519 = arith.negf %518 : vector<8x128xf32>
    %520 = math.exp %519 : vector<8x128xf32>
    %cst_198 = arith.constant 1.000000e+00 : f32
    %521 = vector.broadcast %cst_198 : f32 to vector<8x128xf32>
    %522 = arith.addf %521, %520 : vector<8x128xf32>
    %523 = arith.divf %521, %522 : vector<8x128xf32>
    %524 = vector.extract_strided_slice %511 {offsets = [0, 256], sizes = [8, 128], strides = [1, 1]} : vector<8x512xf32> to vector<8x128xf32>
    %525 = math.tanh %524 : vector<8x128xf32>
    %526 = vector.extract_strided_slice %511 {offsets = [0, 384], sizes = [8, 128], strides = [1, 1]} : vector<8x512xf32> to vector<8x128xf32>
    %527 = arith.negf %526 : vector<8x128xf32>
    %528 = math.exp %527 : vector<8x128xf32>
    %cst_199 = arith.constant 1.000000e+00 : f32
    %529 = vector.broadcast %cst_199 : f32 to vector<8x128xf32>
    %530 = arith.addf %529, %528 : vector<8x128xf32>
    %531 = arith.divf %529, %530 : vector<8x128xf32>
    %532 = arith.mulf %523, %506 : vector<8x128xf32>
    %533 = arith.mulf %517, %525 : vector<8x128xf32>
    %534 = arith.addf %532, %533 : vector<8x128xf32>
    %535 = math.tanh %534 : vector<8x128xf32>
    %536 = arith.mulf %531, %535 : vector<8x128xf32>
    %c8_i32 = arith.constant 8 : i32
    %537 = arith.muli %arg0, %c8_i32 : i32
    %c0_i32_200 = arith.constant 0 : i32
    %538 = arith.addi %537, %c0_i32_200 : i32
    %c0_201 = arith.constant 0 : index
    %c0_202 = arith.constant 0 : index
    %539 = vector.load %arg1[%c0_201, %c0_202] : memref<8x1xi32, #tpu.memory_space<vmem>>, vector<8x1xi32>
    %c1_i32 = arith.constant 1 : i32
    %540 = arith.addi %538, %c1_i32 : i32
    %541 = vector.broadcast %540 : i32 to vector<8x1xi32>
    %542 = arith.cmpi eq, %539, %541 : vector<8x1xi32>
    %543 = vector.shape_cast %542 : vector<8x1xi1> to vector<8x1xi1>
    %544 = vector.broadcast %543 : vector<8x1xi1> to vector<8x128xi1>
    %545 = arith.select %544, %536, %507 : vector<8x128xi1>, vector<8x128xf32>
    %c8_203 = arith.constant 8 : index
    %c0_204 = arith.constant 0 : index
    %546 = vector.load %arg21[%c8_203, %c0_204] : memref<64x512xf32, #tpu.memory_space<vmem>>, vector<8x512xf32>
    %c0_205 = arith.constant 0 : index
    %c0_206 = arith.constant 0 : index
    %547 = vector.load %arg9[%c0_205, %c0_206] : memref<128x512xf32, #tpu.memory_space<vmem>>, vector<128x512xf32>
    %cst_207 = arith.constant dense<0.000000e+00> : vector<8x512xf32>
    %548 = tpu.matmul %536, %547, %cst_207 {dimension_numbers = #tpu.dot_dimension_numbers<[1], [0], [0], [1], [0, 0, 1, 1], [], []>} : vector<8x128xf32>, vector<128x512xf32>, vector<8x512xf32> -> vector<8x512xf32>
    %549 = arith.addf %546, %548 : vector<8x512xf32>
    %550 = vector.extract_strided_slice %549 {offsets = [0, 0], sizes = [8, 128], strides = [1, 1]} : vector<8x512xf32> to vector<8x128xf32>
    %551 = arith.negf %550 : vector<8x128xf32>
    %552 = math.exp %551 : vector<8x128xf32>
    %cst_208 = arith.constant 1.000000e+00 : f32
    %553 = vector.broadcast %cst_208 : f32 to vector<8x128xf32>
    %554 = arith.addf %553, %552 : vector<8x128xf32>
    %555 = arith.divf %553, %554 : vector<8x128xf32>
    %556 = vector.extract_strided_slice %549 {offsets = [0, 128], sizes = [8, 128], strides = [1, 1]} : vector<8x512xf32> to vector<8x128xf32>
    %557 = arith.negf %556 : vector<8x128xf32>
    %558 = math.exp %557 : vector<8x128xf32>
    %cst_209 = arith.constant 1.000000e+00 : f32
    %559 = vector.broadcast %cst_209 : f32 to vector<8x128xf32>
    %560 = arith.addf %559, %558 : vector<8x128xf32>
    %561 = arith.divf %559, %560 : vector<8x128xf32>
    %562 = vector.extract_strided_slice %549 {offsets = [0, 256], sizes = [8, 128], strides = [1, 1]} : vector<8x512xf32> to vector<8x128xf32>
    %563 = math.tanh %562 : vector<8x128xf32>
    %564 = vector.extract_strided_slice %549 {offsets = [0, 384], sizes = [8, 128], strides = [1, 1]} : vector<8x512xf32> to vector<8x128xf32>
    %565 = arith.negf %564 : vector<8x128xf32>
    %566 = math.exp %565 : vector<8x128xf32>
    %cst_210 = arith.constant 1.000000e+00 : f32
    %567 = vector.broadcast %cst_210 : f32 to vector<8x128xf32>
    %568 = arith.addf %567, %566 : vector<8x128xf32>
    %569 = arith.divf %567, %568 : vector<8x128xf32>
    %570 = arith.mulf %561, %534 : vector<8x128xf32>
    %571 = arith.mulf %555, %563 : vector<8x128xf32>
    %572 = arith.addf %570, %571 : vector<8x128xf32>
    %573 = math.tanh %572 : vector<8x128xf32>
    %574 = arith.mulf %569, %573 : vector<8x128xf32>
    %c8_i32_211 = arith.constant 8 : i32
    %575 = arith.muli %arg0, %c8_i32_211 : i32
    %c1_i32_212 = arith.constant 1 : i32
    %576 = arith.addi %575, %c1_i32_212 : i32
    %c0_213 = arith.constant 0 : index
    %c0_214 = arith.constant 0 : index
    %577 = vector.load %arg1[%c0_213, %c0_214] : memref<8x1xi32, #tpu.memory_space<vmem>>, vector<8x1xi32>
    %c1_i32_215 = arith.constant 1 : i32
    %578 = arith.addi %576, %c1_i32_215 : i32
    %579 = vector.broadcast %578 : i32 to vector<8x1xi32>
    %580 = arith.cmpi eq, %577, %579 : vector<8x1xi32>
    %581 = vector.shape_cast %580 : vector<8x1xi1> to vector<8x1xi1>
    %582 = vector.broadcast %581 : vector<8x1xi1> to vector<8x128xi1>
    %583 = arith.select %582, %574, %545 : vector<8x128xi1>, vector<8x128xf32>
    %c16_216 = arith.constant 16 : index
    %c0_217 = arith.constant 0 : index
    %584 = vector.load %arg21[%c16_216, %c0_217] : memref<64x512xf32, #tpu.memory_space<vmem>>, vector<8x512xf32>
    %c0_218 = arith.constant 0 : index
    %c0_219 = arith.constant 0 : index
    %585 = vector.load %arg9[%c0_218, %c0_219] : memref<128x512xf32, #tpu.memory_space<vmem>>, vector<128x512xf32>
    %cst_220 = arith.constant dense<0.000000e+00> : vector<8x512xf32>
    %586 = tpu.matmul %574, %585, %cst_220 {dimension_numbers = #tpu.dot_dimension_numbers<[1], [0], [0], [1], [0, 0, 1, 1], [], []>} : vector<8x128xf32>, vector<128x512xf32>, vector<8x512xf32> -> vector<8x512xf32>
    %587 = arith.addf %584, %586 : vector<8x512xf32>
    %588 = vector.extract_strided_slice %587 {offsets = [0, 0], sizes = [8, 128], strides = [1, 1]} : vector<8x512xf32> to vector<8x128xf32>
    %589 = arith.negf %588 : vector<8x128xf32>
    %590 = math.exp %589 : vector<8x128xf32>
    %cst_221 = arith.constant 1.000000e+00 : f32
    %591 = vector.broadcast %cst_221 : f32 to vector<8x128xf32>
    %592 = arith.addf %591, %590 : vector<8x128xf32>
    %593 = arith.divf %591, %592 : vector<8x128xf32>
    %594 = vector.extract_strided_slice %587 {offsets = [0, 128], sizes = [8, 128], strides = [1, 1]} : vector<8x512xf32> to vector<8x128xf32>
    %595 = arith.negf %594 : vector<8x128xf32>
    %596 = math.exp %595 : vector<8x128xf32>
    %cst_222 = arith.constant 1.000000e+00 : f32
    %597 = vector.broadcast %cst_222 : f32 to vector<8x128xf32>
    %598 = arith.addf %597, %596 : vector<8x128xf32>
    %599 = arith.divf %597, %598 : vector<8x128xf32>
    %600 = vector.extract_strided_slice %587 {offsets = [0, 256], sizes = [8, 128], strides = [1, 1]} : vector<8x512xf32> to vector<8x128xf32>
    %601 = math.tanh %600 : vector<8x128xf32>
    %602 = vector.extract_strided_slice %587 {offsets = [0, 384], sizes = [8, 128], strides = [1, 1]} : vector<8x512xf32> to vector<8x128xf32>
    %603 = arith.negf %602 : vector<8x128xf32>
    %604 = math.exp %603 : vector<8x128xf32>
    %cst_223 = arith.constant 1.000000e+00 : f32
    %605 = vector.broadcast %cst_223 : f32 to vector<8x128xf32>
    %606 = arith.addf %605, %604 : vector<8x128xf32>
    %607 = arith.divf %605, %606 : vector<8x128xf32>
    %608 = arith.mulf %599, %572 : vector<8x128xf32>
    %609 = arith.mulf %593, %601 : vector<8x128xf32>
    %610 = arith.addf %608, %609 : vector<8x128xf32>
    %611 = math.tanh %610 : vector<8x128xf32>
    %612 = arith.mulf %607, %611 : vector<8x128xf32>
    %c8_i32_224 = arith.constant 8 : i32
    %613 = arith.muli %arg0, %c8_i32_224 : i32
    %c2_i32 = arith.constant 2 : i32
    %614 = arith.addi %613, %c2_i32 : i32
    %c0_225 = arith.constant 0 : index
    %c0_226 = arith.constant 0 : index
    %615 = vector.load %arg1[%c0_225, %c0_226] : memref<8x1xi32, #tpu.memory_space<vmem>>, vector<8x1xi32>
    %c1_i32_227 = arith.constant 1 : i32
    %616 = arith.addi %614, %c1_i32_227 : i32
    %617 = vector.broadcast %616 : i32 to vector<8x1xi32>
    %618 = arith.cmpi eq, %615, %617 : vector<8x1xi32>
    %619 = vector.shape_cast %618 : vector<8x1xi1> to vector<8x1xi1>
    %620 = vector.broadcast %619 : vector<8x1xi1> to vector<8x128xi1>
    %621 = arith.select %620, %612, %583 : vector<8x128xi1>, vector<8x128xf32>
    %c24_228 = arith.constant 24 : index
    %c0_229 = arith.constant 0 : index
    %622 = vector.load %arg21[%c24_228, %c0_229] : memref<64x512xf32, #tpu.memory_space<vmem>>, vector<8x512xf32>
    %c0_230 = arith.constant 0 : index
    %c0_231 = arith.constant 0 : index
    %623 = vector.load %arg9[%c0_230, %c0_231] : memref<128x512xf32, #tpu.memory_space<vmem>>, vector<128x512xf32>
    %cst_232 = arith.constant dense<0.000000e+00> : vector<8x512xf32>
    %624 = tpu.matmul %612, %623, %cst_232 {dimension_numbers = #tpu.dot_dimension_numbers<[1], [0], [0], [1], [0, 0, 1, 1], [], []>} : vector<8x128xf32>, vector<128x512xf32>, vector<8x512xf32> -> vector<8x512xf32>
    %625 = arith.addf %622, %624 : vector<8x512xf32>
    %626 = vector.extract_strided_slice %625 {offsets = [0, 0], sizes = [8, 128], strides = [1, 1]} : vector<8x512xf32> to vector<8x128xf32>
    %627 = arith.negf %626 : vector<8x128xf32>
    %628 = math.exp %627 : vector<8x128xf32>
    %cst_233 = arith.constant 1.000000e+00 : f32
    %629 = vector.broadcast %cst_233 : f32 to vector<8x128xf32>
    %630 = arith.addf %629, %628 : vector<8x128xf32>
    %631 = arith.divf %629, %630 : vector<8x128xf32>
    %632 = vector.extract_strided_slice %625 {offsets = [0, 128], sizes = [8, 128], strides = [1, 1]} : vector<8x512xf32> to vector<8x128xf32>
    %633 = arith.negf %632 : vector<8x128xf32>
    %634 = math.exp %633 : vector<8x128xf32>
    %cst_234 = arith.constant 1.000000e+00 : f32
    %635 = vector.broadcast %cst_234 : f32 to vector<8x128xf32>
    %636 = arith.addf %635, %634 : vector<8x128xf32>
    %637 = arith.divf %635, %636 : vector<8x128xf32>
    %638 = vector.extract_strided_slice %625 {offsets = [0, 256], sizes = [8, 128], strides = [1, 1]} : vector<8x512xf32> to vector<8x128xf32>
    %639 = math.tanh %638 : vector<8x128xf32>
    %640 = vector.extract_strided_slice %625 {offsets = [0, 384], sizes = [8, 128], strides = [1, 1]} : vector<8x512xf32> to vector<8x128xf32>
    %641 = arith.negf %640 : vector<8x128xf32>
    %642 = math.exp %641 : vector<8x128xf32>
    %cst_235 = arith.constant 1.000000e+00 : f32
    %643 = vector.broadcast %cst_235 : f32 to vector<8x128xf32>
    %644 = arith.addf %643, %642 : vector<8x128xf32>
    %645 = arith.divf %643, %644 : vector<8x128xf32>
    %646 = arith.mulf %637, %610 : vector<8x128xf32>
    %647 = arith.mulf %631, %639 : vector<8x128xf32>
    %648 = arith.addf %646, %647 : vector<8x128xf32>
    %649 = math.tanh %648 : vector<8x128xf32>
    %650 = arith.mulf %645, %649 : vector<8x128xf32>
    %c8_i32_236 = arith.constant 8 : i32
    %651 = arith.muli %arg0, %c8_i32_236 : i32
    %c3_i32 = arith.constant 3 : i32
    %652 = arith.addi %651, %c3_i32 : i32
    %c0_237 = arith.constant 0 : index
    %c0_238 = arith.constant 0 : index
    %653 = vector.load %arg1[%c0_237, %c0_238] : memref<8x1xi32, #tpu.memory_space<vmem>>, vector<8x1xi32>
    %c1_i32_239 = arith.constant 1 : i32
    %654 = arith.addi %652, %c1_i32_239 : i32
    %655 = vector.broadcast %654 : i32 to vector<8x1xi32>
    %656 = arith.cmpi eq, %653, %655 : vector<8x1xi32>
    %657 = vector.shape_cast %656 : vector<8x1xi1> to vector<8x1xi1>
    %658 = vector.broadcast %657 : vector<8x1xi1> to vector<8x128xi1>
    %659 = arith.select %658, %650, %621 : vector<8x128xi1>, vector<8x128xf32>
    %c32_240 = arith.constant 32 : index
    %c0_241 = arith.constant 0 : index
    %660 = vector.load %arg21[%c32_240, %c0_241] : memref<64x512xf32, #tpu.memory_space<vmem>>, vector<8x512xf32>
    %c0_242 = arith.constant 0 : index
    %c0_243 = arith.constant 0 : index
    %661 = vector.load %arg9[%c0_242, %c0_243] : memref<128x512xf32, #tpu.memory_space<vmem>>, vector<128x512xf32>
    %cst_244 = arith.constant dense<0.000000e+00> : vector<8x512xf32>
    %662 = tpu.matmul %650, %661, %cst_244 {dimension_numbers = #tpu.dot_dimension_numbers<[1], [0], [0], [1], [0, 0, 1, 1], [], []>} : vector<8x128xf32>, vector<128x512xf32>, vector<8x512xf32> -> vector<8x512xf32>
    %663 = arith.addf %660, %662 : vector<8x512xf32>
    %664 = vector.extract_strided_slice %663 {offsets = [0, 0], sizes = [8, 128], strides = [1, 1]} : vector<8x512xf32> to vector<8x128xf32>
    %665 = arith.negf %664 : vector<8x128xf32>
    %666 = math.exp %665 : vector<8x128xf32>
    %cst_245 = arith.constant 1.000000e+00 : f32
    %667 = vector.broadcast %cst_245 : f32 to vector<8x128xf32>
    %668 = arith.addf %667, %666 : vector<8x128xf32>
    %669 = arith.divf %667, %668 : vector<8x128xf32>
    %670 = vector.extract_strided_slice %663 {offsets = [0, 128], sizes = [8, 128], strides = [1, 1]} : vector<8x512xf32> to vector<8x128xf32>
    %671 = arith.negf %670 : vector<8x128xf32>
    %672 = math.exp %671 : vector<8x128xf32>
    %cst_246 = arith.constant 1.000000e+00 : f32
    %673 = vector.broadcast %cst_246 : f32 to vector<8x128xf32>
    %674 = arith.addf %673, %672 : vector<8x128xf32>
    %675 = arith.divf %673, %674 : vector<8x128xf32>
    %676 = vector.extract_strided_slice %663 {offsets = [0, 256], sizes = [8, 128], strides = [1, 1]} : vector<8x512xf32> to vector<8x128xf32>
    %677 = math.tanh %676 : vector<8x128xf32>
    %678 = vector.extract_strided_slice %663 {offsets = [0, 384], sizes = [8, 128], strides = [1, 1]} : vector<8x512xf32> to vector<8x128xf32>
    %679 = arith.negf %678 : vector<8x128xf32>
    %680 = math.exp %679 : vector<8x128xf32>
    %cst_247 = arith.constant 1.000000e+00 : f32
    %681 = vector.broadcast %cst_247 : f32 to vector<8x128xf32>
    %682 = arith.addf %681, %680 : vector<8x128xf32>
    %683 = arith.divf %681, %682 : vector<8x128xf32>
    %684 = arith.mulf %675, %648 : vector<8x128xf32>
    %685 = arith.mulf %669, %677 : vector<8x128xf32>
    %686 = arith.addf %684, %685 : vector<8x128xf32>
    %687 = math.tanh %686 : vector<8x128xf32>
    %688 = arith.mulf %683, %687 : vector<8x128xf32>
    %c8_i32_248 = arith.constant 8 : i32
    %689 = arith.muli %arg0, %c8_i32_248 : i32
    %c4_i32 = arith.constant 4 : i32
    %690 = arith.addi %689, %c4_i32 : i32
    %c0_249 = arith.constant 0 : index
    %c0_250 = arith.constant 0 : index
    %691 = vector.load %arg1[%c0_249, %c0_250] : memref<8x1xi32, #tpu.memory_space<vmem>>, vector<8x1xi32>
    %c1_i32_251 = arith.constant 1 : i32
    %692 = arith.addi %690, %c1_i32_251 : i32
    %693 = vector.broadcast %692 : i32 to vector<8x1xi32>
    %694 = arith.cmpi eq, %691, %693 : vector<8x1xi32>
    %695 = vector.shape_cast %694 : vector<8x1xi1> to vector<8x1xi1>
    %696 = vector.broadcast %695 : vector<8x1xi1> to vector<8x128xi1>
    %697 = arith.select %696, %688, %659 : vector<8x128xi1>, vector<8x128xf32>
    %c40_252 = arith.constant 40 : index
    %c0_253 = arith.constant 0 : index
    %698 = vector.load %arg21[%c40_252, %c0_253] : memref<64x512xf32, #tpu.memory_space<vmem>>, vector<8x512xf32>
    %c0_254 = arith.constant 0 : index
    %c0_255 = arith.constant 0 : index
    %699 = vector.load %arg9[%c0_254, %c0_255] : memref<128x512xf32, #tpu.memory_space<vmem>>, vector<128x512xf32>
    %cst_256 = arith.constant dense<0.000000e+00> : vector<8x512xf32>
    %700 = tpu.matmul %688, %699, %cst_256 {dimension_numbers = #tpu.dot_dimension_numbers<[1], [0], [0], [1], [0, 0, 1, 1], [], []>} : vector<8x128xf32>, vector<128x512xf32>, vector<8x512xf32> -> vector<8x512xf32>
    %701 = arith.addf %698, %700 : vector<8x512xf32>
    %702 = vector.extract_strided_slice %701 {offsets = [0, 0], sizes = [8, 128], strides = [1, 1]} : vector<8x512xf32> to vector<8x128xf32>
    %703 = arith.negf %702 : vector<8x128xf32>
    %704 = math.exp %703 : vector<8x128xf32>
    %cst_257 = arith.constant 1.000000e+00 : f32
    %705 = vector.broadcast %cst_257 : f32 to vector<8x128xf32>
    %706 = arith.addf %705, %704 : vector<8x128xf32>
    %707 = arith.divf %705, %706 : vector<8x128xf32>
    %708 = vector.extract_strided_slice %701 {offsets = [0, 128], sizes = [8, 128], strides = [1, 1]} : vector<8x512xf32> to vector<8x128xf32>
    %709 = arith.negf %708 : vector<8x128xf32>
    %710 = math.exp %709 : vector<8x128xf32>
    %cst_258 = arith.constant 1.000000e+00 : f32
    %711 = vector.broadcast %cst_258 : f32 to vector<8x128xf32>
    %712 = arith.addf %711, %710 : vector<8x128xf32>
    %713 = arith.divf %711, %712 : vector<8x128xf32>
    %714 = vector.extract_strided_slice %701 {offsets = [0, 256], sizes = [8, 128], strides = [1, 1]} : vector<8x512xf32> to vector<8x128xf32>
    %715 = math.tanh %714 : vector<8x128xf32>
    %716 = vector.extract_strided_slice %701 {offsets = [0, 384], sizes = [8, 128], strides = [1, 1]} : vector<8x512xf32> to vector<8x128xf32>
    %717 = arith.negf %716 : vector<8x128xf32>
    %718 = math.exp %717 : vector<8x128xf32>
    %cst_259 = arith.constant 1.000000e+00 : f32
    %719 = vector.broadcast %cst_259 : f32 to vector<8x128xf32>
    %720 = arith.addf %719, %718 : vector<8x128xf32>
    %721 = arith.divf %719, %720 : vector<8x128xf32>
    %722 = arith.mulf %713, %686 : vector<8x128xf32>
    %723 = arith.mulf %707, %715 : vector<8x128xf32>
    %724 = arith.addf %722, %723 : vector<8x128xf32>
    %725 = math.tanh %724 : vector<8x128xf32>
    %726 = arith.mulf %721, %725 : vector<8x128xf32>
    %c8_i32_260 = arith.constant 8 : i32
    %727 = arith.muli %arg0, %c8_i32_260 : i32
    %c5_i32 = arith.constant 5 : i32
    %728 = arith.addi %727, %c5_i32 : i32
    %c0_261 = arith.constant 0 : index
    %c0_262 = arith.constant 0 : index
    %729 = vector.load %arg1[%c0_261, %c0_262] : memref<8x1xi32, #tpu.memory_space<vmem>>, vector<8x1xi32>
    %c1_i32_263 = arith.constant 1 : i32
    %730 = arith.addi %728, %c1_i32_263 : i32
    %731 = vector.broadcast %730 : i32 to vector<8x1xi32>
    %732 = arith.cmpi eq, %729, %731 : vector<8x1xi32>
    %733 = vector.shape_cast %732 : vector<8x1xi1> to vector<8x1xi1>
    %734 = vector.broadcast %733 : vector<8x1xi1> to vector<8x128xi1>
    %735 = arith.select %734, %726, %697 : vector<8x128xi1>, vector<8x128xf32>
    %c48_264 = arith.constant 48 : index
    %c0_265 = arith.constant 0 : index
    %736 = vector.load %arg21[%c48_264, %c0_265] : memref<64x512xf32, #tpu.memory_space<vmem>>, vector<8x512xf32>
    %c0_266 = arith.constant 0 : index
    %c0_267 = arith.constant 0 : index
    %737 = vector.load %arg9[%c0_266, %c0_267] : memref<128x512xf32, #tpu.memory_space<vmem>>, vector<128x512xf32>
    %cst_268 = arith.constant dense<0.000000e+00> : vector<8x512xf32>
    %738 = tpu.matmul %726, %737, %cst_268 {dimension_numbers = #tpu.dot_dimension_numbers<[1], [0], [0], [1], [0, 0, 1, 1], [], []>} : vector<8x128xf32>, vector<128x512xf32>, vector<8x512xf32> -> vector<8x512xf32>
    %739 = arith.addf %736, %738 : vector<8x512xf32>
    %740 = vector.extract_strided_slice %739 {offsets = [0, 0], sizes = [8, 128], strides = [1, 1]} : vector<8x512xf32> to vector<8x128xf32>
    %741 = arith.negf %740 : vector<8x128xf32>
    %742 = math.exp %741 : vector<8x128xf32>
    %cst_269 = arith.constant 1.000000e+00 : f32
    %743 = vector.broadcast %cst_269 : f32 to vector<8x128xf32>
    %744 = arith.addf %743, %742 : vector<8x128xf32>
    %745 = arith.divf %743, %744 : vector<8x128xf32>
    %746 = vector.extract_strided_slice %739 {offsets = [0, 128], sizes = [8, 128], strides = [1, 1]} : vector<8x512xf32> to vector<8x128xf32>
    %747 = arith.negf %746 : vector<8x128xf32>
    %748 = math.exp %747 : vector<8x128xf32>
    %cst_270 = arith.constant 1.000000e+00 : f32
    %749 = vector.broadcast %cst_270 : f32 to vector<8x128xf32>
    %750 = arith.addf %749, %748 : vector<8x128xf32>
    %751 = arith.divf %749, %750 : vector<8x128xf32>
    %752 = vector.extract_strided_slice %739 {offsets = [0, 256], sizes = [8, 128], strides = [1, 1]} : vector<8x512xf32> to vector<8x128xf32>
    %753 = math.tanh %752 : vector<8x128xf32>
    %754 = vector.extract_strided_slice %739 {offsets = [0, 384], sizes = [8, 128], strides = [1, 1]} : vector<8x512xf32> to vector<8x128xf32>
    %755 = arith.negf %754 : vector<8x128xf32>
    %756 = math.exp %755 : vector<8x128xf32>
    %cst_271 = arith.constant 1.000000e+00 : f32
    %757 = vector.broadcast %cst_271 : f32 to vector<8x128xf32>
    %758 = arith.addf %757, %756 : vector<8x128xf32>
    %759 = arith.divf %757, %758 : vector<8x128xf32>
    %760 = arith.mulf %751, %724 : vector<8x128xf32>
    %761 = arith.mulf %745, %753 : vector<8x128xf32>
    %762 = arith.addf %760, %761 : vector<8x128xf32>
    %763 = math.tanh %762 : vector<8x128xf32>
    %764 = arith.mulf %759, %763 : vector<8x128xf32>
    %c8_i32_272 = arith.constant 8 : i32
    %765 = arith.muli %arg0, %c8_i32_272 : i32
    %c6_i32 = arith.constant 6 : i32
    %766 = arith.addi %765, %c6_i32 : i32
    %c0_273 = arith.constant 0 : index
    %c0_274 = arith.constant 0 : index
    %767 = vector.load %arg1[%c0_273, %c0_274] : memref<8x1xi32, #tpu.memory_space<vmem>>, vector<8x1xi32>
    %c1_i32_275 = arith.constant 1 : i32
    %768 = arith.addi %766, %c1_i32_275 : i32
    %769 = vector.broadcast %768 : i32 to vector<8x1xi32>
    %770 = arith.cmpi eq, %767, %769 : vector<8x1xi32>
    %771 = vector.shape_cast %770 : vector<8x1xi1> to vector<8x1xi1>
    %772 = vector.broadcast %771 : vector<8x1xi1> to vector<8x128xi1>
    %773 = arith.select %772, %764, %735 : vector<8x128xi1>, vector<8x128xf32>
    %c56_276 = arith.constant 56 : index
    %c0_277 = arith.constant 0 : index
    %774 = vector.load %arg21[%c56_276, %c0_277] : memref<64x512xf32, #tpu.memory_space<vmem>>, vector<8x512xf32>
    %c0_278 = arith.constant 0 : index
    %c0_279 = arith.constant 0 : index
    %775 = vector.load %arg9[%c0_278, %c0_279] : memref<128x512xf32, #tpu.memory_space<vmem>>, vector<128x512xf32>
    %cst_280 = arith.constant dense<0.000000e+00> : vector<8x512xf32>
    %776 = tpu.matmul %764, %775, %cst_280 {dimension_numbers = #tpu.dot_dimension_numbers<[1], [0], [0], [1], [0, 0, 1, 1], [], []>} : vector<8x128xf32>, vector<128x512xf32>, vector<8x512xf32> -> vector<8x512xf32>
    %777 = arith.addf %774, %776 : vector<8x512xf32>
    %778 = vector.extract_strided_slice %777 {offsets = [0, 0], sizes = [8, 128], strides = [1, 1]} : vector<8x512xf32> to vector<8x128xf32>
    %779 = arith.negf %778 : vector<8x128xf32>
    %780 = math.exp %779 : vector<8x128xf32>
    %cst_281 = arith.constant 1.000000e+00 : f32
    %781 = vector.broadcast %cst_281 : f32 to vector<8x128xf32>
    %782 = arith.addf %781, %780 : vector<8x128xf32>
    %783 = arith.divf %781, %782 : vector<8x128xf32>
    %784 = vector.extract_strided_slice %777 {offsets = [0, 128], sizes = [8, 128], strides = [1, 1]} : vector<8x512xf32> to vector<8x128xf32>
    %785 = arith.negf %784 : vector<8x128xf32>
    %786 = math.exp %785 : vector<8x128xf32>
    %cst_282 = arith.constant 1.000000e+00 : f32
    %787 = vector.broadcast %cst_282 : f32 to vector<8x128xf32>
    %788 = arith.addf %787, %786 : vector<8x128xf32>
    %789 = arith.divf %787, %788 : vector<8x128xf32>
    %790 = vector.extract_strided_slice %777 {offsets = [0, 256], sizes = [8, 128], strides = [1, 1]} : vector<8x512xf32> to vector<8x128xf32>
    %791 = math.tanh %790 : vector<8x128xf32>
    %792 = vector.extract_strided_slice %777 {offsets = [0, 384], sizes = [8, 128], strides = [1, 1]} : vector<8x512xf32> to vector<8x128xf32>
    %793 = arith.negf %792 : vector<8x128xf32>
    %794 = math.exp %793 : vector<8x128xf32>
    %cst_283 = arith.constant 1.000000e+00 : f32
    %795 = vector.broadcast %cst_283 : f32 to vector<8x128xf32>
    %796 = arith.addf %795, %794 : vector<8x128xf32>
    %797 = arith.divf %795, %796 : vector<8x128xf32>
    %798 = arith.mulf %789, %762 : vector<8x128xf32>
    %799 = arith.mulf %783, %791 : vector<8x128xf32>
    %800 = arith.addf %798, %799 : vector<8x128xf32>
    %801 = math.tanh %800 : vector<8x128xf32>
    %802 = arith.mulf %797, %801 : vector<8x128xf32>
    %c8_i32_284 = arith.constant 8 : i32
    %803 = arith.muli %arg0, %c8_i32_284 : i32
    %c7_i32 = arith.constant 7 : i32
    %804 = arith.addi %803, %c7_i32 : i32
    %c0_285 = arith.constant 0 : index
    %c0_286 = arith.constant 0 : index
    %805 = vector.load %arg1[%c0_285, %c0_286] : memref<8x1xi32, #tpu.memory_space<vmem>>, vector<8x1xi32>
    %c1_i32_287 = arith.constant 1 : i32
    %806 = arith.addi %804, %c1_i32_287 : i32
    %807 = vector.broadcast %806 : i32 to vector<8x1xi32>
    %808 = arith.cmpi eq, %805, %807 : vector<8x1xi32>
    %809 = vector.shape_cast %808 : vector<8x1xi1> to vector<8x1xi1>
    %810 = vector.broadcast %809 : vector<8x1xi1> to vector<8x128xi1>
    %811 = arith.select %810, %802, %773 : vector<8x128xi1>, vector<8x128xf32>
    %c0_288 = arith.constant 0 : index
    %c0_289 = arith.constant 0 : index
    %812 = vector.load %arg17[%c0_288, %c0_289] : memref<8x128xf32, #tpu.memory_space<vmem>>, vector<8x128xf32>
    tpu.vector_store %arg17[%c0_288, %c0_289], %802 {strides = array<i32>} : memref<8x128xf32, #tpu.memory_space<vmem>>, vector<8x128xf32>,
    %c0_290 = arith.constant 0 : index
    %c0_291 = arith.constant 0 : index
    %813 = vector.load %arg18[%c0_290, %c0_291] : memref<8x128xf32, #tpu.memory_space<vmem>>, vector<8x128xf32>
    tpu.vector_store %arg18[%c0_290, %c0_291], %800 {strides = array<i32>} : memref<8x128xf32, #tpu.memory_space<vmem>>, vector<8x128xf32>,
    %c0_292 = arith.constant 0 : index
    %c0_293 = arith.constant 0 : index
    %814 = vector.load %arg19[%c0_292, %c0_293] : memref<8x128xf32, #tpu.memory_space<vmem>>, vector<8x128xf32>
    tpu.vector_store %arg19[%c0_292, %c0_293], %811 {strides = array<i32>} : memref<8x128xf32, #tpu.memory_space<vmem>>, vector<8x128xf32>,
    %c0_i32_294 = arith.constant 0 : i32
    %815 = arith.cmpi eq, %arg0, %c0_i32_294 : i32
    %816 = arith.extui %815 : i1 to i32
    %c0_i32_295 = arith.constant 0 : i32
    %817 = arith.cmpi ne, %816, %c0_i32_295 : i32
    scf.if %817 {
      %c0_296 = arith.constant 0 : index
      %c0_297 = arith.constant 0 : index
      %818 = vector.load %arg19[%c0_296, %c0_297] : memref<8x128xf32, #tpu.memory_space<vmem>>, vector<8x128xf32>
      %c0_298 = arith.constant 0 : index
      %c0_299 = arith.constant 0 : index
      %819 = vector.load %arg10[%c0_298, %c0_299] : memref<128x128xf32, #tpu.memory_space<vmem>>, vector<128x128xf32>
      %cst_300 = arith.constant dense<0.000000e+00> : vector<8x128xf32>
      %820 = tpu.matmul %818, %819, %cst_300 {dimension_numbers = #tpu.dot_dimension_numbers<[1], [0], [0], [1], [0, 0, 1, 1], [], []>} : vector<8x128xf32>, vector<128x128xf32>, vector<8x128xf32> -> vector<8x128xf32>
      %c0_301 = arith.constant 0 : index
      %c0_302 = arith.constant 0 : index
      %821 = vector.load %arg11[%c0_301, %c0_302] : memref<1x128xf32, #tpu.memory_space<vmem>>, vector<1x128xf32>
      %822 = vector.broadcast %821 : vector<1x128xf32> to vector<8x128xf32>
      %823 = arith.addf %820, %822 : vector<8x128xf32>
      %cst_303 = arith.constant dense<0xFF800000> : vector<8xf32>
      %824 = vector.multi_reduction <maximumf>, %823, %cst_303 [1] : vector<8x128xf32> to vector<8xf32>
      %825 = vector.shape_cast %824 : vector<8xf32> to vector<8x1xf32>
      %826 = vector.broadcast %825 : vector<8x1xf32> to vector<8x128xf32>
      %827 = arith.subf %823, %826 : vector<8x128xf32>
      %828 = math.exp %827 : vector<8x128xf32>
      %cst_304 = arith.constant dense<0.000000e+00> : vector<8xf32>
      %829 = vector.multi_reduction <add>, %828, %cst_304 [1] : vector<8x128xf32> to vector<8xf32>
      %830 = vector.shape_cast %829 : vector<8xf32> to vector<8x1xf32>
      %831 = math.log %830 : vector<8x1xf32>
      %832 = arith.addf %825, %831 : vector<8x1xf32>
      %833 = vector.broadcast %832 : vector<8x1xf32> to vector<8x128xf32>
      %834 = arith.subf %823, %833 : vector<8x128xf32>
      %835 = vector.extract_strided_slice %834 {offsets = [0, 0], sizes = [8, 2], strides = [1, 1]} : vector<8x128xf32> to vector<8x2xf32>
      %c0_305 = arith.constant 0 : index
      %c0_306 = arith.constant 0 : index
      %836 = vector.load %arg12[%c0_305, %c0_306] : memref<8x2xf32, #tpu.memory_space<vmem>>, vector<8x2xf32>
      tpu.vector_store %arg12[%c0_305, %c0_306], %835 {strides = array<i32>} : memref<8x2xf32, #tpu.memory_space<vmem>>, vector<8x2xf32>,
    } else {
    }
    return
  }
  func.func @transform_0(%arg0: i32) -> (i32, i32) {
    %c0_i32 = arith.constant 0 : i32
    %c0_i32_0 = arith.constant 0 : i32
    %c0_i32_1 = arith.constant 0 : i32
    return %c0_i32, %c0_i32_0 : i32, i32
  }
  func.func @transform_1(%arg0: i32) -> (i32, i32) {
    %c0_i32 = arith.constant 0 : i32
    %c0_i32_0 = arith.constant 0 : i32
    return %arg0, %c0_i32 : i32, i32
  }
  func.func @transform_2(%arg0: i32) -> (i32, i32) {
    %c0_i32 = arith.constant 0 : i32
    %c0_i32_0 = arith.constant 0 : i32
    %c0_i32_1 = arith.constant 0 : i32
    return %c0_i32, %c0_i32_0 : i32, i32
  }
  func.func @transform_3(%arg0: i32) -> (i32, i32) {
    %c0_i32 = arith.constant 0 : i32
    %c0_i32_0 = arith.constant 0 : i32
    %c0_i32_1 = arith.constant 0 : i32
    return %c0_i32, %c0_i32_0 : i32, i32
  }
  func.func @transform_4(%arg0: i32) -> (i32, i32) {
    %c0_i32 = arith.constant 0 : i32
    %c0_i32_0 = arith.constant 0 : i32
    %c0_i32_1 = arith.constant 0 : i32
    return %c0_i32, %c0_i32_0 : i32, i32
  }
  func.func @transform_5(%arg0: i32) -> (i32, i32) {
    %c0_i32 = arith.constant 0 : i32
    %c0_i32_0 = arith.constant 0 : i32
    %c0_i32_1 = arith.constant 0 : i32
    return %c0_i32, %c0_i32_0 : i32, i32
  }
  func.func @transform_6(%arg0: i32) -> (i32, i32) {
    %c0_i32 = arith.constant 0 : i32
    %c0_i32_0 = arith.constant 0 : i32
    %c0_i32_1 = arith.constant 0 : i32
    return %c0_i32, %c0_i32_0 : i32, i32
  }
  func.func @transform_7(%arg0: i32) -> (i32, i32) {
    %c0_i32 = arith.constant 0 : i32
    %c0_i32_0 = arith.constant 0 : i32
    %c0_i32_1 = arith.constant 0 : i32
    return %c0_i32, %c0_i32_0 : i32, i32
  }
  func.func @transform_8(%arg0: i32) -> (i32, i32) {
    %c0_i32 = arith.constant 0 : i32
    %c0_i32_0 = arith.constant 0 : i32
    %c0_i32_1 = arith.constant 0 : i32
    return %c0_i32, %c0_i32_0 : i32, i32
  }
  func.func @transform_9(%arg0: i32) -> (i32, i32) {
    %c0_i32 = arith.constant 0 : i32
    %c0_i32_0 = arith.constant 0 : i32
    %c0_i32_1 = arith.constant 0 : i32
    return %c0_i32, %c0_i32_0 : i32, i32
  }
  func.func @transform_10(%arg0: i32) -> (i32, i32) {
    %c0_i32 = arith.constant 0 : i32
    %c0_i32_0 = arith.constant 0 : i32
    %c0_i32_1 = arith.constant 0 : i32
    return %c0_i32, %c0_i32_0 : i32, i32
  }
  func.func @transform_11(%arg0: i32) -> (i32, i32) {
    %c0_i32 = arith.constant 0 : i32
    %c0_i32_0 = arith.constant 0 : i32
    %c0_i32_1 = arith.constant 0 : i32
    return %c0_i32, %c0_i32_0 : i32, i32
  }
}

</mosaic_0001>

<bundles_post_ra>
// kernel: lstm_classifier_forward.1
= control target key start
LH: loop header
LB: loop body
LE: loop exit
PB: predicated region body
PF: predicated region fallthrough
CT: control target
= control target key end

     0   :  { %v11589_v3 = vmov 0.0   ;;  %vm6820_vm15 = vmmov 0   ;;  %s11575_s2 = inlined_call_operand.vmem [shape: f32[128,512], index: 2, kind: input, shape index: {}]   ;;  %s11576_s1 = inlined_call_operand.vmem [shape: f32[64,512], index: 1, kind: input, shape index: {}]   ;;  %s11577_s3 = inlined_call_operand.vmem [shape: f32[128,512], index: 3, kind: input, shape index: {}]   ;;  %s11578_s5 = inlined_call_operand.vmem [shape: f32[128,512], index: 5, kind: input, shape index: {}]   ;;  %s11579_s4 = inlined_call_operand.vmem [shape: f32[1,512], index: 4, kind: input, shape index: {}]   ;;  %s11580_s6 = inlined_call_operand.vmem [shape: f32[128,512], index: 6, kind: input, shape index: {}]   ;;  %s11581_s8 = inlined_call_operand.vmem [shape: f32[128,512], index: 8, kind: input, shape index: {}]   ;;  %s11582_s0 = inlined_call_operand.vmem [shape: s32[8,1], index: 0, kind: input, shape index: {}]   ;;  %s11583_s7 = inlined_call_operand.vmem [shape: f32[1,512], index: 7, kind: input, shape index: {}]   ;;  %s11584_s9 = inlined_call_operand.vmem [shape: f32[128,128], index: 9, kind: input, shape index: {}]   ;;  %s11585_s10 = inlined_call_operand.vmem [shape: f32[1,128], index: 10, kind: input, shape index: {}]   ;;  %s11586_s11 = inlined_call_operand.vmem [shape: f32[8,2], index: 11, kind: output, shape index: {}]  }
   0x1   :  { %v6884_v0 = vld [vmem:[%s11575_s2 + $0x1e8] sm:$0xff]  ;;  %v6889_v1 = vld [vmem:[%s11575_s2 + $0x1e0] sm:$0xff]  ;;  %183 = vmatprep.mubr.f32.mxu0 %v11589_v3  ;;  %254 = vmatprep.mubr.f32.mxu1 %v11589_v3  ;;  %v6931_v9 = vld [vmem:[%s11575_s2 + $0x1f8] sm:$0xff] }
   0x2   :  { %11909 = vst [vmem:[#allocation11_spill] sm:$0xff] %v6884_v0  ;;  %v6894_v2 = vld [vmem:[%s11575_s2 + $0x1c8] sm:$0xff]  ;;  %119 = vmatprep.subr.mxu0 %v6884_v0  ;;  %v6902_v4 = vld [vmem:[%s11575_s2 + $0x1c0] sm:$0xff]  ;;  %11910 = vst [vmem:[#allocation12_spill] sm:$0xff] %v6931_v9  ;;  %190 = vmatprep.subr.mxu1 %v6931_v9 }
   0x3   :  { %120 = vmatpush1.msra.mxu0 %v6889_v1  ;;  %v6908_v5 = vld [vmem:[%s11575_s2 + $0x1a8] sm:$0xff]  ;;  %v6914_v6 = vld [vmem:[%s11575_s2 + $0x1a0] sm:$0xff]  ;;  %v6943_v11 = vld [vmem:[%s11575_s2 + $0x1f0] sm:$0xff] }
   0x4   :  { %121 = vmatprep.subr.mxu0 %v6894_v2  ;;  %v6920_v7 = vld [vmem:[%s11575_s2 + $0x188] sm:$0xff]  ;;  %v6926_v8 = vld [vmem:[%s11575_s2 + $0x180] sm:$0xff]  ;;  %191 = vmatpush1.msra.mxu1 %v6943_v11  ;;  %v6955_v13 = vld [vmem:[%s11575_s2 + $0x1d8] sm:$0xff] }
   0x5   :  { %122 = vmatpush1.msra.mxu0 %v6902_v4  ;;  %v6937_v10 = vld [vmem:[%s11575_s2 + $0x168] sm:$0xff]  ;;  %v6949_v12 = vld [vmem:[%s11575_s2 + $0x160] sm:$0xff]  ;;  %v6960_v14 = vld [vmem:[%s11575_s2 + $0x1d0] sm:$0xff]  ;;  %192 = vmatprep.subr.mxu1 %v6955_v13 }
   0x6   :  { %123 = vmatprep.subr.mxu0 %v6908_v5  ;;  %v6966_v15 = vld [vmem:[%s11575_s2 + $0x148] sm:$0xff]  ;;  %v6972_v16 = vld [vmem:[%s11575_s2 + $0x1b8] sm:$0xff]  ;;  %v6978_v17 = vld [vmem:[%s11575_s2 + $0x140] sm:$0xff]  ;;  %193 = vmatpush1.msra.mxu1 %v6960_v14 }
   0x7   :  { %124 = vmatpush1.msra.mxu0 %v6914_v6  ;;  %v6984_v18 = vld [vmem:[%s11575_s2 + $0x1b0] sm:$0xff]  ;;  %v6989_v19 = vld [vmem:[%s11575_s2 + $0x198] sm:$0xff]  ;;  %v6995_v20 = vld [vmem:[%s11575_s2 + $0x128] sm:$0xff]  ;;  %194 = vmatprep.subr.mxu1 %v6972_v16 }
   0x8   :  { %125 = vmatprep.subr.mxu0 %v6920_v7  ;;  %v7001_v21 = vld [vmem:[%s11575_s2 + $0x190] sm:$0xff]  ;;  %v7007_v22 = vld [vmem:[%s11575_s2 + $0x120] sm:$0xff]  ;;  %195 = vmatpush1.msra.mxu1 %v6984_v18  ;;  %v7013_v23 = vld [vmem:[%s11575_s2 + $0x178] sm:$0xff] }
   0x9   :  { %126 = vmatpush1.msra.mxu0 %v6926_v8  ;;  %v7019_v24 = vld [vmem:[%s11575_s2 + $0x108] sm:$0xff]  ;;  %196 = vmatprep.subr.mxu1 %v6989_v19  ;;  %v7025_v25 = vld [vmem:[%s11575_s2 + $0x170] sm:$0xff]  ;;  %v7031_v26 = vld [vmem:[%s11575_s2 + $0x100] sm:$0xff] }
   0xa   :  { %127 = vmatprep.subr.mxu0 %v6937_v10  ;;  %197 = vmatpush1.msra.mxu1 %v7001_v21  ;;  %v7037_v27 = vld [vmem:[%s11575_s2 + $0x158] sm:$0xff]  ;;  %v7043_v28 = vld [vmem:[%s11575_s2 + $0xe8] sm:$0xff]  ;;  %v7049_v29 = vld [vmem:[%s11575_s2 + $0x150] sm:$0xff] }
   0xb   :  { %128 = vmatpush1.msra.mxu0 %v6949_v12  ;;  %198 = vmatprep.subr.mxu1 %v7013_v23  ;;  %v7055_v30 = vld [vmem:[%s11575_s2 + $0xe0] sm:$0xff]  ;;  %v7061_v31 = vld [vmem:[%s11575_s2 + $0x138] sm:$0xff]  ;;  %v7067_v32 = vld [vmem:[%s11575_s2 + $0xc8] sm:$0xff] }
   0xc   :  { %129 = vmatprep.subr.mxu0 %v6966_v15  ;;  %199 = vmatpush1.msra.mxu1 %v7025_v25  ;;  %v7073_v33 = vld [vmem:[%s11575_s2 + $0x130] sm:$0xff]  ;;  %v7079_v34 = vld [vmem:[%s11575_s2 + $0xc0] sm:$0xff]  ;;  %v7085_v35 = vld [vmem:[%s11575_s2 + $0x118] sm:$0xff] }
   0xd   :  { %130 = vmatpush1.msra.mxu0 %v6978_v17  ;;  %200 = vmatprep.subr.mxu1 %v7037_v27  ;;  %v7091_v36 = vld [vmem:[%s11575_s2 + $0xa8] sm:$0xff]  ;;  %v7097_v37 = vld [vmem:[%s11575_s2 + $0x110] sm:$0xff]  ;;  %v7103_v38 = vld [vmem:[%s11575_s2 + $0xa0] sm:$0xff] }
   0xe   :  { %131 = vmatprep.subr.mxu0 %v6995_v20  ;;  %201 = vmatpush1.msra.mxu1 %v7049_v29  ;;  %v7109_v39 = vld [vmem:[%s11575_s2 + $0xf8] sm:$0xff]  ;;  %v7115_v40 = vld [vmem:[%s11575_s2 + $0x88] sm:$0xff]  ;;  %v7121_v41 = vld [vmem:[%s11575_s2 + $0xf0] sm:$0xff] }
   0xf   :  { %132 = vmatpush1.msra.mxu0 %v7007_v22  ;;  %202 = vmatprep.subr.mxu1 %v7061_v31  ;;  %v7127_v42 = vld [vmem:[%s11575_s2 + $0x80] sm:$0xff]  ;;  %v7133_v43 = vld [vmem:[%s11575_s2 + $0xd8] sm:$0xff]  ;;  %v7139_v44 = vld [vmem:[%s11575_s2 + $0x68] sm:$0xff] }
  0x10   :  { %133 = vmatprep.subr.mxu0 %v7019_v24  ;;  %203 = vmatpush1.msra.mxu1 %v7073_v33  ;;  %11911 = vst [vmem:[#allocation13_spill] sm:$0xff] %v7139_v44  ;;  %v7145_v45 = vld [vmem:[%s11575_s2 + $0xd0] sm:$0xff]  ;;  %v7151_v46 = vld [vmem:[%s11575_s2 + $0x60] sm:$0xff]  ;;  %v7157_v47 = vld [vmem:[%s11575_s2 + $0xb8] sm:$0xff] }
  0x11   :  { %134 = vmatpush1.msra.mxu0 %v7031_v26  ;;  %204 = vmatprep.subr.mxu1 %v7085_v35  ;;  %11912 = vst [vmem:[#allocation14_spill] sm:$0xff] %v7151_v46  ;;  %v7163_v48 = vld [vmem:[%s11575_s2 + $0x48] sm:$0xff]  ;;  %v7169_v49 = vld [vmem:[%s11575_s2 + $0xb0] sm:$0xff]  ;;  %v7175_v50 = vld [vmem:[%s11575_s2 + $0x40] sm:$0xff] }
  0x12   :  { %135 = vmatprep.subr.mxu0 %v7043_v28  ;;  %205 = vmatpush1.msra.mxu1 %v7097_v37  ;;  %11913 = vst [vmem:[#allocation15_spill] sm:$0xff] %v7163_v48  ;;  %11914 = vst [vmem:[#allocation16_spill] sm:$0xff] %v7175_v50  ;;  %v7181_v51 = vld [vmem:[%s11575_s2 + $0x98] sm:$0xff]  ;;  %v7187_v52 = vld [vmem:[%s11575_s2 + $0x28] sm:$0xff] }
  0x13   :  { %136 = vmatpush1.msra.mxu0 %v7055_v30  ;;  %206 = vmatprep.subr.mxu1 %v7109_v39  ;;  %11915 = vst [vmem:[#allocation17_spill] sm:$0xff] %v7187_v52  ;;  %v7193_v53 = vld [vmem:[%s11575_s2 + $0x90] sm:$0xff]  ;;  %v7199_v54 = vld [vmem:[%s11575_s2 + $0x20] sm:$0xff]  ;;  %v7205_v55 = vld [vmem:[%s11575_s2 + $0x78] sm:$0xff] }
  0x14   :  { %137 = vmatprep.subr.mxu0 %v7067_v32  ;;  %207 = vmatpush1.msra.mxu1 %v7121_v41  ;;  %11916 = vst [vmem:[#allocation18_spill] sm:$0xff] %v7193_v53  ;;  %11917 = vst [vmem:[#allocation19_spill] sm:$0xff] %v7199_v54  ;;  %v7211_v56 = vld [vmem:[%s11575_s2 + $0x8] sm:$0xff]  ;;  %v7217_v57 = vld [vmem:[%s11575_s2 + $0x70] sm:$0xff] }
  0x15   :  { %138 = vmatpush1.msra.mxu0 %v7079_v34  ;;  %208 = vmatprep.subr.mxu1 %v7133_v43  ;;  %11918 = vst [vmem:[#allocation20_spill] sm:$0xff] %v7205_v55  ;;  %11919 = vst [vmem:[#allocation21_spill] sm:$0xff] %v7211_v56  ;;  %v7223_v58 = vld [vmem:[%s11575_s2] sm:$0xff]  ;;  %v7229_v59 = vld [vmem:[%s11575_s2 + $0x58] sm:$0xff] }
  0x16   :  { %139 = vmatprep.subr.mxu0 %v7091_v36  ;;  %209 = vmatpush1.msra.mxu1 %v7145_v45  ;;  %11920 = vst [vmem:[#allocation22_spill] sm:$0xff] %v7217_v57  ;;  %11921 = vst [vmem:[#allocation23_spill] sm:$0xff] %v7223_v58  ;;  %v7236_v60 = vld [vmem:[%s11575_s2 + $0x50] sm:$0xff]  ;;  %v7243_v61 = vld [vmem:[%s11575_s2 + $0x38] sm:$0xff] }
  0x17   :  { %140 = vmatpush1.msra.mxu0 %v7103_v38  ;;  %210 = vmatprep.subr.mxu1 %v7157_v47  ;;  %11922 = vst [vmem:[#allocation24_spill] sm:$0xff] %v7229_v59  ;;  %11923 = vst [vmem:[#allocation25_spill] sm:$0xff] %v7236_v60  ;;  %v7250_v62 = vld [vmem:[%s11575_s2 + $0x30] sm:$0xff]  ;;  %v7257_v63 = vld [vmem:[%s11575_s2 + $0x18] sm:$0xff] }
  0x18   :  { %141 = vmatprep.subr.mxu0 %v7115_v40  ;;  %211 = vmatpush1.msra.mxu1 %v7169_v49  ;;  %11924 = vst [vmem:[#allocation26_spill] sm:$0xff] %v7243_v61  ;;  %11925 = vst [vmem:[#allocation27_spill] sm:$0xff] %v7250_v62 }
  0x19   :  { %142 = vmatpush1.msra.mxu0 %v7127_v42  ;;  %212 = vmatprep.subr.mxu1 %v7181_v51  ;;  %11926 = vst [vmem:[#allocation28_spill] sm:$0xff] %v7257_v63 }
  0x1a   :  { %143 = vmatprep.subr.mxu0 %v7139_v44  ;;  %213 = vmatpush1.msra.mxu1 %v7193_v53 }
  0x1b   :  { %144 = vmatpush1.msra.mxu0 %v7151_v46  ;;  %214 = vmatprep.subr.mxu1 %v7205_v55 }
  0x1c   :  { %145 = vmatprep.subr.mxu0 %v7163_v48  ;;  %215 = vmatpush1.msra.mxu1 %v7217_v57 }
  0x1d   :  { %146 = vmatpush1.msra.mxu0 %v7175_v50  ;;  %216 = vmatprep.subr.mxu1 %v7229_v59 }
  0x1e   :  { %147 = vmatprep.subr.mxu0 %v7187_v52  ;;  %217 = vmatpush1.msra.mxu1 %v7236_v60 }
  0x1f   :  { %148 = vmatpush1.msra.mxu0 %v7199_v54  ;;  %218 = vmatprep.subr.mxu1 %v7243_v61 }
  0x20   :  { %149 = vmatprep.subr.mxu0 %v7211_v56  ;;  %219 = vmatpush1.msra.mxu1 %v7250_v62 }
  0x21   :  { %150 = vmatpush1.msra.mxu0 %v7223_v58  ;;  %v7263_v58 = vld [vmem:[%s11575_s2 + $0x10] sm:$0xff]  ;;  %220 = vmatprep.subr.mxu1 %v7257_v63 }
  0x22   :  { %184 = vmatmul.mubr.f32.vlgmr.msra.gmra.mxu0 %v11589_v3  ;;  %11927 = vst [vmem:[#allocation29_spill] sm:$0xff] %v7263_v58  ;;  %358 = vmatprep.subr.mxu0 %v6884_v0 }
  0x23   :  { %359 = vmatpush1.msra.mxu0 %v6889_v1  ;;  %221 = vmatpush1.msra.mxu1 %v7263_v58 }
  0x24   :  { %360 = vmatprep.subr.mxu0 %v6894_v2  ;;  %255 = vmatmul.mubr.f32.vlgmr.msra.gmra.mxu1 %v11589_v3  ;;  %v11928_v3 = vld [vmem:[#allocation23_spill] sm:$0xff] }
  0x25   :  { %361 = vmatpush1.msra.mxu0 %v6902_v4  ;;  %429 = vmatprep.subr.mxu1 %v6931_v9 }
  0x26   :  { %430 = vmatpush1.msra.mxu1 %v6943_v11  ;;  %362 = vmatprep.subr.mxu0 %v6908_v5 }
  0x27   :  { %431 = vmatprep.subr.mxu1 %v6955_v13  ;;  %363 = vmatpush1.msra.mxu0 %v6914_v6 }
  0x28   :  { %432 = vmatpush1.msra.mxu1 %v6960_v14  ;;  %364 = vmatprep.subr.mxu0 %v6920_v7 }
  0x29   :  { %433 = vmatprep.subr.mxu1 %v6972_v16  ;;  %365 = vmatpush1.msra.mxu0 %v6926_v8 }
  0x2a   :  { %434 = vmatpush1.msra.mxu1 %v6984_v18  ;;  %366 = vmatprep.subr.mxu0 %v6937_v10 }
  0x2b   :  { %435 = vmatprep.subr.mxu1 %v6989_v19  ;;  %367 = vmatpush1.msra.mxu0 %v6949_v12 }
  0x2c   :  { %436 = vmatpush1.msra.mxu1 %v7001_v21  ;;  %368 = vmatprep.subr.mxu0 %v6966_v15 }
  0x2d   :  { %437 = vmatprep.subr.mxu1 %v7013_v23  ;;  %369 = vmatpush1.msra.mxu0 %v6978_v17 }
  0x2e   :  { %438 = vmatpush1.msra.mxu1 %v7025_v25  ;;  %370 = vmatprep.subr.mxu0 %v6995_v20 }
  0x2f   :  { %439 = vmatprep.subr.mxu1 %v7037_v27  ;;  %371 = vmatpush1.msra.mxu0 %v7007_v22 }
  0x30   :  { %440 = vmatpush1.msra.mxu1 %v7049_v29  ;;  %372 = vmatprep.subr.mxu0 %v7019_v24 }
  0x31   :  { %441 = vmatprep.subr.mxu1 %v7061_v31  ;;  %373 = vmatpush1.msra.mxu0 %v7031_v26 }
  0x32   :  { %442 = vmatpush1.msra.mxu1 %v7073_v33  ;;  %374 = vmatprep.subr.mxu0 %v7043_v28 }
  0x33   :  { %443 = vmatprep.subr.mxu1 %v7085_v35  ;;  %375 = vmatpush1.msra.mxu0 %v7055_v30 }
  0x34   :  { %444 = vmatpush1.msra.mxu1 %v7097_v37  ;;  %376 = vmatprep.subr.mxu0 %v7067_v32 }
  0x35   :  { %445 = vmatprep.subr.mxu1 %v7109_v39  ;;  %377 = vmatpush1.msra.mxu0 %v7079_v34 }
  0x36   :  { %446 = vmatpush1.msra.mxu1 %v7121_v41  ;;  %378 = vmatprep.subr.mxu0 %v7091_v36 }
  0x37   :  { %447 = vmatprep.subr.mxu1 %v7133_v43  ;;  %379 = vmatpush1.msra.mxu0 %v7103_v38 }
  0x38   :  { %448 = vmatpush1.msra.mxu1 %v7145_v45  ;;  %380 = vmatprep.subr.mxu0 %v7115_v40 }
  0x39   :  { %449 = vmatprep.subr.mxu1 %v7157_v47  ;;  %381 = vmatpush1.msra.mxu0 %v7127_v42 }
  0x3a   :  { %450 = vmatpush1.msra.mxu1 %v7169_v49  ;;  %382 = vmatprep.subr.mxu0 %v7139_v44 }
  0x3b   :  { %451 = vmatprep.subr.mxu1 %v7181_v51  ;;  %383 = vmatpush1.msra.mxu0 %v7151_v46 }
  0x3c   :  { %452 = vmatpush1.msra.mxu1 %v7193_v53  ;;  %384 = vmatprep.subr.mxu0 %v7163_v48  ;;  %v11929_v48 = vmov 0.0  }
  0x3d   :  { %453 = vmatprep.subr.mxu1 %v7205_v55  ;;  %385 = vmatpush1.msra.mxu0 %v7175_v50 }
  0x3e   :  { %454 = vmatpush1.msra.mxu1 %v7217_v57  ;;  %386 = vmatprep.subr.mxu0 %v7187_v52 }
  0x3f   :  { %455 = vmatprep.subr.mxu1 %v7229_v59  ;;  %387 = vmatpush1.msra.mxu0 %v7199_v54 }
  0x40   :  { %456 = vmatpush1.msra.mxu1 %v7236_v60  ;;  %388 = vmatprep.subr.mxu0 %v7211_v56  ;;  %v51_v56 = vld [vmem:[%s11576_s1] sm:$0xff]  ;;  %v53_v60 = vld [vmem:[%s11576_s1 + $0x10] sm:$0xff] }
  0x41   :  { %457 = vmatprep.subr.mxu1 %v7243_v61  ;;  %389 = vmatpush1.msra.mxu0 %v11928_v3  ;;  %v52_v3 = vld [vmem:[%s11576_s1 + $0x8] sm:$0xff] }
  0x42   :  { %458 = vmatpush1.msra.mxu1 %v7250_v62  ;;  %422 = vmatprep.mubr.f32.mxu0 %v11929_v48 }
  0x43   :  { %459 = vmatprep.subr.mxu1 %v7257_v63  ;;  %493 = vmatprep.mubr.f32.mxu1 %v11929_v48 }
  0x44   :  { %460 = vmatpush1.msra.mxu1 %v7263_v58  ;;  %597 = vmatprep.subr.mxu0 %v6884_v0 }
  0x45   :  { %668 = vmatprep.subr.mxu1 %v6931_v9  ;;  %v54_v9 = vld [vmem:[%s11576_s1 + $0x18] sm:$0xff] }
  0xe2   :  { %v185_v54 = vpop.f32.mrf.mxu0 }
  0xe3   :  { %v261_v62 = vadd.f32 %v185_v54, %v51_v56 }
  0xe4   :  { %v187_v61 = vpop.f32.mrf.mxu0  ;;  %v256_v58 = vpop.f32.mrf.mxu1 }
  0xe5   :  { %v6235_v63 = vmul.f32 -1.442695, %v261_v62  ;;  %v262_v52 = vadd.f32 %v187_v61, %v52_v3  ;;  %v263_v59 = vadd.f32 %v256_v58, %v53_v60  ;;  %v11945_v58 = vld [vmem:[#allocation28_spill] sm:$0xff]  ;;  %v11947_v60 = vmov 0.0  }
  0xe6   :  { %v258_v0 = vpop.f32.mrf.mxu1 }
  0xe7   :  { %6365 = vpow2.f32 %v6235_v63  ;;  %v6236_v48 = vmul.f32 -1.442695, %v262_v52  ;;  %v264_v50 = vadd.f32 %v258_v0, %v54_v9 }
  0xe9   :  { %6367 = vpow2.f32 %v6236_v48  ;;  %v6237_v57 = vmul.f32 -1.442695, %v264_v50 }
  0xea   :  { %6369 = vtanh.f32 %v263_v59  ;;  %v11946_v59 = vld [vmem:[#allocation23_spill] sm:$0xff] }
  0xeb   :  { %6371 = vpow2.f32 %v6237_v57  ;;  %v11944_v57 = vld [vmem:[#allocation21_spill] sm:$0xff] }
  0xf4   :  { %v6366_v54 = vpop.eup %6365 }
  0xf5   :  { %v268_v56 = vadd.f32 1.0, %v6366_v54  ;;  %v11948_v54 = vld [vmem:[#allocation29_spill] sm:$0xff] }
  0xf6   :  { %v6368_v3 = vpop.eup %6367 }
  0xf7   :  { %6373 = vrcp.f32 %v268_v56  ;;  %v274_v52 = vadd.f32 1.0, %v6368_v3  ;;  %v6370_v48 = vpop.eup %6369  ;;  %v11949_v56 = vld [vmem:[#allocation11_spill] sm:$0xff]  ;;  %v11950_v3 = vld [vmem:[#allocation12_spill] sm:$0xff] }
  0xf8   :  { %v6372_v61 = vpop.eup %6371 }
  0xf9   :  { %6375 = vrcp.f32 %v274_v52  ;;  %v281_v46 = vadd.f32 1.0, %v6372_v61  ;;  %v290_v52 = vld [vmem:[%s11576_s1 + $0x20] sm:$0xff]  ;;  %v291_v61 = vld [vmem:[%s11576_s1 + $0x28] sm:$0xff] }
  0xfb   :  { %6377 = vrcp.f32 %v281_v46  ;;  %v11942_v46 = vld [vmem:[#allocation19_spill] sm:$0xff] }
 0x104   :  { %v6374_v62 = vpop.eup %6373 }
 0x105   :  { %v285_v44 = vmul.f32 %v6374_v62, %v6370_v48 }
 0x106   :  { %v6376_v63 = vpop.eup %6375 }
 0x107   :  { %v284_v55 = vmul.f32 0.0, %v6376_v63 }
 0x108   :  { %v6378_v0 = vpop.eup %6377 }
 0x109   :  { %v7349_v53 = vadd.f32 %v285_v44, %v284_v55  ;;  %v11940_v44 = vld [vmem:[#allocation17_spill] sm:$0xff]  ;;  %v11943_v55 = vld [vmem:[#allocation27_spill] sm:$0xff] }
 0x10b   :  { %6379 = vtanh.f32 %v7349_v53 }
 0x118   :  { %v6380_v9 = vpop.eup %6379 }
 0x119   :  { %v7352_v50 = vmul.f32 %v6380_v9, %v6378_v0 }
 0x11b   :  { %11930 = vst [vmem:[#allocation30_spill] sm:$0xff] %v7352_v50  ;;  %423 = vmatmul.mubr.f32.vlgmr.msra.gmra.mxu0 %v7352_v50  ;;  %494 = vmatmul.mubr.f32.vlgmr.msra.gmra.mxu1 %v7352_v50  ;;  %v7890_v50 = vld [vmem:[%s11575_s2 + $0x30] sm:$0xff] }
 0x11c   :  { %598 = vmatpush1.msra.mxu0 %v6889_v1  ;;  %669 = vmatpush1.msra.mxu1 %v6943_v11  ;;  %11968 = vst [vmem:[#allocation11_spill] sm:$0xff] %v7890_v50 }
 0x11d   :  { %599 = vmatprep.subr.mxu0 %v6894_v2  ;;  %670 = vmatprep.subr.mxu1 %v6955_v13 }
 0x11e   :  { %600 = vmatpush1.msra.mxu0 %v6902_v4  ;;  %671 = vmatpush1.msra.mxu1 %v6960_v14 }
 0x11f   :  { %601 = vmatprep.subr.mxu0 %v6908_v5  ;;  %672 = vmatprep.subr.mxu1 %v6972_v16 }
 0x120   :  { %602 = vmatpush1.msra.mxu0 %v6914_v6  ;;  %673 = vmatpush1.msra.mxu1 %v6984_v18 }
 0x121   :  { %603 = vmatprep.subr.mxu0 %v6920_v7  ;;  %674 = vmatprep.subr.mxu1 %v6989_v19 }
 0x122   :  { %604 = vmatpush1.msra.mxu0 %v6926_v8  ;;  %675 = vmatpush1.msra.mxu1 %v7001_v21 }
 0x123   :  { %605 = vmatprep.subr.mxu0 %v6937_v10  ;;  %676 = vmatprep.subr.mxu1 %v7013_v23 }
 0x124   :  { %606 = vmatpush1.msra.mxu0 %v6949_v12  ;;  %677 = vmatpush1.msra.mxu1 %v7025_v25 }
 0x125   :  { %607 = vmatprep.subr.mxu0 %v6966_v15  ;;  %678 = vmatprep.subr.mxu1 %v7037_v27 }
 0x126   :  { %608 = vmatpush1.msra.mxu0 %v6978_v17  ;;  %679 = vmatpush1.msra.mxu1 %v7049_v29 }
 0x127   :  { %609 = vmatprep.subr.mxu0 %v6995_v20  ;;  %680 = vmatprep.subr.mxu1 %v7061_v31 }
 0x128   :  { %610 = vmatpush1.msra.mxu0 %v7007_v22  ;;  %681 = vmatpush1.msra.mxu1 %v7073_v33 }
 0x129   :  { %611 = vmatprep.subr.mxu0 %v7019_v24  ;;  %682 = vmatprep.subr.mxu1 %v7085_v35  ;;  %v11931_v24 = vld [vmem:[#allocation18_spill] sm:$0xff] }
 0x12a   :  { %612 = vmatpush1.msra.mxu0 %v7031_v26  ;;  %683 = vmatpush1.msra.mxu1 %v7097_v37  ;;  %v11932_v26 = vld [vmem:[#allocation13_spill] sm:$0xff] }
 0x12b   :  { %613 = vmatprep.subr.mxu0 %v7043_v28  ;;  %684 = vmatprep.subr.mxu1 %v7109_v39  ;;  %v11933_v28 = vld [vmem:[#allocation20_spill] sm:$0xff] }
 0x12c   :  { %614 = vmatpush1.msra.mxu0 %v7055_v30  ;;  %685 = vmatpush1.msra.mxu1 %v7121_v41  ;;  %v11934_v30 = vld [vmem:[#allocation14_spill] sm:$0xff] }
 0x12d   :  { %615 = vmatprep.subr.mxu0 %v7067_v32  ;;  %686 = vmatprep.subr.mxu1 %v7133_v43  ;;  %v11935_v32 = vld [vmem:[#allocation22_spill] sm:$0xff] }
 0x12e   :  { %616 = vmatpush1.msra.mxu0 %v7079_v34  ;;  %687 = vmatpush1.msra.mxu1 %v7145_v45  ;;  %v11936_v34 = vld [vmem:[#allocation15_spill] sm:$0xff] }
 0x12f   :  { %617 = vmatprep.subr.mxu0 %v7091_v36  ;;  %688 = vmatprep.subr.mxu1 %v7157_v47  ;;  %v11937_v36 = vld [vmem:[#allocation24_spill] sm:$0xff] }
 0x130   :  { %618 = vmatpush1.msra.mxu0 %v7103_v38  ;;  %689 = vmatpush1.msra.mxu1 %v7169_v49  ;;  %v11938_v38 = vld [vmem:[#allocation16_spill] sm:$0xff] }
 0x131   :  { %619 = vmatprep.subr.mxu0 %v7115_v40  ;;  %690 = vmatprep.subr.mxu1 %v7181_v51  ;;  %v11939_v40 = vld [vmem:[#allocation25_spill] sm:$0xff] }
 0x132   :  { %620 = vmatpush1.msra.mxu0 %v7127_v42  ;;  %691 = vmatpush1.msra.mxu1 %v11931_v24  ;;  %v11941_v42 = vld [vmem:[#allocation26_spill] sm:$0xff] }
 0x133   :  { %621 = vmatprep.subr.mxu0 %v11932_v26  ;;  %692 = vmatprep.subr.mxu1 %v11933_v28 }
 0x134   :  { %622 = vmatpush1.msra.mxu0 %v11934_v30  ;;  %693 = vmatpush1.msra.mxu1 %v11935_v32 }
 0x135   :  { %623 = vmatprep.subr.mxu0 %v11936_v34  ;;  %694 = vmatprep.subr.mxu1 %v11937_v36  ;;  %v293_v34 = vld [vmem:[%s11576_s1 + $0x38] sm:$0xff] }
 0x136   :  { %624 = vmatpush1.msra.mxu0 %v11938_v38  ;;  %695 = vmatpush1.msra.mxu1 %v11939_v40 }
 0x137   :  { %625 = vmatprep.subr.mxu0 %v11940_v44  ;;  %696 = vmatprep.subr.mxu1 %v11941_v42 }
 0x138   :  { %626 = vmatpush1.msra.mxu0 %v11942_v46  ;;  %697 = vmatpush1.msra.mxu1 %v11943_v55  ;;  %v292_v46 = vld [vmem:[%s11576_s1 + $0x30] sm:$0xff] }
 0x139   :  { %627 = vmatprep.subr.mxu0 %v11944_v57  ;;  %698 = vmatprep.subr.mxu1 %v11945_v58 }
 0x13a   :  { %628 = vmatpush1.msra.mxu0 %v11946_v59  ;;  %661 = vmatprep.mubr.f32.mxu0 %v11947_v60 }
 0x13b   :  { %699 = vmatpush1.msra.mxu1 %v11948_v54  ;;  %732 = vmatprep.mubr.f32.mxu1 %v11947_v60 }
 0x13c   :  { %836 = vmatprep.subr.mxu0 %v11949_v56  ;;  %907 = vmatprep.subr.mxu1 %v11950_v3 }
 0x1db   :  { %v424_v48 = vpop.f32.mrf.mxu0  ;;  %v495_v26 = vpop.f32.mrf.mxu1 }
 0x1dc   :  { %v500_v62 = vadd.f32 %v424_v48, %v290_v52  ;;  %v502_v56 = vadd.f32 %v495_v26, %v292_v46 }
 0x1dd   :  { %v426_v63 = vpop.f32.mrf.mxu0  ;;  %v497_v38 = vpop.f32.mrf.mxu1 }
 0x1de   :  { %v6238_v0 = vmul.f32 -1.442695, %v500_v62  ;;  %v501_v9 = vadd.f32 %v426_v63, %v291_v61  ;;  %v503_v44 = vadd.f32 %v497_v38, %v293_v34 }
 0x1e0   :  { %6381 = vpow2.f32 %v6238_v0  ;;  %v6239_v30 = vmul.f32 -1.442695, %v501_v9  ;;  %v6240_v57 = vmul.f32 -1.442695, %v503_v44 }
 0x1e2   :  { %6383 = vpow2.f32 %v6239_v30 }
 0x1e3   :  { %6385 = vpow2.f32 %v6240_v57 }
 0x1ed   :  { %v6382_v59 = vpop.eup %6381 }
 0x1ee   :  { %v507_v3 = vadd.f32 1.0, %v6382_v59 }
 0x1ef   :  { %v6384_v52 = vpop.eup %6383 }
 0x1f0   :  { %6387 = vrcp.f32 %v507_v3  ;;  %v513_v48 = vadd.f32 1.0, %v6384_v52  ;;  %v6386_v61 = vpop.eup %6385  ;;  %v7621_v3 = vld [vmem:[%s11575_s2 + $0x1e8] sm:$0xff]  ;;  %v7626_v52 = vld [vmem:[%s11575_s2 + $0x1f8] sm:$0xff] }
 0x1f1   :  { %6389 = vtanh.f32 %v502_v56  ;;  %v520_v9 = vadd.f32 1.0, %v6386_v61  ;;  %11961 = vst [vmem:[#allocation26_spill] sm:$0xff] %v7621_v3  ;;  %11962 = vst [vmem:[#allocation19_spill] sm:$0xff] %v7626_v52  ;;  %v7638_v61 = vld [vmem:[%s11575_s2 + $0x1f0] sm:$0xff] }
 0x1f2   :  { %6391 = vrcp.f32 %v513_v48  ;;  %v7633_v48 = vld [vmem:[%s11575_s2 + $0x1e0] sm:$0xff] }
 0x1f3   :  { %6393 = vrcp.f32 %v520_v9  ;;  %v7662_v9 = vld [vmem:[%s11575_s2 + $0x1d0] sm:$0xff] }
 0x1fd   :  { %v6388_v62 = vpop.eup %6387 }
 0x1fe   :  { %v6390_v63 = vpop.eup %6389 }
 0x1ff   :  { %v6392_v0 = vpop.eup %6391  ;;  %v524_v30 = vmul.f32 %v6390_v63, %v6388_v62  ;;  %v7645_v62 = vld [vmem:[%s11575_s2 + $0x1c8] sm:$0xff]  ;;  %v7650_v63 = vld [vmem:[%s11575_s2 + $0x1d8] sm:$0xff] }
 0x200   :  { %v523_v34 = vmul.f32 %v6392_v0, %v7349_v53  ;;  %v6394_v26 = vpop.eup %6393  ;;  %v7657_v0 = vld [vmem:[%s11575_s2 + $0x1c0] sm:$0xff] }
 0x202   :  { %v7435_v38 = vadd.f32 %v524_v30, %v523_v34  ;;  %v7669_v30 = vld [vmem:[%s11575_s2 + $0x1a8] sm:$0xff]  ;;  %v7674_v34 = vld [vmem:[%s11575_s2 + $0x1b8] sm:$0xff] }
 0x204   :  { %6395 = vtanh.f32 %v7435_v38 }
 0x211   :  { %v6396_v44 = vpop.eup %6395 }
 0x212   :  { %v7438_v46 = vmul.f32 %v6396_v44, %v6394_v26  ;;  %v7686_v26 = vld [vmem:[%s11575_s2 + $0x1b0] sm:$0xff]  ;;  %v7693_v44 = vld [vmem:[%s11575_s2 + $0x188] sm:$0xff] }
 0x214   :  { %11951 = vst [vmem:[#allocation18_spill] sm:$0xff] %v7438_v46  ;;  %662 = vmatmul.mubr.f32.vlgmr.msra.gmra.mxu0 %v7438_v46  ;;  %733 = vmatmul.mubr.f32.vlgmr.msra.gmra.mxu1 %v7438_v46  ;;  %v7883_v46 = vld [vmem:[%s11575_s2 + $0x38] sm:$0xff] }
 0x215   :  { %837 = vmatpush1.msra.mxu0 %v6889_v1  ;;  %908 = vmatpush1.msra.mxu1 %v6943_v11  ;;  %v7491_v1 = vld [vmem:[%s11575_s2 + $0x108] sm:$0xff]  ;;  %11967 = vst [vmem:[#allocation29_spill] sm:$0xff] %v7883_v46 }
 0x216   :  { %838 = vmatprep.subr.mxu0 %v6894_v2  ;;  %909 = vmatprep.subr.mxu1 %v6955_v13  ;;  %v7496_v2 = vld [vmem:[%s11575_s2 + $0x100] sm:$0xff]  ;;  %v7537_v11 = vld [vmem:[%s11575_s2 + $0x88] sm:$0xff] }
 0x217   :  { %839 = vmatpush1.msra.mxu0 %v6902_v4  ;;  %910 = vmatpush1.msra.mxu1 %v6960_v14  ;;  %v7501_v4 = vld [vmem:[%s11575_s2 + $0xe8] sm:$0xff]  ;;  %v7555_v14 = vld [vmem:[%s11575_s2 + $0x60] sm:$0xff] }
 0x218   :  { %840 = vmatprep.subr.mxu0 %v6908_v5  ;;  %911 = vmatprep.subr.mxu1 %v6972_v16  ;;  %v7507_v5 = vld [vmem:[%s11575_s2 + $0xe0] sm:$0xff]  ;;  %v7549_v13 = vld [vmem:[%s11575_s2 + $0x68] sm:$0xff]  ;;  %11953 = vst [vmem:[#allocation20_spill] sm:$0xff] %v7555_v14 }
 0x219   :  { %841 = vmatpush1.msra.mxu0 %v6914_v6  ;;  %912 = vmatpush1.msra.mxu1 %v6984_v18  ;;  %v7513_v6 = vld [vmem:[%s11575_s2 + $0xc8] sm:$0xff]  ;;  %11952 = vst [vmem:[#allocation13_spill] sm:$0xff] %v7549_v13  ;;  %v7567_v16 = vld [vmem:[%s11575_s2 + $0x40] sm:$0xff] }
 0x21a   :  { %842 = vmatprep.subr.mxu0 %v6920_v7  ;;  %913 = vmatprep.subr.mxu1 %v6989_v19  ;;  %v7519_v7 = vld [vmem:[%s11575_s2 + $0xc0] sm:$0xff]  ;;  %11955 = vst [vmem:[#allocation22_spill] sm:$0xff] %v7567_v16  ;;  %v7585_v19 = vld [vmem:[%s11575_s2 + $0x8] sm:$0xff] }
 0x21b   :  { %843 = vmatpush1.msra.mxu0 %v6926_v8  ;;  %914 = vmatpush1.msra.mxu1 %v7001_v21  ;;  %v7525_v8 = vld [vmem:[%s11575_s2 + $0xa8] sm:$0xff]  ;;  %v7579_v18 = vld [vmem:[%s11575_s2 + $0x20] sm:$0xff]  ;;  %11958 = vst [vmem:[#allocation16_spill] sm:$0xff] %v7585_v19 }
 0x21c   :  { %844 = vmatprep.subr.mxu0 %v6937_v10  ;;  %915 = vmatprep.subr.mxu1 %v7013_v23  ;;  %v7531_v10 = vld [vmem:[%s11575_s2 + $0xa0] sm:$0xff]  ;;  %11957 = vst [vmem:[#allocation24_spill] sm:$0xff] %v7579_v18  ;;  %v530_v23 = vld [vmem:[%s11576_s1 + $0x48] sm:$0xff] }
 0x21d   :  { %845 = vmatpush1.msra.mxu0 %v6949_v12  ;;  %916 = vmatpush1.msra.mxu1 %v7025_v25  ;;  %v7543_v12 = vld [vmem:[%s11575_s2 + $0x80] sm:$0xff] }
 0x21e   :  { %846 = vmatprep.subr.mxu0 %v6966_v15  ;;  %917 = vmatprep.subr.mxu1 %v7037_v27  ;;  %v7561_v15 = vld [vmem:[%s11575_s2 + $0x48] sm:$0xff]  ;;  %v529_v21 = vld [vmem:[%s11576_s1 + $0x40] sm:$0xff] }
 0x21f   :  { %847 = vmatpush1.msra.mxu0 %v6978_v17  ;;  %918 = vmatpush1.msra.mxu1 %v7049_v29  ;;  %11954 = vst [vmem:[#allocation14_spill] sm:$0xff] %v7561_v15  ;;  %v7573_v17 = vld [vmem:[%s11575_s2 + $0x28] sm:$0xff] }
 0x220   :  { %848 = vmatprep.subr.mxu0 %v6995_v20  ;;  %919 = vmatprep.subr.mxu1 %v7061_v31  ;;  %11956 = vst [vmem:[#allocation15_spill] sm:$0xff] %v7573_v17  ;;  %v7591_v20 = vld [vmem:[%s11575_s2] sm:$0xff] }
 0x221   :  { %849 = vmatpush1.msra.mxu0 %v7007_v22  ;;  %920 = vmatpush1.msra.mxu1 %v7073_v33  ;;  %11959 = vst [vmem:[#allocation25_spill] sm:$0xff] %v7591_v20 }
 0x222   :  { %921 = vmatprep.subr.mxu1 %v7085_v35  ;;  %900 = vmatprep.mubr.f32.mxu0 %v11947_v60 }
 0x223   :  { %922 = vmatpush1.msra.mxu1 %v7097_v37  ;;  %971 = vmatprep.mubr.f32.mxu1 %v11947_v60  ;;  %v532_v37 = vld [vmem:[%s11576_s1 + $0x58] sm:$0xff] }
 0x224   :  { %923 = vmatprep.subr.mxu1 %v7109_v39  ;;  %850 = vmatprep.subr.mxu0 %v7491_v1 }
 0x225   :  { %924 = vmatpush1.msra.mxu1 %v7121_v41  ;;  %851 = vmatpush1.msra.mxu0 %v7496_v2 }
 0x226   :  { %925 = vmatprep.subr.mxu1 %v7133_v43  ;;  %852 = vmatprep.subr.mxu0 %v7501_v4  ;;  %v531_v43 = vld [vmem:[%s11576_s1 + $0x50] sm:$0xff] }
 0x227   :  { %926 = vmatpush1.msra.mxu1 %v7145_v45  ;;  %853 = vmatpush1.msra.mxu0 %v7507_v5 }
 0x228   :  { %927 = vmatprep.subr.mxu1 %v7157_v47  ;;  %854 = vmatprep.subr.mxu0 %v7513_v6 }
 0x229   :  { %928 = vmatpush1.msra.mxu1 %v7169_v49  ;;  %855 = vmatpush1.msra.mxu0 %v7519_v7 }
 0x22a   :  { %929 = vmatprep.subr.mxu1 %v7181_v51  ;;  %856 = vmatprep.subr.mxu0 %v7525_v8 }
 0x22b   :  { %930 = vmatpush1.msra.mxu1 %v11931_v24  ;;  %857 = vmatpush1.msra.mxu0 %v7531_v10 }
 0x22c   :  { %931 = vmatprep.subr.mxu1 %v11933_v28  ;;  %858 = vmatprep.subr.mxu0 %v7537_v11 }
 0x22d   :  { %932 = vmatpush1.msra.mxu1 %v11935_v32  ;;  %859 = vmatpush1.msra.mxu0 %v7543_v12 }
 0x22e   :  { %933 = vmatprep.subr.mxu1 %v11937_v36  ;;  %860 = vmatprep.subr.mxu0 %v7549_v13 }
 0x22f   :  { %934 = vmatpush1.msra.mxu1 %v11939_v40  ;;  %861 = vmatpush1.msra.mxu0 %v7555_v14 }
 0x230   :  { %935 = vmatprep.subr.mxu1 %v11941_v42  ;;  %862 = vmatprep.subr.mxu0 %v7561_v15 }
 0x231   :  { %936 = vmatpush1.msra.mxu1 %v11943_v55  ;;  %863 = vmatpush1.msra.mxu0 %v7567_v16 }
 0x232   :  { %937 = vmatprep.subr.mxu1 %v11945_v58  ;;  %864 = vmatprep.subr.mxu0 %v7573_v17 }
 0x233   :  { %938 = vmatpush1.msra.mxu1 %v11948_v54  ;;  %865 = vmatpush1.msra.mxu0 %v7579_v18 }
 0x234   :  { %866 = vmatprep.subr.mxu0 %v7585_v19  ;;  %1146 = vmatprep.subr.mxu1 %v7626_v52 }
 0x235   :  { %867 = vmatpush1.msra.mxu0 %v7591_v20 }
 0x236   :  { %1075 = vmatprep.subr.mxu0 %v7621_v3 }
 0x2d4   :  { %v663_v22 = vpop.f32.mrf.mxu0  ;;  %v734_v33 = vpop.f32.mrf.mxu1 }
 0x2d5   :  { %v739_v25 = vadd.f32 %v663_v22, %v529_v21  ;;  %v741_v49 = vadd.f32 %v734_v33, %v531_v43  ;;  %v7698_v21 = vld [vmem:[%s11575_s2 + $0x198] sm:$0xff]  ;;  %v7705_v22 = vld [vmem:[%s11575_s2 + $0x180] sm:$0xff]  ;;  %v7741_v33 = vld [vmem:[%s11575_s2 + $0x148] sm:$0xff] }
 0x2d6   :  { %v665_v27 = vpop.f32.mrf.mxu0  ;;  %v736_v39 = vpop.f32.mrf.mxu1  ;;  %v7770_v43 = vld [vmem:[%s11575_s2 + $0x138] sm:$0xff] }
 0x2d7   :  { %v6241_v29 = vmul.f32 -1.442695, %v739_v25  ;;  %v740_v31 = vadd.f32 %v665_v27, %v530_v23  ;;  %v742_v41 = vadd.f32 %v736_v39, %v532_v37  ;;  %v7710_v23 = vld [vmem:[%s11575_s2 + $0x190] sm:$0xff]  ;;  %v7717_v25 = vld [vmem:[%s11575_s2 + $0x168] sm:$0xff]  ;;  %v7722_v27 = vld [vmem:[%s11575_s2 + $0x178] sm:$0xff] }
 0x2d8   :  { %v7753_v37 = vld [vmem:[%s11575_s2 + $0x140] sm:$0xff]  ;;  %v7758_v39 = vld [vmem:[%s11575_s2 + $0x150] sm:$0xff] }
 0x2d9   :  { %6397 = vpow2.f32 %v6241_v29  ;;  %v6242_v35 = vmul.f32 -1.442695, %v740_v31  ;;  %v6243_v45 = vmul.f32 -1.442695, %v742_v41  ;;  %v7729_v29 = vld [vmem:[%s11575_s2 + $0x160] sm:$0xff]  ;;  %v7734_v31 = vld [vmem:[%s11575_s2 + $0x170] sm:$0xff] }
 0x2da   :  { %v7765_v41 = vld [vmem:[%s11575_s2 + $0x128] sm:$0xff] }
 0x2db   :  { %6399 = vpow2.f32 %v6242_v35  ;;  %v7746_v35 = vld [vmem:[%s11575_s2 + $0x158] sm:$0xff] }
 0x2dc   :  { %6401 = vpow2.f32 %v6243_v45  ;;  %v7777_v45 = vld [vmem:[%s11575_s2 + $0x120] sm:$0xff] }
 0x2e6   :  { %v6398_v47 = vpop.eup %6397 }
 0x2e7   :  { %v746_v51 = vadd.f32 1.0, %v6398_v47  ;;  %v7782_v47 = vld [vmem:[%s11575_s2 + $0x130] sm:$0xff] }
 0x2e8   :  { %v6400_v53 = vpop.eup %6399 }
 0x2e9   :  { %6403 = vrcp.f32 %v746_v51  ;;  %v752_v24 = vadd.f32 1.0, %v6400_v53  ;;  %v6402_v28 = vpop.eup %6401  ;;  %v7794_v51 = vld [vmem:[%s11575_s2 + $0x110] sm:$0xff]  ;;  %v7799_v53 = vld [vmem:[%s11575_s2 + $0xf8] sm:$0xff] }
 0x2ea   :  { %6405 = vtanh.f32 %v741_v49  ;;  %v759_v42 = vadd.f32 1.0, %v6402_v28  ;;  %v7789_v49 = vld [vmem:[%s11575_s2 + $0x118] sm:$0xff] }
 0x2eb   :  { %6407 = vrcp.f32 %v752_v24  ;;  %v7806_v24 = vld [vmem:[%s11575_s2 + $0xf0] sm:$0xff]  ;;  %v7813_v28 = vld [vmem:[%s11575_s2 + $0xd8] sm:$0xff] }
 0x2ec   :  { %6409 = vrcp.f32 %v759_v42  ;;  %v7841_v42 = vld [vmem:[%s11575_s2 + $0x98] sm:$0xff] }
 0x2f6   :  { %v6404_v32 = vpop.eup %6403 }
 0x2f7   :  { %v6406_v36 = vpop.eup %6405 }
 0x2f8   :  { %v6408_v40 = vpop.eup %6407  ;;  %v763_v55 = vmul.f32 %v6406_v36, %v6404_v32  ;;  %v7820_v32 = vld [vmem:[%s11575_s2 + $0xd0] sm:$0xff]  ;;  %v7827_v36 = vld [vmem:[%s11575_s2 + $0xb8] sm:$0xff] }
 0x2f9   :  { %v762_v58 = vmul.f32 %v6408_v40, %v7435_v38  ;;  %v6410_v57 = vpop.eup %6409  ;;  %v7681_v38 = vld [vmem:[%s11575_s2 + $0x1a0] sm:$0xff]  ;;  %v7834_v40 = vld [vmem:[%s11575_s2 + $0xb0] sm:$0xff] }
 0x2fb   :  { %v7609_v54 = vadd.f32 %v763_v55, %v762_v58  ;;  %v7848_v55 = vld [vmem:[%s11575_s2 + $0x90] sm:$0xff]  ;;  %v7855_v58 = vld [vmem:[%s11575_s2 + $0x78] sm:$0xff] }
 0x2fc   :  { %11963 = vst [vmem:[#allocation27_spill] sm:$0xff] %v7855_v58 }
 0x2fd   :  { %6411 = vtanh.f32 %v7609_v54 }
 0x30a   :  { %v6412_v59 = vpop.eup %6411 }
 0x30b   :  { %v7612_v56 = vmul.f32 %v6412_v59, %v6410_v57  ;;  %v7862_v57 = vld [vmem:[%s11575_s2 + $0x70] sm:$0xff]  ;;  %v7869_v59 = vld [vmem:[%s11575_s2 + $0x58] sm:$0xff] }
 0x30c   :  { %11964 = vst [vmem:[#allocation21_spill] sm:$0xff] %v7862_v57  ;;  %11965 = vst [vmem:[#allocation28_spill] sm:$0xff] %v7869_v59 }
 0x30d   :  { %11960 = vst [vmem:[#allocation17_spill] sm:$0xff] %v7612_v56  ;;  %901 = vmatmul.mubr.f32.vlgmr.msra.gmra.mxu0 %v7612_v56  ;;  %972 = vmatmul.mubr.f32.vlgmr.msra.gmra.mxu1 %v7612_v56  ;;  %v7876_v56 = vld [vmem:[%s11575_s2 + $0x50] sm:$0xff] }
 0x30e   :  { %1139 = vmatprep.mubr.f32.mxu0 %v11947_v60  ;;  %1210 = vmatprep.mubr.f32.mxu1 %v11947_v60  ;;  %11966 = vst [vmem:[#allocation23_spill] sm:$0xff] %v7876_v56  ;;  %v7897_v60 = vld [vmem:[%s11575_s2 + $0x18] sm:$0xff] }
 0x30f   :  { %1076 = vmatpush1.msra.mxu0 %v7633_v48  ;;  %1147 = vmatpush1.msra.mxu1 %v7638_v61  ;;  %11969 = vst [vmem:[#allocation12_spill] sm:$0xff] %v7897_v60 }
 0x310   :  { %1077 = vmatprep.subr.mxu0 %v7645_v62  ;;  %1148 = vmatprep.subr.mxu1 %v7650_v63 }
 0x311   :  { %1078 = vmatpush1.msra.mxu0 %v7657_v0  ;;  %1149 = vmatpush1.msra.mxu1 %v7662_v9 }
 0x312   :  { %1079 = vmatprep.subr.mxu0 %v7669_v30  ;;  %1150 = vmatprep.subr.mxu1 %v7674_v34 }
 0x313   :  { %1080 = vmatpush1.msra.mxu0 %v7681_v38  ;;  %1151 = vmatpush1.msra.mxu1 %v7686_v26 }
 0x314   :  { %1081 = vmatprep.subr.mxu0 %v7693_v44  ;;  %1152 = vmatprep.subr.mxu1 %v7698_v21 }
 0x315   :  { %1082 = vmatpush1.msra.mxu0 %v7705_v22  ;;  %1153 = vmatpush1.msra.mxu1 %v7710_v23 }
 0x316   :  { %1083 = vmatprep.subr.mxu0 %v7717_v25  ;;  %1154 = vmatprep.subr.mxu1 %v7722_v27 }
 0x317   :  { %1084 = vmatpush1.msra.mxu0 %v7729_v29  ;;  %1155 = vmatpush1.msra.mxu1 %v7734_v31 }
 0x318   :  { %1085 = vmatprep.subr.mxu0 %v7741_v33  ;;  %1156 = vmatprep.subr.mxu1 %v7746_v35 }
 0x319   :  { %1086 = vmatpush1.msra.mxu0 %v7753_v37  ;;  %1157 = vmatpush1.msra.mxu1 %v7758_v39 }
 0x31a   :  { %1087 = vmatprep.subr.mxu0 %v7765_v41  ;;  %1158 = vmatprep.subr.mxu1 %v7770_v43 }
 0x31b   :  { %1088 = vmatpush1.msra.mxu0 %v7777_v45  ;;  %1159 = vmatpush1.msra.mxu1 %v7782_v47 }
 0x31c   :  { %1089 = vmatprep.subr.mxu0 %v7491_v1  ;;  %1160 = vmatprep.subr.mxu1 %v7789_v49 }
 0x31d   :  { %1090 = vmatpush1.msra.mxu0 %v7496_v2  ;;  %1161 = vmatpush1.msra.mxu1 %v7794_v51 }
 0x31e   :  { %1091 = vmatprep.subr.mxu0 %v7501_v4  ;;  %1162 = vmatprep.subr.mxu1 %v7799_v53 }
 0x31f   :  { %1092 = vmatpush1.msra.mxu0 %v7507_v5  ;;  %1163 = vmatpush1.msra.mxu1 %v7806_v24 }
 0x320   :  { %1093 = vmatprep.subr.mxu0 %v7513_v6  ;;  %1164 = vmatprep.subr.mxu1 %v7813_v28 }
 0x321   :  { %1094 = vmatpush1.msra.mxu0 %v7519_v7  ;;  %1165 = vmatpush1.msra.mxu1 %v7820_v32 }
 0x322   :  { %1095 = vmatprep.subr.mxu0 %v7525_v8  ;;  %1166 = vmatprep.subr.mxu1 %v7827_v36 }
 0x323   :  { %1096 = vmatpush1.msra.mxu0 %v7531_v10  ;;  %1167 = vmatpush1.msra.mxu1 %v7834_v40 }
 0x324   :  { %1097 = vmatprep.subr.mxu0 %v7537_v11  ;;  %1168 = vmatprep.subr.mxu1 %v7841_v42 }
 0x325   :  { %1098 = vmatpush1.msra.mxu0 %v7543_v12  ;;  %1169 = vmatpush1.msra.mxu1 %v7848_v55 }
 0x326   :  { %1099 = vmatprep.subr.mxu0 %v7549_v13  ;;  %1170 = vmatprep.subr.mxu1 %v7855_v58 }
 0x327   :  { %1100 = vmatpush1.msra.mxu0 %v7555_v14  ;;  %1171 = vmatpush1.msra.mxu1 %v7862_v57 }
 0x328   :  { %1101 = vmatprep.subr.mxu0 %v7561_v15  ;;  %1172 = vmatprep.subr.mxu1 %v7869_v59  ;;  %v7904_v59 = vld [vmem:[%s11575_s2 + $0x10] sm:$0xff] }
 0x329   :  { %1102 = vmatpush1.msra.mxu0 %v7567_v16  ;;  %1173 = vmatpush1.msra.mxu1 %v7876_v56  ;;  %11970 = vst [vmem:[#allocation31_spill] sm:$0xff] %v7904_v59  ;;  %v770_v15 = vld [vmem:[%s11576_s1 + $0x70] sm:$0xff] }
 0x32a   :  { %1103 = vmatprep.subr.mxu0 %v7573_v17  ;;  %1174 = vmatprep.subr.mxu1 %v7883_v46  ;;  %v768_v46 = vld [vmem:[%s11576_s1 + $0x60] sm:$0xff] }
 0x32b   :  { %1104 = vmatpush1.msra.mxu0 %v7579_v18  ;;  %1175 = vmatpush1.msra.mxu1 %v7890_v50  ;;  %v769_v50 = vld [vmem:[%s11576_s1 + $0x68] sm:$0xff] }
 0x32c   :  { %1105 = vmatprep.subr.mxu0 %v7585_v19  ;;  %1176 = vmatprep.subr.mxu1 %v7897_v60 }
 0x32d   :  { %1106 = vmatpush1.msra.mxu0 %v7591_v20  ;;  %1177 = vmatpush1.msra.mxu1 %v7904_v59 }
 0x32e   :  { %1314 = vmatprep.subr.mxu0 %v7621_v3  ;;  %1385 = vmatprep.subr.mxu1 %v7626_v52  ;;  %v771_v52 = vld [vmem:[%s11576_s1 + $0x78] sm:$0xff] }
 0x3cd   :  { %v902_v17 = vpop.f32.mrf.mxu0  ;;  %v973_v20 = vpop.f32.mrf.mxu1 }
 0x3ce   :  { %v978_v19 = vadd.f32 %v902_v17, %v768_v46  ;;  %v980_v46 = vadd.f32 %v973_v20, %v770_v15  ;;  %v11972_v20 = vld [vmem:[#allocation13_spill] sm:$0xff] }
 0x3cf   :  { %v904_v18 = vpop.f32.mrf.mxu0  ;;  %v975_v3 = vpop.f32.mrf.mxu1 }
 0x3d0   :  { %v6244_v60 = vmul.f32 -1.442695, %v978_v19  ;;  %v979_v56 = vadd.f32 %v904_v18, %v769_v50  ;;  %v981_v16 = vadd.f32 %v975_v3, %v771_v52 }
 0x3d2   :  { %6413 = vpow2.f32 %v6244_v60  ;;  %v6245_v59 = vmul.f32 -1.442695, %v979_v56  ;;  %v6246_v57 = vmul.f32 -1.442695, %v981_v16 }
 0x3d4   :  { %6415 = vpow2.f32 %v6245_v59 }
 0x3d5   :  { %6417 = vpow2.f32 %v6246_v57  ;;  %v11975_v57 = vld [vmem:[#allocation21_spill] sm:$0xff] }
 0x3df   :  { %v6414_v14 = vpop.eup %6413 }
 0x3e0   :  { %v985_v17 = vadd.f32 1.0, %v6414_v14 }
 0x3e1   :  { %v6416_v19 = vpop.eup %6415 }
 0x3e2   :  { %6419 = vrcp.f32 %v985_v17  ;;  %v991_v50 = vadd.f32 1.0, %v6416_v19  ;;  %v6418_v60 = vpop.eup %6417  ;;  %v11977_v17 = vld [vmem:[#allocation28_spill] sm:$0xff]  ;;  %v11978_v19 = vld [vmem:[#allocation22_spill] sm:$0xff] }
 0x3e3   :  { %6421 = vtanh.f32 %v980_v46  ;;  %v998_v58 = vadd.f32 1.0, %v6418_v60  ;;  %v11976_v46 = vld [vmem:[#allocation14_spill] sm:$0xff]  ;;  %v11980_v60 = vld [vmem:[#allocation15_spill] sm:$0xff] }
 0x3e4   :  { %6423 = vrcp.f32 %v991_v50  ;;  %v11979_v50 = vld [vmem:[#allocation23_spill] sm:$0xff] }
 0x3e5   :  { %6425 = vrcp.f32 %v998_v58  ;;  %v11974_v58 = vld [vmem:[#allocation20_spill] sm:$0xff] }
 0x3ef   :  { %v6420_v18 = vpop.eup %6419 }
 0x3f0   :  { %v6422_v56 = vpop.eup %6421 }
 0x3f1   :  { %v6424_v59 = vpop.eup %6423  ;;  %v1002_v3 = vmul.f32 %v6422_v56, %v6420_v18  ;;  %v11981_v18 = vld [vmem:[#allocation29_spill] sm:$0xff]  ;;  %v11982_v56 = vld [vmem:[#allocation24_spill] sm:$0xff] }
 0x3f2   :  { %v1001_v52 = vmul.f32 %v6424_v59, %v7609_v54  ;;  %v6426_v14 = vpop.eup %6425  ;;  %v11973_v54 = vld [vmem:[#allocation27_spill] sm:$0xff] }
 0x3f3   :  { %v11983_v59 = vld [vmem:[#allocation11_spill] sm:$0xff] }
 0x3f4   :  { %v7927_v13 = vadd.f32 %v1002_v3, %v1001_v52  ;;  %v11984_v3 = vld [vmem:[#allocation16_spill] sm:$0xff] }
 0x3f5   :  { %v11985_v52 = vld [vmem:[#allocation12_spill] sm:$0xff] }
 0x3f6   :  { %6427 = vtanh.f32 %v7927_v13 }
 0x403   :  { %v6428_v15 = vpop.eup %6427 }
 0x404   :  { %v7930_v16 = vmul.f32 %v6428_v15, %v6426_v14  ;;  %v11986_v14 = vld [vmem:[#allocation25_spill] sm:$0xff]  ;;  %v11987_v15 = vmov 0.0  }
 0x406   :  { %11971 = vst [vmem:[#allocation32_spill] sm:$0xff] %v7930_v16  ;;  %1140 = vmatmul.mubr.f32.vlgmr.msra.gmra.mxu0 %v7930_v16  ;;  %1211 = vmatmul.mubr.f32.vlgmr.msra.gmra.mxu1 %v7930_v16  ;;  %v11988_v16 = vld [vmem:[#allocation31_spill] sm:$0xff] }
 0x407   :  { %1315 = vmatpush1.msra.mxu0 %v7633_v48  ;;  %1386 = vmatpush1.msra.mxu1 %v7638_v61 }
 0x408   :  { %1316 = vmatprep.subr.mxu0 %v7645_v62  ;;  %1387 = vmatprep.subr.mxu1 %v7650_v63 }
 0x409   :  { %1317 = vmatpush1.msra.mxu0 %v7657_v0  ;;  %1388 = vmatpush1.msra.mxu1 %v7662_v9 }
 0x40a   :  { %1318 = vmatprep.subr.mxu0 %v7669_v30  ;;  %1389 = vmatprep.subr.mxu1 %v7674_v34 }
 0x40b   :  { %1319 = vmatpush1.msra.mxu0 %v7681_v38  ;;  %1390 = vmatpush1.msra.mxu1 %v7686_v26 }
 0x40c   :  { %1320 = vmatprep.subr.mxu0 %v7693_v44  ;;  %1391 = vmatprep.subr.mxu1 %v7698_v21 }
 0x40d   :  { %1321 = vmatpush1.msra.mxu0 %v7705_v22  ;;  %1392 = vmatpush1.msra.mxu1 %v7710_v23 }
 0x40e   :  { %1322 = vmatprep.subr.mxu0 %v7717_v25  ;;  %1393 = vmatprep.subr.mxu1 %v7722_v27 }
 0x40f   :  { %1323 = vmatpush1.msra.mxu0 %v7729_v29  ;;  %1394 = vmatpush1.msra.mxu1 %v7734_v31 }
 0x410   :  { %1324 = vmatprep.subr.mxu0 %v7741_v33  ;;  %1395 = vmatprep.subr.mxu1 %v7746_v35 }
 0x411   :  { %1325 = vmatpush1.msra.mxu0 %v7753_v37  ;;  %1396 = vmatpush1.msra.mxu1 %v7758_v39 }
 0x412   :  { %1326 = vmatprep.subr.mxu0 %v7765_v41  ;;  %1397 = vmatprep.subr.mxu1 %v7770_v43 }
 0x413   :  { %1327 = vmatpush1.msra.mxu0 %v7777_v45  ;;  %1398 = vmatpush1.msra.mxu1 %v7782_v47 }
 0x414   :  { %1328 = vmatprep.subr.mxu0 %v7491_v1  ;;  %1399 = vmatprep.subr.mxu1 %v7789_v49 }
 0x415   :  { %1329 = vmatpush1.msra.mxu0 %v7496_v2  ;;  %1400 = vmatpush1.msra.mxu1 %v7794_v51 }
 0x416   :  { %1330 = vmatprep.subr.mxu0 %v7501_v4  ;;  %1401 = vmatprep.subr.mxu1 %v7799_v53 }
 0x417   :  { %1331 = vmatpush1.msra.mxu0 %v7507_v5  ;;  %1402 = vmatpush1.msra.mxu1 %v7806_v24 }
 0x418   :  { %1332 = vmatprep.subr.mxu0 %v7513_v6  ;;  %1403 = vmatprep.subr.mxu1 %v7813_v28 }
 0x419   :  { %1333 = vmatpush1.msra.mxu0 %v7519_v7  ;;  %1404 = vmatpush1.msra.mxu1 %v7820_v32 }
 0x41a   :  { %1334 = vmatprep.subr.mxu0 %v7525_v8  ;;  %1405 = vmatprep.subr.mxu1 %v7827_v36 }
 0x41b   :  { %1335 = vmatpush1.msra.mxu0 %v7531_v10  ;;  %1406 = vmatpush1.msra.mxu1 %v7834_v40 }
 0x41c   :  { %1336 = vmatprep.subr.mxu0 %v7537_v11  ;;  %1407 = vmatprep.subr.mxu1 %v7841_v42 }
 0x41d   :  { %1337 = vmatpush1.msra.mxu0 %v7543_v12  ;;  %1408 = vmatpush1.msra.mxu1 %v7848_v55 }
 0x41e   :  { %1338 = vmatprep.subr.mxu0 %v11972_v20  ;;  %1409 = vmatprep.subr.mxu1 %v11973_v54 }
 0x41f   :  { %1339 = vmatpush1.msra.mxu0 %v11974_v58  ;;  %1410 = vmatpush1.msra.mxu1 %v11975_v57 }
 0x420   :  { %1340 = vmatprep.subr.mxu0 %v11976_v46  ;;  %1411 = vmatprep.subr.mxu1 %v11977_v17  ;;  %v1009_v46 = vld [vmem:[%s11576_s1 + $0x90] sm:$0xff] }
 0x421   :  { %1341 = vmatpush1.msra.mxu0 %v11978_v19  ;;  %1412 = vmatpush1.msra.mxu1 %v11979_v50  ;;  %v11989_v50 = vld [vmem:[#allocation26_spill] sm:$0xff] }
 0x422   :  { %1342 = vmatprep.subr.mxu0 %v11980_v60  ;;  %1413 = vmatprep.subr.mxu1 %v11981_v18  ;;  %v11990_v60 = vld [vmem:[#allocation19_spill] sm:$0xff] }
 0x423   :  { %1343 = vmatpush1.msra.mxu0 %v11982_v56  ;;  %1414 = vmatpush1.msra.mxu1 %v11983_v59  ;;  %v1007_v59 = vld [vmem:[%s11576_s1 + $0x80] sm:$0xff] }
 0x424   :  { %1344 = vmatprep.subr.mxu0 %v11984_v3  ;;  %1415 = vmatprep.subr.mxu1 %v11985_v52  ;;  %v1008_v52 = vld [vmem:[%s11576_s1 + $0x88] sm:$0xff] }
 0x425   :  { %1345 = vmatpush1.msra.mxu0 %v11986_v14  ;;  %1378 = vmatprep.mubr.f32.mxu0 %v11987_v15 }
 0x426   :  { %1416 = vmatpush1.msra.mxu1 %v11988_v16  ;;  %1449 = vmatprep.mubr.f32.mxu1 %v11987_v15 }
 0x427   :  { %1553 = vmatprep.subr.mxu0 %v11989_v50  ;;  %1624 = vmatprep.subr.mxu1 %v11990_v60  ;;  %v1010_v60 = vld [vmem:[%s11576_s1 + $0x98] sm:$0xff] }
 0x4c6   :  { %v1141_v56 = vpop.f32.mrf.mxu0  ;;  %v1212_v16 = vpop.f32.mrf.mxu1 }
 0x4c7   :  { %v1217_v14 = vadd.f32 %v1141_v56, %v1007_v59  ;;  %v1219_v56 = vadd.f32 %v1212_v16, %v1009_v46  ;;  %v12003_v46 = vld [vmem:[#allocation16_spill] sm:$0xff] }
 0x4c8   :  { %v1143_v3 = vpop.f32.mrf.mxu0  ;;  %v1214_v50 = vpop.f32.mrf.mxu1 }
 0x4c9   :  { %v6247_v18 = vmul.f32 -1.442695, %v1217_v14  ;;  %v1218_v19 = vadd.f32 %v1143_v3, %v1008_v52  ;;  %v1220_v17 = vadd.f32 %v1214_v50, %v1010_v60 }
 0x4cb   :  { %6429 = vpow2.f32 %v6247_v18  ;;  %v6248_v15 = vmul.f32 -1.442695, %v1218_v19  ;;  %v6249_v57 = vmul.f32 -1.442695, %v1220_v17  ;;  %v12004_v17 = vld [vmem:[#allocation12_spill] sm:$0xff] }
 0x4cd   :  { %6431 = vpow2.f32 %v6248_v15 }
 0x4ce   :  { %6433 = vpow2.f32 %v6249_v57 }
 0x4d8   :  { %v6430_v58 = vpop.eup %6429 }
 0x4d9   :  { %v1224_v59 = vadd.f32 1.0, %v6430_v58 }
 0x4da   :  { %v6432_v14 = vpop.eup %6431 }
 0x4db   :  { %6435 = vrcp.f32 %v1224_v59  ;;  %v1230_v18 = vadd.f32 1.0, %v6432_v14  ;;  %v6434_v19 = vpop.eup %6433  ;;  %v12006_v59 = vmov 0.0   ;;  %v12007_v14 = vld [vmem:[#allocation31_spill] sm:$0xff] }
 0x4dc   :  { %6437 = vtanh.f32 %v1219_v56  ;;  %v1237_v54 = vadd.f32 1.0, %v6434_v19  ;;  %v12005_v56 = vld [vmem:[#allocation25_spill] sm:$0xff]  ;;  %v12009_v19 = vld [vmem:[#allocation19_spill] sm:$0xff] }
 0x4dd   :  { %6439 = vrcp.f32 %v1230_v18  ;;  %v12008_v18 = vld [vmem:[#allocation26_spill] sm:$0xff] }
 0x4de   :  { %6441 = vrcp.f32 %v1237_v54  ;;  %v12002_v54 = vld [vmem:[#allocation11_spill] sm:$0xff] }
 0x4e8   :  { %v6436_v3 = vpop.eup %6435 }
 0x4e9   :  { %v6438_v52 = vpop.eup %6437 }
 0x4ea   :  { %v6440_v15 = vpop.eup %6439  ;;  %v1241_v50 = vmul.f32 %v6438_v52, %v6436_v3  ;;  %v1246_v3 = vld [vmem:[%s11576_s1 + $0xa0] sm:$0xff] }
 0x4eb   :  { %v1240_v60 = vmul.f32 %v6440_v15, %v7927_v13  ;;  %v6442_v16 = vpop.eup %6441  ;;  %v12001_v13 = vld [vmem:[#allocation24_spill] sm:$0xff] }
 0x4ec   :  { %v1247_v15 = vld [vmem:[%s11576_s1 + $0xa8] sm:$0xff] }
 0x4ed   :  { %v8013_v20 = vadd.f32 %v1241_v50, %v1240_v60 }
 0x4ef   :  { %6443 = vtanh.f32 %v8013_v20 }
 0x4fc   :  { %v6444_v58 = vpop.eup %6443 }
 0x4fd   :  { %v8016_v57 = vmul.f32 %v6444_v58, %v6442_v16 }
 0x4ff   :  { %1379 = vmatmul.mubr.f32.vlgmr.msra.gmra.mxu0 %v8016_v57  ;;  %1450 = vmatmul.mubr.f32.vlgmr.msra.gmra.mxu1 %v8016_v57 }
 0x500   :  { %1554 = vmatpush1.msra.mxu0 %v7633_v48  ;;  %1625 = vmatpush1.msra.mxu1 %v7638_v61 }
 0x501   :  { %1555 = vmatprep.subr.mxu0 %v7645_v62  ;;  %1626 = vmatprep.subr.mxu1 %v7650_v63 }
 0x502   :  { %1556 = vmatpush1.msra.mxu0 %v7657_v0  ;;  %1627 = vmatpush1.msra.mxu1 %v7662_v9 }
 0x503   :  { %1557 = vmatprep.subr.mxu0 %v7669_v30  ;;  %1628 = vmatprep.subr.mxu1 %v7674_v34 }
 0x504   :  { %1558 = vmatpush1.msra.mxu0 %v7681_v38  ;;  %1629 = vmatpush1.msra.mxu1 %v7686_v26 }
 0x505   :  { %1559 = vmatprep.subr.mxu0 %v7693_v44  ;;  %1630 = vmatprep.subr.mxu1 %v7698_v21 }
 0x506   :  { %1560 = vmatpush1.msra.mxu0 %v7705_v22  ;;  %1631 = vmatpush1.msra.mxu1 %v7710_v23 }
 0x507   :  { %1561 = vmatprep.subr.mxu0 %v7717_v25  ;;  %1632 = vmatprep.subr.mxu1 %v7722_v27 }
 0x508   :  { %1562 = vmatpush1.msra.mxu0 %v7729_v29  ;;  %1633 = vmatpush1.msra.mxu1 %v7734_v31 }
 0x509   :  { %1563 = vmatprep.subr.mxu0 %v7741_v33  ;;  %1634 = vmatprep.subr.mxu1 %v7746_v35 }
 0x50a   :  { %1564 = vmatpush1.msra.mxu0 %v7753_v37  ;;  %1635 = vmatpush1.msra.mxu1 %v7758_v39 }
 0x50b   :  { %1565 = vmatprep.subr.mxu0 %v7765_v41  ;;  %1636 = vmatprep.subr.mxu1 %v7770_v43 }
 0x50c   :  { %1566 = vmatpush1.msra.mxu0 %v7777_v45  ;;  %1637 = vmatpush1.msra.mxu1 %v7782_v47 }
 0x50d   :  { %1567 = vmatprep.subr.mxu0 %v7491_v1  ;;  %1638 = vmatprep.subr.mxu1 %v7789_v49  ;;  %v11991_v1 = vld [vmem:[#allocation13_spill] sm:$0xff] }
 0x50e   :  { %1568 = vmatpush1.msra.mxu0 %v7496_v2  ;;  %1639 = vmatpush1.msra.mxu1 %v7794_v51  ;;  %v11992_v2 = vld [vmem:[#allocation27_spill] sm:$0xff] }
 0x50f   :  { %1569 = vmatprep.subr.mxu0 %v7501_v4  ;;  %1640 = vmatprep.subr.mxu1 %v7799_v53  ;;  %v11993_v4 = vld [vmem:[#allocation20_spill] sm:$0xff] }
 0x510   :  { %1570 = vmatpush1.msra.mxu0 %v7507_v5  ;;  %1641 = vmatpush1.msra.mxu1 %v7806_v24  ;;  %v11994_v5 = vld [vmem:[#allocation21_spill] sm:$0xff] }
 0x511   :  { %1571 = vmatprep.subr.mxu0 %v7513_v6  ;;  %1642 = vmatprep.subr.mxu1 %v7813_v28  ;;  %v11995_v6 = vld [vmem:[#allocation14_spill] sm:$0xff] }
 0x512   :  { %1572 = vmatpush1.msra.mxu0 %v7519_v7  ;;  %1643 = vmatpush1.msra.mxu1 %v7820_v32  ;;  %v11996_v7 = vld [vmem:[#allocation28_spill] sm:$0xff] }
 0x513   :  { %1573 = vmatprep.subr.mxu0 %v7525_v8  ;;  %1644 = vmatprep.subr.mxu1 %v7827_v36  ;;  %v11997_v8 = vld [vmem:[#allocation22_spill] sm:$0xff] }
 0x514   :  { %1574 = vmatpush1.msra.mxu0 %v7531_v10  ;;  %1645 = vmatpush1.msra.mxu1 %v7834_v40  ;;  %v11998_v10 = vld [vmem:[#allocation23_spill] sm:$0xff] }
 0x515   :  { %1575 = vmatprep.subr.mxu0 %v7537_v11  ;;  %1646 = vmatprep.subr.mxu1 %v7841_v42  ;;  %v11999_v11 = vld [vmem:[#allocation15_spill] sm:$0xff] }
 0x516   :  { %1576 = vmatpush1.msra.mxu0 %v7543_v12  ;;  %1647 = vmatpush1.msra.mxu1 %v7848_v55  ;;  %v12000_v12 = vld [vmem:[#allocation29_spill] sm:$0xff] }
 0x517   :  { %1577 = vmatprep.subr.mxu0 %v11991_v1  ;;  %1648 = vmatprep.subr.mxu1 %v11992_v2 }
 0x518   :  { %1578 = vmatpush1.msra.mxu0 %v11993_v4  ;;  %1649 = vmatpush1.msra.mxu1 %v11994_v5 }
 0x519   :  { %1579 = vmatprep.subr.mxu0 %v11995_v6  ;;  %1650 = vmatprep.subr.mxu1 %v11996_v7  ;;  %v1249_v6 = vld [vmem:[%s11576_s1 + $0xb8] sm:$0xff] }
 0x51a   :  { %1580 = vmatpush1.msra.mxu0 %v11997_v8  ;;  %1651 = vmatpush1.msra.mxu1 %v11998_v10 }
 0x51b   :  { %1581 = vmatprep.subr.mxu0 %v11999_v11  ;;  %1652 = vmatprep.subr.mxu1 %v12000_v12 }
 0x51c   :  { %1582 = vmatpush1.msra.mxu0 %v12001_v13  ;;  %1653 = vmatpush1.msra.mxu1 %v12002_v54  ;;  %v1248_v13 = vld [vmem:[%s11576_s1 + $0xb0] sm:$0xff] }
 0x51d   :  { %1583 = vmatprep.subr.mxu0 %v12003_v46  ;;  %1654 = vmatprep.subr.mxu1 %v12004_v17 }
 0x51e   :  { %1584 = vmatpush1.msra.mxu0 %v12005_v56  ;;  %1617 = vmatprep.mubr.f32.mxu0 %v12006_v59 }
 0x51f   :  { %1655 = vmatpush1.msra.mxu1 %v12007_v14  ;;  %1688 = vmatprep.mubr.f32.mxu1 %v12006_v59 }
 0x520   :  { %1792 = vmatprep.subr.mxu0 %v12008_v18  ;;  %1863 = vmatprep.subr.mxu1 %v12009_v19 }
 0x5bf   :  { %v1380_v52 = vpop.f32.mrf.mxu0  ;;  %v1451_v1 = vpop.f32.mrf.mxu1 }
 0x5c0   :  { %v1456_v50 = vadd.f32 %v1380_v52, %v1246_v3  ;;  %v1458_v18 = vadd.f32 %v1451_v1, %v1248_v13 }
 0x5c1   :  { %v1382_v60 = vpop.f32.mrf.mxu0  ;;  %v1453_v8 = vpop.f32.mrf.mxu1 }
 0x5c2   :  { %v6250_v16 = vmul.f32 -1.442695, %v1456_v50  ;;  %v1457_v58 = vadd.f32 %v1382_v60, %v1247_v15  ;;  %v1459_v11 = vadd.f32 %v1453_v8, %v1249_v6 }
 0x5c4   :  { %6445 = vpow2.f32 %v6250_v16  ;;  %v6251_v4 = vmul.f32 -1.442695, %v1457_v58  ;;  %v6252_v46 = vmul.f32 -1.442695, %v1459_v11 }
 0x5c6   :  { %6447 = vpow2.f32 %v6251_v4 }
 0x5c7   :  { %6449 = vpow2.f32 %v6252_v46 }
 0x5d1   :  { %v6446_v56 = vpop.eup %6445 }
 0x5d2   :  { %v1463_v19 = vadd.f32 1.0, %v6446_v56 }
 0x5d3   :  { %v6448_v3 = vpop.eup %6447 }
 0x5d4   :  { %6451 = vrcp.f32 %v1463_v19  ;;  %v1469_v52 = vadd.f32 1.0, %v6448_v3  ;;  %v6450_v15 = vpop.eup %6449 }
 0x5d5   :  { %6453 = vtanh.f32 %v1458_v18  ;;  %v1476_v58 = vadd.f32 1.0, %v6450_v15  ;;  %v2035_v15 = vld [vmem:[%s11577_s3 + $0x1f0] sm:$0xff] }
 0x5d6   :  { %6455 = vrcp.f32 %v1469_v52  ;;  %v2033_v52 = vld [vmem:[%s11577_s3 + $0x1e0] sm:$0xff] }
 0x5d7   :  { %6457 = vrcp.f32 %v1476_v58  ;;  %v2031_v58 = vld [vmem:[%s11577_s3 + $0x1d0] sm:$0xff] }
 0x5e1   :  { %v6452_v50 = vpop.eup %6451 }
 0x5e2   :  { %v6454_v60 = vpop.eup %6453 }
 0x5e3   :  { %v6456_v16 = vpop.eup %6455  ;;  %v1480_v4 = vmul.f32 %v6454_v60, %v6452_v50  ;;  %v2030_v50 = vld [vmem:[%s11577_s3 + $0x1c8] sm:$0xff]  ;;  %v2032_v60 = vld [vmem:[%s11577_s3 + $0x1d8] sm:$0xff] }
 0x5e4   :  { %v1479_v6 = vmul.f32 %v6456_v16, %v8013_v20  ;;  %v6458_v1 = vpop.eup %6457  ;;  %v2029_v16 = vld [vmem:[%s11577_s3 + $0x1c0] sm:$0xff] }
 0x5e6   :  { %v8099_v8 = vadd.f32 %v1480_v4, %v1479_v6  ;;  %v2026_v4 = vld [vmem:[%s11577_s3 + $0x1a8] sm:$0xff]  ;;  %v2028_v6 = vld [vmem:[%s11577_s3 + $0x1b8] sm:$0xff] }
 0x5e8   :  { %6459 = vtanh.f32 %v8099_v8 }
 0x5f5   :  { %v6460_v11 = vpop.eup %6459 }
 0x5f6   :  { %v8102_v13 = vmul.f32 %v6460_v11, %v6458_v1  ;;  %v2027_v1 = vld [vmem:[%s11577_s3 + $0x1b0] sm:$0xff]  ;;  %v2022_v11 = vld [vmem:[%s11577_s3 + $0x188] sm:$0xff] }
 0x5f8   :  { %1618 = vmatmul.mubr.f32.vlgmr.msra.gmra.mxu0 %v8102_v13  ;;  %1689 = vmatmul.mubr.f32.vlgmr.msra.gmra.mxu1 %v8102_v13 }
 0x5f9   :  { %1793 = vmatpush1.msra.mxu0 %v7633_v48  ;;  %1864 = vmatpush1.msra.mxu1 %v7638_v61  ;;  %v1761_v48 = vld [vmem:[%s11575_s2 + $0x108] sm:$0xff]  ;;  %v1760_v61 = vld [vmem:[%s11575_s2 + $0x100] sm:$0xff] }
 0x5fa   :  { %1794 = vmatprep.subr.mxu0 %v7645_v62  ;;  %1865 = vmatprep.subr.mxu1 %v7650_v63  ;;  %v1757_v62 = vld [vmem:[%s11575_s2 + $0xe8] sm:$0xff]  ;;  %v1756_v63 = vld [vmem:[%s11575_s2 + $0xe0] sm:$0xff] }
 0x5fb   :  { %1795 = vmatpush1.msra.mxu0 %v7657_v0  ;;  %1866 = vmatpush1.msra.mxu1 %v7662_v9  ;;  %v1753_v0 = vld [vmem:[%s11575_s2 + $0xc8] sm:$0xff]  ;;  %v1752_v9 = vld [vmem:[%s11575_s2 + $0xc0] sm:$0xff] }
 0x5fc   :  { %1796 = vmatprep.subr.mxu0 %v7669_v30  ;;  %1867 = vmatprep.subr.mxu1 %v7674_v34  ;;  %v1749_v30 = vld [vmem:[%s11575_s2 + $0xa8] sm:$0xff]  ;;  %v1748_v34 = vld [vmem:[%s11575_s2 + $0xa0] sm:$0xff] }
 0x5fd   :  { %1797 = vmatpush1.msra.mxu0 %v7681_v38  ;;  %1868 = vmatpush1.msra.mxu1 %v7686_v26  ;;  %v1745_v38 = vld [vmem:[%s11575_s2 + $0x88] sm:$0xff]  ;;  %v1744_v26 = vld [vmem:[%s11575_s2 + $0x80] sm:$0xff] }
 0x5fe   :  { %1798 = vmatprep.subr.mxu0 %v7693_v44  ;;  %1869 = vmatprep.subr.mxu1 %v7698_v21  ;;  %v2036_v44 = vld [vmem:[%s11577_s3 + $0x1f8] sm:$0xff]  ;;  %v1741_v21 = vld [vmem:[%s11575_s2 + $0x68] sm:$0xff] }
 0x5ff   :  { %1799 = vmatpush1.msra.mxu0 %v7705_v22  ;;  %1870 = vmatpush1.msra.mxu1 %v7710_v23  ;;  %v1740_v22 = vld [vmem:[%s11575_s2 + $0x60] sm:$0xff]  ;;  %v1737_v23 = vld [vmem:[%s11575_s2 + $0x48] sm:$0xff] }
 0x600   :  { %1800 = vmatprep.subr.mxu0 %v7717_v25  ;;  %1871 = vmatprep.subr.mxu1 %v7722_v27  ;;  %v1736_v25 = vld [vmem:[%s11575_s2 + $0x40] sm:$0xff]  ;;  %v1733_v27 = vld [vmem:[%s11575_s2 + $0x28] sm:$0xff] }
 0x601   :  { %1801 = vmatpush1.msra.mxu0 %v7729_v29  ;;  %1872 = vmatpush1.msra.mxu1 %v7734_v31  ;;  %v1732_v29 = vld [vmem:[%s11575_s2 + $0x20] sm:$0xff]  ;;  %v1729_v31 = vld [vmem:[%s11575_s2 + $0x8] sm:$0xff] }
 0x602   :  { %1802 = vmatprep.subr.mxu0 %v7741_v33  ;;  %1873 = vmatprep.subr.mxu1 %v7746_v35  ;;  %v1728_v33 = vld [vmem:[%s11575_s2] sm:$0xff]  ;;  %v2034_v35 = vld [vmem:[%s11577_s3 + $0x1e8] sm:$0xff] }
 0x603   :  { %1803 = vmatpush1.msra.mxu0 %v7753_v37  ;;  %1874 = vmatpush1.msra.mxu1 %v7758_v39  ;;  %v1485_v37 = vld [vmem:[%s11576_s1 + $0xc0] sm:$0xff] }
 0x604   :  { %1804 = vmatprep.subr.mxu0 %v7765_v41  ;;  %1875 = vmatprep.subr.mxu1 %v7770_v43  ;;  %v1486_v41 = vld [vmem:[%s11576_s1 + $0xc8] sm:$0xff] }
 0x605   :  { %1805 = vmatpush1.msra.mxu0 %v7777_v45  ;;  %1876 = vmatpush1.msra.mxu1 %v7782_v47 }
 0x606   :  { %1877 = vmatprep.subr.mxu1 %v7789_v49  ;;  %1856 = vmatprep.mubr.f32.mxu0 %v12006_v59 }
 0x607   :  { %1878 = vmatpush1.msra.mxu1 %v7794_v51  ;;  %1927 = vmatprep.mubr.f32.mxu1 %v12006_v59 }
 0x608   :  { %1879 = vmatprep.subr.mxu1 %v7799_v53  ;;  %1806 = vmatprep.subr.mxu0 %v1761_v48  ;;  %v2024_v48 = vld [vmem:[%s11577_s3 + $0x198] sm:$0xff] }
 0x609   :  { %1880 = vmatpush1.msra.mxu1 %v7806_v24  ;;  %1807 = vmatpush1.msra.mxu0 %v1760_v61  ;;  %v1488_v24 = vld [vmem:[%s11576_s1 + $0xd8] sm:$0xff]  ;;  %v2021_v61 = vld [vmem:[%s11577_s3 + $0x180] sm:$0xff] }
 0x60a   :  { %1881 = vmatprep.subr.mxu1 %v7813_v28  ;;  %1808 = vmatprep.subr.mxu0 %v1757_v62  ;;  %v2023_v62 = vld [vmem:[%s11577_s3 + $0x190] sm:$0xff] }
 0x60b   :  { %1882 = vmatpush1.msra.mxu1 %v7820_v32  ;;  %1809 = vmatpush1.msra.mxu0 %v1756_v63  ;;  %v2018_v63 = vld [vmem:[%s11577_s3 + $0x168] sm:$0xff] }
 0x60c   :  { %1883 = vmatprep.subr.mxu1 %v7827_v36  ;;  %1810 = vmatprep.subr.mxu0 %v1753_v0  ;;  %v1487_v36 = vld [vmem:[%s11576_s1 + $0xd0] sm:$0xff]  ;;  %v2020_v0 = vld [vmem:[%s11577_s3 + $0x178] sm:$0xff] }
 0x60d   :  { %1884 = vmatpush1.msra.mxu1 %v7834_v40  ;;  %1811 = vmatpush1.msra.mxu0 %v1752_v9  ;;  %v2017_v9 = vld [vmem:[%s11577_s3 + $0x160] sm:$0xff] }
 0x60e   :  { %1885 = vmatprep.subr.mxu1 %v7841_v42  ;;  %1812 = vmatprep.subr.mxu0 %v1749_v30  ;;  %v2019_v30 = vld [vmem:[%s11577_s3 + $0x170] sm:$0xff] }
 0x60f   :  { %1886 = vmatpush1.msra.mxu1 %v7848_v55  ;;  %1813 = vmatpush1.msra.mxu0 %v1748_v34  ;;  %v2014_v34 = vld [vmem:[%s11577_s3 + $0x148] sm:$0xff] }
 0x610   :  { %1887 = vmatprep.subr.mxu1 %v11992_v2  ;;  %1814 = vmatprep.subr.mxu0 %v1745_v38  ;;  %v2016_v38 = vld [vmem:[%s11577_s3 + $0x158] sm:$0xff] }
 0x611   :  { %1888 = vmatpush1.msra.mxu1 %v11994_v5  ;;  %1815 = vmatpush1.msra.mxu0 %v1744_v26  ;;  %v2013_v26 = vld [vmem:[%s11577_s3 + $0x140] sm:$0xff] }
 0x612   :  { %1889 = vmatprep.subr.mxu1 %v11996_v7  ;;  %1816 = vmatprep.subr.mxu0 %v1741_v21  ;;  %v2010_v21 = vld [vmem:[%s11577_s3 + $0x128] sm:$0xff] }
 0x613   :  { %1890 = vmatpush1.msra.mxu1 %v11998_v10  ;;  %1817 = vmatpush1.msra.mxu0 %v1740_v22  ;;  %v2012_v22 = vld [vmem:[%s11577_s3 + $0x138] sm:$0xff] }
 0x614   :  { %1891 = vmatprep.subr.mxu1 %v12000_v12  ;;  %1818 = vmatprep.subr.mxu0 %v1737_v23  ;;  %v2009_v23 = vld [vmem:[%s11577_s3 + $0x120] sm:$0xff] }
 0x615   :  { %1892 = vmatpush1.msra.mxu1 %v12002_v54  ;;  %1819 = vmatpush1.msra.mxu0 %v1736_v25  ;;  %v2011_v25 = vld [vmem:[%s11577_s3 + $0x130] sm:$0xff] }
 0x616   :  { %1893 = vmatprep.subr.mxu1 %v12004_v17  ;;  %1820 = vmatprep.subr.mxu0 %v1733_v27  ;;  %v2006_v27 = vld [vmem:[%s11577_s3 + $0x108] sm:$0xff] }
 0x617   :  { %1894 = vmatpush1.msra.mxu1 %v12007_v14  ;;  %1821 = vmatpush1.msra.mxu0 %v1732_v29  ;;  %v2008_v29 = vld [vmem:[%s11577_s3 + $0x118] sm:$0xff] }
 0x618   :  { %2172 = vmatprep.subr.mxu1 %v2036_v44  ;;  %1822 = vmatprep.subr.mxu0 %v1729_v31  ;;  %v2015_v44 = vld [vmem:[%s11577_s3 + $0x150] sm:$0xff]  ;;  %v2005_v31 = vld [vmem:[%s11577_s3 + $0x100] sm:$0xff] }
 0x619   :  { %1823 = vmatpush1.msra.mxu0 %v1728_v33  ;;  %v2007_v33 = vld [vmem:[%s11577_s3 + $0x110] sm:$0xff] }
 0x61a   :  { %2059 = vmatprep.subr.mxu0 %v2034_v35  ;;  %v2002_v35 = vld [vmem:[%s11577_s3 + $0xe8] sm:$0xff] }
 0x6b8   :  { %v1619_v39 = vpop.f32.mrf.mxu0  ;;  %v1690_v51 = vpop.f32.mrf.mxu1 }
 0x6b9   :  { %v1695_v43 = vadd.f32 %v1619_v39, %v1485_v37  ;;  %v1697_v55 = vadd.f32 %v1690_v51, %v1487_v36  ;;  %v2004_v37 = vld [vmem:[%s11577_s3 + $0xf8] sm:$0xff]  ;;  %v2001_v39 = vld [vmem:[%s11577_s3 + $0xe0] sm:$0xff]  ;;  %v1994_v51 = vld [vmem:[%s11577_s3 + $0xa8] sm:$0xff] }
 0x6ba   :  { %v1621_v45 = vpop.f32.mrf.mxu0  ;;  %v1692_v28 = vpop.f32.mrf.mxu1  ;;  %v1992_v36 = vld [vmem:[%s11577_s3 + $0x98] sm:$0xff] }
 0x6bb   :  { %v6253_v47 = vmul.f32 -1.442695, %v1695_v43  ;;  %v1696_v49 = vadd.f32 %v1621_v45, %v1486_v41  ;;  %v1698_v32 = vadd.f32 %v1692_v28, %v1488_v24  ;;  %v2003_v41 = vld [vmem:[%s11577_s3 + $0xf0] sm:$0xff]  ;;  %v1998_v43 = vld [vmem:[%s11577_s3 + $0xc8] sm:$0xff]  ;;  %v2000_v45 = vld [vmem:[%s11577_s3 + $0xd8] sm:$0xff] }
 0x6bc   :  { %v1993_v24 = vld [vmem:[%s11577_s3 + $0xa0] sm:$0xff]  ;;  %v1995_v28 = vld [vmem:[%s11577_s3 + $0xb0] sm:$0xff] }
 0x6bd   :  { %6461 = vpow2.f32 %v6253_v47  ;;  %v6254_v53 = vmul.f32 -1.442695, %v1696_v49  ;;  %v6255_v40 = vmul.f32 -1.442695, %v1698_v32  ;;  %v1997_v47 = vld [vmem:[%s11577_s3 + $0xc0] sm:$0xff]  ;;  %v1999_v49 = vld [vmem:[%s11577_s3 + $0xd0] sm:$0xff] }
 0x6be   :  { %v1990_v32 = vld [vmem:[%s11577_s3 + $0x88] sm:$0xff] }
 0x6bf   :  { %6463 = vpow2.f32 %v6254_v53  ;;  %v1996_v53 = vld [vmem:[%s11577_s3 + $0xb8] sm:$0xff] }
 0x6c0   :  { %6465 = vpow2.f32 %v6255_v40  ;;  %v1989_v40 = vld [vmem:[%s11577_s3 + $0x80] sm:$0xff] }
 0x6ca   :  { %v6462_v42 = vpop.eup %6461 }
 0x6cb   :  { %v1702_v20 = vadd.f32 1.0, %v6462_v42  ;;  %v1991_v42 = vld [vmem:[%s11577_s3 + $0x90] sm:$0xff] }
 0x6cc   :  { %v6464_v2 = vpop.eup %6463 }
 0x6cd   :  { %6467 = vrcp.f32 %v1702_v20  ;;  %v1708_v5 = vadd.f32 1.0, %v6464_v2  ;;  %v6466_v7 = vpop.eup %6465  ;;  %v1988_v20 = vld [vmem:[%s11577_s3 + $0x78] sm:$0xff]  ;;  %v1985_v2 = vld [vmem:[%s11577_s3 + $0x60] sm:$0xff] }
 0x6ce   :  { %6469 = vtanh.f32 %v1697_v55  ;;  %v1715_v17 = vadd.f32 1.0, %v6466_v7  ;;  %v1986_v55 = vld [vmem:[%s11577_s3 + $0x68] sm:$0xff] }
 0x6cf   :  { %6471 = vrcp.f32 %v1708_v5  ;;  %v1987_v5 = vld [vmem:[%s11577_s3 + $0x70] sm:$0xff]  ;;  %v1982_v7 = vld [vmem:[%s11577_s3 + $0x48] sm:$0xff] }
 0x6d0   :  { %6473 = vrcp.f32 %v1715_v17  ;;  %v1978_v17 = vld [vmem:[%s11577_s3 + $0x28] sm:$0xff] }
 0x6da   :  { %v6468_v10 = vpop.eup %6467 }
 0x6db   :  { %v6470_v12 = vpop.eup %6469 }
 0x6dc   :  { %v6472_v54 = vpop.eup %6471  ;;  %v1719_v14 = vmul.f32 %v6470_v12, %v6468_v10  ;;  %v1984_v10 = vld [vmem:[%s11577_s3 + $0x58] sm:$0xff]  ;;  %v1981_v12 = vld [vmem:[%s11577_s3 + $0x40] sm:$0xff] }
 0x6dd   :  { %v1718_v46 = vmul.f32 %v6472_v54, %v8099_v8  ;;  %v6474_v18 = vpop.eup %6473  ;;  %v2025_v8 = vld [vmem:[%s11577_s3 + $0x1a0] sm:$0xff]  ;;  %v1983_v54 = vld [vmem:[%s11577_s3 + $0x50] sm:$0xff] }
 0x6df   :  { %v8225_v56 = vadd.f32 %v1719_v14, %v1718_v46  ;;  %v1980_v14 = vld [vmem:[%s11577_s3 + $0x38] sm:$0xff]  ;;  %v1977_v46 = vld [vmem:[%s11577_s3 + $0x20] sm:$0xff] }
 0x6e1   :  { %6475 = vtanh.f32 %v8225_v56 }
 0x6ee   :  { %v6476_v19 = vpop.eup %6475 }
 0x6ef   :  { %v8228_v3 = vmul.f32 %v6476_v19, %v6474_v18  ;;  %v1979_v18 = vld [vmem:[%s11577_s3 + $0x30] sm:$0xff]  ;;  %v1974_v19 = vld [vmem:[%s11577_s3 + $0x8] sm:$0xff] }
 0x6f1   :  { %1857 = vmatmul.mubr.f32.vlgmr.msra.gmra.mxu0 %v8228_v3  ;;  %1928 = vmatmul.mubr.f32.vlgmr.msra.gmra.mxu1 %v8228_v3 }
 0x6f2   :  { %2060 = vmatpush1.msra.mxu0 %v2033_v52  ;;  %2173 = vmatpush1.msra.mxu1 %v2035_v15  ;;  %v1976_v52 = vld [vmem:[%s11577_s3 + $0x18] sm:$0xff]  ;;  %v1973_v15 = vld [vmem:[%s11577_s3] sm:$0xff] }
 0x6f3   :  { %2061 = vmatprep.subr.mxu0 %v2030_v50  ;;  %2174 = vmatprep.subr.mxu1 %v2032_v60  ;;  %v1975_v50 = vld [vmem:[%s11577_s3 + $0x10] sm:$0xff]  ;;  %v12010_v60 = vld [vmem:[#allocation30_spill] sm:$0xff] }
 0x6f4   :  { %2062 = vmatpush1.msra.mxu0 %v2029_v16  ;;  %2175 = vmatpush1.msra.mxu1 %v2031_v58  ;;  %v12011_v16 = vld [vmem:[#allocation18_spill] sm:$0xff]  ;;  %v12012_v58 = vld [vmem:[#allocation17_spill] sm:$0xff] }
 0x6f5   :  { %2063 = vmatprep.subr.mxu0 %v2026_v4  ;;  %2176 = vmatprep.subr.mxu1 %v2028_v6  ;;  %v12013_v4 = vld [vmem:[#allocation32_spill] sm:$0xff]  ;;  %v8468_v6 = vld [vmem:[%s11578_s5 + $0x1f0] sm:$0xff] }
 0x6f6   :  { %2064 = vmatpush1.msra.mxu0 %v2025_v8  ;;  %2177 = vmatpush1.msra.mxu1 %v2027_v1  ;;  %v8474_v8 = vld [vmem:[%s11578_s5 + $0x1c8] sm:$0xff]  ;;  %v8480_v1 = vld [vmem:[%s11578_s5 + $0x1d8] sm:$0xff] }
 0x6f7   :  { %2065 = vmatprep.subr.mxu0 %v2022_v11  ;;  %2178 = vmatprep.subr.mxu1 %v2024_v48  ;;  %v8486_v11 = vld [vmem:[%s11578_s5 + $0x1c0] sm:$0xff]  ;;  %v8492_v48 = vld [vmem:[%s11578_s5 + $0x1d0] sm:$0xff] }
 0x6f8   :  { %2066 = vmatpush1.msra.mxu0 %v2021_v61  ;;  %2179 = vmatpush1.msra.mxu1 %v2023_v62  ;;  %v8498_v61 = vld [vmem:[%s11578_s5 + $0x1a8] sm:$0xff]  ;;  %v8504_v62 = vld [vmem:[%s11578_s5 + $0x1b8] sm:$0xff] }
 0x6f9   :  { %2067 = vmatprep.subr.mxu0 %v2018_v63  ;;  %2180 = vmatprep.subr.mxu1 %v2020_v0  ;;  %v8510_v63 = vld [vmem:[%s11578_s5 + $0x1a0] sm:$0xff]  ;;  %v8516_v0 = vld [vmem:[%s11578_s5 + $0x1b0] sm:$0xff] }
 0x6fa   :  { %2068 = vmatpush1.msra.mxu0 %v2017_v9  ;;  %2181 = vmatpush1.msra.mxu1 %v2019_v30  ;;  %v8522_v9 = vld [vmem:[%s11578_s5 + $0x188] sm:$0xff]  ;;  %v8528_v30 = vld [vmem:[%s11578_s5 + $0x198] sm:$0xff] }
 0x6fb   :  { %2069 = vmatprep.subr.mxu0 %v2014_v34  ;;  %2182 = vmatprep.subr.mxu1 %v2016_v38  ;;  %v8534_v34 = vld [vmem:[%s11578_s5 + $0x180] sm:$0xff]  ;;  %v8540_v38 = vld [vmem:[%s11578_s5 + $0x190] sm:$0xff] }
 0x6fc   :  { %2070 = vmatpush1.msra.mxu0 %v2013_v26  ;;  %2183 = vmatpush1.msra.mxu1 %v2015_v44  ;;  %v8546_v26 = vld [vmem:[%s11578_s5 + $0x168] sm:$0xff]  ;;  %v8552_v44 = vld [vmem:[%s11578_s5 + $0x178] sm:$0xff] }
 0x6fd   :  { %2071 = vmatprep.subr.mxu0 %v2010_v21  ;;  %2184 = vmatprep.subr.mxu1 %v2012_v22  ;;  %v8558_v21 = vld [vmem:[%s11578_s5 + $0x160] sm:$0xff]  ;;  %v8564_v22 = vld [vmem:[%s11578_s5 + $0x170] sm:$0xff] }
 0x6fe   :  { %2072 = vmatpush1.msra.mxu0 %v2009_v23  ;;  %2185 = vmatpush1.msra.mxu1 %v2011_v25  ;;  %v8570_v23 = vld [vmem:[%s11578_s5 + $0x148] sm:$0xff]  ;;  %v8576_v25 = vld [vmem:[%s11578_s5 + $0x158] sm:$0xff] }
 0x6ff   :  { %2073 = vmatprep.subr.mxu0 %v2006_v27  ;;  %2186 = vmatprep.subr.mxu1 %v2008_v29  ;;  %v8582_v27 = vld [vmem:[%s11578_s5 + $0x140] sm:$0xff]  ;;  %v8588_v29 = vld [vmem:[%s11578_s5 + $0x150] sm:$0xff] }
 0x700   :  { %2074 = vmatpush1.msra.mxu0 %v2005_v31  ;;  %2187 = vmatpush1.msra.mxu1 %v2007_v33  ;;  %v8594_v31 = vld [vmem:[%s11578_s5 + $0x128] sm:$0xff]  ;;  %v8600_v33 = vld [vmem:[%s11578_s5 + $0x138] sm:$0xff] }
 0x701   :  { %2075 = vmatprep.subr.mxu0 %v2002_v35  ;;  %2188 = vmatprep.subr.mxu1 %v2004_v37  ;;  %v8606_v35 = vld [vmem:[%s11578_s5 + $0x120] sm:$0xff]  ;;  %v8612_v37 = vld [vmem:[%s11578_s5 + $0x130] sm:$0xff] }
 0x702   :  { %2076 = vmatpush1.msra.mxu0 %v2001_v39  ;;  %2189 = vmatpush1.msra.mxu1 %v2003_v41  ;;  %v8618_v39 = vld [vmem:[%s11578_s5 + $0x108] sm:$0xff]  ;;  %v8624_v41 = vld [vmem:[%s11578_s5 + $0x118] sm:$0xff] }
 0x703   :  { %2077 = vmatprep.subr.mxu0 %v1998_v43  ;;  %2190 = vmatprep.subr.mxu1 %v2000_v45  ;;  %v8630_v43 = vld [vmem:[%s11578_s5 + $0x100] sm:$0xff]  ;;  %v8636_v45 = vld [vmem:[%s11578_s5 + $0x110] sm:$0xff] }
 0x704   :  { %2078 = vmatpush1.msra.mxu0 %v1997_v47  ;;  %2191 = vmatpush1.msra.mxu1 %v1999_v49  ;;  %v8642_v47 = vld [vmem:[%s11578_s5 + $0xe8] sm:$0xff]  ;;  %v8648_v49 = vld [vmem:[%s11578_s5 + $0xf8] sm:$0xff] }
 0x705   :  { %2079 = vmatprep.subr.mxu0 %v1994_v51  ;;  %2192 = vmatprep.subr.mxu1 %v1996_v53  ;;  %v8654_v51 = vld [vmem:[%s11578_s5 + $0xe0] sm:$0xff]  ;;  %v8660_v53 = vld [vmem:[%s11578_s5 + $0xf0] sm:$0xff] }
 0x706   :  { %2080 = vmatpush1.msra.mxu0 %v1993_v24  ;;  %2193 = vmatpush1.msra.mxu1 %v1995_v28  ;;  %v8666_v24 = vld [vmem:[%s11578_s5 + $0xc8] sm:$0xff]  ;;  %v8672_v28 = vld [vmem:[%s11578_s5 + $0xd8] sm:$0xff] }
 0x707   :  { %2081 = vmatprep.subr.mxu0 %v1990_v32  ;;  %2194 = vmatprep.subr.mxu1 %v1992_v36  ;;  %v8678_v32 = vld [vmem:[%s11578_s5 + $0xc0] sm:$0xff]  ;;  %v8684_v36 = vld [vmem:[%s11578_s5 + $0xd0] sm:$0xff] }
 0x708   :  { %2082 = vmatpush1.msra.mxu0 %v1989_v40  ;;  %2195 = vmatpush1.msra.mxu1 %v1991_v42  ;;  %v8690_v40 = vld [vmem:[%s11578_s5 + $0xa8] sm:$0xff]  ;;  %v8696_v42 = vld [vmem:[%s11578_s5 + $0xb8] sm:$0xff] }
 0x709   :  { %2083 = vmatprep.subr.mxu0 %v1986_v55  ;;  %2196 = vmatprep.subr.mxu1 %v1988_v20  ;;  %v8702_v55 = vld [vmem:[%s11578_s5 + $0xa0] sm:$0xff]  ;;  %v8708_v20 = vld [vmem:[%s11578_s5 + $0xb0] sm:$0xff] }
 0x70a   :  { %2084 = vmatpush1.msra.mxu0 %v1985_v2  ;;  %2197 = vmatpush1.msra.mxu1 %v1987_v5  ;;  %v8714_v2 = vld [vmem:[%s11578_s5 + $0x88] sm:$0xff]  ;;  %v8720_v5 = vld [vmem:[%s11578_s5 + $0x98] sm:$0xff] }
 0x70b   :  { %2085 = vmatprep.subr.mxu0 %v1982_v7  ;;  %2198 = vmatprep.subr.mxu1 %v1984_v10  ;;  %12016 = vst [vmem:[#allocation20_spill] sm:$0xff] %v8720_v5  ;;  %v8726_v7 = vld [vmem:[%s11578_s5 + $0x80] sm:$0xff]  ;;  %v8732_v10 = vld [vmem:[%s11578_s5 + $0x90] sm:$0xff] }
 0x70c   :  { %2086 = vmatpush1.msra.mxu0 %v1981_v12  ;;  %2199 = vmatpush1.msra.mxu1 %v1983_v54  ;;  %12017 = vst [vmem:[#allocation21_spill] sm:$0xff] %v8726_v7  ;;  %12018 = vst [vmem:[#allocation14_spill] sm:$0xff] %v8732_v10  ;;  %v8738_v12 = vld [vmem:[%s11578_s5 + $0x68] sm:$0xff]  ;;  %v8744_v54 = vld [vmem:[%s11578_s5 + $0x78] sm:$0xff] }
 0x70d   :  { %2087 = vmatprep.subr.mxu0 %v1978_v17  ;;  %2200 = vmatprep.subr.mxu1 %v1980_v14  ;;  %12019 = vst [vmem:[#allocation28_spill] sm:$0xff] %v8738_v12  ;;  %12020 = vst [vmem:[#allocation22_spill] sm:$0xff] %v8744_v54  ;;  %v8750_v17 = vld [vmem:[%s11578_s5 + $0x60] sm:$0xff]  ;;  %v8756_v14 = vld [vmem:[%s11578_s5 + $0x70] sm:$0xff] }
 0x70e   :  { %2088 = vmatpush1.msra.mxu0 %v1977_v46  ;;  %2201 = vmatpush1.msra.mxu1 %v1979_v18  ;;  %12021 = vst [vmem:[#allocation23_spill] sm:$0xff] %v8750_v17  ;;  %12022 = vst [vmem:[#allocation15_spill] sm:$0xff] %v8756_v14  ;;  %v8762_v46 = vld [vmem:[%s11578_s5 + $0x48] sm:$0xff]  ;;  %v8768_v18 = vld [vmem:[%s11578_s5 + $0x58] sm:$0xff] }
 0x70f   :  { %2089 = vmatprep.subr.mxu0 %v1974_v19  ;;  %2202 = vmatprep.subr.mxu1 %v1976_v52  ;;  %12023 = vst [vmem:[#allocation29_spill] sm:$0xff] %v8762_v46  ;;  %12024 = vst [vmem:[#allocation24_spill] sm:$0xff] %v8768_v18  ;;  %v8774_v19 = vld [vmem:[%s11578_s5 + $0x40] sm:$0xff]  ;;  %v8780_v52 = vld [vmem:[%s11578_s5 + $0x50] sm:$0xff] }
 0x710   :  { %2090 = vmatpush1.msra.mxu0 %v1973_v15  ;;  %2123 = vmatprep.mubr.f32.mxu0 %v12006_v59  ;;  %12025 = vst [vmem:[#allocation11_spill] sm:$0xff] %v8774_v19  ;;  %12026 = vst [vmem:[#allocation16_spill] sm:$0xff] %v8780_v52  ;;  %v8786_v15 = vld [vmem:[%s11578_s5 + $0x28] sm:$0xff] }
 0x711   :  { %2203 = vmatpush1.msra.mxu1 %v1975_v50  ;;  %2236 = vmatprep.mubr.f32.mxu1 %v12006_v59  ;;  %12027 = vst [vmem:[#allocation12_spill] sm:$0xff] %v8786_v15  ;;  %v8792_v50 = vld [vmem:[%s11578_s5 + $0x38] sm:$0xff] }
 0x712   :  { %2124 = vmatmul.mubr.f32.vlgmr.msra.gmra.mxu0 %v12010_v60  ;;  %2237 = vmatmul.mubr.f32.vlgmr.msra.gmra.mxu1 %v12010_v60  ;;  %12028 = vst [vmem:[#allocation25_spill] sm:$0xff] %v8792_v50  ;;  %v8798_v60 = vld [vmem:[%s11578_s5 + $0x20] sm:$0xff] }
 0x713   :  { %2129 = vmatprep.mubr.f32.mxu0 %v12006_v59  ;;  %2242 = vmatprep.mubr.f32.mxu1 %v12006_v59  ;;  %12029 = vst [vmem:[#allocation31_spill] sm:$0xff] %v8798_v60 }
 0x716   :  { %2130 = vmatmul.mubr.f32.gmra.mxu0 %v12011_v16  ;;  %2243 = vmatmul.mubr.f32.gmra.mxu1 %v12011_v16  ;;  %v8804_v16 = vld [vmem:[%s11578_s5 + $0x30] sm:$0xff] }
 0x717   :  { %2135 = vmatprep.mubr.f32.mxu0 %v12006_v59  ;;  %2248 = vmatprep.mubr.f32.mxu1 %v12006_v59  ;;  %12030 = vst [vmem:[#allocation26_spill] sm:$0xff] %v8804_v16 }
 0x71a   :  { %2136 = vmatmul.mubr.f32.gmra.mxu0 %v12012_v58  ;;  %2249 = vmatmul.mubr.f32.gmra.mxu1 %v12012_v58  ;;  %v8810_v58 = vld [vmem:[%s11578_s5 + $0x8] sm:$0xff] }
 0x71b   :  { %2141 = vmatprep.mubr.f32.mxu0 %v12006_v59  ;;  %2254 = vmatprep.mubr.f32.mxu1 %v12006_v59  ;;  %12031 = vst [vmem:[#allocation19_spill] sm:$0xff] %v8810_v58 }
 0x71e   :  { %2142 = vmatmul.mubr.f32.gmra.mxu0 %v12013_v4  ;;  %2255 = vmatmul.mubr.f32.gmra.mxu1 %v12013_v4  ;;  %v8816_v4 = vld [vmem:[%s11578_s5] sm:$0xff] }
 0x71f   :  { %2147 = vmatprep.mubr.f32.mxu0 %v12006_v59  ;;  %2260 = vmatprep.mubr.f32.mxu1 %v12006_v59  ;;  %12032 = vst [vmem:[#allocation30_spill] sm:$0xff] %v8816_v4 }
 0x722   :  { %2148 = vmatmul.mubr.f32.gmra.mxu0 %v8016_v57  ;;  %2261 = vmatmul.mubr.f32.gmra.mxu1 %v8016_v57  ;;  %v8451_v57 = vld [vmem:[%s11578_s5 + $0x1e8] sm:$0xff] }
 0x723   :  { %2153 = vmatprep.mubr.f32.mxu0 %v12006_v59  ;;  %2266 = vmatprep.mubr.f32.mxu1 %v12006_v59  ;;  %12014 = vst [vmem:[#allocation13_spill] sm:$0xff] %v8451_v57 }
 0x724   :  { %2387 = vmatprep.subr.mxu0 %v8451_v57 }
 0x726   :  { %2154 = vmatmul.mubr.f32.gmra.mxu0 %v8102_v13  ;;  %2267 = vmatmul.mubr.f32.gmra.mxu1 %v8102_v13  ;;  %v8456_v13 = vld [vmem:[%s11578_s5 + $0x1f8] sm:$0xff] }
 0x727   :  { %2159 = vmatprep.mubr.f32.mxu0 %v12006_v59  ;;  %2272 = vmatprep.mubr.f32.mxu1 %v12006_v59  ;;  %12015 = vst [vmem:[#allocation27_spill] sm:$0xff] %v8456_v13 }
 0x728   :  { %2458 = vmatprep.subr.mxu1 %v8456_v13 }
 0x729   :  { %2459 = vmatpush1.msra.mxu1 %v8468_v6 }
 0x72a   :  { %2160 = vmatmul.mubr.f32.gmra.mxu0 %v8228_v3  ;;  %2273 = vmatmul.mubr.f32.gmra.mxu1 %v8228_v3  ;;  %v8462_v3 = vld [vmem:[%s11578_s5 + $0x1e0] sm:$0xff] }
 0x72b   :  { %2165 = vmatprep.mubr.f32.mxu0 %v12006_v59  ;;  %2278 = vmatprep.mubr.f32.mxu1 %v12006_v59 }
 0x72c   :  { %2388 = vmatpush1.msra.mxu0 %v8462_v3  ;;  %2460 = vmatprep.subr.mxu1 %v8480_v1 }
 0x72d   :  { %2389 = vmatprep.subr.mxu0 %v8474_v8  ;;  %2461 = vmatpush1.msra.mxu1 %v8492_v48 }
 0x72e   :  { %2390 = vmatpush1.msra.mxu0 %v8486_v11  ;;  %2462 = vmatprep.subr.mxu1 %v8504_v62 }
 0x72f   :  { %2391 = vmatprep.subr.mxu0 %v8498_v61  ;;  %2463 = vmatpush1.msra.mxu1 %v8516_v0 }
 0x730   :  { %2392 = vmatpush1.msra.mxu0 %v8510_v63  ;;  %2464 = vmatprep.subr.mxu1 %v8528_v30 }
 0x731   :  { %2393 = vmatprep.subr.mxu0 %v8522_v9  ;;  %2465 = vmatpush1.msra.mxu1 %v8540_v38 }
 0x732   :  { %2394 = vmatpush1.msra.mxu0 %v8534_v34  ;;  %2466 = vmatprep.subr.mxu1 %v8552_v44 }
 0x733   :  { %2395 = vmatprep.subr.mxu0 %v8546_v26  ;;  %2467 = vmatpush1.msra.mxu1 %v8564_v22 }
 0x734   :  { %2396 = vmatpush1.msra.mxu0 %v8558_v21  ;;  %2468 = vmatprep.subr.mxu1 %v8576_v25 }
 0x735   :  { %2397 = vmatprep.subr.mxu0 %v8570_v23  ;;  %2469 = vmatpush1.msra.mxu1 %v8588_v29 }
 0x736   :  { %2398 = vmatpush1.msra.mxu0 %v8582_v27  ;;  %2470 = vmatprep.subr.mxu1 %v8600_v33 }
 0x737   :  { %2399 = vmatprep.subr.mxu0 %v8594_v31  ;;  %2471 = vmatpush1.msra.mxu1 %v8612_v37 }
 0x738   :  { %2400 = vmatpush1.msra.mxu0 %v8606_v35  ;;  %2472 = vmatprep.subr.mxu1 %v8624_v41 }
 0x739   :  { %2401 = vmatprep.subr.mxu0 %v8618_v39  ;;  %2473 = vmatpush1.msra.mxu1 %v8636_v45 }
 0x73a   :  { %2402 = vmatpush1.msra.mxu0 %v8630_v43  ;;  %2474 = vmatprep.subr.mxu1 %v8648_v49 }
 0x73b   :  { %2403 = vmatprep.subr.mxu0 %v8642_v47  ;;  %2475 = vmatpush1.msra.mxu1 %v8660_v53 }
 0x73c   :  { %2404 = vmatpush1.msra.mxu0 %v8654_v51  ;;  %2476 = vmatprep.subr.mxu1 %v8672_v28 }
 0x73d   :  { %2405 = vmatprep.subr.mxu0 %v8666_v24  ;;  %2477 = vmatpush1.msra.mxu1 %v8684_v36 }
 0x73e   :  { %2406 = vmatpush1.msra.mxu0 %v8678_v32  ;;  %2478 = vmatprep.subr.mxu1 %v8696_v42 }
 0x73f   :  { %2407 = vmatprep.subr.mxu0 %v8690_v40  ;;  %2479 = vmatpush1.msra.mxu1 %v8708_v20 }
 0x740   :  { %2408 = vmatpush1.msra.mxu0 %v8702_v55  ;;  %2480 = vmatprep.subr.mxu1 %v8720_v5 }
 0x741   :  { %2409 = vmatprep.subr.mxu0 %v8714_v2  ;;  %2481 = vmatpush1.msra.mxu1 %v8732_v10 }
 0x742   :  { %2410 = vmatpush1.msra.mxu0 %v8726_v7  ;;  %2482 = vmatprep.subr.mxu1 %v8744_v54 }
 0x743   :  { %2411 = vmatprep.subr.mxu0 %v8738_v12  ;;  %2483 = vmatpush1.msra.mxu1 %v8756_v14  ;;  %v1726_v14 = vld [vmem:[%s11576_s1 + $0xf0] sm:$0xff] }
 0x744   :  { %2412 = vmatpush1.msra.mxu0 %v8750_v17  ;;  %2484 = vmatprep.subr.mxu1 %v8768_v18 }
 0x745   :  { %2413 = vmatprep.subr.mxu0 %v8762_v46  ;;  %2485 = vmatpush1.msra.mxu1 %v8780_v52 }
 0x746   :  { %2414 = vmatpush1.msra.mxu0 %v8774_v19  ;;  %2486 = vmatprep.subr.mxu1 %v8792_v50  ;;  %v8821_v50 = vld [vmem:[%s11578_s5 + $0x18] sm:$0xff] }
 0x747   :  { %2415 = vmatprep.subr.mxu0 %v8786_v15  ;;  %2487 = vmatpush1.msra.mxu1 %v8804_v16  ;;  %12033 = vst [vmem:[#allocation18_spill] sm:$0xff] %v8821_v50  ;;  %v1724_v16 = vld [vmem:[%s11576_s1 + $0xe0] sm:$0xff] }
 0x748   :  { %2416 = vmatpush1.msra.mxu0 %v8798_v60  ;;  %2488 = vmatprep.subr.mxu1 %v8821_v50  ;;  %v8828_v60 = vld [vmem:[%s11578_s5 + $0x10] sm:$0xff]  ;;  %v1725_v50 = vld [vmem:[%s11576_s1 + $0xe8] sm:$0xff] }
 0x749   :  { %2417 = vmatprep.subr.mxu0 %v8810_v58  ;;  %12034 = vst [vmem:[#allocation17_spill] sm:$0xff] %v8828_v60  ;;  %2489 = vmatpush1.msra.mxu1 %v8828_v60 }
 0x74a   :  { %2418 = vmatpush1.msra.mxu0 %v8816_v4  ;;  %2697 = vmatprep.subr.mxu1 %v8456_v13  ;;  %v1727_v13 = vld [vmem:[%s11576_s1 + $0xf8] sm:$0xff] }
 0x74b   :  { %2626 = vmatprep.subr.mxu0 %v8451_v57 }
 0x7b1   :  { %v1858_v58 = vpop.f32.mrf.mxu0  ;;  %v1929_v4 = vpop.f32.mrf.mxu1 }
 0x7b2   :  { %v1934_v15 = vadd.f32 %v1858_v58, %v1724_v16  ;;  %v1936_v16 = vadd.f32 %v1929_v4, %v1726_v14  ;;  %v12039_v4 = vld [vmem:[#allocation15_spill] sm:$0xff] }
 0x7b3   :  { %v1860_v52 = vpop.f32.mrf.mxu0  ;;  %v1931_v57 = vpop.f32.mrf.mxu1 }
 0x7b4   :  { %v6256_v19 = vmul.f32 -1.442695, %v1934_v15  ;;  %v1935_v18 = vadd.f32 %v1860_v52, %v1725_v50  ;;  %v1937_v46 = vadd.f32 %v1931_v57, %v1727_v13 }
 0x7b6   :  { %6477 = vpow2.f32 %v6256_v19  ;;  %v6257_v60 = vmul.f32 -1.442695, %v1935_v18  ;;  %v6258_v17 = vmul.f32 -1.442695, %v1937_v46 }
 0x7b8   :  { %6479 = vpow2.f32 %v6257_v60 }
 0x7b9   :  { %6481 = vpow2.f32 %v6258_v17  ;;  %v12038_v17 = vld [vmem:[#allocation23_spill] sm:$0xff] }
 0x7c3   :  { %v6478_v54 = vpop.eup %6477 }
 0x7c4   :  { %v1941_v58 = vadd.f32 1.0, %v6478_v54 }
 0x7c5   :  { %v6480_v15 = vpop.eup %6479 }
 0x7c6   :  { %6483 = vrcp.f32 %v1941_v58  ;;  %v1947_v19 = vadd.f32 1.0, %v6480_v15  ;;  %v6482_v18 = vpop.eup %6481  ;;  %v12041_v58 = vld [vmem:[#allocation24_spill] sm:$0xff]  ;;  %v12042_v15 = vld [vmem:[#allocation11_spill] sm:$0xff] }
 0x7c7   :  { %6485 = vtanh.f32 %v1936_v16  ;;  %v1954_v12 = vadd.f32 1.0, %v6482_v18  ;;  %v12040_v16 = vld [vmem:[#allocation29_spill] sm:$0xff]  ;;  %v12044_v18 = vld [vmem:[#allocation12_spill] sm:$0xff] }
 0x7c8   :  { %6487 = vrcp.f32 %v1947_v19  ;;  %v12043_v19 = vld [vmem:[#allocation16_spill] sm:$0xff] }
 0x7c9   :  { %6489 = vrcp.f32 %v1954_v12  ;;  %v12037_v12 = vld [vmem:[#allocation22_spill] sm:$0xff] }
 0x7d3   :  { %v6484_v52 = vpop.eup %6483 }
 0x7d4   :  { %v6486_v50 = vpop.eup %6485 }
 0x7d5   :  { %v6488_v60 = vpop.eup %6487  ;;  %v1958_v57 = vmul.f32 %v6486_v50, %v6484_v52  ;;  %v12045_v52 = vld [vmem:[#allocation25_spill] sm:$0xff]  ;;  %v12046_v50 = vld [vmem:[#allocation31_spill] sm:$0xff] }
 0x7d6   :  { %v1957_v13 = vmul.f32 %v6488_v60, %v8225_v56  ;;  %v6490_v46 = vpop.eup %6489  ;;  %v12035_v56 = vld [vmem:[#allocation14_spill] sm:$0xff] }
 0x7d7   :  { %v12047_v60 = vld [vmem:[#allocation26_spill] sm:$0xff] }
 0x7d8   :  { %v1959_v10 = vadd.f32 %v1958_v57, %v1957_v13  ;;  %v12048_v57 = vld [vmem:[#allocation19_spill] sm:$0xff]  ;;  %v12049_v13 = vld [vmem:[#allocation18_spill] sm:$0xff] }
 0x7da   :  { %6491 = vtanh.f32 %v1959_v10  ;;  %v12036_v10 = vld [vmem:[#allocation28_spill] sm:$0xff] }
 0x7e7   :  { %v6492_v14 = vpop.eup %6491 }
 0x7e8   :  { %v1961_v54 = vmul.f32 %v6492_v14, %v6490_v46  ;;  %v12050_v46 = vld [vmem:[#allocation30_spill] sm:$0xff]  ;;  %v12051_v14 = vld [vmem:[#allocation17_spill] sm:$0xff] }
 0x7ea   :  { %2166 = vmatmul.mubr.f32.gmra.mxu0 %v1961_v54  ;;  %2279 = vmatmul.mubr.f32.gmra.mxu1 %v1961_v54  ;;  %v12052_v54 = vld [vmem:[#allocation13_spill] sm:$0xff] }
 0x7eb   :  { %2451 = vmatprep.mubr.f32.mxu0 %v12006_v59  ;;  %2522 = vmatprep.mubr.f32.mxu1 %v12006_v59 }
 0x7ee   :  { %2452 = vmatmul.mubr.f32.vlgmr.msra.gmra.mxu0 %v12006_v59  ;;  %2523 = vmatmul.mubr.f32.vlgmr.msra.gmra.mxu1 %v12006_v59 }
 0x7ef   :  { %2627 = vmatpush1.msra.mxu0 %v8462_v3  ;;  %2698 = vmatpush1.msra.mxu1 %v8468_v6 }
 0x7f0   :  { %2628 = vmatprep.subr.mxu0 %v8474_v8  ;;  %2699 = vmatprep.subr.mxu1 %v8480_v1 }
 0x7f1   :  { %2629 = vmatpush1.msra.mxu0 %v8486_v11  ;;  %2700 = vmatpush1.msra.mxu1 %v8492_v48 }
 0x7f2   :  { %2630 = vmatprep.subr.mxu0 %v8498_v61  ;;  %2701 = vmatprep.subr.mxu1 %v8504_v62 }
 0x7f3   :  { %2631 = vmatpush1.msra.mxu0 %v8510_v63  ;;  %2702 = vmatpush1.msra.mxu1 %v8516_v0 }
 0x7f4   :  { %2632 = vmatprep.subr.mxu0 %v8522_v9  ;;  %2703 = vmatprep.subr.mxu1 %v8528_v30 }
 0x7f5   :  { %2633 = vmatpush1.msra.mxu0 %v8534_v34  ;;  %2704 = vmatpush1.msra.mxu1 %v8540_v38 }
 0x7f6   :  { %2634 = vmatprep.subr.mxu0 %v8546_v26  ;;  %2705 = vmatprep.subr.mxu1 %v8552_v44 }
 0x7f7   :  { %2635 = vmatpush1.msra.mxu0 %v8558_v21  ;;  %2706 = vmatpush1.msra.mxu1 %v8564_v22 }
 0x7f8   :  { %2636 = vmatprep.subr.mxu0 %v8570_v23  ;;  %2707 = vmatprep.subr.mxu1 %v8576_v25 }
 0x7f9   :  { %2637 = vmatpush1.msra.mxu0 %v8582_v27  ;;  %2708 = vmatpush1.msra.mxu1 %v8588_v29 }
 0x7fa   :  { %2638 = vmatprep.subr.mxu0 %v8594_v31  ;;  %2709 = vmatprep.subr.mxu1 %v8600_v33 }
 0x7fb   :  { %2639 = vmatpush1.msra.mxu0 %v8606_v35  ;;  %2710 = vmatpush1.msra.mxu1 %v8612_v37 }
 0x7fc   :  { %2640 = vmatprep.subr.mxu0 %v8618_v39  ;;  %2711 = vmatprep.subr.mxu1 %v8624_v41 }
 0x7fd   :  { %2641 = vmatpush1.msra.mxu0 %v8630_v43  ;;  %2712 = vmatpush1.msra.mxu1 %v8636_v45 }
 0x7fe   :  { %2642 = vmatprep.subr.mxu0 %v8642_v47  ;;  %2713 = vmatprep.subr.mxu1 %v8648_v49 }
 0x7ff   :  { %2643 = vmatpush1.msra.mxu0 %v8654_v51  ;;  %2714 = vmatpush1.msra.mxu1 %v8660_v53 }
 0x800   :  { %2644 = vmatprep.subr.mxu0 %v8666_v24  ;;  %2715 = vmatprep.subr.mxu1 %v8672_v28 }
 0x801   :  { %2645 = vmatpush1.msra.mxu0 %v8678_v32  ;;  %2716 = vmatpush1.msra.mxu1 %v8684_v36 }
 0x802   :  { %2646 = vmatprep.subr.mxu0 %v8690_v40  ;;  %2717 = vmatprep.subr.mxu1 %v8696_v42 }
 0x803   :  { %2647 = vmatpush1.msra.mxu0 %v8702_v55  ;;  %2718 = vmatpush1.msra.mxu1 %v8708_v20 }
 0x804   :  { %2648 = vmatprep.subr.mxu0 %v8714_v2  ;;  %2719 = vmatprep.subr.mxu1 %v8720_v5 }
 0x805   :  { %2649 = vmatpush1.msra.mxu0 %v8726_v7  ;;  %2720 = vmatpush1.msra.mxu1 %v12035_v56 }
 0x806   :  { %2650 = vmatprep.subr.mxu0 %v12036_v10  ;;  %2721 = vmatprep.subr.mxu1 %v12037_v12 }
 0x807   :  { %2651 = vmatpush1.msra.mxu0 %v12038_v17  ;;  %2722 = vmatpush1.msra.mxu1 %v12039_v4 }
 0x808   :  { %2652 = vmatprep.subr.mxu0 %v12040_v16  ;;  %2723 = vmatprep.subr.mxu1 %v12041_v58 }
 0x809   :  { %2653 = vmatpush1.msra.mxu0 %v12042_v15  ;;  %2724 = vmatpush1.msra.mxu1 %v12043_v19 }
 0x80a   :  { %2654 = vmatprep.subr.mxu0 %v12044_v18  ;;  %2725 = vmatprep.subr.mxu1 %v12045_v52  ;;  %v12053_v18 = vld [vmem:[#allocation27_spill] sm:$0xff]  ;;  %v2125_v52 = vpop.f32.mrf.mxu0 }
 0x80b   :  { %2655 = vmatpush1.msra.mxu0 %v12046_v50  ;;  %2726 = vmatpush1.msra.mxu1 %v12047_v60  ;;  %v2238_v50 = vpop.f32.mrf.mxu1 }
 0x80c   :  { %2656 = vmatprep.subr.mxu0 %v12048_v57  ;;  %2727 = vmatprep.subr.mxu1 %v12049_v13  ;;  %v2127_v19 = vpop.f32.mrf.mxu0 }
 0x80d   :  { %2657 = vmatpush1.msra.mxu0 %v12050_v46  ;;  %2690 = vmatprep.mubr.f32.mxu0 %v12006_v59  ;;  %v2240_v60 = vpop.f32.mrf.mxu1 }
 0x80e   :  { %2728 = vmatpush1.msra.mxu1 %v12051_v14  ;;  %2761 = vmatprep.mubr.f32.mxu1 %v12006_v59  ;;  %v8917_v15 = vpop.f32.mrf.mxu0 }
 0x80f   :  { %2865 = vmatprep.subr.mxu0 %v12052_v54  ;;  %2936 = vmatprep.subr.mxu1 %v12053_v18  ;;  %12054 = vst [vmem:[#allocation32_spill] sm:$0xff] %v8917_v15  ;;  %v8919_v57 = vpop.f32.mrf.mxu1 }
 0x810   :  { %12055 = vst [vmem:[#allocation13_spill] sm:$0xff] %v8919_v57  ;;  %v8921_v13 = vpop.f32.mrf.mxu0 }
 0x811   :  { %12056 = vst [vmem:[#allocation27_spill] sm:$0xff] %v8921_v13  ;;  %v8923_v46 = vpop.f32.mrf.mxu1 }
 0x812   :  { %12057 = vst [vmem:[#allocation33_spill] sm:$0xff] %v8923_v46  ;;  %v8925_v58 = vpop.f32.mrf.mxu0 }
 0x813   :  { %12058 = vst [vmem:[#allocation34_spill] sm:$0xff] %v8925_v58  ;;  %v8927_v14 = vpop.f32.mrf.mxu1 }
 0x814   :  { %12059 = vst [vmem:[#allocation35_spill] sm:$0xff] %v8927_v14  ;;  %v8929_v59 = vpop.f32.mrf.mxu0 }
 0x815   :  { %12060 = vst [vmem:[#allocation36_spill] sm:$0xff] %v8929_v59  ;;  %v8931_v54 = vpop.f32.mrf.mxu1  ;;  %v2039_v59 = vlaneseq }
 0x816   :  { %12061 = vst [vmem:[#allocation37_spill] sm:$0xff] %v8931_v54  ;;  %v8933_v18 = vpop.f32.mrf.mxu0 }
 0x817   :  { %12062 = vst [vmem:[#allocation38_spill] sm:$0xff] %v8933_v18  ;;  %v8935_v16 = vpop.f32.mrf.mxu1 }
 0x818   :  { %12063 = vst [vmem:[#allocation39_spill] sm:$0xff] %v8935_v16  ;;  %v8937_v4 = vpop.f32.mrf.mxu0  ;;  %v8955_v16 = vshrl.u32 %v2039_v59, 7 }
 0x819   :  { %12064 = vst [vmem:[#allocation40_spill] sm:$0xff] %v8937_v4  ;;  %v8939_v15 = vpop.f32.mrf.mxu1 }
 0x81a   :  { %12065 = vst [vmem:[#allocation41_spill] sm:$0xff] %v8939_v15  ;;  %v8941_v57 = vpop.f32.mrf.mxu0  ;;  %12073 = vst [vmem:[#allocation49_spill] sm:$0xff] %v8955_v16 }
 0x81b   :  { %12066 = vst [vmem:[#allocation42_spill] sm:$0xff] %v8941_v57  ;;  %v8943_v13 = vpop.f32.mrf.mxu1  ;;  %v11702_v57 = vsub.s32 0, %v8955_v16 }
 0x81c   :  { %12067 = vst [vmem:[#allocation43_spill] sm:$0xff] %v8943_v13  ;;  %v8945_v46 = vpop.f32.mrf.mxu0 }
 0x81d   :  { %12068 = vst [vmem:[#allocation44_spill] sm:$0xff] %v8945_v46  ;;  %v8947_v58 = vpop.f32.mrf.mxu1 }
 0x81e   :  { %12069 = vst [vmem:[#allocation45_spill] sm:$0xff] %v8947_v58  ;;  %v8949_v14 = vpop.f32.mrf.mxu0  ;;  %v2037_v58 = vld [vmem:[%s11579_s4] sm:$0xf] }
 0x81f   :  { %12070 = vst [vmem:[#allocation46_spill] sm:$0xff] %v8949_v14  ;;  %v8951_v54 = vpop.f32.mrf.mxu1  ;;  %v11705_v14 = vsub.s32 1, %v8955_v16  ;;  %v8972_v59 = vrot.slane %v2037_v58, %v11702_v57 }
 0x820   :  { %12071 = vst [vmem:[#allocation47_spill] sm:$0xff] %v8951_v54  ;;  %v8953_v18 = vpop.f32.mrf.mxu0 }
 0x821   :  { %12072 = vst [vmem:[#allocation48_spill] sm:$0xff] %v8953_v18  ;;  %v8957_v4 = vpop.f32.mrf.mxu1  ;;  %12078 = vst [vmem:[#allocation54_spill] sm:$0xff] %v8972_v59  ;;  %v2126_v17 = vadd.f32 %v2125_v52, %v8972_v59  ;;  %v11715_v52 = vsub.s32 2, %v8955_v16 }
 0x822   :  { %12074 = vst [vmem:[#allocation50_spill] sm:$0xff] %v8957_v4  ;;  %v8959_v15 = vpop.f32.mrf.mxu0 }
 0x823   :  { %12075 = vst [vmem:[#allocation51_spill] sm:$0xff] %v8959_v15  ;;  %v8962_v13 = vpop.f32.mrf.mxu1  ;;  %v8980_v15 = vrot.slane %v2037_v58, %v11705_v14 }
 0x824   :  { %12076 = vst [vmem:[#allocation52_spill] sm:$0xff] %v8962_v13  ;;  %v8968_v46 = vpop.f32.mrf.mxu0 }
 0x825   :  { %12077 = vst [vmem:[#allocation53_spill] sm:$0xff] %v8968_v46  ;;  %v8974_v54 = vpop.f32.mrf.mxu1  ;;  %12081 = vst [vmem:[#allocation57_spill] sm:$0xff] %v8980_v15  ;;  %v2128_v46 = vadd.f32 %v2127_v19, %v8980_v15 }
 0x826   :  { %12079 = vst [vmem:[#allocation55_spill] sm:$0xff] %v8974_v54  ;;  %v11708_v54 = vsub.s32 3, %v8955_v16 }
 0x8aa   :  { %v8976_v4 = vpop.f32.mrf.mxu0  ;;  %v8982_v13 = vpop.f32.mrf.mxu1 }
 0x8ab   :  { %12080 = vst [vmem:[#allocation56_spill] sm:$0xff] %v8976_v4  ;;  %12082 = vst [vmem:[#allocation58_spill] sm:$0xff] %v8982_v13  ;;  %v8993_v13 = vrot.slane %v2037_v58, %v11708_v54 }
 0x8ac   :  { %v8984_v18 = vpop.f32.mrf.mxu0  ;;  %v8988_v10 = vpop.f32.mrf.mxu1 }
 0x8ad   :  { %12083 = vst [vmem:[#allocation59_spill] sm:$0xff] %v8984_v18  ;;  %12084 = vst [vmem:[#allocation60_spill] sm:$0xff] %v8988_v10  ;;  %v2241_v19 = vadd.f32 %v2240_v60, %v8993_v13 }
 0x8ae   :  { %v2453_v12 = vpop.f32.mrf.mxu0  ;;  %v2524_v14 = vpop.f32.mrf.mxu1  ;;  %12085 = vst [vmem:[#allocation61_spill] sm:$0xff] %v8993_v13 }
 0x8af   :  { %v2529_v57 = vadd.f32 %v2453_v12, %v2126_v17  ;;  %v8999_v12 = vrot.slane %v2037_v58, %v11715_v52 }
 0x8b0   :  { %v2455_v56 = vpop.f32.mrf.mxu0  ;;  %v2526_v18 = vpop.f32.mrf.mxu1 }
 0x8b1   :  { %v6259_v4 = vmul.f32 -1.442695, %v2529_v57  ;;  %v2530_v7 = vadd.f32 %v2455_v56, %v2128_v46  ;;  %v2532_v17 = vadd.f32 %v2526_v18, %v2241_v19  ;;  %v2239_v56 = vadd.f32 %v2238_v50, %v8999_v12 }
 0x8b3   :  { %6493 = vpow2.f32 %v6259_v4  ;;  %v6260_v5 = vmul.f32 -1.442695, %v2530_v7  ;;  %v6261_v4 = vmul.f32 -1.442695, %v2532_v17  ;;  %v2531_v7 = vadd.f32 %v2524_v14, %v2239_v56 }
 0x8b5   :  { %6495 = vpow2.f32 %v6260_v5 }
 0x8b6   :  { %6497 = vpow2.f32 %v6261_v4 }
 0x8c0   :  { %v6494_v57 = vpop.eup %6493 }
 0x8c1   :  { %v2536_v46 = vadd.f32 1.0, %v6494_v57 }
 0x8c2   :  { %v6496_v10 = vpop.eup %6495 }
 0x8c3   :  { %6499 = vrcp.f32 %v2536_v46  ;;  %v2542_v5 = vadd.f32 1.0, %v6496_v10  ;;  %v6498_v54 = vpop.eup %6497  ;;  %v12110_v10 = vld [vmem:[#allocation61_spill] sm:$0xff] }
 0x8c4   :  { %6501 = vtanh.f32 %v2531_v7  ;;  %v2549_v16 = vadd.f32 1.0, %v6498_v54  ;;  %v12112_v54 = vld [vmem:[#allocation13_spill] sm:$0xff] }
 0x8c5   :  { %6503 = vrcp.f32 %v2542_v5 }
 0x8c6   :  { %6505 = vrcp.f32 %v2549_v16  ;;  %v12111_v16 = vld [vmem:[#allocation33_spill] sm:$0xff] }
 0x8d0   :  { %v6500_v15 = vpop.eup %6499 }
 0x8d1   :  { %v6502_v60 = vpop.eup %6501 }
 0x8d2   :  { %v6504_v13 = vpop.eup %6503  ;;  %v2553_v52 = vmul.f32 %v6502_v60, %v6500_v15  ;;  %v2247_v15 = vadd.f32 %v12111_v16, %v12110_v10  ;;  %v9135_v16 = vld [vmem:[%s11578_s5 + $0x1d0] sm:$0xff] }
 0x8d3   :  { %v2552_v58 = vmul.f32 0.0, %v6504_v13  ;;  %v6506_v50 = vpop.eup %6505 }
 0x8d5   :  { %v9002_v18 = vadd.f32 %v2553_v52, %v2552_v58  ;;  %v2245_v52 = vadd.f32 %v12112_v54, %v8999_v12  ;;  %v9154_v54 = vld [vmem:[%s11578_s5 + $0x1a0] sm:$0xff] }
 0x8d7   :  { %6507 = vtanh.f32 %v9002_v18 }
 0x8e4   :  { %v6508_v14 = vpop.eup %6507 }
 0x8e5   :  { %v9005_v19 = vmul.f32 %v6508_v14, %v6506_v50 }
 0x8e7   :  { %12086 = vst [vmem:[#allocation62_spill] sm:$0xff] %v9005_v19  ;;  %2691 = vmatmul.mubr.f32.vlgmr.msra.gmra.mxu0 %v9005_v19  ;;  %2762 = vmatmul.mubr.f32.vlgmr.msra.gmra.mxu1 %v9005_v19  ;;  %v9260_v19 = vld [vmem:[%s11578_s5 + $0x108] sm:$0xff] }
 0x8e8   :  { %2866 = vmatpush1.msra.mxu0 %v8462_v3  ;;  %2937 = vmatpush1.msra.mxu1 %v8468_v6  ;;  %v12087_v3 = vld [vmem:[#allocation20_spill] sm:$0xff]  ;;  %v12088_v6 = vld [vmem:[#allocation21_spill] sm:$0xff] }
 0x8e9   :  { %2867 = vmatprep.subr.mxu0 %v8474_v8  ;;  %2938 = vmatprep.subr.mxu1 %v8480_v1  ;;  %v12089_v8 = vld [vmem:[#allocation14_spill] sm:$0xff]  ;;  %v12090_v1 = vld [vmem:[#allocation28_spill] sm:$0xff] }
 0x8ea   :  { %2868 = vmatpush1.msra.mxu0 %v8486_v11  ;;  %2939 = vmatpush1.msra.mxu1 %v8492_v48  ;;  %v12091_v11 = vld [vmem:[#allocation22_spill] sm:$0xff]  ;;  %v12092_v48 = vld [vmem:[#allocation23_spill] sm:$0xff] }
 0x8eb   :  { %2869 = vmatprep.subr.mxu0 %v8498_v61  ;;  %2940 = vmatprep.subr.mxu1 %v8504_v62  ;;  %v12093_v61 = vld [vmem:[#allocation15_spill] sm:$0xff]  ;;  %v12094_v62 = vld [vmem:[#allocation29_spill] sm:$0xff] }
 0x8ec   :  { %2870 = vmatpush1.msra.mxu0 %v8510_v63  ;;  %2941 = vmatpush1.msra.mxu1 %v8516_v0  ;;  %v12095_v63 = vld [vmem:[#allocation24_spill] sm:$0xff]  ;;  %v12096_v0 = vld [vmem:[#allocation11_spill] sm:$0xff]  ;;  %12120 = vst [vmem:[#allocation29_spill] sm:$0xff] %v9260_v19 }
 0x8ed   :  { %2871 = vmatprep.subr.mxu0 %v8522_v9  ;;  %2942 = vmatprep.subr.mxu1 %v8528_v30  ;;  %v12097_v9 = vld [vmem:[#allocation16_spill] sm:$0xff] }
 0x8ee   :  { %2872 = vmatpush1.msra.mxu0 %v8534_v34  ;;  %2943 = vmatpush1.msra.mxu1 %v8540_v38  ;;  %v12098_v30 = vld [vmem:[#allocation12_spill] sm:$0xff]  ;;  %v12099_v34 = vld [vmem:[#allocation25_spill] sm:$0xff]  ;;  %v12100_v38 = vld [vmem:[#allocation31_spill] sm:$0xff] }
 0x8ef   :  { %2873 = vmatprep.subr.mxu0 %v8546_v26  ;;  %2944 = vmatprep.subr.mxu1 %v8552_v44  ;;  %v12101_v26 = vld [vmem:[#allocation26_spill] sm:$0xff]  ;;  %v12102_v44 = vld [vmem:[#allocation19_spill] sm:$0xff] }
 0x8f0   :  { %2874 = vmatpush1.msra.mxu0 %v8558_v21  ;;  %2945 = vmatpush1.msra.mxu1 %v8564_v22  ;;  %v12103_v21 = vld [vmem:[#allocation18_spill] sm:$0xff] }
 0x8f1   :  { %2875 = vmatprep.subr.mxu0 %v8570_v23  ;;  %2946 = vmatprep.subr.mxu1 %v8576_v25  ;;  %v12104_v22 = vld [vmem:[#allocation30_spill] sm:$0xff]  ;;  %v12105_v23 = vmov 0.0   ;;  %v12106_v25 = vld [vmem:[#allocation17_spill] sm:$0xff] }
 0x8f2   :  { %2876 = vmatpush1.msra.mxu0 %v8582_v27  ;;  %2947 = vmatpush1.msra.mxu1 %v8588_v29  ;;  %v12107_v27 = vld [vmem:[#allocation32_spill] sm:$0xff] }
 0x8f3   :  { %2877 = vmatprep.subr.mxu0 %v8594_v31  ;;  %2948 = vmatprep.subr.mxu1 %v8600_v33  ;;  %v2132_v29 = vadd.f32 %v12107_v27, %v8972_v59  ;;  %v12108_v33 = vld [vmem:[#allocation57_spill] sm:$0xff] }
 0x8f4   :  { %2878 = vmatpush1.msra.mxu0 %v8606_v35  ;;  %2949 = vmatpush1.msra.mxu1 %v8612_v37  ;;  %v12109_v35 = vld [vmem:[#allocation27_spill] sm:$0xff] }
 0x8f5   :  { %2879 = vmatprep.subr.mxu0 %v8618_v39  ;;  %2950 = vmatprep.subr.mxu1 %v8624_v41  ;;  %v2134_v37 = vadd.f32 %v12109_v35, %v12108_v33 }
 0x8f6   :  { %2880 = vmatpush1.msra.mxu0 %v8630_v43  ;;  %2951 = vmatpush1.msra.mxu1 %v8636_v45 }
 0x8f7   :  { %2881 = vmatprep.subr.mxu0 %v8642_v47  ;;  %2952 = vmatprep.subr.mxu1 %v8648_v49 }
 0x8f8   :  { %2882 = vmatpush1.msra.mxu0 %v8654_v51  ;;  %2953 = vmatpush1.msra.mxu1 %v8660_v53 }
 0x8f9   :  { %2883 = vmatprep.subr.mxu0 %v8666_v24  ;;  %2954 = vmatprep.subr.mxu1 %v8672_v28 }
 0x8fa   :  { %2884 = vmatpush1.msra.mxu0 %v8678_v32  ;;  %2955 = vmatpush1.msra.mxu1 %v8684_v36 }
 0x8fb   :  { %2885 = vmatprep.subr.mxu0 %v8690_v40  ;;  %2956 = vmatprep.subr.mxu1 %v8696_v42 }
 0x8fc   :  { %2886 = vmatpush1.msra.mxu0 %v8702_v55  ;;  %2957 = vmatpush1.msra.mxu1 %v8708_v20 }
 0x8fd   :  { %2887 = vmatprep.subr.mxu0 %v8714_v2  ;;  %2958 = vmatprep.subr.mxu1 %v12087_v3 }
 0x8fe   :  { %2888 = vmatpush1.msra.mxu0 %v12088_v6  ;;  %2959 = vmatpush1.msra.mxu1 %v12089_v8 }
 0x8ff   :  { %2889 = vmatprep.subr.mxu0 %v12090_v1  ;;  %2960 = vmatprep.subr.mxu1 %v12091_v11 }
 0x900   :  { %2890 = vmatpush1.msra.mxu0 %v12092_v48  ;;  %2961 = vmatpush1.msra.mxu1 %v12093_v61 }
 0x901   :  { %2891 = vmatprep.subr.mxu0 %v12094_v62  ;;  %2962 = vmatprep.subr.mxu1 %v12095_v63 }
 0x902   :  { %2892 = vmatpush1.msra.mxu0 %v12096_v0  ;;  %2963 = vmatpush1.msra.mxu1 %v12097_v9 }
 0x903   :  { %2893 = vmatprep.subr.mxu0 %v12098_v30  ;;  %2964 = vmatprep.subr.mxu1 %v12099_v34 }
 0x904   :  { %2894 = vmatpush1.msra.mxu0 %v12100_v38  ;;  %2965 = vmatpush1.msra.mxu1 %v12101_v26 }
 0x905   :  { %2895 = vmatprep.subr.mxu0 %v12102_v44  ;;  %2966 = vmatprep.subr.mxu1 %v12103_v21 }
 0x906   :  { %2896 = vmatpush1.msra.mxu0 %v12104_v22  ;;  %2929 = vmatprep.mubr.f32.mxu0 %v12105_v23 }
 0x907   :  { %2967 = vmatpush1.msra.mxu1 %v12106_v25  ;;  %3000 = vmatprep.mubr.f32.mxu1 %v12105_v23 }
 0x9a7   :  { %v2692_v31 = vpop.f32.mrf.mxu0  ;;  %v2763_v47 = vpop.f32.mrf.mxu1 }
 0x9a8   :  { %v2768_v39 = vadd.f32 %v2692_v31, %v2132_v29  ;;  %v2770_v17 = vadd.f32 %v2763_v47, %v2245_v52  ;;  %v9118_v47 = vld [vmem:[%s11578_s5 + $0x1c8] sm:$0xff]  ;;  %v9159_v52 = vld [vmem:[%s11578_s5 + $0x1b0] sm:$0xff] }
 0x9a9   :  { %v2694_v41 = vpop.f32.mrf.mxu0  ;;  %v2765_v24 = vpop.f32.mrf.mxu1 }
 0x9aa   :  { %v6262_v43 = vmul.f32 -1.442695, %v2768_v39  ;;  %v2769_v45 = vadd.f32 %v2694_v41, %v2134_v37  ;;  %v2771_v13 = vadd.f32 %v2765_v24, %v2247_v15  ;;  %v9099_v41 = vld [vmem:[%s11578_s5 + $0x1f8] sm:$0xff]  ;;  %v9130_v24 = vld [vmem:[%s11578_s5 + $0x1c0] sm:$0xff]  ;;  %v9142_v15 = vld [vmem:[%s11578_s5 + $0x1a8] sm:$0xff] }
 0x9ab   :  { %12115 = vst [vmem:[#allocation14_spill] sm:$0xff] %v9099_v41  ;;  %3175 = vmatprep.subr.mxu1 %v9099_v41 }
 0x9ac   :  { %6509 = vpow2.f32 %v6262_v43  ;;  %v6263_v51 = vmul.f32 -1.442695, %v2769_v45  ;;  %v6264_v56 = vmul.f32 -1.442695, %v2771_v13  ;;  %v9106_v43 = vld [vmem:[%s11578_s5 + $0x1e0] sm:$0xff]  ;;  %v9111_v45 = vld [vmem:[%s11578_s5 + $0x1f0] sm:$0xff] }
 0x9ad   :  { %v9147_v13 = vld [vmem:[%s11578_s5 + $0x1b8] sm:$0xff] }
 0x9ae   :  { %6511 = vpow2.f32 %v6263_v51  ;;  %v9123_v51 = vld [vmem:[%s11578_s5 + $0x1d8] sm:$0xff] }
 0x9af   :  { %6513 = vtanh.f32 %v2770_v17  ;;  %v9166_v17 = vld [vmem:[%s11578_s5 + $0x188] sm:$0xff] }
 0x9b0   :  { %6515 = vpow2.f32 %v6264_v56  ;;  %v9171_v56 = vld [vmem:[%s11578_s5 + $0x198] sm:$0xff] }
 0x9b9   :  { %v6510_v4 = vpop.eup %6509 }
 0x9ba   :  { %v2775_v57 = vadd.f32 1.0, %v6510_v4  ;;  %v9178_v4 = vld [vmem:[%s11578_s5 + $0x180] sm:$0xff] }
 0x9bb   :  { %v6512_v7 = vpop.eup %6511 }
 0x9bc   :  { %6517 = vrcp.f32 %v2775_v57  ;;  %v2781_v46 = vadd.f32 1.0, %v6512_v7  ;;  %v6514_v5 = vpop.eup %6513  ;;  %v9183_v57 = vld [vmem:[%s11578_s5 + $0x190] sm:$0xff]  ;;  %v9190_v7 = vld [vmem:[%s11578_s5 + $0x168] sm:$0xff] }
 0x9bd   :  { %v6516_v60 = vpop.eup %6515 }
 0x9be   :  { %6519 = vrcp.f32 %v2781_v46  ;;  %v2788_v27 = vadd.f32 1.0, %v6516_v60  ;;  %v9195_v46 = vld [vmem:[%s11578_s5 + $0x178] sm:$0xff]  ;;  %v9207_v60 = vld [vmem:[%s11578_s5 + $0x170] sm:$0xff] }
 0x9c0   :  { %6521 = vrcp.f32 %v2788_v27  ;;  %v9231_v27 = vld [vmem:[%s11578_s5 + $0x150] sm:$0xff] }
 0x9c9   :  { %v6518_v58 = vpop.eup %6517 }
 0x9ca   :  { %v2792_v50 = vmul.f32 %v6518_v58, %v6514_v5  ;;  %v9202_v5 = vld [vmem:[%s11578_s5 + $0x160] sm:$0xff]  ;;  %v9214_v58 = vld [vmem:[%s11578_s5 + $0x148] sm:$0xff] }
 0x9cb   :  { %v6520_v14 = vpop.eup %6519 }
 0x9cc   :  { %v2791_v29 = vmul.f32 %v6520_v14, %v9002_v18  ;;  %v9094_v18 = vld [vmem:[%s11578_s5 + $0x1e8] sm:$0xff]  ;;  %v9226_v14 = vld [vmem:[%s11578_s5 + $0x140] sm:$0xff] }
 0x9cd   :  { %v6522_v35 = vpop.eup %6521  ;;  %12114 = vst [vmem:[#allocation21_spill] sm:$0xff] %v9094_v18  ;;  %3104 = vmatprep.subr.mxu0 %v9094_v18 }
 0x9ce   :  { %v9082_v31 = vadd.f32 %v2792_v50, %v2791_v29  ;;  %v9219_v50 = vld [vmem:[%s11578_s5 + $0x158] sm:$0xff]  ;;  %v9238_v29 = vld [vmem:[%s11578_s5 + $0x128] sm:$0xff] }
 0x9cf   :  { %12116 = vst [vmem:[#allocation28_spill] sm:$0xff] %v9238_v29 }
 0x9d0   :  { %6523 = vtanh.f32 %v9082_v31 }
 0x9dd   :  { %v6524_v37 = vpop.eup %6523 }
 0x9de   :  { %v9085_v39 = vmul.f32 %v6524_v37, %v6522_v35  ;;  %v9243_v35 = vld [vmem:[%s11578_s5 + $0x138] sm:$0xff]  ;;  %v9250_v37 = vld [vmem:[%s11578_s5 + $0x120] sm:$0xff] }
 0x9df   :  { %12117 = vst [vmem:[#allocation22_spill] sm:$0xff] %v9243_v35  ;;  %12118 = vst [vmem:[#allocation23_spill] sm:$0xff] %v9250_v37 }
 0x9e0   :  { %12113 = vst [vmem:[#allocation20_spill] sm:$0xff] %v9085_v39  ;;  %2930 = vmatmul.mubr.f32.vlgmr.msra.gmra.mxu0 %v9085_v39  ;;  %3001 = vmatmul.mubr.f32.vlgmr.msra.gmra.mxu1 %v9085_v39  ;;  %v9255_v39 = vld [vmem:[%s11578_s5 + $0x130] sm:$0xff] }
 0x9e1   :  { %3168 = vmatprep.mubr.f32.mxu0 %v12105_v23  ;;  %3239 = vmatprep.mubr.f32.mxu1 %v12105_v23  ;;  %12119 = vst [vmem:[#allocation15_spill] sm:$0xff] %v9255_v39  ;;  %v9267_v23 = vld [vmem:[%s11578_s5 + $0x118] sm:$0xff] }
 0x9e2   :  { %3105 = vmatpush1.msra.mxu0 %v9106_v43  ;;  %3176 = vmatpush1.msra.mxu1 %v9111_v45 }
 0x9e3   :  { %3106 = vmatprep.subr.mxu0 %v9118_v47  ;;  %3177 = vmatprep.subr.mxu1 %v9123_v51 }
 0x9e4   :  { %3107 = vmatpush1.msra.mxu0 %v9130_v24  ;;  %3178 = vmatpush1.msra.mxu1 %v9135_v16 }
 0x9e5   :  { %3108 = vmatprep.subr.mxu0 %v9142_v15  ;;  %3179 = vmatprep.subr.mxu1 %v9147_v13 }
 0x9e6   :  { %3109 = vmatpush1.msra.mxu0 %v9154_v54  ;;  %3180 = vmatpush1.msra.mxu1 %v9159_v52 }
 0x9e7   :  { %3110 = vmatprep.subr.mxu0 %v9166_v17  ;;  %3181 = vmatprep.subr.mxu1 %v9171_v56 }
 0x9e8   :  { %3111 = vmatpush1.msra.mxu0 %v9178_v4  ;;  %3182 = vmatpush1.msra.mxu1 %v9183_v57 }
 0x9e9   :  { %3112 = vmatprep.subr.mxu0 %v9190_v7  ;;  %3183 = vmatprep.subr.mxu1 %v9195_v46 }
 0x9ea   :  { %3113 = vmatpush1.msra.mxu0 %v9202_v5  ;;  %3184 = vmatpush1.msra.mxu1 %v9207_v60 }
 0x9eb   :  { %3114 = vmatprep.subr.mxu0 %v9214_v58  ;;  %3185 = vmatprep.subr.mxu1 %v9219_v50 }
 0x9ec   :  { %3115 = vmatpush1.msra.mxu0 %v9226_v14  ;;  %3186 = vmatpush1.msra.mxu1 %v9231_v27 }
 0x9ed   :  { %3116 = vmatprep.subr.mxu0 %v9238_v29  ;;  %3187 = vmatprep.subr.mxu1 %v9243_v35  ;;  %v9272_v35 = vld [vmem:[%s11578_s5 + $0x100] sm:$0xff]  ;;  %v9277_v29 = vld [vmem:[%s11578_s5 + $0x110] sm:$0xff] }
 0x9ee   :  { %3117 = vmatpush1.msra.mxu0 %v9250_v37  ;;  %3188 = vmatpush1.msra.mxu1 %v9255_v39  ;;  %v9284_v39 = vld [vmem:[%s11578_s5 + $0xe8] sm:$0xff]  ;;  %v9289_v37 = vld [vmem:[%s11578_s5 + $0xe0] sm:$0xff] }
 0x9ef   :  { %3118 = vmatprep.subr.mxu0 %v9260_v19  ;;  %3189 = vmatprep.subr.mxu1 %v9267_v23  ;;  %v9296_v19 = vld [vmem:[%s11578_s5 + $0xc8] sm:$0xff] }
 0x9f0   :  { %3119 = vmatpush1.msra.mxu0 %v9272_v35  ;;  %3190 = vmatpush1.msra.mxu1 %v9277_v29 }
 0x9f1   :  { %3120 = vmatprep.subr.mxu0 %v9284_v39  ;;  %3191 = vmatprep.subr.mxu1 %v8648_v49  ;;  %v12121_v49 = vld [vmem:[#allocation34_spill] sm:$0xff] }
 0x9f2   :  { %3121 = vmatpush1.msra.mxu0 %v9289_v37  ;;  %3192 = vmatpush1.msra.mxu1 %v8660_v53  ;;  %v2138_v53 = vadd.f32 %v12121_v49, %v8972_v59 }
 0x9f3   :  { %3122 = vmatprep.subr.mxu0 %v9296_v19  ;;  %3193 = vmatprep.subr.mxu1 %v8672_v28 }
 0x9f4   :  { %3123 = vmatpush1.msra.mxu0 %v8678_v32  ;;  %3194 = vmatpush1.msra.mxu1 %v8684_v36  ;;  %v12122_v32 = vld [vmem:[#allocation36_spill] sm:$0xff] }
 0x9f5   :  { %3124 = vmatprep.subr.mxu0 %v8690_v40  ;;  %3195 = vmatprep.subr.mxu1 %v8696_v42  ;;  %v2140_v36 = vadd.f32 %v12122_v32, %v12108_v33 }
 0x9f6   :  { %3125 = vmatpush1.msra.mxu0 %v8702_v55  ;;  %3196 = vmatpush1.msra.mxu1 %v8708_v20 }
 0x9f7   :  { %3126 = vmatprep.subr.mxu0 %v8714_v2  ;;  %3197 = vmatprep.subr.mxu1 %v12087_v3 }
 0x9f8   :  { %3127 = vmatpush1.msra.mxu0 %v12088_v6  ;;  %3198 = vmatpush1.msra.mxu1 %v12089_v8  ;;  %v12123_v8 = vld [vmem:[#allocation37_spill] sm:$0xff] }
 0x9f9   :  { %3128 = vmatprep.subr.mxu0 %v12090_v1  ;;  %3199 = vmatprep.subr.mxu1 %v12091_v11  ;;  %v2253_v1 = vadd.f32 %v12123_v8, %v12110_v10  ;;  %v9396_v8 = vld [vmem:[%s11578_s5 + $0xd8] sm:$0xff] }
 0x9fa   :  { %3129 = vmatpush1.msra.mxu0 %v12092_v48  ;;  %3200 = vmatpush1.msra.mxu1 %v12093_v61  ;;  %v12124_v48 = vld [vmem:[#allocation35_spill] sm:$0xff] }
 0x9fb   :  { %3130 = vmatprep.subr.mxu0 %v12094_v62  ;;  %3201 = vmatprep.subr.mxu1 %v12095_v63  ;;  %v2251_v61 = vadd.f32 %v12124_v48, %v8999_v12  ;;  %v9412_v48 = vld [vmem:[%s11578_s5 + $0xa8] sm:$0xff] }
 0x9fc   :  { %3131 = vmatpush1.msra.mxu0 %v12096_v0  ;;  %3202 = vmatpush1.msra.mxu1 %v12097_v9 }
 0x9fd   :  { %3132 = vmatprep.subr.mxu0 %v12098_v30  ;;  %3203 = vmatprep.subr.mxu1 %v12099_v34 }
 0x9fe   :  { %3133 = vmatpush1.msra.mxu0 %v12100_v38  ;;  %3204 = vmatpush1.msra.mxu1 %v12101_v26 }
 0x9ff   :  { %3134 = vmatprep.subr.mxu0 %v12102_v44  ;;  %3205 = vmatprep.subr.mxu1 %v12103_v21 }
 0xa00   :  { %3135 = vmatpush1.msra.mxu0 %v12104_v22  ;;  %3206 = vmatpush1.msra.mxu1 %v12106_v25 }
 0xa01   :  { %3343 = vmatprep.subr.mxu0 %v9094_v18  ;;  %3414 = vmatprep.subr.mxu1 %v9099_v41 }
 0xaa0   :  { %v2931_v28 = vpop.f32.mrf.mxu0  ;;  %v3002_v2 = vpop.f32.mrf.mxu1 }
 0xaa1   :  { %v3007_v40 = vadd.f32 %v2931_v28, %v2138_v53  ;;  %v3009_v62 = vadd.f32 %v3002_v2, %v2251_v61  ;;  %v12131_v2 = vmov 0.0   ;;  %v9419_v61 = vld [vmem:[%s11578_s5 + $0xb8] sm:$0xff] }
 0xaa2   :  { %v2933_v42 = vpop.f32.mrf.mxu0  ;;  %v3004_v6 = vpop.f32.mrf.mxu1 }
 0xaa3   :  { %v6265_v55 = vmul.f32 -1.442695, %v3007_v40  ;;  %v3008_v20 = vadd.f32 %v2933_v42, %v2140_v36  ;;  %v3010_v11 = vadd.f32 %v3004_v6, %v2253_v1  ;;  %v12127_v40 = vld [vmem:[#allocation22_spill] sm:$0xff]  ;;  %v12128_v42 = vld [vmem:[#allocation23_spill] sm:$0xff]  ;;  %v9391_v6 = vld [vmem:[%s11578_s5 + $0xf0] sm:$0xff] }
 0xaa4   :  { %v9402_v1 = vld [vmem:[%s11578_s5 + $0xc0] sm:$0xff] }
 0xaa5   :  { %6525 = vpow2.f32 %v6265_v55  ;;  %v6266_v3 = vmul.f32 -1.442695, %v3008_v20  ;;  %v6267_v63 = vmul.f32 -1.442695, %v3010_v11  ;;  %v12129_v55 = vld [vmem:[#allocation15_spill] sm:$0xff]  ;;  %v12130_v20 = vld [vmem:[#allocation29_spill] sm:$0xff] }
 0xaa6   :  { %v9407_v11 = vld [vmem:[%s11578_s5 + $0xd0] sm:$0xff] }
 0xaa7   :  { %6527 = vpow2.f32 %v6266_v3  ;;  %v9386_v3 = vld [vmem:[%s11578_s5 + $0xf8] sm:$0xff] }
 0xaa8   :  { %6529 = vtanh.f32 %v3009_v62  ;;  %v9424_v62 = vld [vmem:[%s11578_s5 + $0xa0] sm:$0xff] }
 0xaa9   :  { %6531 = vpow2.f32 %v6267_v63  ;;  %v9431_v63 = vld [vmem:[%s11578_s5 + $0xb0] sm:$0xff] }
 0xaaa   :  { %12132 = vst [vmem:[#allocation11_spill] sm:$0xff] %v9431_v63 }
 0xab2   :  { %v6526_v0 = vpop.eup %6525 }
 0xab3   :  { %v3014_v9 = vadd.f32 1.0, %v6526_v0  ;;  %v9436_v0 = vld [vmem:[%s11578_s5 + $0x88] sm:$0xff] }
 0xab4   :  { %v6528_v30 = vpop.eup %6527  ;;  %12133 = vst [vmem:[#allocation16_spill] sm:$0xff] %v9436_v0 }
 0xab5   :  { %6533 = vrcp.f32 %v3014_v9  ;;  %v3020_v34 = vadd.f32 1.0, %v6528_v30  ;;  %v6530_v38 = vpop.eup %6529  ;;  %v9441_v9 = vld [vmem:[%s11578_s5 + $0x80] sm:$0xff]  ;;  %v9448_v30 = vld [vmem:[%s11578_s5 + $0x98] sm:$0xff] }
 0xab6   :  { %v6532_v26 = vpop.eup %6531  ;;  %12134 = vst [vmem:[#allocation12_spill] sm:$0xff] %v9441_v9  ;;  %12135 = vst [vmem:[#allocation25_spill] sm:$0xff] %v9448_v30 }
 0xab7   :  { %6535 = vrcp.f32 %v3020_v34  ;;  %v3027_v25 = vadd.f32 1.0, %v6532_v26  ;;  %v9453_v34 = vld [vmem:[%s11578_s5 + $0x68] sm:$0xff]  ;;  %v9465_v26 = vld [vmem:[%s11578_s5 + $0x60] sm:$0xff] }
 0xab8   :  { %12136 = vst [vmem:[#allocation31_spill] sm:$0xff] %v9453_v34  ;;  %12138 = vst [vmem:[#allocation19_spill] sm:$0xff] %v9465_v26 }
 0xab9   :  { %6537 = vrcp.f32 %v3027_v25  ;;  %v9489_v25 = vld [vmem:[%s11578_s5 + $0x40] sm:$0xff] }
 0xaba   :  { %12142 = vst [vmem:[#allocation32_spill] sm:$0xff] %v9489_v25 }
 0xac2   :  { %v6534_v44 = vpop.eup %6533 }
 0xac3   :  { %v3031_v21 = vmul.f32 %v6534_v44, %v6530_v38  ;;  %v9460_v38 = vld [vmem:[%s11578_s5 + $0x90] sm:$0xff]  ;;  %v9472_v44 = vld [vmem:[%s11578_s5 + $0x78] sm:$0xff] }
 0xac4   :  { %v6536_v22 = vpop.eup %6535  ;;  %12137 = vst [vmem:[#allocation26_spill] sm:$0xff] %v9460_v38  ;;  %12139 = vst [vmem:[#allocation18_spill] sm:$0xff] %v9472_v44 }
 0xac5   :  { %v3030_v49 = vmul.f32 %v6536_v22, %v9082_v31  ;;  %v12126_v31 = vld [vmem:[#allocation28_spill] sm:$0xff]  ;;  %v9484_v22 = vld [vmem:[%s11578_s5 + $0x70] sm:$0xff] }
 0xac6   :  { %v6538_v28 = vpop.eup %6537  ;;  %12141 = vst [vmem:[#allocation17_spill] sm:$0xff] %v9484_v22 }
 0xac7   :  { %v9341_v53 = vadd.f32 %v3031_v21, %v3030_v49  ;;  %v9477_v21 = vld [vmem:[%s11578_s5 + $0x48] sm:$0xff]  ;;  %v9496_v49 = vld [vmem:[%s11578_s5 + $0x58] sm:$0xff] }
 0xac8   :  { %12140 = vst [vmem:[#allocation30_spill] sm:$0xff] %v9477_v21  ;;  %12143 = vst [vmem:[#allocation57_spill] sm:$0xff] %v9496_v49 }
 0xac9   :  { %6539 = vtanh.f32 %v9341_v53 }
 0xad6   :  { %v6540_v32 = vpop.eup %6539 }
 0xad7   :  { %v9344_v36 = vmul.f32 %v6540_v32, %v6538_v28  ;;  %v9501_v28 = vld [vmem:[%s11578_s5 + $0x28] sm:$0xff]  ;;  %v9508_v32 = vld [vmem:[%s11578_s5 + $0x50] sm:$0xff] }
 0xad8   :  { %12144 = vst [vmem:[#allocation27_spill] sm:$0xff] %v9501_v28  ;;  %12145 = vst [vmem:[#allocation61_spill] sm:$0xff] %v9508_v32 }
 0xad9   :  { %12125 = vst [vmem:[#allocation24_spill] sm:$0xff] %v9344_v36  ;;  %3169 = vmatmul.mubr.f32.vlgmr.msra.gmra.mxu0 %v9344_v36  ;;  %3240 = vmatmul.mubr.f32.vlgmr.msra.gmra.mxu1 %v9344_v36  ;;  %v9513_v36 = vld [vmem:[%s11578_s5 + $0x20] sm:$0xff] }
 0xada   :  { %3344 = vmatpush1.msra.mxu0 %v9106_v43  ;;  %3415 = vmatpush1.msra.mxu1 %v9111_v45  ;;  %12146 = vst [vmem:[#allocation33_spill] sm:$0xff] %v9513_v36 }
 0xadb   :  { %3345 = vmatprep.subr.mxu0 %v9118_v47  ;;  %3416 = vmatprep.subr.mxu1 %v9123_v51 }
 0xadc   :  { %3346 = vmatpush1.msra.mxu0 %v9130_v24  ;;  %3417 = vmatpush1.msra.mxu1 %v9135_v16 }
 0xadd   :  { %3347 = vmatprep.subr.mxu0 %v9142_v15  ;;  %3418 = vmatprep.subr.mxu1 %v9147_v13 }
 0xade   :  { %3348 = vmatpush1.msra.mxu0 %v9154_v54  ;;  %3419 = vmatpush1.msra.mxu1 %v9159_v52 }
 0xadf   :  { %3349 = vmatprep.subr.mxu0 %v9166_v17  ;;  %3420 = vmatprep.subr.mxu1 %v9171_v56 }
 0xae0   :  { %3350 = vmatpush1.msra.mxu0 %v9178_v4  ;;  %3421 = vmatpush1.msra.mxu1 %v9183_v57 }
 0xae1   :  { %3351 = vmatprep.subr.mxu0 %v9190_v7  ;;  %3422 = vmatprep.subr.mxu1 %v9195_v46 }
 0xae2   :  { %3352 = vmatpush1.msra.mxu0 %v9202_v5  ;;  %3423 = vmatpush1.msra.mxu1 %v9207_v60 }
 0xae3   :  { %3353 = vmatprep.subr.mxu0 %v9214_v58  ;;  %3424 = vmatprep.subr.mxu1 %v9219_v50 }
 0xae4   :  { %3354 = vmatpush1.msra.mxu0 %v9226_v14  ;;  %3425 = vmatpush1.msra.mxu1 %v9231_v27 }
 0xae5   :  { %3355 = vmatprep.subr.mxu0 %v12126_v31  ;;  %3426 = vmatprep.subr.mxu1 %v12127_v40 }
 0xae6   :  { %3356 = vmatpush1.msra.mxu0 %v12128_v42  ;;  %3427 = vmatpush1.msra.mxu1 %v12129_v55 }
 0xae7   :  { %3357 = vmatprep.subr.mxu0 %v12130_v20  ;;  %3428 = vmatprep.subr.mxu1 %v9267_v23 }
 0xae8   :  { %3358 = vmatpush1.msra.mxu0 %v9272_v35  ;;  %3429 = vmatpush1.msra.mxu1 %v9277_v29 }
 0xae9   :  { %3359 = vmatprep.subr.mxu0 %v9284_v39  ;;  %3407 = vmatprep.mubr.f32.mxu0 %v12131_v2 }
 0xaea   :  { %3360 = vmatpush1.msra.mxu0 %v9289_v37  ;;  %3478 = vmatprep.mubr.f32.mxu1 %v12131_v2  ;;  %v9520_v2 = vld [vmem:[%s11578_s5 + $0x38] sm:$0xff] }
 0xaeb   :  { %3361 = vmatprep.subr.mxu0 %v9296_v19  ;;  %3430 = vmatprep.subr.mxu1 %v9386_v3  ;;  %12147 = vst [vmem:[#allocation13_spill] sm:$0xff] %v9520_v2 }
 0xaec   :  { %3431 = vmatpush1.msra.mxu1 %v9391_v6  ;;  %3362 = vmatpush1.msra.mxu0 %v9402_v1 }
 0xaed   :  { %3432 = vmatprep.subr.mxu1 %v9396_v8  ;;  %3363 = vmatprep.subr.mxu0 %v9412_v48 }
 0xaee   :  { %3433 = vmatpush1.msra.mxu1 %v9407_v11  ;;  %3364 = vmatpush1.msra.mxu0 %v9424_v62 }
 0xaef   :  { %3434 = vmatprep.subr.mxu1 %v9419_v61  ;;  %3365 = vmatprep.subr.mxu0 %v9436_v0 }
 0xaf0   :  { %3435 = vmatpush1.msra.mxu1 %v9431_v63  ;;  %3366 = vmatpush1.msra.mxu0 %v9441_v9 }
 0xaf1   :  { %3436 = vmatprep.subr.mxu1 %v9448_v30  ;;  %3367 = vmatprep.subr.mxu0 %v9453_v34  ;;  %v12156_v30 = vld [vmem:[#allocation39_spill] sm:$0xff] }
 0xaf2   :  { %3437 = vmatpush1.msra.mxu1 %v9460_v38  ;;  %3368 = vmatpush1.msra.mxu0 %v9465_v26 }
 0xaf3   :  { %3438 = vmatprep.subr.mxu1 %v9472_v44  ;;  %3369 = vmatprep.subr.mxu0 %v9477_v21  ;;  %v9525_v21 = vld [vmem:[%s11578_s5 + $0x8] sm:$0xff] }
 0xaf4   :  { %3439 = vmatpush1.msra.mxu1 %v9484_v22  ;;  %3370 = vmatpush1.msra.mxu0 %v9489_v25  ;;  %12148 = vst [vmem:[#allocation34_spill] sm:$0xff] %v9525_v21  ;;  %v9532_v22 = vld [vmem:[%s11578_s5 + $0x30] sm:$0xff]  ;;  %v9537_v25 = vld [vmem:[%s11578_s5] sm:$0xff] }
 0xaf5   :  { %3440 = vmatprep.subr.mxu1 %v9496_v49  ;;  %3371 = vmatprep.subr.mxu0 %v9501_v28  ;;  %12149 = vst [vmem:[#allocation36_spill] sm:$0xff] %v9532_v22  ;;  %12150 = vst [vmem:[#allocation37_spill] sm:$0xff] %v9537_v25  ;;  %v9544_v49 = vld [vmem:[%s11578_s5 + $0x18] sm:$0xff]  ;;  %v9551_v28 = vld [vmem:[%s11578_s5 + $0x10] sm:$0xff] }
 0xaf6   :  { %3441 = vmatpush1.msra.mxu1 %v9508_v32  ;;  %3372 = vmatpush1.msra.mxu0 %v9513_v36  ;;  %12151 = vst [vmem:[#allocation35_spill] sm:$0xff] %v9544_v49  ;;  %12152 = vst [vmem:[#allocation28_spill] sm:$0xff] %v9551_v28  ;;  %v12153_v36 = vld [vmem:[#allocation38_spill] sm:$0xff]  ;;  %v12154_v32 = vld [vmem:[#allocation40_spill] sm:$0xff] }
 0xaf7   :  { %3442 = vmatprep.subr.mxu1 %v9520_v2  ;;  %3373 = vmatprep.subr.mxu0 %v9525_v21  ;;  %v2144_v21 = vadd.f32 %v12153_v36, %v8972_v59  ;;  %v2146_v26 = vadd.f32 %v12154_v32, %v12108_v33  ;;  %v2257_v36 = vadd.f32 %v12156_v30, %v8999_v12  ;;  %v12160_v30 = vld [vmem:[#allocation25_spill] sm:$0xff] }
 0xaf8   :  { %3443 = vmatpush1.msra.mxu1 %v9532_v22  ;;  %3374 = vmatpush1.msra.mxu0 %v9537_v25 }
 0xaf9   :  { %3444 = vmatprep.subr.mxu1 %v9544_v49  ;;  %3582 = vmatprep.subr.mxu0 %v9094_v18 }
 0xafa   :  { %3445 = vmatpush1.msra.mxu1 %v9551_v28  ;;  %v12155_v28 = vld [vmem:[#allocation41_spill] sm:$0xff] }
 0xafb   :  { %3653 = vmatprep.subr.mxu1 %v9099_v41  ;;  %v2259_v9 = vadd.f32 %v12155_v28, %v12110_v10  ;;  %v12162_v28 = vld [vmem:[#allocation26_spill] sm:$0xff] }
 0xb99   :  { %v3170_v2 = vpop.f32.mrf.mxu0  ;;  %v3241_v25 = vpop.f32.mrf.mxu1 }
 0xb9a   :  { %v3246_v44 = vadd.f32 %v3170_v2, %v2144_v21  ;;  %v3248_v59 = vadd.f32 %v3241_v25, %v2257_v36  ;;  %v12161_v25 = vld [vmem:[#allocation12_spill] sm:$0xff]  ;;  %v12163_v36 = vld [vmem:[#allocation31_spill] sm:$0xff] }
 0xb9b   :  { %v3172_v34 = vpop.f32.mrf.mxu0  ;;  %v3243_v18 = vpop.f32.mrf.mxu1 }
 0xb9c   :  { %v6268_v22 = vmul.f32 -1.442695, %v3246_v44  ;;  %v3247_v38 = vadd.f32 %v3172_v34, %v2146_v26  ;;  %v3249_v41 = vadd.f32 %v3243_v18, %v2259_v9 }
 0xb9e   :  { %6541 = vpow2.f32 %v6268_v22  ;;  %v6269_v49 = vmul.f32 -1.442695, %v3247_v38  ;;  %v6270_v0 = vmul.f32 -1.442695, %v3249_v41 }
 0xba0   :  { %6543 = vpow2.f32 %v6269_v49 }
 0xba1   :  { %6545 = vtanh.f32 %v3248_v59 }
 0xba2   :  { %6547 = vpow2.f32 %v6270_v0  ;;  %v12159_v0 = vld [vmem:[#allocation16_spill] sm:$0xff] }
 0xbab   :  { %v6542_v63 = vpop.eup %6541 }
 0xbac   :  { %v3253_v32 = vadd.f32 1.0, %v6542_v63 }
 0xbad   :  { %v6544_v2 = vpop.eup %6543 }
 0xbae   :  { %6549 = vrcp.f32 %v3253_v32  ;;  %v3259_v34 = vadd.f32 1.0, %v6544_v2  ;;  %v6546_v38 = vpop.eup %6545  ;;  %v12164_v32 = vld [vmem:[#allocation18_spill] sm:$0xff]  ;;  %v12165_v2 = vld [vmem:[#allocation19_spill] sm:$0xff] }
 0xbaf   :  { %v6548_v26 = vpop.eup %6547 }
 0xbb0   :  { %6551 = vrcp.f32 %v3259_v34  ;;  %v3266_v49 = vadd.f32 1.0, %v6548_v26  ;;  %v12166_v34 = vld [vmem:[#allocation17_spill] sm:$0xff] }
 0xbb1   :  { %v12168_v26 = vld [vmem:[#allocation57_spill] sm:$0xff] }
 0xbb2   :  { %6553 = vrcp.f32 %v3266_v49  ;;  %v12172_v49 = vld [vmem:[#allocation13_spill] sm:$0xff] }
 0xbbb   :  { %v6550_v44 = vpop.eup %6549 }
 0xbbc   :  { %v3270_v21 = vmul.f32 %v6550_v44, %v6546_v38  ;;  %v12167_v38 = vld [vmem:[#allocation30_spill] sm:$0xff]  ;;  %v12169_v44 = vld [vmem:[#allocation32_spill] sm:$0xff] }
 0xbbd   :  { %v6552_v22 = vpop.eup %6551 }
 0xbbe   :  { %v3269_v18 = vmul.f32 %v6552_v22, %v9341_v53  ;;  %v12158_v53 = vld [vmem:[#allocation11_spill] sm:$0xff] }
 0xbbf   :  { %v6554_v41 = vpop.eup %6553  ;;  %v12171_v22 = vld [vmem:[#allocation27_spill] sm:$0xff] }
 0xbc0   :  { %v9568_v9 = vadd.f32 %v3270_v21, %v3269_v18  ;;  %v12170_v21 = vld [vmem:[#allocation61_spill] sm:$0xff] }
 0xbc1   :  { %v12173_v18 = vld [vmem:[#allocation33_spill] sm:$0xff] }
 0xbc2   :  { %6555 = vtanh.f32 %v9568_v9 }
 0xbcf   :  { %v6556_v59 = vpop.eup %6555 }
 0xbd0   :  { %v9571_v63 = vmul.f32 %v6556_v59, %v6554_v41  ;;  %v12174_v41 = vld [vmem:[#allocation36_spill] sm:$0xff]  ;;  %v12175_v59 = vld [vmem:[#allocation34_spill] sm:$0xff] }
 0xbd2   :  { %12157 = vst [vmem:[#allocation22_spill] sm:$0xff] %v9571_v63  ;;  %3408 = vmatmul.mubr.f32.vlgmr.msra.gmra.mxu0 %v9571_v63  ;;  %3479 = vmatmul.mubr.f32.vlgmr.msra.gmra.mxu1 %v9571_v63  ;;  %v12176_v63 = vld [vmem:[#allocation35_spill] sm:$0xff] }
 0xbd3   :  { %3583 = vmatpush1.msra.mxu0 %v9106_v43  ;;  %3654 = vmatpush1.msra.mxu1 %v9111_v45 }
 0xbd4   :  { %3584 = vmatprep.subr.mxu0 %v9118_v47  ;;  %3655 = vmatprep.subr.mxu1 %v9123_v51 }
 0xbd5   :  { %3585 = vmatpush1.msra.mxu0 %v9130_v24  ;;  %3656 = vmatpush1.msra.mxu1 %v9135_v16 }
 0xbd6   :  { %3586 = vmatprep.subr.mxu0 %v9142_v15  ;;  %3657 = vmatprep.subr.mxu1 %v9147_v13 }
 0xbd7   :  { %3587 = vmatpush1.msra.mxu0 %v9154_v54  ;;  %3658 = vmatpush1.msra.mxu1 %v9159_v52 }
 0xbd8   :  { %3588 = vmatprep.subr.mxu0 %v9166_v17  ;;  %3659 = vmatprep.subr.mxu1 %v9171_v56 }
 0xbd9   :  { %3589 = vmatpush1.msra.mxu0 %v9178_v4  ;;  %3660 = vmatpush1.msra.mxu1 %v9183_v57 }
 0xbda   :  { %3590 = vmatprep.subr.mxu0 %v9190_v7  ;;  %3661 = vmatprep.subr.mxu1 %v9195_v46 }
 0xbdb   :  { %3591 = vmatpush1.msra.mxu0 %v9202_v5  ;;  %3662 = vmatpush1.msra.mxu1 %v9207_v60 }
 0xbdc   :  { %3592 = vmatprep.subr.mxu0 %v9214_v58  ;;  %3663 = vmatprep.subr.mxu1 %v9219_v50 }
 0xbdd   :  { %3593 = vmatpush1.msra.mxu0 %v9226_v14  ;;  %3664 = vmatpush1.msra.mxu1 %v9231_v27 }
 0xbde   :  { %3594 = vmatprep.subr.mxu0 %v12126_v31  ;;  %3665 = vmatprep.subr.mxu1 %v12127_v40 }
 0xbdf   :  { %3595 = vmatpush1.msra.mxu0 %v12128_v42  ;;  %3666 = vmatpush1.msra.mxu1 %v12129_v55 }
 0xbe0   :  { %3596 = vmatprep.subr.mxu0 %v12130_v20  ;;  %3667 = vmatprep.subr.mxu1 %v9267_v23 }
 0xbe1   :  { %3597 = vmatpush1.msra.mxu0 %v9272_v35  ;;  %3668 = vmatpush1.msra.mxu1 %v9277_v29 }
 0xbe2   :  { %3598 = vmatprep.subr.mxu0 %v9284_v39  ;;  %3669 = vmatprep.subr.mxu1 %v9386_v3 }
 0xbe3   :  { %3599 = vmatpush1.msra.mxu0 %v9289_v37  ;;  %3670 = vmatpush1.msra.mxu1 %v9391_v6 }
 0xbe4   :  { %3600 = vmatprep.subr.mxu0 %v9296_v19  ;;  %3671 = vmatprep.subr.mxu1 %v9396_v8 }
 0xbe5   :  { %3601 = vmatpush1.msra.mxu0 %v9402_v1  ;;  %3672 = vmatpush1.msra.mxu1 %v9407_v11 }
 0xbe6   :  { %3602 = vmatprep.subr.mxu0 %v9412_v48  ;;  %3673 = vmatprep.subr.mxu1 %v9419_v61 }
 0xbe7   :  { %3603 = vmatpush1.msra.mxu0 %v9424_v62  ;;  %3674 = vmatpush1.msra.mxu1 %v12158_v53 }
 0xbe8   :  { %3604 = vmatprep.subr.mxu0 %v12159_v0  ;;  %3675 = vmatprep.subr.mxu1 %v12160_v30  ;;  %v12186_v30 = vld [vmem:[#allocation43_spill] sm:$0xff] }
 0xbe9   :  { %3605 = vmatpush1.msra.mxu0 %v12161_v25  ;;  %3676 = vmatpush1.msra.mxu1 %v12162_v28 }
 0xbea   :  { %3606 = vmatprep.subr.mxu0 %v12163_v36  ;;  %3677 = vmatprep.subr.mxu1 %v12164_v32 }
 0xbeb   :  { %3607 = vmatpush1.msra.mxu0 %v12165_v2  ;;  %3678 = vmatpush1.msra.mxu1 %v12166_v34  ;;  %v12177_v34 = vld [vmem:[#allocation37_spill] sm:$0xff] }
 0xbec   :  { %3608 = vmatprep.subr.mxu0 %v12167_v38  ;;  %3679 = vmatprep.subr.mxu1 %v12168_v26  ;;  %v12178_v38 = vmov 0.0   ;;  %v12179_v26 = vld [vmem:[#allocation28_spill] sm:$0xff] }
 0xbed   :  { %3609 = vmatpush1.msra.mxu0 %v12169_v44  ;;  %3680 = vmatpush1.msra.mxu1 %v12170_v21  ;;  %v12180_v21 = vld [vmem:[#allocation21_spill] sm:$0xff] }
 0xbee   :  { %3610 = vmatprep.subr.mxu0 %v12171_v22  ;;  %3681 = vmatprep.subr.mxu1 %v12172_v49  ;;  %v12181_v22 = vld [vmem:[#allocation14_spill] sm:$0xff] }
 0xbef   :  { %3611 = vmatpush1.msra.mxu0 %v12173_v18  ;;  %3682 = vmatpush1.msra.mxu1 %v12174_v41  ;;  %v12182_v49 = vld [vmem:[#allocation54_spill] sm:$0xff] }
 0xbf0   :  { %3612 = vmatprep.subr.mxu0 %v12175_v59  ;;  %3683 = vmatprep.subr.mxu1 %v12176_v63  ;;  %v12183_v18 = vld [vmem:[#allocation42_spill] sm:$0xff]  ;;  %v12184_v59 = vld [vmem:[#allocation44_spill] sm:$0xff] }
 0xbf1   :  { %3613 = vmatpush1.msra.mxu0 %v12177_v34  ;;  %3646 = vmatprep.mubr.f32.mxu0 %v12178_v38  ;;  %v2150_v44 = vadd.f32 %v12183_v18, %v12182_v49  ;;  %v2152_v2 = vadd.f32 %v12184_v59, %v12108_v33  ;;  %v2263_v18 = vadd.f32 %v12186_v30, %v8999_v12 }
 0xbf2   :  { %3684 = vmatpush1.msra.mxu1 %v12179_v26  ;;  %3717 = vmatprep.mubr.f32.mxu1 %v12178_v38 }
 0xbf3   :  { %3821 = vmatprep.subr.mxu0 %v12180_v21  ;;  %3892 = vmatprep.subr.mxu1 %v12181_v22  ;;  %v12185_v21 = vld [vmem:[#allocation45_spill] sm:$0xff] }
 0xbf4   :  { %v2265_v25 = vadd.f32 %v12185_v21, %v12110_v10 }
 0xc92   :  { %v3409_v41 = vpop.f32.mrf.mxu0  ;;  %v3480_v28 = vpop.f32.mrf.mxu1 }
 0xc93   :  { %v3485_v63 = vadd.f32 %v3409_v41, %v2150_v44  ;;  %v3487_v49 = vadd.f32 %v3480_v28, %v2263_v18  ;;  %v12213_v18 = vld [vmem:[#allocation47_spill] sm:$0xff] }
 0xc94   :  { %v3411_v32 = vpop.f32.mrf.mxu0  ;;  %v3482_v38 = vpop.f32.mrf.mxu1 }
 0xc95   :  { %v6271_v34 = vmul.f32 -1.442695, %v3485_v63  ;;  %v3486_v36 = vadd.f32 %v3411_v32, %v2152_v2  ;;  %v3488_v22 = vadd.f32 %v3482_v38, %v2265_v25 }
 0xc97   :  { %6557 = vpow2.f32 %v6271_v34  ;;  %v6272_v26 = vmul.f32 -1.442695, %v3486_v36  ;;  %v6273_v0 = vmul.f32 -1.442695, %v3488_v22 }
 0xc99   :  { %6559 = vpow2.f32 %v6272_v26 }
 0xc9a   :  { %6561 = vtanh.f32 %v3487_v49  ;;  %v12212_v49 = vld [vmem:[#allocation50_spill] sm:$0xff] }
 0xc9b   :  { %6563 = vpow2.f32 %v6273_v0  ;;  %v2271_v21 = vadd.f32 %v12212_v49, %v12110_v10  ;;  %v4054_v49 = vld [vmem:[%s11578_s5 + $0x1d0] sm:$0xff] }
 0xca4   :  { %v6558_v53 = vpop.eup %6557 }
 0xca5   :  { %v3492_v59 = vadd.f32 1.0, %v6558_v53 }
 0xca6   :  { %v6560_v44 = vpop.eup %6559 }
 0xca7   :  { %6565 = vrcp.f32 %v3492_v59  ;;  %v3498_v63 = vadd.f32 1.0, %v6560_v44  ;;  %v6562_v36 = vpop.eup %6561  ;;  %v2269_v59 = vadd.f32 %v12213_v18, %v8999_v12  ;;  %v4048_v18 = vld [vmem:[%s11578_s5 + $0x1a0] sm:$0xff] }
 0xca8   :  { %v6564_v32 = vpop.eup %6563 }
 0xca9   :  { %6567 = vrcp.f32 %v3498_v63  ;;  %v3505_v41 = vadd.f32 1.0, %v6564_v32 }
 0xcab   :  { %6569 = vrcp.f32 %v3505_v41 }
 0xcb4   :  { %v6566_v2 = vpop.eup %6565 }
 0xcb5   :  { %v3509_v34 = vmul.f32 %v6566_v2, %v6562_v36 }
 0xcb6   :  { %v6568_v26 = vpop.eup %6567 }
 0xcb7   :  { %v3508_v25 = vmul.f32 %v6568_v26, %v9568_v9 }
 0xcb8   :  { %v6570_v53 = vpop.eup %6569 }
 0xcb9   :  { %v9650_v38 = vadd.f32 %v3509_v34, %v3508_v25 }
 0xcbb   :  { %6571 = vtanh.f32 %v9650_v38 }
 0xcc8   :  { %v6572_v30 = vpop.eup %6571 }
 0xcc9   :  { %v9653_v28 = vmul.f32 %v6572_v30, %v6570_v53 }
 0xccb   :  { %3647 = vmatmul.mubr.f32.vlgmr.msra.gmra.mxu0 %v9653_v28  ;;  %3718 = vmatmul.mubr.f32.vlgmr.msra.gmra.mxu1 %v9653_v28 }
 0xccc   :  { %3822 = vmatpush1.msra.mxu0 %v9106_v43  ;;  %3893 = vmatpush1.msra.mxu1 %v9111_v45  ;;  %v12189_v43 = vld [vmem:[#allocation25_spill] sm:$0xff]  ;;  %v12190_v45 = vld [vmem:[#allocation12_spill] sm:$0xff] }
 0xccd   :  { %3823 = vmatprep.subr.mxu0 %v9118_v47  ;;  %3894 = vmatprep.subr.mxu1 %v9123_v51  ;;  %v12192_v47 = vld [vmem:[#allocation31_spill] sm:$0xff]  ;;  %v12193_v51 = vld [vmem:[#allocation18_spill] sm:$0xff] }
 0xcce   :  { %3824 = vmatpush1.msra.mxu0 %v9130_v24  ;;  %3895 = vmatpush1.msra.mxu1 %v9135_v16  ;;  %v12194_v24 = vld [vmem:[#allocation19_spill] sm:$0xff]  ;;  %v12195_v16 = vld [vmem:[#allocation17_spill] sm:$0xff] }
 0xccf   :  { %3825 = vmatprep.subr.mxu0 %v9142_v15  ;;  %3896 = vmatprep.subr.mxu1 %v9147_v13  ;;  %v12196_v15 = vld [vmem:[#allocation30_spill] sm:$0xff]  ;;  %v12197_v13 = vld [vmem:[#allocation57_spill] sm:$0xff] }
 0xcd0   :  { %3826 = vmatpush1.msra.mxu0 %v9154_v54  ;;  %3897 = vmatpush1.msra.mxu1 %v9159_v52  ;;  %v12198_v54 = vld [vmem:[#allocation32_spill] sm:$0xff]  ;;  %v12199_v52 = vld [vmem:[#allocation61_spill] sm:$0xff] }
 0xcd1   :  { %3827 = vmatprep.subr.mxu0 %v9166_v17  ;;  %3898 = vmatprep.subr.mxu1 %v9171_v56  ;;  %v12200_v17 = vld [vmem:[#allocation27_spill] sm:$0xff]  ;;  %v12201_v56 = vld [vmem:[#allocation13_spill] sm:$0xff] }
 0xcd2   :  { %3828 = vmatpush1.msra.mxu0 %v9178_v4  ;;  %3899 = vmatpush1.msra.mxu1 %v9183_v57  ;;  %v12202_v4 = vld [vmem:[#allocation33_spill] sm:$0xff]  ;;  %v12203_v57 = vld [vmem:[#allocation36_spill] sm:$0xff] }
 0xcd3   :  { %3829 = vmatprep.subr.mxu0 %v9190_v7  ;;  %3900 = vmatprep.subr.mxu1 %v9195_v46  ;;  %v12204_v7 = vld [vmem:[#allocation34_spill] sm:$0xff]  ;;  %v12205_v46 = vld [vmem:[#allocation35_spill] sm:$0xff] }
 0xcd4   :  { %3830 = vmatpush1.msra.mxu0 %v9202_v5  ;;  %3901 = vmatpush1.msra.mxu1 %v9207_v60  ;;  %v12206_v5 = vld [vmem:[#allocation37_spill] sm:$0xff]  ;;  %v12207_v60 = vmov 0.0  }
 0xcd5   :  { %3831 = vmatprep.subr.mxu0 %v9214_v58  ;;  %3902 = vmatprep.subr.mxu1 %v9219_v50  ;;  %v12208_v58 = vld [vmem:[#allocation28_spill] sm:$0xff]  ;;  %v12209_v50 = vld [vmem:[#allocation54_spill] sm:$0xff] }
 0xcd6   :  { %3832 = vmatpush1.msra.mxu0 %v9226_v14  ;;  %3903 = vmatpush1.msra.mxu1 %v9231_v27  ;;  %v12210_v14 = vld [vmem:[#allocation46_spill] sm:$0xff] }
 0xcd7   :  { %3833 = vmatprep.subr.mxu0 %v12126_v31  ;;  %3904 = vmatprep.subr.mxu1 %v12127_v40  ;;  %v2156_v27 = vadd.f32 %v12210_v14, %v12209_v50 }
 0xcd8   :  { %3834 = vmatpush1.msra.mxu0 %v12128_v42  ;;  %3905 = vmatpush1.msra.mxu1 %v12129_v55 }
 0xcd9   :  { %3835 = vmatprep.subr.mxu0 %v12130_v20  ;;  %3906 = vmatprep.subr.mxu1 %v9267_v23  ;;  %v12187_v23 = vld [vmem:[#allocation11_spill] sm:$0xff] }
 0xcda   :  { %3836 = vmatpush1.msra.mxu0 %v9272_v35  ;;  %3907 = vmatpush1.msra.mxu1 %v9277_v29  ;;  %v12211_v35 = vld [vmem:[#allocation48_spill] sm:$0xff] }
 0xcdb   :  { %3837 = vmatprep.subr.mxu0 %v9284_v39  ;;  %3908 = vmatprep.subr.mxu1 %v9386_v3  ;;  %v12188_v39 = vld [vmem:[#allocation16_spill] sm:$0xff] }
 0xcdc   :  { %3838 = vmatpush1.msra.mxu0 %v9289_v37  ;;  %3909 = vmatpush1.msra.mxu1 %v9391_v6  ;;  %v2158_v37 = vadd.f32 %v12211_v35, %v12108_v33 }
 0xcdd   :  { %3839 = vmatprep.subr.mxu0 %v9296_v19  ;;  %3910 = vmatprep.subr.mxu1 %v9396_v8  ;;  %v12191_v19 = vld [vmem:[#allocation26_spill] sm:$0xff] }
 0xcde   :  { %3840 = vmatpush1.msra.mxu0 %v9402_v1  ;;  %3911 = vmatpush1.msra.mxu1 %v9407_v11 }
 0xcdf   :  { %3841 = vmatprep.subr.mxu0 %v9412_v48  ;;  %3912 = vmatprep.subr.mxu1 %v9419_v61 }
 0xce0   :  { %3842 = vmatpush1.msra.mxu0 %v9424_v62  ;;  %3913 = vmatpush1.msra.mxu1 %v12187_v23 }
 0xce1   :  { %3843 = vmatprep.subr.mxu0 %v12188_v39  ;;  %3914 = vmatprep.subr.mxu1 %v12189_v43 }
 0xce2   :  { %3844 = vmatpush1.msra.mxu0 %v12190_v45  ;;  %3915 = vmatpush1.msra.mxu1 %v12191_v19 }
 0xce3   :  { %3845 = vmatprep.subr.mxu0 %v12192_v47  ;;  %3916 = vmatprep.subr.mxu1 %v12193_v51 }
 0xce4   :  { %3846 = vmatpush1.msra.mxu0 %v12194_v24  ;;  %3917 = vmatpush1.msra.mxu1 %v12195_v16 }
 0xce5   :  { %3847 = vmatprep.subr.mxu0 %v12196_v15  ;;  %3918 = vmatprep.subr.mxu1 %v12197_v13 }
 0xce6   :  { %3848 = vmatpush1.msra.mxu0 %v12198_v54  ;;  %3919 = vmatpush1.msra.mxu1 %v12199_v52 }
 0xce7   :  { %3849 = vmatprep.subr.mxu0 %v12200_v17  ;;  %3920 = vmatprep.subr.mxu1 %v12201_v56 }
 0xce8   :  { %3850 = vmatpush1.msra.mxu0 %v12202_v4  ;;  %3921 = vmatpush1.msra.mxu1 %v12203_v57 }
 0xce9   :  { %3851 = vmatprep.subr.mxu0 %v12204_v7  ;;  %3922 = vmatprep.subr.mxu1 %v12205_v46 }
 0xcea   :  { %3852 = vmatpush1.msra.mxu0 %v12206_v5  ;;  %3885 = vmatprep.mubr.f32.mxu0 %v12207_v60 }
 0xceb   :  { %3923 = vmatpush1.msra.mxu1 %v12208_v58  ;;  %3956 = vmatprep.mubr.f32.mxu1 %v12207_v60 }
 0xd8b   :  { %v3648_v29 = vpop.f32.mrf.mxu0  ;;  %v3719_v20 = vpop.f32.mrf.mxu1 }
 0xd8c   :  { %v3724_v31 = vadd.f32 %v3648_v29, %v2156_v27  ;;  %v3726_v44 = vadd.f32 %v3719_v20, %v2269_v59  ;;  %v4053_v20 = vld [vmem:[%s11578_s5 + $0x1c8] sm:$0xff]  ;;  %v4050_v59 = vld [vmem:[%s11578_s5 + $0x1b0] sm:$0xff] }
 0xd8d   :  { %v3650_v40 = vpop.f32.mrf.mxu0  ;;  %v3721_v0 = vpop.f32.mrf.mxu1 }
 0xd8e   :  { %v6274_v42 = vmul.f32 -1.442695, %v3724_v31  ;;  %v3725_v55 = vadd.f32 %v3650_v40, %v2158_v37  ;;  %v3727_v22 = vadd.f32 %v3721_v0, %v2271_v21  ;;  %v4059_v40 = vld [vmem:[%s11578_s5 + $0x1f8] sm:$0xff]  ;;  %v4052_v0 = vld [vmem:[%s11578_s5 + $0x1c0] sm:$0xff]  ;;  %v4049_v21 = vld [vmem:[%s11578_s5 + $0x1a8] sm:$0xff] }
 0xd8f   :  { %4131 = vmatprep.subr.mxu1 %v4059_v40  ;;  %v4029_v40 = vld [vmem:[%s11578_s5 + $0x108] sm:$0xff] }
 0xd90   :  { %6573 = vpow2.f32 %v6274_v42  ;;  %v6275_v9 = vmul.f32 -1.442695, %v3725_v55  ;;  %v6276_v63 = vmul.f32 -1.442695, %v3727_v22  ;;  %v4056_v42 = vld [vmem:[%s11578_s5 + $0x1e0] sm:$0xff]  ;;  %v4058_v55 = vld [vmem:[%s11578_s5 + $0x1f0] sm:$0xff] }
 0xd91   :  { %v4051_v22 = vld [vmem:[%s11578_s5 + $0x1b8] sm:$0xff] }
 0xd92   :  { %6575 = vpow2.f32 %v6275_v9  ;;  %v4055_v9 = vld [vmem:[%s11578_s5 + $0x1d8] sm:$0xff] }
 0xd93   :  { %6577 = vtanh.f32 %v3726_v44  ;;  %v4045_v44 = vld [vmem:[%s11578_s5 + $0x188] sm:$0xff] }
 0xd94   :  { %6579 = vpow2.f32 %v6276_v63  ;;  %v4047_v63 = vld [vmem:[%s11578_s5 + $0x198] sm:$0xff] }
 0xd9d   :  { %v6574_v36 = vpop.eup %6573 }
 0xd9e   :  { %v3731_v32 = vadd.f32 1.0, %v6574_v36  ;;  %v4044_v36 = vld [vmem:[%s11578_s5 + $0x180] sm:$0xff] }
 0xd9f   :  { %v6576_v2 = vpop.eup %6575 }
 0xda0   :  { %6581 = vrcp.f32 %v3731_v32  ;;  %v3737_v34 = vadd.f32 1.0, %v6576_v2  ;;  %v6578_v26 = vpop.eup %6577  ;;  %v4046_v32 = vld [vmem:[%s11578_s5 + $0x190] sm:$0xff]  ;;  %v4041_v2 = vld [vmem:[%s11578_s5 + $0x168] sm:$0xff] }
 0xda1   :  { %v6580_v41 = vpop.eup %6579 }
 0xda2   :  { %6583 = vrcp.f32 %v3737_v34  ;;  %v3744_v14 = vadd.f32 1.0, %v6580_v41  ;;  %v4043_v34 = vld [vmem:[%s11578_s5 + $0x178] sm:$0xff]  ;;  %v4042_v41 = vld [vmem:[%s11578_s5 + $0x170] sm:$0xff] }
 0xda4   :  { %6585 = vrcp.f32 %v3744_v14  ;;  %v4038_v14 = vld [vmem:[%s11578_s5 + $0x150] sm:$0xff] }
 0xdad   :  { %v6582_v25 = vpop.eup %6581 }
 0xdae   :  { %v3748_v53 = vmul.f32 %v6582_v25, %v6578_v26  ;;  %v4040_v26 = vld [vmem:[%s11578_s5 + $0x160] sm:$0xff]  ;;  %v4037_v25 = vld [vmem:[%s11578_s5 + $0x148] sm:$0xff] }
 0xdaf   :  { %v6584_v30 = vpop.eup %6583 }
 0xdb0   :  { %v3747_v27 = vmul.f32 %v6584_v30, %v9650_v38  ;;  %v4057_v38 = vld [vmem:[%s11578_s5 + $0x1e8] sm:$0xff]  ;;  %v4036_v30 = vld [vmem:[%s11578_s5 + $0x140] sm:$0xff] }
 0xdb1   :  { %v6586_v35 = vpop.eup %6585  ;;  %4060 = vmatprep.subr.mxu0 %v4057_v38  ;;  %v4034_v38 = vld [vmem:[%s11578_s5 + $0x130] sm:$0xff] }
 0xdb2   :  { %v9730_v29 = vadd.f32 %v3748_v53, %v3747_v27  ;;  %v4039_v53 = vld [vmem:[%s11578_s5 + $0x158] sm:$0xff]  ;;  %v4033_v27 = vld [vmem:[%s11578_s5 + $0x128] sm:$0xff] }
 0xdb4   :  { %6587 = vtanh.f32 %v9730_v29 }
 0xdc1   :  { %v6588_v37 = vpop.eup %6587 }
 0xdc2   :  { %v9733_v31 = vmul.f32 %v6588_v37, %v6586_v35  ;;  %v4035_v35 = vld [vmem:[%s11578_s5 + $0x138] sm:$0xff]  ;;  %v4032_v37 = vld [vmem:[%s11578_s5 + $0x120] sm:$0xff] }
 0xdc4   :  { %3886 = vmatmul.mubr.f32.vlgmr.msra.gmra.mxu0 %v9733_v31  ;;  %3957 = vmatmul.mubr.f32.vlgmr.msra.gmra.mxu1 %v9733_v31 }
 0xdc5   :  { %4124 = vmatprep.mubr.f32.mxu0 %v12207_v60  ;;  %4195 = vmatprep.mubr.f32.mxu1 %v12207_v60 }
 0xdc6   :  { %4061 = vmatpush1.msra.mxu0 %v4056_v42  ;;  %4132 = vmatpush1.msra.mxu1 %v4058_v55  ;;  %v4031_v42 = vld [vmem:[%s11578_s5 + $0x118] sm:$0xff]  ;;  %v4028_v55 = vld [vmem:[%s11578_s5 + $0x100] sm:$0xff] }
 0xdc7   :  { %4062 = vmatprep.subr.mxu0 %v4053_v20  ;;  %4133 = vmatprep.subr.mxu1 %v4055_v9  ;;  %v4030_v20 = vld [vmem:[%s11578_s5 + $0x110] sm:$0xff]  ;;  %v4025_v9 = vld [vmem:[%s11578_s5 + $0xe8] sm:$0xff] }
 0xdc8   :  { %4063 = vmatpush1.msra.mxu0 %v4052_v0  ;;  %4134 = vmatpush1.msra.mxu1 %v4054_v49  ;;  %v4024_v0 = vld [vmem:[%s11578_s5 + $0xe0] sm:$0xff]  ;;  %v4021_v49 = vld [vmem:[%s11578_s5 + $0xc8] sm:$0xff] }
 0xdc9   :  { %4064 = vmatprep.subr.mxu0 %v4049_v21  ;;  %4135 = vmatprep.subr.mxu1 %v4051_v22 }
 0xdca   :  { %4065 = vmatpush1.msra.mxu0 %v4048_v18  ;;  %4136 = vmatpush1.msra.mxu1 %v4050_v59 }
 0xdcb   :  { %4066 = vmatprep.subr.mxu0 %v4045_v44  ;;  %4137 = vmatprep.subr.mxu1 %v4047_v63 }
 0xdcc   :  { %4067 = vmatpush1.msra.mxu0 %v4044_v36  ;;  %4138 = vmatpush1.msra.mxu1 %v4046_v32  ;;  %v4301_v32 = vld [vmem:[%s11580_s6 + $0x1e0] sm:$0xff] }
 0xdcd   :  { %4068 = vmatprep.subr.mxu0 %v4041_v2  ;;  %4139 = vmatprep.subr.mxu1 %v4043_v34  ;;  %v4303_v2 = vld [vmem:[%s11580_s6 + $0x1f0] sm:$0xff]  ;;  %v4300_v34 = vld [vmem:[%s11580_s6 + $0x1d8] sm:$0xff] }
 0xdce   :  { %4069 = vmatpush1.msra.mxu0 %v4040_v26  ;;  %4140 = vmatpush1.msra.mxu1 %v4042_v41  ;;  %v4297_v26 = vld [vmem:[%s11580_s6 + $0x1c0] sm:$0xff]  ;;  %v4299_v41 = vld [vmem:[%s11580_s6 + $0x1d0] sm:$0xff] }
 0xdcf   :  { %4070 = vmatprep.subr.mxu0 %v4037_v25  ;;  %4141 = vmatprep.subr.mxu1 %v4039_v53  ;;  %v4294_v25 = vld [vmem:[%s11580_s6 + $0x1a8] sm:$0xff]  ;;  %v4296_v53 = vld [vmem:[%s11580_s6 + $0x1b8] sm:$0xff] }
 0xdd0   :  { %4071 = vmatpush1.msra.mxu0 %v4036_v30  ;;  %4142 = vmatpush1.msra.mxu1 %v4038_v14  ;;  %v4293_v30 = vld [vmem:[%s11580_s6 + $0x1a0] sm:$0xff]  ;;  %v4295_v14 = vld [vmem:[%s11580_s6 + $0x1b0] sm:$0xff] }
 0xdd1   :  { %4072 = vmatprep.subr.mxu0 %v4033_v27  ;;  %4143 = vmatprep.subr.mxu1 %v4035_v35  ;;  %v4290_v27 = vld [vmem:[%s11580_s6 + $0x188] sm:$0xff]  ;;  %v4292_v35 = vld [vmem:[%s11580_s6 + $0x198] sm:$0xff] }
 0xdd2   :  { %4073 = vmatpush1.msra.mxu0 %v4032_v37  ;;  %4144 = vmatpush1.msra.mxu1 %v4034_v38  ;;  %v4289_v37 = vld [vmem:[%s11580_s6 + $0x180] sm:$0xff]  ;;  %v4291_v38 = vld [vmem:[%s11580_s6 + $0x190] sm:$0xff] }
 0xdd3   :  { %4074 = vmatprep.subr.mxu0 %v4029_v40  ;;  %4145 = vmatprep.subr.mxu1 %v4031_v42  ;;  %v4286_v40 = vld [vmem:[%s11580_s6 + $0x168] sm:$0xff]  ;;  %v4288_v42 = vld [vmem:[%s11580_s6 + $0x178] sm:$0xff] }
 0xdd4   :  { %4075 = vmatpush1.msra.mxu0 %v4028_v55  ;;  %4146 = vmatpush1.msra.mxu1 %v4030_v20  ;;  %v4285_v55 = vld [vmem:[%s11580_s6 + $0x160] sm:$0xff]  ;;  %v4287_v20 = vld [vmem:[%s11580_s6 + $0x170] sm:$0xff] }
 0xdd5   :  { %4076 = vmatprep.subr.mxu0 %v4025_v9  ;;  %4147 = vmatprep.subr.mxu1 %v9386_v3  ;;  %v4302_v3 = vld [vmem:[%s11580_s6 + $0x1e8] sm:$0xff] }
 0xdd6   :  { %4077 = vmatpush1.msra.mxu0 %v4024_v0  ;;  %4148 = vmatpush1.msra.mxu1 %v9391_v6  ;;  %v4304_v6 = vld [vmem:[%s11580_s6 + $0x1f8] sm:$0xff]  ;;  %v4282_v9 = vld [vmem:[%s11580_s6 + $0x148] sm:$0xff] }
 0xdd7   :  { %4078 = vmatprep.subr.mxu0 %v4021_v49  ;;  %4149 = vmatprep.subr.mxu1 %v9396_v8  ;;  %v12214_v8 = vld [vmem:[#allocation51_spill] sm:$0xff]  ;;  %v4284_v0 = vld [vmem:[%s11580_s6 + $0x158] sm:$0xff] }
 0xdd8   :  { %4079 = vmatpush1.msra.mxu0 %v9402_v1  ;;  %4150 = vmatpush1.msra.mxu1 %v9407_v11  ;;  %v2162_v1 = vadd.f32 %v12214_v8, %v12209_v50  ;;  %v4281_v49 = vld [vmem:[%s11580_s6 + $0x140] sm:$0xff]  ;;  %v4280_v8 = vld [vmem:[%s11580_s6 + $0x138] sm:$0xff] }
 0xdd9   :  { %4080 = vmatprep.subr.mxu0 %v9412_v48  ;;  %4151 = vmatprep.subr.mxu1 %v9419_v61  ;;  %v12215_v48 = vld [vmem:[#allocation53_spill] sm:$0xff] }
 0xdda   :  { %4081 = vmatpush1.msra.mxu0 %v9424_v62  ;;  %4152 = vmatpush1.msra.mxu1 %v12187_v23  ;;  %v2164_v61 = vadd.f32 %v12215_v48, %v12108_v33  ;;  %v4274_v48 = vld [vmem:[%s11580_s6 + $0x108] sm:$0xff] }
 0xddb   :  { %4082 = vmatprep.subr.mxu0 %v12188_v39  ;;  %4153 = vmatprep.subr.mxu1 %v12189_v43 }
 0xddc   :  { %4083 = vmatpush1.msra.mxu0 %v12190_v45  ;;  %4154 = vmatpush1.msra.mxu1 %v12191_v19 }
 0xddd   :  { %4084 = vmatprep.subr.mxu0 %v12192_v47  ;;  %4155 = vmatprep.subr.mxu1 %v12193_v51  ;;  %v12216_v51 = vld [vmem:[#allocation55_spill] sm:$0xff] }
 0xdde   :  { %4085 = vmatpush1.msra.mxu0 %v12194_v24  ;;  %4156 = vmatpush1.msra.mxu1 %v12195_v16  ;;  %v2277_v24 = vadd.f32 %v12216_v51, %v12110_v10  ;;  %v4268_v51 = vld [vmem:[%s11580_s6 + $0xd8] sm:$0xff] }
 0xddf   :  { %4086 = vmatprep.subr.mxu0 %v12196_v15  ;;  %4157 = vmatprep.subr.mxu1 %v12197_v13  ;;  %v12217_v15 = vld [vmem:[#allocation52_spill] sm:$0xff] }
 0xde0   :  { %4087 = vmatpush1.msra.mxu0 %v12198_v54  ;;  %4158 = vmatpush1.msra.mxu1 %v12199_v52  ;;  %v2275_v13 = vadd.f32 %v12217_v15, %v8999_v12  ;;  %v4262_v15 = vld [vmem:[%s11580_s6 + $0xa8] sm:$0xff] }
 0xde1   :  { %4088 = vmatprep.subr.mxu0 %v12200_v17  ;;  %4159 = vmatprep.subr.mxu1 %v12201_v56 }
 0xde2   :  { %4089 = vmatpush1.msra.mxu0 %v12202_v4  ;;  %4160 = vmatpush1.msra.mxu1 %v12203_v57 }
 0xde3   :  { %4090 = vmatprep.subr.mxu0 %v12204_v7  ;;  %4161 = vmatprep.subr.mxu1 %v12205_v46 }
 0xde4   :  { %4091 = vmatpush1.msra.mxu0 %v12206_v5  ;;  %4162 = vmatpush1.msra.mxu1 %v12208_v58 }
 0xde5   :  { %4327 = vmatprep.subr.mxu0 %v4302_v3  ;;  %4440 = vmatprep.subr.mxu1 %v4304_v6  ;;  %v4283_v3 = vld [vmem:[%s11580_s6 + $0x150] sm:$0xff]  ;;  %v4278_v6 = vld [vmem:[%s11580_s6 + $0x128] sm:$0xff] }
 0xe84   :  { %v3887_v11 = vpop.f32.mrf.mxu0  ;;  %v3958_v45 = vpop.f32.mrf.mxu1 }
 0xe85   :  { %v3963_v62 = vadd.f32 %v3887_v11, %v2162_v1  ;;  %v3965_v54 = vadd.f32 %v3958_v45, %v2275_v13  ;;  %v4277_v1 = vld [vmem:[%s11580_s6 + $0x120] sm:$0xff]  ;;  %v4279_v11 = vld [vmem:[%s11580_s6 + $0x130] sm:$0xff]  ;;  %v4264_v13 = vld [vmem:[%s11580_s6 + $0xb8] sm:$0xff] }
 0xe86   :  { %v3889_v23 = vpop.f32.mrf.mxu0  ;;  %v3960_v47 = vpop.f32.mrf.mxu1  ;;  %v4269_v45 = vld [vmem:[%s11580_s6 + $0xe0] sm:$0xff] }
 0xe87   :  { %v6277_v39 = vmul.f32 -1.442695, %v3963_v62  ;;  %v3964_v43 = vadd.f32 %v3889_v23, %v2164_v61  ;;  %v3966_v16 = vadd.f32 %v3960_v47, %v2277_v24  ;;  %v4276_v61 = vld [vmem:[%s11580_s6 + $0x118] sm:$0xff]  ;;  %v4273_v62 = vld [vmem:[%s11580_s6 + $0x100] sm:$0xff]  ;;  %v4275_v23 = vld [vmem:[%s11580_s6 + $0x110] sm:$0xff] }
 0xe88   :  { %v4266_v47 = vld [vmem:[%s11580_s6 + $0xc8] sm:$0xff]  ;;  %v4265_v24 = vld [vmem:[%s11580_s6 + $0xc0] sm:$0xff] }
 0xe89   :  { %6589 = vpow2.f32 %v6277_v39  ;;  %v6278_v19 = vmul.f32 -1.442695, %v3964_v43  ;;  %v6279_v52 = vmul.f32 -1.442695, %v3966_v16  ;;  %v4270_v39 = vld [vmem:[%s11580_s6 + $0xe8] sm:$0xff]  ;;  %v4272_v43 = vld [vmem:[%s11580_s6 + $0xf8] sm:$0xff] }
 0xe8a   :  { %v4267_v16 = vld [vmem:[%s11580_s6 + $0xd0] sm:$0xff] }
 0xe8b   :  { %6591 = vpow2.f32 %v6278_v19  ;;  %v4271_v19 = vld [vmem:[%s11580_s6 + $0xf0] sm:$0xff] }
 0xe8c   :  { %6593 = vtanh.f32 %v3965_v54  ;;  %v4261_v54 = vld [vmem:[%s11580_s6 + $0xa0] sm:$0xff] }
 0xe8d   :  { %6595 = vpow2.f32 %v6279_v52  ;;  %v4263_v52 = vld [vmem:[%s11580_s6 + $0xb0] sm:$0xff] }
 0xe96   :  { %v6590_v17 = vpop.eup %6589 }
 0xe97   :  { %v3970_v56 = vadd.f32 1.0, %v6590_v17  ;;  %v4258_v17 = vld [vmem:[%s11580_s6 + $0x88] sm:$0xff] }
 0xe98   :  { %v6592_v4 = vpop.eup %6591 }
 0xe99   :  { %6597 = vrcp.f32 %v3970_v56  ;;  %v3976_v57 = vadd.f32 1.0, %v6592_v4  ;;  %v6594_v7 = vpop.eup %6593  ;;  %v4260_v56 = vld [vmem:[%s11580_s6 + $0x98] sm:$0xff]  ;;  %v4257_v4 = vld [vmem:[%s11580_s6 + $0x80] sm:$0xff] }
 0xe9a   :  { %v6596_v46 = vpop.eup %6595 }
 0xe9b   :  { %6599 = vrcp.f32 %v3976_v57  ;;  %v3983_v22 = vadd.f32 1.0, %v6596_v46  ;;  %v4259_v57 = vld [vmem:[%s11580_s6 + $0x90] sm:$0xff]  ;;  %v4256_v46 = vld [vmem:[%s11580_s6 + $0x78] sm:$0xff] }
 0xe9d   :  { %6601 = vrcp.f32 %v3983_v22  ;;  %v4252_v22 = vld [vmem:[%s11580_s6 + $0x58] sm:$0xff] }
 0xea6   :  { %v6598_v5 = vpop.eup %6597 }
 0xea7   :  { %v3987_v58 = vmul.f32 %v6598_v5, %v6594_v7  ;;  %v4254_v7 = vld [vmem:[%s11580_s6 + $0x68] sm:$0xff]  ;;  %v4253_v5 = vld [vmem:[%s11580_s6 + $0x60] sm:$0xff] }
 0xea8   :  { %v6600_v21 = vpop.eup %6599 }
 0xea9   :  { %v3986_v18 = vmul.f32 %v6600_v21, %v9730_v29  ;;  %v4298_v29 = vld [vmem:[%s11580_s6 + $0x1c8] sm:$0xff] }
 0xeaa   :  { %v6602_v44 = vpop.eup %6601  ;;  %v4250_v21 = vld [vmem:[%s11580_s6 + $0x48] sm:$0xff] }
 0xeab   :  { %v9888_v59 = vadd.f32 %v3987_v58, %v3986_v18  ;;  %v4255_v58 = vld [vmem:[%s11580_s6 + $0x70] sm:$0xff]  ;;  %v4249_v18 = vld [vmem:[%s11580_s6 + $0x40] sm:$0xff] }
 0xead   :  { %6603 = vtanh.f32 %v9888_v59 }
 0xeba   :  { %v6604_v63 = vpop.eup %6603 }
 0xebb   :  { %v9891_v36 = vmul.f32 %v6604_v63, %v6602_v44  ;;  %v4251_v44 = vld [vmem:[%s11580_s6 + $0x50] sm:$0xff]  ;;  %v4246_v63 = vld [vmem:[%s11580_s6 + $0x28] sm:$0xff] }
 0xebd   :  { %4125 = vmatmul.mubr.f32.vlgmr.msra.gmra.mxu0 %v9891_v36  ;;  %4196 = vmatmul.mubr.f32.vlgmr.msra.gmra.mxu1 %v9891_v36 }
 0xebe   :  { %4328 = vmatpush1.msra.mxu0 %v4301_v32  ;;  %4441 = vmatpush1.msra.mxu1 %v4303_v2  ;;  %v4248_v32 = vld [vmem:[%s11580_s6 + $0x38] sm:$0xff]  ;;  %v4245_v2 = vld [vmem:[%s11580_s6 + $0x20] sm:$0xff] }
 0xebf   :  { %4329 = vmatprep.subr.mxu0 %v4298_v29  ;;  %4442 = vmatprep.subr.mxu1 %v4300_v34  ;;  %v4247_v29 = vld [vmem:[%s11580_s6 + $0x30] sm:$0xff]  ;;  %v4242_v34 = vld [vmem:[%s11580_s6 + $0x8] sm:$0xff] }
 0xec0   :  { %4330 = vmatpush1.msra.mxu0 %v4297_v26  ;;  %4443 = vmatpush1.msra.mxu1 %v4299_v41  ;;  %v4244_v26 = vld [vmem:[%s11580_s6 + $0x18] sm:$0xff]  ;;  %v4241_v41 = vld [vmem:[%s11580_s6] sm:$0xff] }
 0xec1   :  { %4331 = vmatprep.subr.mxu0 %v4294_v25  ;;  %4444 = vmatprep.subr.mxu1 %v4296_v53  ;;  %v4243_v25 = vld [vmem:[%s11580_s6 + $0x10] sm:$0xff]  ;;  %v12218_v53 = vld [vmem:[#allocation62_spill] sm:$0xff] }
 0xec2   :  { %4332 = vmatpush1.msra.mxu0 %v4293_v30  ;;  %4445 = vmatpush1.msra.mxu1 %v4295_v14  ;;  %v12219_v30 = vld [vmem:[#allocation20_spill] sm:$0xff] }
 0xec3   :  { %4333 = vmatprep.subr.mxu0 %v4290_v27  ;;  %4446 = vmatprep.subr.mxu1 %v4292_v35  ;;  %v12220_v14 = vld [vmem:[#allocation24_spill] sm:$0xff]  ;;  %v12221_v27 = vld [vmem:[#allocation22_spill] sm:$0xff]  ;;  %v10131_v35 = vld [vmem:[%s11581_s8 + $0x1f0] sm:$0xff] }
 0xec4   :  { %4334 = vmatpush1.msra.mxu0 %v4289_v37  ;;  %4447 = vmatpush1.msra.mxu1 %v4291_v38  ;;  %v10137_v37 = vld [vmem:[%s11581_s8 + $0x1c8] sm:$0xff]  ;;  %v10143_v38 = vld [vmem:[%s11581_s8 + $0x1d8] sm:$0xff] }
 0xec5   :  { %4335 = vmatprep.subr.mxu0 %v4286_v40  ;;  %4448 = vmatprep.subr.mxu1 %v4288_v42  ;;  %v10149_v40 = vld [vmem:[%s11581_s8 + $0x1c0] sm:$0xff]  ;;  %v10155_v42 = vld [vmem:[%s11581_s8 + $0x1d0] sm:$0xff] }
 0xec6   :  { %4336 = vmatpush1.msra.mxu0 %v4285_v55  ;;  %4449 = vmatpush1.msra.mxu1 %v4287_v20  ;;  %v10161_v55 = vld [vmem:[%s11581_s8 + $0x1a8] sm:$0xff]  ;;  %v10167_v20 = vld [vmem:[%s11581_s8 + $0x1b8] sm:$0xff] }
 0xec7   :  { %4337 = vmatprep.subr.mxu0 %v4282_v9  ;;  %4450 = vmatprep.subr.mxu1 %v4284_v0  ;;  %v10173_v9 = vld [vmem:[%s11581_s8 + $0x1a0] sm:$0xff]  ;;  %v10179_v0 = vld [vmem:[%s11581_s8 + $0x1b0] sm:$0xff] }
 0xec8   :  { %4338 = vmatpush1.msra.mxu0 %v4281_v49  ;;  %4451 = vmatpush1.msra.mxu1 %v4283_v3  ;;  %v10185_v49 = vld [vmem:[%s11581_s8 + $0x188] sm:$0xff]  ;;  %v10191_v3 = vld [vmem:[%s11581_s8 + $0x198] sm:$0xff] }
 0xec9   :  { %4339 = vmatprep.subr.mxu0 %v4278_v6  ;;  %4452 = vmatprep.subr.mxu1 %v4280_v8  ;;  %v10197_v6 = vld [vmem:[%s11581_s8 + $0x180] sm:$0xff]  ;;  %v10203_v8 = vld [vmem:[%s11581_s8 + $0x190] sm:$0xff] }
 0xeca   :  { %4340 = vmatpush1.msra.mxu0 %v4277_v1  ;;  %4453 = vmatpush1.msra.mxu1 %v4279_v11  ;;  %v10209_v1 = vld [vmem:[%s11581_s8 + $0x168] sm:$0xff]  ;;  %v10215_v11 = vld [vmem:[%s11581_s8 + $0x178] sm:$0xff] }
 0xecb   :  { %4341 = vmatprep.subr.mxu0 %v4274_v48  ;;  %4454 = vmatprep.subr.mxu1 %v4276_v61  ;;  %v10221_v48 = vld [vmem:[%s11581_s8 + $0x160] sm:$0xff]  ;;  %v10227_v61 = vld [vmem:[%s11581_s8 + $0x170] sm:$0xff] }
 0xecc   :  { %4342 = vmatpush1.msra.mxu0 %v4273_v62  ;;  %4455 = vmatpush1.msra.mxu1 %v4275_v23  ;;  %v10233_v62 = vld [vmem:[%s11581_s8 + $0x148] sm:$0xff]  ;;  %v10239_v23 = vld [vmem:[%s11581_s8 + $0x158] sm:$0xff] }
 0xecd   :  { %4343 = vmatprep.subr.mxu0 %v4270_v39  ;;  %4456 = vmatprep.subr.mxu1 %v4272_v43  ;;  %v10245_v39 = vld [vmem:[%s11581_s8 + $0x140] sm:$0xff]  ;;  %v10251_v43 = vld [vmem:[%s11581_s8 + $0x150] sm:$0xff] }
 0xece   :  { %4344 = vmatpush1.msra.mxu0 %v4269_v45  ;;  %4457 = vmatpush1.msra.mxu1 %v4271_v19  ;;  %v10257_v45 = vld [vmem:[%s11581_s8 + $0x128] sm:$0xff]  ;;  %v10263_v19 = vld [vmem:[%s11581_s8 + $0x138] sm:$0xff] }
 0xecf   :  { %4345 = vmatprep.subr.mxu0 %v4266_v47  ;;  %4458 = vmatprep.subr.mxu1 %v4268_v51  ;;  %v10269_v47 = vld [vmem:[%s11581_s8 + $0x120] sm:$0xff]  ;;  %v10275_v51 = vld [vmem:[%s11581_s8 + $0x130] sm:$0xff] }
 0xed0   :  { %4346 = vmatpush1.msra.mxu0 %v4265_v24  ;;  %4459 = vmatpush1.msra.mxu1 %v4267_v16  ;;  %v10281_v24 = vld [vmem:[%s11581_s8 + $0x108] sm:$0xff]  ;;  %v10287_v16 = vld [vmem:[%s11581_s8 + $0x118] sm:$0xff] }
 0xed1   :  { %4347 = vmatprep.subr.mxu0 %v4262_v15  ;;  %4460 = vmatprep.subr.mxu1 %v4264_v13  ;;  %v10293_v15 = vld [vmem:[%s11581_s8 + $0x100] sm:$0xff]  ;;  %v10299_v13 = vld [vmem:[%s11581_s8 + $0x110] sm:$0xff] }
 0xed2   :  { %4348 = vmatpush1.msra.mxu0 %v4261_v54  ;;  %4461 = vmatpush1.msra.mxu1 %v4263_v52  ;;  %v10305_v54 = vld [vmem:[%s11581_s8 + $0xe8] sm:$0xff]  ;;  %v10311_v52 = vld [vmem:[%s11581_s8 + $0xf8] sm:$0xff] }
 0xed3   :  { %4349 = vmatprep.subr.mxu0 %v4258_v17  ;;  %4462 = vmatprep.subr.mxu1 %v4260_v56  ;;  %v10317_v17 = vld [vmem:[%s11581_s8 + $0xe0] sm:$0xff]  ;;  %v10323_v56 = vld [vmem:[%s11581_s8 + $0xf0] sm:$0xff] }
 0xed4   :  { %4350 = vmatpush1.msra.mxu0 %v4257_v4  ;;  %4463 = vmatpush1.msra.mxu1 %v4259_v57  ;;  %v10329_v4 = vld [vmem:[%s11581_s8 + $0xc8] sm:$0xff]  ;;  %v10335_v57 = vld [vmem:[%s11581_s8 + $0xd8] sm:$0xff] }
 0xed5   :  { %4351 = vmatprep.subr.mxu0 %v4254_v7  ;;  %4464 = vmatprep.subr.mxu1 %v4256_v46  ;;  %v10341_v7 = vld [vmem:[%s11581_s8 + $0xc0] sm:$0xff]  ;;  %v10347_v46 = vld [vmem:[%s11581_s8 + $0xd0] sm:$0xff] }
 0xed6   :  { %4352 = vmatpush1.msra.mxu0 %v4253_v5  ;;  %4465 = vmatpush1.msra.mxu1 %v4255_v58  ;;  %v10353_v5 = vld [vmem:[%s11581_s8 + $0xa8] sm:$0xff]  ;;  %v10359_v58 = vld [vmem:[%s11581_s8 + $0xb8] sm:$0xff] }
 0xed7   :  { %4353 = vmatprep.subr.mxu0 %v4250_v21  ;;  %4466 = vmatprep.subr.mxu1 %v4252_v22  ;;  %v10365_v21 = vld [vmem:[%s11581_s8 + $0xa0] sm:$0xff]  ;;  %v10371_v22 = vld [vmem:[%s11581_s8 + $0xb0] sm:$0xff] }
 0xed8   :  { %4354 = vmatpush1.msra.mxu0 %v4249_v18  ;;  %4467 = vmatpush1.msra.mxu1 %v4251_v44  ;;  %12224 = vst [vmem:[#allocation29_spill] sm:$0xff] %v10365_v21  ;;  %12225 = vst [vmem:[#allocation38_spill] sm:$0xff] %v10371_v22  ;;  %v10377_v18 = vld [vmem:[%s11581_s8 + $0x88] sm:$0xff]  ;;  %v10383_v44 = vld [vmem:[%s11581_s8 + $0x98] sm:$0xff] }
 0xed9   :  { %4355 = vmatprep.subr.mxu0 %v4246_v63  ;;  %4468 = vmatprep.subr.mxu1 %v4248_v32  ;;  %12226 = vst [vmem:[#allocation40_spill] sm:$0xff] %v10377_v18  ;;  %12227 = vst [vmem:[#allocation41_spill] sm:$0xff] %v10383_v44  ;;  %v10389_v63 = vld [vmem:[%s11581_s8 + $0x80] sm:$0xff]  ;;  %v10395_v32 = vld [vmem:[%s11581_s8 + $0x90] sm:$0xff] }
 0xeda   :  { %4356 = vmatpush1.msra.mxu0 %v4245_v2  ;;  %4469 = vmatpush1.msra.mxu1 %v4247_v29  ;;  %12228 = vst [vmem:[#allocation39_spill] sm:$0xff] %v10389_v63  ;;  %12229 = vst [vmem:[#allocation21_spill] sm:$0xff] %v10395_v32  ;;  %v10401_v2 = vld [vmem:[%s11581_s8 + $0x68] sm:$0xff]  ;;  %v10407_v29 = vld [vmem:[%s11581_s8 + $0x78] sm:$0xff] }
 0xedb   :  { %4357 = vmatprep.subr.mxu0 %v4242_v34  ;;  %4470 = vmatprep.subr.mxu1 %v4244_v26  ;;  %12230 = vst [vmem:[#allocation14_spill] sm:$0xff] %v10401_v2  ;;  %12231 = vst [vmem:[#allocation42_spill] sm:$0xff] %v10407_v29  ;;  %v10413_v34 = vld [vmem:[%s11581_s8 + $0x60] sm:$0xff]  ;;  %v10419_v26 = vld [vmem:[%s11581_s8 + $0x70] sm:$0xff] }
 0xedc   :  { %4358 = vmatpush1.msra.mxu0 %v4241_v41  ;;  %4391 = vmatprep.mubr.f32.mxu0 %v12207_v60  ;;  %12232 = vst [vmem:[#allocation44_spill] sm:$0xff] %v10413_v34  ;;  %12233 = vst [vmem:[#allocation45_spill] sm:$0xff] %v10419_v26  ;;  %v10425_v41 = vld [vmem:[%s11581_s8 + $0x48] sm:$0xff] }
 0xedd   :  { %4471 = vmatpush1.msra.mxu1 %v4243_v25  ;;  %4504 = vmatprep.mubr.f32.mxu1 %v12207_v60  ;;  %12234 = vst [vmem:[#allocation43_spill] sm:$0xff] %v10425_v41  ;;  %v10431_v25 = vld [vmem:[%s11581_s8 + $0x58] sm:$0xff] }
 0xede   :  { %4392 = vmatmul.mubr.f32.vlgmr.msra.gmra.mxu0 %v12218_v53  ;;  %4505 = vmatmul.mubr.f32.vlgmr.msra.gmra.mxu1 %v12218_v53  ;;  %12235 = vst [vmem:[#allocation11_spill] sm:$0xff] %v10431_v25  ;;  %v10437_v53 = vld [vmem:[%s11581_s8 + $0x40] sm:$0xff] }
 0xedf   :  { %4397 = vmatprep.mubr.f32.mxu0 %v12207_v60  ;;  %4510 = vmatprep.mubr.f32.mxu1 %v12207_v60  ;;  %12236 = vst [vmem:[#allocation16_spill] sm:$0xff] %v10437_v53 }
 0xee2   :  { %4398 = vmatmul.mubr.f32.gmra.mxu0 %v12219_v30  ;;  %4511 = vmatmul.mubr.f32.gmra.mxu1 %v12219_v30  ;;  %v10443_v30 = vld [vmem:[%s11581_s8 + $0x50] sm:$0xff] }
 0xee3   :  { %4403 = vmatprep.mubr.f32.mxu0 %v12207_v60  ;;  %4516 = vmatprep.mubr.f32.mxu1 %v12207_v60  ;;  %12237 = vst [vmem:[#allocation25_spill] sm:$0xff] %v10443_v30 }
 0xee6   :  { %4404 = vmatmul.mubr.f32.gmra.mxu0 %v12220_v14  ;;  %4517 = vmatmul.mubr.f32.gmra.mxu1 %v12220_v14  ;;  %v10449_v14 = vld [vmem:[%s11581_s8 + $0x28] sm:$0xff] }
 0xee7   :  { %4409 = vmatprep.mubr.f32.mxu0 %v12207_v60  ;;  %4522 = vmatprep.mubr.f32.mxu1 %v12207_v60  ;;  %12238 = vst [vmem:[#allocation12_spill] sm:$0xff] %v10449_v14 }
 0xeea   :  { %4410 = vmatmul.mubr.f32.gmra.mxu0 %v12221_v27  ;;  %4523 = vmatmul.mubr.f32.gmra.mxu1 %v12221_v27  ;;  %v10455_v27 = vld [vmem:[%s11581_s8 + $0x38] sm:$0xff] }
 0xeeb   :  { %4415 = vmatprep.mubr.f32.mxu0 %v12207_v60  ;;  %4528 = vmatprep.mubr.f32.mxu1 %v12207_v60  ;;  %12239 = vst [vmem:[#allocation26_spill] sm:$0xff] %v10455_v27 }
 0xeee   :  { %4416 = vmatmul.mubr.f32.gmra.mxu0 %v9653_v28  ;;  %4529 = vmatmul.mubr.f32.gmra.mxu1 %v9653_v28  ;;  %v10114_v28 = vld [vmem:[%s11581_s8 + $0x1e8] sm:$0xff] }
 0xeef   :  { %4421 = vmatprep.mubr.f32.mxu0 %v12207_v60  ;;  %4534 = vmatprep.mubr.f32.mxu1 %v12207_v60  ;;  %12222 = vst [vmem:[#allocation23_spill] sm:$0xff] %v10114_v28 }
 0xef0   :  { %4656 = vmatprep.subr.mxu0 %v10114_v28 }
 0xef2   :  { %4422 = vmatmul.mubr.f32.gmra.mxu0 %v9733_v31  ;;  %4535 = vmatmul.mubr.f32.gmra.mxu1 %v9733_v31  ;;  %v10119_v31 = vld [vmem:[%s11581_s8 + $0x1f8] sm:$0xff] }
 0xef3   :  { %4427 = vmatprep.mubr.f32.mxu0 %v12207_v60  ;;  %4540 = vmatprep.mubr.f32.mxu1 %v12207_v60  ;;  %12223 = vst [vmem:[#allocation15_spill] sm:$0xff] %v10119_v31 }
 0xef4   :  { %4727 = vmatprep.subr.mxu1 %v10119_v31 }
 0xef5   :  { %4728 = vmatpush1.msra.mxu1 %v10131_v35 }
 0xef6   :  { %4428 = vmatmul.mubr.f32.gmra.mxu0 %v9891_v36  ;;  %4541 = vmatmul.mubr.f32.gmra.mxu1 %v9891_v36  ;;  %v10125_v36 = vld [vmem:[%s11581_s8 + $0x1e0] sm:$0xff] }
 0xef7   :  { %4433 = vmatprep.mubr.f32.mxu0 %v12207_v60  ;;  %4546 = vmatprep.mubr.f32.mxu1 %v12207_v60 }
 0xef8   :  { %4657 = vmatpush1.msra.mxu0 %v10125_v36  ;;  %4729 = vmatprep.subr.mxu1 %v10143_v38 }
 0xef9   :  { %4658 = vmatprep.subr.mxu0 %v10137_v37  ;;  %4730 = vmatpush1.msra.mxu1 %v10155_v42 }
 0xefa   :  { %4659 = vmatpush1.msra.mxu0 %v10149_v40  ;;  %4731 = vmatprep.subr.mxu1 %v10167_v20 }
 0xefb   :  { %4660 = vmatprep.subr.mxu0 %v10161_v55  ;;  %4732 = vmatpush1.msra.mxu1 %v10179_v0 }
 0xefc   :  { %4661 = vmatpush1.msra.mxu0 %v10173_v9  ;;  %4733 = vmatprep.subr.mxu1 %v10191_v3 }
 0xefd   :  { %4662 = vmatprep.subr.mxu0 %v10185_v49  ;;  %4734 = vmatpush1.msra.mxu1 %v10203_v8 }
 0xefe   :  { %4663 = vmatpush1.msra.mxu0 %v10197_v6  ;;  %4735 = vmatprep.subr.mxu1 %v10215_v11 }
 0xeff   :  { %4664 = vmatprep.subr.mxu0 %v10209_v1  ;;  %4736 = vmatpush1.msra.mxu1 %v10227_v61 }
 0xf00   :  { %4665 = vmatpush1.msra.mxu0 %v10221_v48  ;;  %4737 = vmatprep.subr.mxu1 %v10239_v23 }
 0xf01   :  { %4666 = vmatprep.subr.mxu0 %v10233_v62  ;;  %4738 = vmatpush1.msra.mxu1 %v10251_v43 }
 0xf02   :  { %4667 = vmatpush1.msra.mxu0 %v10245_v39  ;;  %4739 = vmatprep.subr.mxu1 %v10263_v19 }
 0xf03   :  { %4668 = vmatprep.subr.mxu0 %v10257_v45  ;;  %4740 = vmatpush1.msra.mxu1 %v10275_v51 }
 0xf04   :  { %4669 = vmatpush1.msra.mxu0 %v10269_v47  ;;  %4741 = vmatprep.subr.mxu1 %v10287_v16 }
 0xf05   :  { %4670 = vmatprep.subr.mxu0 %v10281_v24  ;;  %4742 = vmatpush1.msra.mxu1 %v10299_v13 }
 0xf06   :  { %4671 = vmatpush1.msra.mxu0 %v10293_v15  ;;  %4743 = vmatprep.subr.mxu1 %v10311_v52 }
 0xf07   :  { %4672 = vmatprep.subr.mxu0 %v10305_v54  ;;  %4744 = vmatpush1.msra.mxu1 %v10323_v56 }
 0xf08   :  { %4673 = vmatpush1.msra.mxu0 %v10317_v17  ;;  %4745 = vmatprep.subr.mxu1 %v10335_v57 }
 0xf09   :  { %4674 = vmatprep.subr.mxu0 %v10329_v4  ;;  %4746 = vmatpush1.msra.mxu1 %v10347_v46 }
 0xf0a   :  { %4675 = vmatpush1.msra.mxu0 %v10341_v7  ;;  %4747 = vmatprep.subr.mxu1 %v10359_v58 }
 0xf0b   :  { %4676 = vmatprep.subr.mxu0 %v10353_v5  ;;  %4748 = vmatpush1.msra.mxu1 %v10371_v22 }
 0xf0c   :  { %4677 = vmatpush1.msra.mxu0 %v10365_v21  ;;  %4749 = vmatprep.subr.mxu1 %v10383_v44 }
 0xf0d   :  { %4678 = vmatprep.subr.mxu0 %v10377_v18  ;;  %4750 = vmatpush1.msra.mxu1 %v10395_v32  ;;  %v12250_v18 = vld [vmem:[#allocation58_spill] sm:$0xff] }
 0xf0e   :  { %4679 = vmatpush1.msra.mxu0 %v10389_v63  ;;  %4751 = vmatprep.subr.mxu1 %v10407_v29 }
 0xf0f   :  { %4680 = vmatprep.subr.mxu0 %v10401_v2  ;;  %4752 = vmatpush1.msra.mxu1 %v10419_v26  ;;  %v12248_v26 = vld [vmem:[#allocation59_spill] sm:$0xff] }
 0xf10   :  { %4681 = vmatpush1.msra.mxu0 %v10413_v34  ;;  %4753 = vmatprep.subr.mxu1 %v10431_v25  ;;  %v10461_v25 = vld [vmem:[%s11581_s8 + $0x20] sm:$0xff]  ;;  %v2170_v34 = vadd.f32 %v12248_v26, %v12108_v33 }
 0xf11   :  { %4682 = vmatprep.subr.mxu0 %v10425_v41  ;;  %4754 = vmatpush1.msra.mxu1 %v10443_v30  ;;  %12240 = vst [vmem:[#allocation31_spill] sm:$0xff] %v10461_v25  ;;  %v10473_v30 = vld [vmem:[%s11581_s8 + $0x8] sm:$0xff]  ;;  %v11827_v41 = vmov 0  }
 0xf12   :  { %4683 = vmatpush1.msra.mxu0 %v10437_v53  ;;  %4755 = vmatprep.subr.mxu1 %v10455_v27  ;;  %v10467_v53 = vld [vmem:[%s11581_s8 + $0x30] sm:$0xff]  ;;  %12242 = vst [vmem:[#allocation19_spill] sm:$0xff] %v10473_v30  ;;  %v10484_v27 = vld [vmem:[%s11581_s8 + $0x18] sm:$0xff] }
 0xf13   :  { %4684 = vmatprep.subr.mxu0 %v10449_v14  ;;  %12241 = vst [vmem:[#allocation18_spill] sm:$0xff] %v10467_v53  ;;  %4756 = vmatpush1.msra.mxu1 %v10467_v53  ;;  %v10479_v14 = vld [vmem:[%s11581_s8] sm:$0xff]  ;;  %12244 = vst [vmem:[#allocation30_spill] sm:$0xff] %v10484_v27 }
 0xf14   :  { %4685 = vmatpush1.msra.mxu0 %v10461_v25  ;;  %12243 = vst [vmem:[#allocation17_spill] sm:$0xff] %v10479_v14  ;;  %4757 = vmatprep.subr.mxu1 %v10484_v27  ;;  %v10491_v25 = vld [vmem:[%s11581_s8 + $0x10] sm:$0xff]  ;;  %v10498_v53 = vld [vmem:[%s11582_s0] sm:$0xff] }
 0xf15   :  { %4686 = vmatprep.subr.mxu0 %v10473_v30  ;;  %12245 = vst [vmem:[#allocation57_spill] sm:$0xff] %v10491_v25  ;;  %4758 = vmatpush1.msra.mxu1 %v10491_v25  ;;  %12246 = vst [vmem:[#allocation32_spill] sm:$0xff] %v10498_v53  ;;  %vm4830_vm0 = vcmp.eq.s32.totalorder %v10498_v53, 1  ;;  %v12247_v25 = vld [vmem:[#allocation56_spill] sm:$0xff] }
 0xf16   :  { %4687 = vmatpush1.msra.mxu0 %v10479_v14  ;;  %6363 = vset.pattern.permute.xlu0 %v11827_v41  ;;  %v4831_v27 = vsel %vm4830_vm0, 1, %v11827_v41  ;;  %v2168_v14 = vadd.f32 %v12247_v25, %v12209_v50  ;;  %v2281_v50 = vadd.f32 %v12250_v18, %v8999_v12  ;;  %v12253_v18 = vld [vmem:[#allocation40_spill] sm:$0xff] }
 0xf17   :  { %4841 = vmatprep.subr.mxu0 %v10114_v28  ;;  %4912 = vmatprep.subr.mxu1 %v10119_v31  ;;  %v12249_v31 = vld [vmem:[#allocation60_spill] sm:$0xff] }
 0xf18   :  { %6364 = vset.pattern.permute.xlu1 %v11827_v41  ;;  %4833 = vperm.xlu0 %6363, %v4831_v27   ;;  %v2283_v41 = vadd.f32 %v12249_v31, %v12110_v10 }
 0xf7d   :  { %v4126_v30 = vpop.f32.mrf.mxu0  ;;  %v4197_v28 = vpop.f32.mrf.mxu1 }
 0xf7e   :  { %v4202_v29 = vadd.f32 %v4126_v30, %v2168_v14  ;;  %v4204_v25 = vadd.f32 %v4197_v28, %v2281_v50  ;;  %v12255_v30 = vld [vmem:[#allocation39_spill] sm:$0xff]  ;;  %v12256_v14 = vld [vmem:[#allocation21_spill] sm:$0xff]  ;;  %v12258_v50 = vld [vmem:[#allocation42_spill] sm:$0xff] }
 0xf7f   :  { %v4128_v2 = vpop.f32.mrf.mxu0  ;;  %v4199_v44 = vpop.f32.mrf.mxu1 }
 0xf80   :  { %v6280_v32 = vmul.f32 -1.442695, %v4202_v29  ;;  %v4203_v53 = vadd.f32 %v4128_v2, %v2170_v34  ;;  %v4205_v27 = vadd.f32 %v4199_v44, %v2283_v41  ;;  %v12254_v41 = vld [vmem:[#allocation41_spill] sm:$0xff] }
 0xf82   :  { %6605 = vpow2.f32 %v6280_v32  ;;  %v6281_v63 = vmul.f32 -1.442695, %v4203_v53  ;;  %v6282_v22 = vmul.f32 -1.442695, %v4205_v27  ;;  %v12257_v27 = vld [vmem:[#allocation14_spill] sm:$0xff] }
 0xf84   :  { %6607 = vpow2.f32 %v6281_v63 }
 0xf85   :  { %6609 = vtanh.f32 %v4204_v25  ;;  %v12259_v25 = vld [vmem:[#allocation44_spill] sm:$0xff] }
 0xf86   :  { %6611 = vpow2.f32 %v6282_v22  ;;  %v12252_v22 = vld [vmem:[#allocation38_spill] sm:$0xff] }
 0xf8f   :  { %v6606_v21 = vpop.eup %6605 }
 0xf90   :  { %v4209_v33 = vadd.f32 1.0, %v6606_v21 }
 0xf91   :  { %v6608_v26 = vpop.eup %6607 }
 0xf92   :  { %6613 = vrcp.f32 %v4209_v33  ;;  %v4215_v32 = vadd.f32 1.0, %v6608_v26  ;;  %v6610_v2 = vpop.eup %6609  ;;  %v12260_v33 = vld [vmem:[#allocation45_spill] sm:$0xff]  ;;  %v12261_v26 = vld [vmem:[#allocation43_spill] sm:$0xff] }
 0xf93   :  { %v6612_v63 = vpop.eup %6611 }
 0xf94   :  { %6615 = vrcp.f32 %v4215_v32  ;;  %v4222_v10 = vadd.f32 1.0, %v6612_v63  ;;  %v12262_v32 = vld [vmem:[#allocation11_spill] sm:$0xff]  ;;  %v12264_v63 = vld [vmem:[#allocation25_spill] sm:$0xff] }
 0xf96   :  { %6617 = vrcp.f32 %v4222_v10  ;;  %v12268_v10 = vld [vmem:[#allocation18_spill] sm:$0xff] }
 0xf9f   :  { %v6614_v29 = vpop.eup %6613 }
 0xfa0   :  { %v4226_v34 = vmul.f32 %v6614_v29, %v6610_v2  ;;  %v12263_v2 = vld [vmem:[#allocation16_spill] sm:$0xff] }
 0xfa1   :  { %v6616_v53 = vpop.eup %6615  ;;  %v12265_v29 = vld [vmem:[#allocation12_spill] sm:$0xff] }
 0xfa2   :  { %v4225_v31 = vmul.f32 %v6616_v53, %v9888_v59  ;;  %v12251_v59 = vld [vmem:[#allocation29_spill] sm:$0xff]  ;;  %v12267_v53 = vld [vmem:[#allocation31_spill] sm:$0xff] }
 0xfa3   :  { %v6618_v12 = vpop.eup %6617 }
 0xfa4   :  { %v4227_v44 = vadd.f32 %v4226_v34, %v4225_v31  ;;  %v12266_v34 = vld [vmem:[#allocation26_spill] sm:$0xff]  ;;  %v12269_v31 = vld [vmem:[#allocation19_spill] sm:$0xff] }
 0xfa6   :  { %6619 = vtanh.f32 %v4227_v44  ;;  %v12270_v44 = vld [vmem:[#allocation30_spill] sm:$0xff] }
 0xfb3   :  { %v6620_v28 = vpop.eup %6619 }
 0xfb4   :  { %v4229_v21 = vmul.f32 %v6620_v28, %v6618_v12  ;;  %v12271_v12 = vld [vmem:[#allocation17_spill] sm:$0xff] }
 0xfb5   :  { %v12272_v28 = vld [vmem:[#allocation57_spill] sm:$0xff] }
 0xfb6   :  { %4434 = vmatmul.mubr.f32.gmra.mxu0 %v4229_v21  ;;  %4547 = vmatmul.mubr.f32.gmra.mxu1 %v4229_v21  ;;  %v12273_v21 = vld [vmem:[#allocation23_spill] sm:$0xff] }
 0xfb7   :  { %4720 = vmatprep.mubr.f32.mxu0 %v12207_v60  ;;  %4791 = vmatprep.mubr.f32.mxu1 %v12207_v60 }
 0xfba   :  { %4721 = vmatmul.mubr.f32.vlgmr.msra.gmra.mxu0 %v12207_v60  ;;  %4792 = vmatmul.mubr.f32.vlgmr.msra.gmra.mxu1 %v12207_v60 }
 0xfbb   :  { %4842 = vmatpush1.msra.mxu0 %v10125_v36  ;;  %4913 = vmatpush1.msra.mxu1 %v10131_v35 }
 0xfbc   :  { %4843 = vmatprep.subr.mxu0 %v10137_v37  ;;  %4914 = vmatprep.subr.mxu1 %v10143_v38 }
 0xfbd   :  { %4844 = vmatpush1.msra.mxu0 %v10149_v40  ;;  %4915 = vmatpush1.msra.mxu1 %v10155_v42 }
 0xfbe   :  { %4845 = vmatprep.subr.mxu0 %v10161_v55  ;;  %4916 = vmatprep.subr.mxu1 %v10167_v20 }
 0xfbf   :  { %4846 = vmatpush1.msra.mxu0 %v10173_v9  ;;  %4917 = vmatpush1.msra.mxu1 %v10179_v0 }
 0xfc0   :  { %4847 = vmatprep.subr.mxu0 %v10185_v49  ;;  %4918 = vmatprep.subr.mxu1 %v10191_v3 }
 0xfc1   :  { %4848 = vmatpush1.msra.mxu0 %v10197_v6  ;;  %4919 = vmatpush1.msra.mxu1 %v10203_v8 }
 0xfc2   :  { %4849 = vmatprep.subr.mxu0 %v10209_v1  ;;  %4920 = vmatprep.subr.mxu1 %v10215_v11 }
 0xfc3   :  { %4850 = vmatpush1.msra.mxu0 %v10221_v48  ;;  %4921 = vmatpush1.msra.mxu1 %v10227_v61 }
 0xfc4   :  { %4851 = vmatprep.subr.mxu0 %v10233_v62  ;;  %4922 = vmatprep.subr.mxu1 %v10239_v23 }
 0xfc5   :  { %4852 = vmatpush1.msra.mxu0 %v10245_v39  ;;  %4923 = vmatpush1.msra.mxu1 %v10251_v43 }
 0xfc6   :  { %4853 = vmatprep.subr.mxu0 %v10257_v45  ;;  %4924 = vmatprep.subr.mxu1 %v10263_v19 }
 0xfc7   :  { %4854 = vmatpush1.msra.mxu0 %v10269_v47  ;;  %4925 = vmatpush1.msra.mxu1 %v10275_v51 }
 0xfc8   :  { %4855 = vmatprep.subr.mxu0 %v10281_v24  ;;  %4926 = vmatprep.subr.mxu1 %v10287_v16 }
 0xfc9   :  { %4856 = vmatpush1.msra.mxu0 %v10293_v15  ;;  %4927 = vmatpush1.msra.mxu1 %v10299_v13 }
 0xfca   :  { %4857 = vmatprep.subr.mxu0 %v10305_v54  ;;  %4928 = vmatprep.subr.mxu1 %v10311_v52 }
 0xfcb   :  { %4858 = vmatpush1.msra.mxu0 %v10317_v17  ;;  %4929 = vmatpush1.msra.mxu1 %v10323_v56 }
 0xfcc   :  { %4859 = vmatprep.subr.mxu0 %v10329_v4  ;;  %4930 = vmatprep.subr.mxu1 %v10335_v57 }
 0xfcd   :  { %4860 = vmatpush1.msra.mxu0 %v10341_v7  ;;  %4931 = vmatpush1.msra.mxu1 %v10347_v46 }
 0xfce   :  { %4861 = vmatprep.subr.mxu0 %v10353_v5  ;;  %4932 = vmatprep.subr.mxu1 %v10359_v58 }
 0xfcf   :  { %4862 = vmatpush1.msra.mxu0 %v12251_v59  ;;  %4933 = vmatpush1.msra.mxu1 %v12252_v22 }
 0xfd0   :  { %4863 = vmatprep.subr.mxu0 %v12253_v18  ;;  %4934 = vmatprep.subr.mxu1 %v12254_v41 }
 0xfd1   :  { %4864 = vmatpush1.msra.mxu0 %v12255_v30  ;;  %4935 = vmatpush1.msra.mxu1 %v12256_v14 }
 0xfd2   :  { %4865 = vmatprep.subr.mxu0 %v12257_v27  ;;  %4936 = vmatprep.subr.mxu1 %v12258_v50 }
 0xfd3   :  { %4866 = vmatpush1.msra.mxu0 %v12259_v25  ;;  %4937 = vmatpush1.msra.mxu1 %v12260_v33 }
 0xfd4   :  { %4867 = vmatprep.subr.mxu0 %v12261_v26  ;;  %4938 = vmatprep.subr.mxu1 %v12262_v32 }
 0xfd5   :  { %4868 = vmatpush1.msra.mxu0 %v12263_v2  ;;  %4939 = vmatpush1.msra.mxu1 %v12264_v63  ;;  %v4506_v63 = vpop.f32.mrf.mxu1 }
 0xfd6   :  { %4869 = vmatprep.subr.mxu0 %v12265_v29  ;;  %4940 = vmatprep.subr.mxu1 %v12266_v34  ;;  %v12274_v29 = vld [vmem:[#allocation15_spill] sm:$0xff]  ;;  %v12275_v34 = vld [vmem:[#allocation32_spill] sm:$0xff] }
 0xfd7   :  { %4870 = vmatpush1.msra.mxu0 %v12267_v53  ;;  %4941 = vmatpush1.msra.mxu1 %v12268_v10  ;;  %vm5013_vm1 = vcmp.eq.s32.totalorder %v12275_v34, 2  ;;  %v12276_v53 = vmov 0   ;;  %v4508_v2 = vpop.f32.mrf.mxu1 }
 0xfd8   :  { %4871 = vmatprep.subr.mxu0 %v12269_v31  ;;  %4942 = vmatprep.subr.mxu1 %v12270_v44  ;;  %v5014_v10 = vsel %vm5013_vm1, 1, %v12276_v53  ;;  %v4393_v31 = vpop.f32.mrf.mxu0  ;;  %vm6229_vm1 = vcmask 15360  }
 0xfd9   :  { %4872 = vmatpush1.msra.mxu0 %v12271_v12  ;;  %4905 = vmatprep.mubr.f32.mxu0 %v12207_v60  ;;  %v10589_v32 = vpop.f32.mrf.mxu1 }
 0xfda   :  { %4943 = vmatpush1.msra.mxu1 %v12272_v28  ;;  %4976 = vmatprep.mubr.f32.mxu1 %v12207_v60  ;;  %v4395_v44 = vpop.f32.mrf.mxu0  ;;  %12278 = vst [vmem:[#allocation27_spill] sm:$0xff] %v10589_v32 }
 0xfdb   :  { %5024 = vmatprep.subr.mxu0 %v12273_v21  ;;  %5095 = vmatprep.subr.mxu1 %v12274_v29  ;;  %v10593_v60 = vpop.f32.mrf.mxu1 }
 0xfdc   :  { %5016 = vperm.xlu0 %6363, %v5014_v10   ;;  %v10587_v12 = vpop.f32.mrf.mxu0  ;;  %12280 = vst [vmem:[#allocation33_spill] sm:$0xff] %v10593_v60 }
 0xfdd   :  { %12277 = vst [vmem:[#allocation61_spill] sm:$0xff] %v10587_v12  ;;  %v10597_v29 = vpop.f32.mrf.mxu1 }
 0xfde   :  { %v10591_v28 = vpop.f32.mrf.mxu0  ;;  %12282 = vst [vmem:[#allocation34_spill] sm:$0xff] %v10597_v29 }
 0xfdf   :  { %12279 = vst [vmem:[#allocation13_spill] sm:$0xff] %v10591_v28  ;;  %v10601_v53 = vpop.f32.mrf.mxu1 }
 0xfe0   :  { %v10595_v21 = vpop.f32.mrf.mxu0  ;;  %12284 = vst [vmem:[#allocation37_spill] sm:$0xff] %v10601_v53 }
 0xfe1   :  { %12281 = vst [vmem:[#allocation36_spill] sm:$0xff] %v10595_v21  ;;  %v10605_v26 = vpop.f32.mrf.mxu1 }
 0xfe2   :  { %v10599_v34 = vpop.f32.mrf.mxu0  ;;  %12286 = vst [vmem:[#allocation54_spill] sm:$0xff] %v10605_v26 }
 0xfe3   :  { %12283 = vst [vmem:[#allocation35_spill] sm:$0xff] %v10599_v34  ;;  %v10609_v12 = vpop.f32.mrf.mxu1 }
 0xfe4   :  { %v10603_v10 = vpop.f32.mrf.mxu0  ;;  %12288 = vst [vmem:[#allocation48_spill] sm:$0xff] %v10609_v12 }
 0xfe5   :  { %12285 = vst [vmem:[#allocation28_spill] sm:$0xff] %v10603_v10  ;;  %v10613_v28 = vpop.f32.mrf.mxu1 }
 0xfe6   :  { %v10607_v33 = vpop.f32.mrf.mxu0  ;;  %12290 = vst [vmem:[#allocation47_spill] sm:$0xff] %v10613_v28  ;;  %v4305_v28 = vld [vmem:[%s11583_s7] sm:$0xf] }
 0xfe7   :  { %12287 = vst [vmem:[#allocation46_spill] sm:$0xff] %v10607_v33  ;;  %v10617_v21 = vpop.f32.mrf.mxu1 }
 0xfe8   :  { %v10611_v32 = vpop.f32.mrf.mxu0  ;;  %12292 = vst [vmem:[#allocation53_spill] sm:$0xff] %v10617_v21 }
 0xfe9   :  { %12289 = vst [vmem:[#allocation50_spill] sm:$0xff] %v10611_v32  ;;  %v10621_v34 = vpop.f32.mrf.mxu1 }
 0xfea   :  { %v10615_v60 = vpop.f32.mrf.mxu0  ;;  %12294 = vst [vmem:[#allocation52_spill] sm:$0xff] %v10621_v34 }
 0xfeb   :  { %12291 = vst [vmem:[#allocation51_spill] sm:$0xff] %v10615_v60  ;;  %v10625_v10 = vpop.f32.mrf.mxu1  ;;  %v12300_v60 = vld [vmem:[#allocation49_spill] sm:$0xff] }
 0xfec   :  { %v10619_v29 = vpop.f32.mrf.mxu0  ;;  %12296 = vst [vmem:[#allocation20_spill] sm:$0xff] %v10625_v10  ;;  %v12301_v21 = vsub.s32 0, %v12300_v60  ;;  %v12305_v10 = vsub.s32 1, %v12300_v60 }
 0xfed   :  { %12293 = vst [vmem:[#allocation55_spill] sm:$0xff] %v10619_v29  ;;  %v10629_v33 = vpop.f32.mrf.mxu1 }
 0xfee   :  { %v10623_v53 = vpop.f32.mrf.mxu0  ;;  %12298 = vst [vmem:[#allocation22_spill] sm:$0xff] %v10629_v33  ;;  %v10638_v12 = vrot.slane %v4305_v28, %v12301_v21 }
 0xfef   :  { %12295 = vst [vmem:[#allocation62_spill] sm:$0xff] %v10623_v53  ;;  %v10640_v29 = vpop.f32.mrf.mxu1  ;;  %v10646_v53 = vrot.slane %v4305_v28, %v12305_v10  ;;  %v12309_v10 = vsub.s32 3, %v12300_v60 }
 0xff0   :  { %v10627_v26 = vpop.f32.mrf.mxu0  ;;  %12302 = vst [vmem:[#allocation59_spill] sm:$0xff] %v10638_v12  ;;  %12303 = vst [vmem:[#allocation60_spill] sm:$0xff] %v10640_v29  ;;  %v4394_v25 = vadd.f32 %v4393_v31, %v10638_v12 }
 0xff1   :  { %12297 = vst [vmem:[#allocation24_spill] sm:$0xff] %v10627_v26  ;;  %v10658_v18 = vrot.slane %v4305_v28, %v12309_v10 }
 0xff2   :  { %v10634_v32 = vpop.f32.mrf.mxu0 }
 0xff3   :  { %12299 = vst [vmem:[#allocation56_spill] sm:$0xff] %v10634_v32  ;;  %v4396_v32 = vadd.f32 %v4395_v44, %v10646_v53  ;;  %12310 = vst [vmem:[#allocation65_spill] sm:$0xff] %v10658_v18  ;;  %v4509_v31 = vadd.f32 %v4508_v2, %v10658_v18 }
0x1076   :  { %v10642_v34 = vpop.f32.mrf.mxu0  ;;  %v10648_v26 = vpop.f32.mrf.mxu1 }
0x1077   :  { %12304 = vst [vmem:[#allocation58_spill] sm:$0xff] %v10642_v34  ;;  %12306 = vst [vmem:[#allocation49_spill] sm:$0xff] %v10648_v26 }
0x1078   :  { %v10650_v33 = vpop.f32.mrf.mxu0  ;;  %v10654_v27 = vpop.f32.mrf.mxu1 }
0x1079   :  { %12307 = vst [vmem:[#allocation63_spill] sm:$0xff] %v10650_v33  ;;  %12308 = vst [vmem:[#allocation64_spill] sm:$0xff] %v10654_v27  ;;  %v12311_v33 = vsub.s32 2, %v12300_v60 }
0x107a   :  { %v4722_v50 = vpop.f32.mrf.mxu0  ;;  %v4793_v34 = vpop.f32.mrf.mxu1 }
0x107b   :  { %v4798_v21 = vadd.f32 %v4722_v50, %v4394_v25  ;;  %v10663_v44 = vrot.slane %v4305_v28, %v12311_v33 }
0x107c   :  { %v4724_v14 = vpop.f32.mrf.mxu0  ;;  %v4795_v26 = vpop.f32.mrf.mxu1 }
0x107d   :  { %v6283_v29 = vmul.f32 -1.442695, %v4798_v21  ;;  %v4799_v30 = vadd.f32 %v4724_v14, %v4396_v32  ;;  %v4801_v27 = vadd.f32 %v4795_v26, %v4509_v31  ;;  %v4507_v50 = vadd.f32 %v4506_v63, %v10663_v44  ;;  %v12313_v31 = vld [vmem:[#allocation41_spill] sm:$0xff] }
0x107f   :  { %6621 = vpow2.f32 %v6283_v29  ;;  %v6284_v41 = vmul.f32 -1.442695, %v4799_v30  ;;  %v6285_v25 = vmul.f32 -1.442695, %v4801_v27  ;;  %v4800_v32 = vadd.f32 %v4793_v34, %v4507_v50  ;;  %v12314_v50 = vld [vmem:[#allocation39_spill] sm:$0xff] }
0x1081   :  { %6623 = vpow2.f32 %v6284_v41 }
0x1082   :  { %6625 = vpow2.f32 %v6285_v25  ;;  %v12315_v25 = vld [vmem:[#allocation21_spill] sm:$0xff] }
0x108c   :  { %v6622_v14 = vpop.eup %6621 }
0x108d   :  { %v4805_v29 = vadd.f32 1.0, %v6622_v14  ;;  %v12316_v14 = vld [vmem:[#allocation14_spill] sm:$0xff] }
0x108e   :  { %v6624_v30 = vpop.eup %6623 }
0x108f   :  { %6627 = vrcp.f32 %v4805_v29  ;;  %v4811_v21 = vadd.f32 1.0, %v6624_v30  ;;  %v6626_v41 = vpop.eup %6625  ;;  %v12318_v29 = vld [vmem:[#allocation44_spill] sm:$0xff]  ;;  %v12319_v30 = vld [vmem:[#allocation45_spill] sm:$0xff] }
0x1090   :  { %6629 = vtanh.f32 %v4800_v32  ;;  %v4818_v60 = vadd.f32 1.0, %v6626_v41  ;;  %v12317_v32 = vld [vmem:[#allocation42_spill] sm:$0xff]  ;;  %v12321_v41 = vld [vmem:[#allocation11_spill] sm:$0xff] }
0x1091   :  { %6631 = vrcp.f32 %v4811_v21  ;;  %v12320_v21 = vld [vmem:[#allocation43_spill] sm:$0xff] }
0x1092   :  { %6633 = vrcp.f32 %v4818_v60  ;;  %v12324_v60 = vld [vmem:[#allocation12_spill] sm:$0xff] }
0x109c   :  { %v6628_v10 = vpop.eup %6627 }
0x109d   :  { %v6630_v2 = vpop.eup %6629 }
0x109e   :  { %v6632_v18 = vpop.eup %6631  ;;  %v4822_v28 = vmul.f32 %v6630_v2, %v6628_v10  ;;  %v12322_v10 = vld [vmem:[#allocation16_spill] sm:$0xff]  ;;  %v12323_v2 = vld [vmem:[#allocation25_spill] sm:$0xff] }
0x109f   :  { %v4821_v33 = vmul.f32 0.0, %v6632_v18  ;;  %v6634_v27 = vpop.eup %6633  ;;  %v12312_v18 = vld [vmem:[#allocation40_spill] sm:$0xff] }
0x10a1   :  { %v10666_v26 = vadd.f32 %v4822_v28, %v4821_v33  ;;  %v12325_v33 = vld [vmem:[#allocation26_spill] sm:$0xff]  ;;  %v12326_v28 = vld [vmem:[#allocation31_spill] sm:$0xff] }
0x10a3   :  { %6635 = vtanh.f32 %v10666_v26 }
0x10b0   :  { %v6636_v63 = vpop.eup %6635 }
0x10b1   :  { %v10669_v34 = vmul.f32 %v6636_v63, %v6634_v27  ;;  %v12327_v27 = vld [vmem:[#allocation18_spill] sm:$0xff]  ;;  %v12328_v63 = vld [vmem:[#allocation19_spill] sm:$0xff] }
0x10b3   :  { %4906 = vmatmul.mubr.f32.vlgmr.msra.gmra.mxu0 %v10669_v34  ;;  %4977 = vmatmul.mubr.f32.vlgmr.msra.gmra.mxu1 %v10669_v34 }
0x10b4   :  { %5025 = vmatpush1.msra.mxu0 %v10125_v36  ;;  %5096 = vmatpush1.msra.mxu1 %v10131_v35 }
0x10b5   :  { %5026 = vmatprep.subr.mxu0 %v10137_v37  ;;  %5097 = vmatprep.subr.mxu1 %v10143_v38 }
0x10b6   :  { %5027 = vmatpush1.msra.mxu0 %v10149_v40  ;;  %5098 = vmatpush1.msra.mxu1 %v10155_v42 }
0x10b7   :  { %5028 = vmatprep.subr.mxu0 %v10161_v55  ;;  %5099 = vmatprep.subr.mxu1 %v10167_v20 }
0x10b8   :  { %5029 = vmatpush1.msra.mxu0 %v10173_v9  ;;  %5100 = vmatpush1.msra.mxu1 %v10179_v0 }
0x10b9   :  { %5030 = vmatprep.subr.mxu0 %v10185_v49  ;;  %5101 = vmatprep.subr.mxu1 %v10191_v3 }
0x10ba   :  { %5031 = vmatpush1.msra.mxu0 %v10197_v6  ;;  %5102 = vmatpush1.msra.mxu1 %v10203_v8 }
0x10bb   :  { %5032 = vmatprep.subr.mxu0 %v10209_v1  ;;  %5103 = vmatprep.subr.mxu1 %v10215_v11 }
0x10bc   :  { %5033 = vmatpush1.msra.mxu0 %v10221_v48  ;;  %5104 = vmatpush1.msra.mxu1 %v10227_v61 }
0x10bd   :  { %5034 = vmatprep.subr.mxu0 %v10233_v62  ;;  %5105 = vmatprep.subr.mxu1 %v10239_v23 }
0x10be   :  { %5035 = vmatpush1.msra.mxu0 %v10245_v39  ;;  %5106 = vmatpush1.msra.mxu1 %v10251_v43 }
0x10bf   :  { %5036 = vmatprep.subr.mxu0 %v10257_v45  ;;  %5107 = vmatprep.subr.mxu1 %v10263_v19 }
0x10c0   :  { %5037 = vmatpush1.msra.mxu0 %v10269_v47  ;;  %5108 = vmatpush1.msra.mxu1 %v10275_v51 }
0x10c1   :  { %5038 = vmatprep.subr.mxu0 %v10281_v24  ;;  %5109 = vmatprep.subr.mxu1 %v10287_v16 }
0x10c2   :  { %5039 = vmatpush1.msra.mxu0 %v10293_v15  ;;  %5110 = vmatpush1.msra.mxu1 %v10299_v13 }
0x10c3   :  { %5040 = vmatprep.subr.mxu0 %v10305_v54  ;;  %5111 = vmatprep.subr.mxu1 %v10311_v52 }
0x10c4   :  { %5041 = vmatpush1.msra.mxu0 %v10317_v17  ;;  %5112 = vmatpush1.msra.mxu1 %v10323_v56 }
0x10c5   :  { %5042 = vmatprep.subr.mxu0 %v10329_v4  ;;  %5113 = vmatprep.subr.mxu1 %v10335_v57 }
0x10c6   :  { %5043 = vmatpush1.msra.mxu0 %v10341_v7  ;;  %5114 = vmatpush1.msra.mxu1 %v10347_v46 }
0x10c7   :  { %5044 = vmatprep.subr.mxu0 %v10353_v5  ;;  %5115 = vmatprep.subr.mxu1 %v10359_v58 }
0x10c8   :  { %5045 = vmatpush1.msra.mxu0 %v12251_v59  ;;  %5116 = vmatpush1.msra.mxu1 %v12252_v22 }
0x10c9   :  { %5046 = vmatprep.subr.mxu0 %v12312_v18  ;;  %5117 = vmatprep.subr.mxu1 %v12313_v31  ;;  %v12340_v31 = vld [vmem:[#allocation33_spill] sm:$0xff]  ;;  %v12341_v18 = vld [vmem:[#allocation27_spill] sm:$0xff] }
0x10ca   :  { %5047 = vmatpush1.msra.mxu0 %v12314_v50  ;;  %5118 = vmatpush1.msra.mxu1 %v12315_v25 }
0x10cb   :  { %5048 = vmatprep.subr.mxu0 %v12316_v14  ;;  %5119 = vmatprep.subr.mxu1 %v12317_v32 }
0x10cc   :  { %5049 = vmatpush1.msra.mxu0 %v12318_v29  ;;  %5120 = vmatpush1.msra.mxu1 %v12319_v30  ;;  %v12329_v29 = vld [vmem:[#allocation30_spill] sm:$0xff]  ;;  %v12330_v30 = vld [vmem:[#allocation17_spill] sm:$0xff] }
0x10cd   :  { %5050 = vmatprep.subr.mxu0 %v12320_v21  ;;  %5121 = vmatprep.subr.mxu1 %v12321_v41  ;;  %v12331_v21 = vmov 0.0   ;;  %v12332_v41 = vld [vmem:[#allocation57_spill] sm:$0xff] }
0x10ce   :  { %5051 = vmatpush1.msra.mxu0 %v12322_v10  ;;  %5122 = vmatpush1.msra.mxu1 %v12323_v2  ;;  %v12333_v2 = vld [vmem:[#allocation23_spill] sm:$0xff] }
0x10cf   :  { %5052 = vmatprep.subr.mxu0 %v12324_v60  ;;  %5123 = vmatprep.subr.mxu1 %v12325_v33  ;;  %v12334_v60 = vld [vmem:[#allocation15_spill] sm:$0xff]  ;;  %v12335_v33 = vld [vmem:[#allocation32_spill] sm:$0xff] }
0x10d0   :  { %5053 = vmatpush1.msra.mxu0 %v12326_v28  ;;  %5124 = vmatpush1.msra.mxu1 %v12327_v27  ;;  %vm5196_vm2 = vcmp.eq.s32.totalorder %v12335_v33, 3  ;;  %v12336_v28 = vmov 0   ;;  %v12339_v33 = vld [vmem:[#allocation65_spill] sm:$0xff] }
0x10d1   :  { %5054 = vmatprep.subr.mxu0 %v12328_v63  ;;  %5125 = vmatprep.subr.mxu1 %v12329_v29  ;;  %v5197_v27 = vsel %vm5196_vm2, 1, %v12336_v28  ;;  %v12337_v63 = vld [vmem:[#allocation61_spill] sm:$0xff]  ;;  %v4515_v28 = vadd.f32 %v12340_v31, %v12339_v33 }
0x10d2   :  { %5055 = vmatpush1.msra.mxu0 %v12330_v30  ;;  %5088 = vmatprep.mubr.f32.mxu0 %v12331_v21  ;;  %v4400_v29 = vadd.f32 %v12337_v63, %v10638_v12  ;;  %v12338_v30 = vld [vmem:[#allocation13_spill] sm:$0xff]  ;;  %v4513_v63 = vadd.f32 %v12341_v18, %v10663_v44 }
0x10d3   :  { %5126 = vmatpush1.msra.mxu1 %v12332_v41  ;;  %5159 = vmatprep.mubr.f32.mxu1 %v12331_v21  ;;  %v4402_v32 = vadd.f32 %v12338_v30, %v10646_v53 }
0x10d4   :  { %5207 = vmatprep.subr.mxu0 %v12333_v2  ;;  %5278 = vmatprep.subr.mxu1 %v12334_v60 }
0x10d5   :  { %5199 = vperm.xlu1 %6364, %v5197_v27  }
0x1173   :  { %v4907_v10 = vpop.f32.mrf.mxu0  ;;  %v4978_v2 = vpop.f32.mrf.mxu1 }
0x1174   :  { %v4983_v14 = vadd.f32 %v4907_v10, %v4400_v29  ;;  %v4985_v12 = vadd.f32 %v4978_v2, %v4513_v63 }
0x1175   :  { %v4909_v41 = vpop.f32.mrf.mxu0  ;;  %v4980_v60 = vpop.f32.mrf.mxu1 }
0x1176   :  { %v6286_v25 = vmul.f32 -1.442695, %v4983_v14  ;;  %v4984_v21 = vadd.f32 %v4909_v41, %v4402_v32  ;;  %v4986_v27 = vadd.f32 %v4980_v60, %v4515_v28 }
0x1178   :  { %6637 = vpow2.f32 %v6286_v25  ;;  %v6287_v50 = vmul.f32 -1.442695, %v4984_v21  ;;  %v6288_v22 = vmul.f32 -1.442695, %v4986_v27 }
0x117a   :  { %6639 = vpow2.f32 %v6287_v50 }
0x117b   :  { %6641 = vtanh.f32 %v4985_v12 }
0x117c   :  { %6643 = vpow2.f32 %v6288_v22 }
0x1185   :  { %v6638_v59 = vpop.eup %6637 }
0x1186   :  { %v4990_v30 = vadd.f32 1.0, %v6638_v59  ;;  %v4834_v59 = vpop.permute.xlu0 %4833 }
0x1187   :  { %v6640_v29 = vpop.eup %6639  ;;  %vm4835_vm3 = vcmp.eq.s32.totalorder %v4834_v59, 1 }
0x1188   :  { %6645 = vrcp.f32 %v4990_v30  ;;  %v4996_v25 = vadd.f32 1.0, %v6640_v29  ;;  %v6642_v14 = vpop.eup %6641  ;;  %v4836_v28 = vsel %vm4835_vm3, %v10669_v34, 0.0  ;;  %v12372_v34 = vld [vmem:[#allocation37_spill] sm:$0xff]  ;;  %v12373_v29 = vld [vmem:[#allocation34_spill] sm:$0xff] }
0x1189   :  { %v6644_v50 = vpop.eup %6643  ;;  %v4521_v63 = vadd.f32 %v12372_v34, %v12339_v33  ;;  %v10920_v34 = vld [vmem:[%s11581_s8 + $0x190] sm:$0xff] }
0x118a   :  { %6647 = vrcp.f32 %v4996_v25  ;;  %v5003_v31 = vadd.f32 1.0, %v6644_v50  ;;  %v5017_v12 = vpop.permute.xlu0 %5016  ;;  %v4519_v25 = vadd.f32 %v12373_v29, %v10663_v44  ;;  %v10938_v29 = vld [vmem:[%s11581_s8 + $0x160] sm:$0xff] }
0x118b   :  { %vm5018_vm4 = vcmp.eq.s32.totalorder %v5017_v12, 1 }
0x118c   :  { %6649 = vrcp.f32 %v5003_v31 }
0x1195   :  { %v6646_v32 = vpop.eup %6645 }
0x1196   :  { %v5007_v21 = vmul.f32 %v6646_v32, %v6642_v14 }
0x1197   :  { %v6648_v41 = vpop.eup %6647 }
0x1198   :  { %v5006_v10 = vmul.f32 %v6648_v41, %v10666_v26 }
0x1199   :  { %v6650_v18 = vpop.eup %6649 }
0x119a   :  { %v10750_v60 = vadd.f32 %v5007_v21, %v5006_v10 }
0x119c   :  { %6651 = vtanh.f32 %v10750_v60 }
0x11a9   :  { %v6652_v22 = vpop.eup %6651 }
0x11aa   :  { %v5010_v2 = vmul.f32 %v6652_v22, %v6650_v18 }
0x11ac   :  { %v10754_v27 = vsel %vm5018_vm4, %v5010_v2, %v4836_v28  ;;  %5089 = vmatmul.mubr.f32.vlgmr.msra.gmra.mxu0 %v5010_v2  ;;  %5160 = vmatmul.mubr.f32.vlgmr.msra.gmra.mxu1 %v5010_v2 }
0x11ad   :  { %5208 = vmatpush1.msra.mxu0 %v10125_v36  ;;  %5279 = vmatpush1.msra.mxu1 %v10131_v35  ;;  %v12342_v36 = vld [vmem:[#allocation29_spill] sm:$0xff]  ;;  %v12343_v35 = vld [vmem:[#allocation38_spill] sm:$0xff] }
0x11ae   :  { %5209 = vmatprep.subr.mxu0 %v10137_v37  ;;  %5280 = vmatprep.subr.mxu1 %v10143_v38  ;;  %v12344_v37 = vld [vmem:[#allocation40_spill] sm:$0xff]  ;;  %v12345_v38 = vld [vmem:[#allocation41_spill] sm:$0xff] }
0x11af   :  { %5210 = vmatpush1.msra.mxu0 %v10149_v40  ;;  %5281 = vmatpush1.msra.mxu1 %v10155_v42  ;;  %v12346_v40 = vld [vmem:[#allocation39_spill] sm:$0xff]  ;;  %v12347_v42 = vld [vmem:[#allocation21_spill] sm:$0xff] }
0x11b0   :  { %5211 = vmatprep.subr.mxu0 %v10161_v55  ;;  %5282 = vmatprep.subr.mxu1 %v10167_v20  ;;  %v12348_v55 = vld [vmem:[#allocation14_spill] sm:$0xff] }
0x11b1   :  { %5212 = vmatpush1.msra.mxu0 %v10173_v9  ;;  %5283 = vmatpush1.msra.mxu1 %v10179_v0  ;;  %v12349_v20 = vld [vmem:[#allocation42_spill] sm:$0xff]  ;;  %v12350_v9 = vld [vmem:[#allocation44_spill] sm:$0xff]  ;;  %v12351_v0 = vld [vmem:[#allocation45_spill] sm:$0xff] }
0x11b2   :  { %5213 = vmatprep.subr.mxu0 %v10185_v49  ;;  %5284 = vmatprep.subr.mxu1 %v10191_v3  ;;  %v12352_v49 = vld [vmem:[#allocation43_spill] sm:$0xff] }
0x11b3   :  { %5214 = vmatpush1.msra.mxu0 %v10197_v6  ;;  %5285 = vmatpush1.msra.mxu1 %v10203_v8  ;;  %v12353_v3 = vld [vmem:[#allocation11_spill] sm:$0xff]  ;;  %v12354_v6 = vld [vmem:[#allocation16_spill] sm:$0xff]  ;;  %v12355_v8 = vld [vmem:[#allocation25_spill] sm:$0xff] }
0x11b4   :  { %5215 = vmatprep.subr.mxu0 %v10209_v1  ;;  %5286 = vmatprep.subr.mxu1 %v10215_v11  ;;  %v12356_v1 = vld [vmem:[#allocation12_spill] sm:$0xff]  ;;  %v12357_v11 = vld [vmem:[#allocation26_spill] sm:$0xff] }
0x11b5   :  { %5216 = vmatpush1.msra.mxu0 %v10221_v48  ;;  %5287 = vmatpush1.msra.mxu1 %v10227_v61  ;;  %v12358_v48 = vld [vmem:[#allocation31_spill] sm:$0xff]  ;;  %v12359_v61 = vld [vmem:[#allocation18_spill] sm:$0xff] }
0x11b6   :  { %5217 = vmatprep.subr.mxu0 %v10233_v62  ;;  %5288 = vmatprep.subr.mxu1 %v10239_v23  ;;  %v12360_v62 = vld [vmem:[#allocation19_spill] sm:$0xff]  ;;  %v12361_v23 = vld [vmem:[#allocation30_spill] sm:$0xff] }
0x11b7   :  { %5218 = vmatpush1.msra.mxu0 %v10245_v39  ;;  %5289 = vmatpush1.msra.mxu1 %v10251_v43  ;;  %v12362_v39 = vld [vmem:[#allocation17_spill] sm:$0xff]  ;;  %v12363_v43 = vmov 0.0  }
0x11b8   :  { %5219 = vmatprep.subr.mxu0 %v10257_v45  ;;  %5290 = vmatprep.subr.mxu1 %v10263_v19  ;;  %v12364_v45 = vld [vmem:[#allocation57_spill] sm:$0xff]  ;;  %v12365_v19 = vld [vmem:[#allocation23_spill] sm:$0xff] }
0x11b9   :  { %5220 = vmatpush1.msra.mxu0 %v10269_v47  ;;  %5291 = vmatpush1.msra.mxu1 %v10275_v51  ;;  %v12366_v47 = vld [vmem:[#allocation15_spill] sm:$0xff]  ;;  %v12367_v51 = vld [vmem:[#allocation32_spill] sm:$0xff] }
0x11ba   :  { %5221 = vmatprep.subr.mxu0 %v10281_v24  ;;  %5292 = vmatprep.subr.mxu1 %v10287_v16  ;;  %vm5379_vm5 = vcmp.eq.s32.totalorder %v12367_v51, 4  ;;  %v12368_v24 = vmov 0   ;;  %vm5562_vm7 = vcmp.eq.s32.totalorder %v12367_v51, 5 }
0x11bb   :  { %5222 = vmatpush1.msra.mxu0 %v10293_v15  ;;  %5293 = vmatpush1.msra.mxu1 %v10299_v13  ;;  %v5380_v16 = vsel %vm5379_vm5, 1, %v12368_v24  ;;  %v12369_v15 = vld [vmem:[#allocation59_spill] sm:$0xff]  ;;  %v12370_v13 = vld [vmem:[#allocation36_spill] sm:$0xff] }
0x11bc   :  { %5223 = vmatprep.subr.mxu0 %v10305_v54  ;;  %5294 = vmatprep.subr.mxu1 %v10311_v52  ;;  %v4406_v54 = vadd.f32 %v12370_v13, %v12369_v15 }
0x11bd   :  { %5224 = vmatpush1.msra.mxu0 %v10317_v17  ;;  %5295 = vmatpush1.msra.mxu1 %v10323_v56  ;;  %v12371_v17 = vld [vmem:[#allocation35_spill] sm:$0xff] }
0x11be   :  { %5225 = vmatprep.subr.mxu0 %v10329_v4  ;;  %5296 = vmatprep.subr.mxu1 %v10335_v57  ;;  %v4408_v56 = vadd.f32 %v12371_v17, %v10646_v53  ;;  %v10866_v17 = vld [vmem:[%s11581_s8 + $0x1c0] sm:$0xff] }
0x11bf   :  { %5226 = vmatpush1.msra.mxu0 %v10341_v7  ;;  %5297 = vmatpush1.msra.mxu1 %v10347_v46 }
0x11c0   :  { %5227 = vmatprep.subr.mxu0 %v10353_v5  ;;  %5298 = vmatprep.subr.mxu1 %v10359_v58 }
0x11c1   :  { %5228 = vmatpush1.msra.mxu0 %v12342_v36  ;;  %5299 = vmatpush1.msra.mxu1 %v12343_v35  ;;  %v5200_v35 = vpop.permute.xlu1 %5199 }
0x11c2   :  { %5229 = vmatprep.subr.mxu0 %v12344_v37  ;;  %5300 = vmatprep.subr.mxu1 %v12345_v38  ;;  %vm5201_vm6 = vcmp.eq.s32.totalorder %v5200_v35, 1  ;;  %v11028_v35 = vld [vmem:[%s11581_s8 + $0xf8] sm:$0xff] }
0x11c3   :  { %5230 = vmatpush1.msra.mxu0 %v12346_v40  ;;  %5301 = vmatpush1.msra.mxu1 %v12347_v42  ;;  %12374 = vst [vmem:[#allocation61_spill] sm:$0xff] %v11028_v35 }
0x11c4   :  { %5231 = vmatprep.subr.mxu0 %v12348_v55  ;;  %5302 = vmatprep.subr.mxu1 %v12349_v20 }
0x11c5   :  { %5232 = vmatpush1.msra.mxu0 %v12350_v9  ;;  %5303 = vmatpush1.msra.mxu1 %v12351_v0 }
0x11c6   :  { %5233 = vmatprep.subr.mxu0 %v12352_v49  ;;  %5304 = vmatprep.subr.mxu1 %v12353_v3 }
0x11c7   :  { %5234 = vmatpush1.msra.mxu0 %v12354_v6  ;;  %5305 = vmatpush1.msra.mxu1 %v12355_v8 }
0x11c8   :  { %5235 = vmatprep.subr.mxu0 %v12356_v1  ;;  %5306 = vmatprep.subr.mxu1 %v12357_v11 }
0x11c9   :  { %5236 = vmatpush1.msra.mxu0 %v12358_v48  ;;  %5307 = vmatpush1.msra.mxu1 %v12359_v61 }
0x11ca   :  { %5237 = vmatprep.subr.mxu0 %v12360_v62  ;;  %5308 = vmatprep.subr.mxu1 %v12361_v23 }
0x11cb   :  { %5238 = vmatpush1.msra.mxu0 %v12362_v39  ;;  %5271 = vmatprep.mubr.f32.mxu0 %v12363_v43 }
0x11cc   :  { %5309 = vmatpush1.msra.mxu1 %v12364_v45  ;;  %5342 = vmatprep.mubr.f32.mxu1 %v12363_v43 }
0x11cd   :  { %5390 = vmatprep.subr.mxu0 %v12365_v19  ;;  %5461 = vmatprep.subr.mxu1 %v12366_v47 }
0x11ce   :  { %5382 = vperm.xlu1 %6364, %v5380_v16  }
0x126c   :  { %v5090_v52 = vpop.f32.mrf.mxu0  ;;  %v5161_v5 = vpop.f32.mrf.mxu1 }
0x126d   :  { %v5166_v4 = vadd.f32 %v5090_v52, %v4406_v54  ;;  %v5168_v14 = vadd.f32 %v5161_v5, %v4519_v25  ;;  %v10842_v54 = vld [vmem:[%s11581_s8 + $0x1e0] sm:$0xff]  ;;  %v10860_v52 = vld [vmem:[%s11581_s8 + $0x1d8] sm:$0xff]  ;;  %v10902_v5 = vld [vmem:[%s11581_s8 + $0x188] sm:$0xff] }
0x126e   :  { %v5092_v57 = vpop.f32.mrf.mxu0  ;;  %v5163_v26 = vpop.f32.mrf.mxu1  ;;  %v10944_v25 = vld [vmem:[%s11581_s8 + $0x170] sm:$0xff] }
0x126f   :  { %v6289_v7 = vmul.f32 -1.442695, %v5166_v4  ;;  %v5167_v46 = vadd.f32 %v5092_v57, %v4408_v56  ;;  %v5169_v30 = vadd.f32 %v5163_v26, %v4521_v63  ;;  %v10872_v56 = vld [vmem:[%s11581_s8 + $0x1d0] sm:$0xff]  ;;  %v10878_v4 = vld [vmem:[%s11581_s8 + $0x1a8] sm:$0xff]  ;;  %v10884_v57 = vld [vmem:[%s11581_s8 + $0x1b8] sm:$0xff] }
0x1270   :  { %v10914_v26 = vld [vmem:[%s11581_s8 + $0x180] sm:$0xff]  ;;  %v10926_v63 = vld [vmem:[%s11581_s8 + $0x168] sm:$0xff] }
0x1271   :  { %6653 = vpow2.f32 %v6289_v7  ;;  %v6290_v58 = vmul.f32 -1.442695, %v5167_v46  ;;  %v6291_v50 = vmul.f32 -1.442695, %v5169_v30  ;;  %v10890_v7 = vld [vmem:[%s11581_s8 + $0x1a0] sm:$0xff]  ;;  %v10896_v46 = vld [vmem:[%s11581_s8 + $0x1b0] sm:$0xff] }
0x1272   :  { %v10932_v30 = vld [vmem:[%s11581_s8 + $0x178] sm:$0xff] }
0x1273   :  { %6655 = vpow2.f32 %v6290_v58  ;;  %v10908_v58 = vld [vmem:[%s11581_s8 + $0x198] sm:$0xff] }
0x1274   :  { %6657 = vtanh.f32 %v5168_v14  ;;  %v10950_v14 = vld [vmem:[%s11581_s8 + $0x148] sm:$0xff] }
0x1275   :  { %6659 = vpow2.f32 %v6291_v50  ;;  %v10956_v50 = vld [vmem:[%s11581_s8 + $0x158] sm:$0xff] }
0x127e   :  { %v6654_v32 = vpop.eup %6653 }
0x127f   :  { %v5173_v21 = vadd.f32 1.0, %v6654_v32  ;;  %v10962_v32 = vld [vmem:[%s11581_s8 + $0x140] sm:$0xff] }
0x1280   :  { %v6656_v41 = vpop.eup %6655 }
0x1281   :  { %6661 = vrcp.f32 %v5173_v21  ;;  %v5179_v31 = vadd.f32 1.0, %v6656_v41  ;;  %v6658_v10 = vpop.eup %6657  ;;  %v10968_v21 = vld [vmem:[%s11581_s8 + $0x150] sm:$0xff]  ;;  %v10974_v41 = vld [vmem:[%s11581_s8 + $0x128] sm:$0xff] }
0x1282   :  { %v6660_v59 = vpop.eup %6659 }
0x1283   :  { %6663 = vrcp.f32 %v5179_v31  ;;  %v5186_v2 = vadd.f32 1.0, %v6660_v59  ;;  %v10980_v31 = vld [vmem:[%s11581_s8 + $0x138] sm:$0xff]  ;;  %v10992_v59 = vld [vmem:[%s11581_s8 + $0x130] sm:$0xff] }
0x1285   :  { %6665 = vrcp.f32 %v5186_v2  ;;  %v11016_v2 = vld [vmem:[%s11581_s8 + $0x110] sm:$0xff] }
0x128e   :  { %v6662_v12 = vpop.eup %6661 }
0x128f   :  { %v5190_v18 = vmul.f32 %v6662_v12, %v6658_v10  ;;  %v10986_v10 = vld [vmem:[%s11581_s8 + $0x120] sm:$0xff]  ;;  %v10998_v12 = vld [vmem:[%s11581_s8 + $0x108] sm:$0xff] }
0x1290   :  { %v6664_v22 = vpop.eup %6663 }
0x1291   :  { %v5189_v28 = vmul.f32 %v6664_v22, %v10750_v60  ;;  %v10848_v60 = vld [vmem:[%s11581_s8 + $0x1f0] sm:$0xff]  ;;  %v11010_v22 = vld [vmem:[%s11581_s8 + $0x100] sm:$0xff] }
0x1292   :  { %v6666_v19 = vpop.eup %6665 }
0x1293   :  { %v10833_v36 = vadd.f32 %v5190_v18, %v5189_v28  ;;  %v11004_v18 = vld [vmem:[%s11581_s8 + $0x118] sm:$0xff]  ;;  %v11022_v28 = vld [vmem:[%s11581_s8 + $0xe8] sm:$0xff] }
0x1295   :  { %6667 = vtanh.f32 %v10833_v36 }
0x12a2   :  { %v6668_v47 = vpop.eup %6667 }
0x12a3   :  { %v5193_v16 = vmul.f32 %v6668_v47, %v6666_v19  ;;  %v11034_v19 = vld [vmem:[%s11581_s8 + $0xe0] sm:$0xff]  ;;  %v11040_v47 = vld [vmem:[%s11581_s8 + $0xf0] sm:$0xff] }
0x12a4   :  { %12375 = vst [vmem:[#allocation13_spill] sm:$0xff] %v11034_v19  ;;  %12376 = vst [vmem:[#allocation65_spill] sm:$0xff] %v11040_v47 }
0x12a5   :  { %v10837_v13 = vsel %vm5201_vm6, %v5193_v16, %v10754_v27  ;;  %5272 = vmatmul.mubr.f32.vlgmr.msra.gmra.mxu0 %v5193_v16  ;;  %5343 = vmatmul.mubr.f32.vlgmr.msra.gmra.mxu1 %v5193_v16  ;;  %v10854_v27 = vld [vmem:[%s11581_s8 + $0x1c8] sm:$0xff] }
0x12a6   :  { %5391 = vmatpush1.msra.mxu0 %v10842_v54  ;;  %5462 = vmatpush1.msra.mxu1 %v10848_v60  ;;  %v11046_v16 = vld [vmem:[%s11581_s8 + $0xc8] sm:$0xff] }
0x12a7   :  { %5392 = vmatprep.subr.mxu0 %v10854_v27  ;;  %5463 = vmatprep.subr.mxu1 %v10860_v52  ;;  %12377 = vst [vmem:[#allocation33_spill] sm:$0xff] %v11046_v16 }
0x12a8   :  { %5393 = vmatpush1.msra.mxu0 %v10866_v17  ;;  %5464 = vmatpush1.msra.mxu1 %v10872_v56 }
0x12a9   :  { %5394 = vmatprep.subr.mxu0 %v10878_v4  ;;  %5465 = vmatprep.subr.mxu1 %v10884_v57 }
0x12aa   :  { %5395 = vmatpush1.msra.mxu0 %v10890_v7  ;;  %5466 = vmatpush1.msra.mxu1 %v10896_v46 }
0x12ab   :  { %5396 = vmatprep.subr.mxu0 %v10902_v5  ;;  %5467 = vmatprep.subr.mxu1 %v10908_v58 }
0x12ac   :  { %5397 = vmatpush1.msra.mxu0 %v10914_v26  ;;  %5468 = vmatpush1.msra.mxu1 %v10920_v34 }
0x12ad   :  { %5398 = vmatprep.subr.mxu0 %v10926_v63  ;;  %5469 = vmatprep.subr.mxu1 %v10932_v30 }
0x12ae   :  { %5399 = vmatpush1.msra.mxu0 %v10938_v29  ;;  %5470 = vmatpush1.msra.mxu1 %v10944_v25 }
0x12af   :  { %5400 = vmatprep.subr.mxu0 %v10950_v14  ;;  %5471 = vmatprep.subr.mxu1 %v10956_v50 }
0x12b0   :  { %5401 = vmatpush1.msra.mxu0 %v10962_v32  ;;  %5472 = vmatpush1.msra.mxu1 %v10968_v21 }
0x12b1   :  { %5402 = vmatprep.subr.mxu0 %v10974_v41  ;;  %5473 = vmatprep.subr.mxu1 %v10980_v31 }
0x12b2   :  { %5403 = vmatpush1.msra.mxu0 %v10986_v10  ;;  %5474 = vmatpush1.msra.mxu1 %v10992_v59 }
0x12b3   :  { %5404 = vmatprep.subr.mxu0 %v10998_v12  ;;  %5475 = vmatprep.subr.mxu1 %v11004_v18 }
0x12b4   :  { %5405 = vmatpush1.msra.mxu0 %v11010_v22  ;;  %5476 = vmatpush1.msra.mxu1 %v11016_v2 }
0x12b5   :  { %5406 = vmatprep.subr.mxu0 %v11022_v28  ;;  %5477 = vmatprep.subr.mxu1 %v11028_v35  ;;  %v11052_v35 = vld [vmem:[%s11581_s8 + $0xd8] sm:$0xff] }
0x12b6   :  { %5407 = vmatpush1.msra.mxu0 %v11034_v19  ;;  %5478 = vmatpush1.msra.mxu1 %v11040_v47  ;;  %12378 = vst [vmem:[#allocation27_spill] sm:$0xff] %v11052_v35  ;;  %v11058_v19 = vld [vmem:[%s11581_s8 + $0xc0] sm:$0xff]  ;;  %v11064_v47 = vld [vmem:[%s11581_s8 + $0xd0] sm:$0xff] }
0x12b7   :  { %5408 = vmatprep.subr.mxu0 %v11046_v16  ;;  %5479 = vmatprep.subr.mxu1 %v11052_v35  ;;  %12379 = vst [vmem:[#allocation29_spill] sm:$0xff] %v11058_v19  ;;  %12380 = vst [vmem:[#allocation38_spill] sm:$0xff] %v11064_v47  ;;  %v11070_v16 = vld [vmem:[%s11581_s8 + $0xa8] sm:$0xff]  ;;  %v11076_v35 = vld [vmem:[%s11581_s8 + $0xb8] sm:$0xff] }
0x12b8   :  { %5409 = vmatpush1.msra.mxu0 %v11058_v19  ;;  %5480 = vmatpush1.msra.mxu1 %v11064_v47  ;;  %v11082_v19 = vld [vmem:[%s11581_s8 + $0xa0] sm:$0xff]  ;;  %v11088_v47 = vld [vmem:[%s11581_s8 + $0xb0] sm:$0xff] }
0x12b9   :  { %5410 = vmatprep.subr.mxu0 %v11070_v16  ;;  %5481 = vmatprep.subr.mxu1 %v11076_v35  ;;  %12381 = vst [vmem:[#allocation40_spill] sm:$0xff] %v11082_v19  ;;  %12382 = vst [vmem:[#allocation41_spill] sm:$0xff] %v11088_v47 }
0x12ba   :  { %5411 = vmatpush1.msra.mxu0 %v11082_v19  ;;  %5482 = vmatpush1.msra.mxu1 %v11088_v47 }
0x12bb   :  { %5412 = vmatprep.subr.mxu0 %v12344_v37  ;;  %5483 = vmatprep.subr.mxu1 %v12345_v38  ;;  %v11116_v37 = vld [vmem:[%s11581_s8 + $0x1e8] sm:$0xff]  ;;  %v11122_v38 = vld [vmem:[%s11581_s8 + $0x1f8] sm:$0xff] }
0x12bc   :  { %5413 = vmatpush1.msra.mxu0 %v12346_v40  ;;  %5484 = vmatpush1.msra.mxu1 %v12347_v42  ;;  %12383 = vst [vmem:[#allocation39_spill] sm:$0xff] %v11116_v37  ;;  %12384 = vst [vmem:[#allocation21_spill] sm:$0xff] %v11122_v38  ;;  %v5563_v40 = vsel %vm5562_vm7, 1, %v12368_v24  ;;  %v12385_v42 = vld [vmem:[#allocation28_spill] sm:$0xff] }
0x12bd   :  { %5414 = vmatprep.subr.mxu0 %v12348_v55  ;;  %5485 = vmatprep.subr.mxu1 %v12349_v20  ;;  %v4412_v55 = vadd.f32 %v12385_v42, %v12369_v15 }
0x12be   :  { %5415 = vmatpush1.msra.mxu0 %v12350_v9  ;;  %5486 = vmatpush1.msra.mxu1 %v12351_v0  ;;  %v12386_v9 = vld [vmem:[#allocation46_spill] sm:$0xff] }
0x12bf   :  { %5416 = vmatprep.subr.mxu0 %v12352_v49  ;;  %5487 = vmatprep.subr.mxu1 %v12353_v3  ;;  %v4414_v0 = vadd.f32 %v12386_v9, %v10646_v53 }
0x12c0   :  { %5417 = vmatpush1.msra.mxu0 %v12354_v6  ;;  %5488 = vmatpush1.msra.mxu1 %v12355_v8 }
0x12c1   :  { %5418 = vmatprep.subr.mxu0 %v12356_v1  ;;  %5489 = vmatprep.subr.mxu1 %v12357_v11 }
0x12c2   :  { %5419 = vmatpush1.msra.mxu0 %v12358_v48  ;;  %5490 = vmatpush1.msra.mxu1 %v12359_v61  ;;  %v12387_v61 = vld [vmem:[#allocation48_spill] sm:$0xff] }
0x12c3   :  { %5420 = vmatprep.subr.mxu0 %v12360_v62  ;;  %5491 = vmatprep.subr.mxu1 %v12361_v23  ;;  %v4527_v62 = vadd.f32 %v12387_v61, %v12339_v33 }
0x12c4   :  { %5421 = vmatpush1.msra.mxu0 %v12362_v39  ;;  %5454 = vmatprep.mubr.f32.mxu0 %v12363_v43  ;;  %v12388_v39 = vld [vmem:[#allocation54_spill] sm:$0xff] }
0x12c5   :  { %5492 = vmatpush1.msra.mxu1 %v12364_v45  ;;  %5525 = vmatprep.mubr.f32.mxu1 %v12363_v43  ;;  %v4525_v45 = vadd.f32 %v12388_v39, %v10663_v44 }
0x12c6   :  { %5573 = vmatprep.subr.mxu0 %v11116_v37  ;;  %5644 = vmatprep.subr.mxu1 %v11122_v38 }
0x12c7   :  { %5565 = vperm.xlu0 %6363, %v5563_v40  }
0x1365   :  { %v5273_v20 = vpop.f32.mrf.mxu0  ;;  %v5344_v1 = vpop.f32.mrf.mxu1 }
0x1366   :  { %v5349_v49 = vadd.f32 %v5273_v20, %v4412_v55  ;;  %v5351_v51 = vadd.f32 %v5344_v1, %v4525_v45  ;;  %v5383_v1 = vpop.permute.xlu1 %5382 }
0x1367   :  { %v5275_v3 = vpop.f32.mrf.mxu0  ;;  %v5346_v48 = vpop.f32.mrf.mxu1  ;;  %vm5384_vm8 = vcmp.eq.s32.totalorder %v5383_v1, 1  ;;  %v11235_v1 = vld [vmem:[%s11581_s8 + $0x48] sm:$0xff] }
0x1368   :  { %v6292_v6 = vmul.f32 -1.442695, %v5349_v49  ;;  %v5350_v8 = vadd.f32 %v5275_v3, %v4414_v0  ;;  %v5352_v23 = vadd.f32 %v5346_v48, %v4527_v62  ;;  %12404 = vst [vmem:[#allocation12_spill] sm:$0xff] %v11235_v1 }
0x136a   :  { %6669 = vpow2.f32 %v6292_v6  ;;  %v6293_v11 = vmul.f32 -1.442695, %v5350_v8  ;;  %v6294_v40 = vmul.f32 -1.442695, %v5352_v23 }
0x136c   :  { %6671 = vpow2.f32 %v6293_v11 }
0x136d   :  { %6673 = vtanh.f32 %v5351_v51  ;;  %v12391_v51 = vld [vmem:[#allocation65_spill] sm:$0xff] }
0x136e   :  { %6675 = vpow2.f32 %v6294_v40  ;;  %v12392_v40 = vld [vmem:[#allocation33_spill] sm:$0xff] }
0x1377   :  { %v6670_v42 = vpop.eup %6669 }
0x1378   :  { %v5356_v9 = vadd.f32 1.0, %v6670_v42  ;;  %v12393_v42 = vld [vmem:[#allocation27_spill] sm:$0xff] }
0x1379   :  { %v6672_v55 = vpop.eup %6671 }
0x137a   :  { %6677 = vrcp.f32 %v5356_v9  ;;  %v5362_v20 = vadd.f32 1.0, %v6672_v55  ;;  %v6674_v0 = vpop.eup %6673  ;;  %v12394_v9 = vld [vmem:[#allocation29_spill] sm:$0xff]  ;;  %v12395_v55 = vld [vmem:[#allocation38_spill] sm:$0xff] }
0x137b   :  { %v6676_v49 = vpop.eup %6675 }
0x137c   :  { %6679 = vrcp.f32 %v5362_v20  ;;  %v5369_v11 = vadd.f32 1.0, %v6676_v49  ;;  %v11187_v20 = vld [vmem:[%s11581_s8 + $0x88] sm:$0xff]  ;;  %v11199_v49 = vld [vmem:[%s11581_s8 + $0x80] sm:$0xff] }
0x137d   :  { %12396 = vst [vmem:[#allocation14_spill] sm:$0xff] %v11187_v20  ;;  %12398 = vst [vmem:[#allocation44_spill] sm:$0xff] %v11199_v49 }
0x137e   :  { %6681 = vrcp.f32 %v5369_v11  ;;  %v11223_v11 = vld [vmem:[%s11581_s8 + $0x60] sm:$0xff] }
0x137f   :  { %12402 = vst [vmem:[#allocation16_spill] sm:$0xff] %v11223_v11 }
0x1387   :  { %v6678_v3 = vpop.eup %6677 }
0x1388   :  { %v5373_v6 = vmul.f32 %v6678_v3, %v6674_v0  ;;  %v11193_v0 = vld [vmem:[%s11581_s8 + $0x98] sm:$0xff]  ;;  %v11205_v3 = vld [vmem:[%s11581_s8 + $0x90] sm:$0xff] }
0x1389   :  { %v6680_v8 = vpop.eup %6679  ;;  %12397 = vst [vmem:[#allocation42_spill] sm:$0xff] %v11193_v0  ;;  %12399 = vst [vmem:[#allocation45_spill] sm:$0xff] %v11205_v3 }
0x138a   :  { %v5372_v48 = vmul.f32 %v6680_v8, %v10833_v36  ;;  %v12389_v36 = vld [vmem:[#allocation61_spill] sm:$0xff]  ;;  %v11217_v8 = vld [vmem:[%s11581_s8 + $0x78] sm:$0xff] }
0x138b   :  { %v6682_v62 = vpop.eup %6681  ;;  %12401 = vst [vmem:[#allocation11_spill] sm:$0xff] %v11217_v8 }
0x138c   :  { %v11136_v61 = vadd.f32 %v5373_v6, %v5372_v48  ;;  %v11211_v6 = vld [vmem:[%s11581_s8 + $0x68] sm:$0xff]  ;;  %v11229_v48 = vld [vmem:[%s11581_s8 + $0x70] sm:$0xff] }
0x138d   :  { %12400 = vst [vmem:[#allocation43_spill] sm:$0xff] %v11211_v6  ;;  %12403 = vst [vmem:[#allocation25_spill] sm:$0xff] %v11229_v48 }
0x138e   :  { %6683 = vtanh.f32 %v11136_v61 }
0x139b   :  { %v6684_v23 = vpop.eup %6683 }
0x139c   :  { %v5376_v39 = vmul.f32 %v6684_v23, %v6682_v62  ;;  %v11241_v62 = vld [vmem:[%s11581_s8 + $0x58] sm:$0xff]  ;;  %v11247_v23 = vld [vmem:[%s11581_s8 + $0x40] sm:$0xff] }
0x139d   :  { %12405 = vst [vmem:[#allocation26_spill] sm:$0xff] %v11241_v62  ;;  %12406 = vst [vmem:[#allocation31_spill] sm:$0xff] %v11247_v23 }
0x139e   :  { %v11140_v45 = vsel %vm5384_vm8, %v5376_v39, %v10837_v13  ;;  %5455 = vmatmul.mubr.f32.vlgmr.msra.gmra.mxu0 %v5376_v39  ;;  %5526 = vmatmul.mubr.f32.vlgmr.msra.gmra.mxu1 %v5376_v39  ;;  %v12390_v13 = vld [vmem:[#allocation13_spill] sm:$0xff] }
0x139f   :  { %5574 = vmatpush1.msra.mxu0 %v10842_v54  ;;  %5645 = vmatpush1.msra.mxu1 %v10848_v60  ;;  %v11253_v39 = vld [vmem:[%s11581_s8 + $0x50] sm:$0xff] }
0x13a0   :  { %5575 = vmatprep.subr.mxu0 %v10854_v27  ;;  %5646 = vmatprep.subr.mxu1 %v10860_v52  ;;  %12407 = vst [vmem:[#allocation18_spill] sm:$0xff] %v11253_v39 }
0x13a1   :  { %5576 = vmatpush1.msra.mxu0 %v10866_v17  ;;  %5647 = vmatpush1.msra.mxu1 %v10872_v56 }
0x13a2   :  { %5577 = vmatprep.subr.mxu0 %v10878_v4  ;;  %5648 = vmatprep.subr.mxu1 %v10884_v57 }
0x13a3   :  { %5578 = vmatpush1.msra.mxu0 %v10890_v7  ;;  %5649 = vmatpush1.msra.mxu1 %v10896_v46 }
0x13a4   :  { %5579 = vmatprep.subr.mxu0 %v10902_v5  ;;  %5650 = vmatprep.subr.mxu1 %v10908_v58 }
0x13a5   :  { %5580 = vmatpush1.msra.mxu0 %v10914_v26  ;;  %5651 = vmatpush1.msra.mxu1 %v10920_v34 }
0x13a6   :  { %5581 = vmatprep.subr.mxu0 %v10926_v63  ;;  %5652 = vmatprep.subr.mxu1 %v10932_v30 }
0x13a7   :  { %5582 = vmatpush1.msra.mxu0 %v10938_v29  ;;  %5653 = vmatpush1.msra.mxu1 %v10944_v25 }
0x13a8   :  { %5583 = vmatprep.subr.mxu0 %v10950_v14  ;;  %5654 = vmatprep.subr.mxu1 %v10956_v50 }
0x13a9   :  { %5584 = vmatpush1.msra.mxu0 %v10962_v32  ;;  %5655 = vmatpush1.msra.mxu1 %v10968_v21 }
0x13aa   :  { %5585 = vmatprep.subr.mxu0 %v10974_v41  ;;  %5656 = vmatprep.subr.mxu1 %v10980_v31 }
0x13ab   :  { %5586 = vmatpush1.msra.mxu0 %v10986_v10  ;;  %5657 = vmatpush1.msra.mxu1 %v10992_v59 }
0x13ac   :  { %5587 = vmatprep.subr.mxu0 %v10998_v12  ;;  %5658 = vmatprep.subr.mxu1 %v11004_v18 }
0x13ad   :  { %5588 = vmatpush1.msra.mxu0 %v11010_v22  ;;  %5659 = vmatpush1.msra.mxu1 %v11016_v2 }
0x13ae   :  { %5589 = vmatprep.subr.mxu0 %v11022_v28  ;;  %5660 = vmatprep.subr.mxu1 %v12389_v36 }
0x13af   :  { %5590 = vmatpush1.msra.mxu0 %v12390_v13  ;;  %5661 = vmatpush1.msra.mxu1 %v12391_v51 }
0x13b0   :  { %5591 = vmatprep.subr.mxu0 %v12392_v40  ;;  %5662 = vmatprep.subr.mxu1 %v12393_v42 }
0x13b1   :  { %5592 = vmatpush1.msra.mxu0 %v12394_v9  ;;  %5663 = vmatpush1.msra.mxu1 %v12395_v55 }
0x13b2   :  { %5593 = vmatprep.subr.mxu0 %v11070_v16  ;;  %5664 = vmatprep.subr.mxu1 %v11076_v35 }
0x13b3   :  { %5594 = vmatpush1.msra.mxu0 %v11082_v19  ;;  %5665 = vmatpush1.msra.mxu1 %v11088_v47 }
0x13b4   :  { %5595 = vmatprep.subr.mxu0 %v11187_v20  ;;  %5666 = vmatprep.subr.mxu1 %v11193_v0  ;;  %v12420_v20 = vld [vmem:[#allocation47_spill] sm:$0xff] }
0x13b5   :  { %5596 = vmatpush1.msra.mxu0 %v11199_v49  ;;  %5667 = vmatpush1.msra.mxu1 %v11205_v3 }
0x13b6   :  { %5597 = vmatprep.subr.mxu0 %v11211_v6  ;;  %5668 = vmatprep.subr.mxu1 %v11217_v8 }
0x13b7   :  { %5598 = vmatpush1.msra.mxu0 %v11223_v11  ;;  %5669 = vmatpush1.msra.mxu1 %v11229_v48 }
0x13b8   :  { %5599 = vmatprep.subr.mxu0 %v11235_v1  ;;  %5670 = vmatprep.subr.mxu1 %v11241_v62  ;;  %v11259_v1 = vld [vmem:[%s11581_s8 + $0x28] sm:$0xff]  ;;  %v11265_v62 = vld [vmem:[%s11581_s8 + $0x38] sm:$0xff] }
0x13b9   :  { %5600 = vmatpush1.msra.mxu0 %v11247_v23  ;;  %5671 = vmatpush1.msra.mxu1 %v11253_v39  ;;  %12408 = vst [vmem:[#allocation19_spill] sm:$0xff] %v11259_v1  ;;  %12409 = vst [vmem:[#allocation30_spill] sm:$0xff] %v11265_v62  ;;  %v11271_v23 = vld [vmem:[%s11581_s8 + $0x20] sm:$0xff]  ;;  %v11277_v39 = vld [vmem:[%s11581_s8 + $0x30] sm:$0xff] }
0x13ba   :  { %5601 = vmatprep.subr.mxu0 %v11259_v1  ;;  %5672 = vmatprep.subr.mxu1 %v11265_v62  ;;  %12410 = vst [vmem:[#allocation17_spill] sm:$0xff] %v11271_v23  ;;  %12411 = vst [vmem:[#allocation57_spill] sm:$0xff] %v11277_v39  ;;  %v11283_v1 = vld [vmem:[%s11581_s8 + $0x8] sm:$0xff]  ;;  %v11289_v62 = vld [vmem:[%s11581_s8 + $0x18] sm:$0xff] }
0x13bb   :  { %5602 = vmatpush1.msra.mxu0 %v11271_v23  ;;  %5673 = vmatpush1.msra.mxu1 %v11277_v39  ;;  %12412 = vst [vmem:[#allocation23_spill] sm:$0xff] %v11283_v1  ;;  %12413 = vst [vmem:[#allocation15_spill] sm:$0xff] %v11289_v62  ;;  %v11295_v23 = vld [vmem:[%s11581_s8] sm:$0xff]  ;;  %v12417_v39 = vld [vmem:[#allocation50_spill] sm:$0xff] }
0x13bc   :  { %5603 = vmatprep.subr.mxu0 %v11283_v1  ;;  %5674 = vmatprep.subr.mxu1 %v11289_v62  ;;  %12414 = vst [vmem:[#allocation32_spill] sm:$0xff] %v11295_v23  ;;  %v11302_v1 = vld [vmem:[%s11581_s8 + $0x10] sm:$0xff]  ;;  %v11311_v62 = vld [vmem:[%s11582_s0] sm:$0xff]  ;;  %v4418_v48 = vadd.f32 %v12417_v39, %v12369_v15  ;;  %v4531_v39 = vadd.f32 %v12420_v20, %v10663_v44 }
0x13bd   :  { %5604 = vmatpush1.msra.mxu0 %v11295_v23  ;;  %5637 = vmatprep.mubr.f32.mxu0 %v12363_v43  ;;  %12415 = vst [vmem:[#allocation36_spill] sm:$0xff] %v11302_v1  ;;  %12416 = vst [vmem:[#allocation35_spill] sm:$0xff] %v11311_v62  ;;  %vm5745_vm9 = vcmp.eq.s32.totalorder %v11311_v62, 6  ;;  %v12419_v62 = vld [vmem:[#allocation53_spill] sm:$0xff] }
0x13be   :  { %5675 = vmatpush1.msra.mxu1 %v11302_v1  ;;  %5708 = vmatprep.mubr.f32.mxu1 %v12363_v43  ;;  %v5746_v23 = vsel %vm5745_vm9, 1, %v12368_v24  ;;  %v12418_v43 = vld [vmem:[#allocation51_spill] sm:$0xff]  ;;  %v4533_v24 = vadd.f32 %v12419_v62, %v12339_v33  ;;  %v12423_v62 = vld [vmem:[#allocation14_spill] sm:$0xff] }
0x13bf   :  { %5756 = vmatprep.subr.mxu0 %v11116_v37  ;;  %5827 = vmatprep.subr.mxu1 %v11122_v38  ;;  %v4420_v11 = vadd.f32 %v12418_v43, %v10646_v53 }
0x13c0   :  { %5748 = vperm.xlu1 %6364, %v5746_v23  }
0x145e   :  { %v5456_v1 = vpop.f32.mrf.mxu0  ;;  %v5527_v3 = vpop.f32.mrf.mxu1 }
0x145f   :  { %v5532_v37 = vadd.f32 %v5456_v1, %v4418_v48  ;;  %v5534_v15 = vadd.f32 %v5527_v3, %v4531_v39  ;;  %v12425_v39 = vld [vmem:[#allocation44_spill] sm:$0xff] }
0x1460   :  { %v5458_v8 = vpop.f32.mrf.mxu0  ;;  %v5529_v0 = vpop.f32.mrf.mxu1 }
0x1461   :  { %v6295_v38 = vmul.f32 -1.442695, %v5532_v37  ;;  %v5533_v6 = vadd.f32 %v5458_v8, %v4420_v11  ;;  %v5535_v23 = vadd.f32 %v5529_v0, %v4533_v24 }
0x1463   :  { %6685 = vpow2.f32 %v6295_v38  ;;  %v6296_v49 = vmul.f32 -1.442695, %v5533_v6  ;;  %v6297_v47 = vmul.f32 -1.442695, %v5535_v23  ;;  %v12424_v23 = vld [vmem:[#allocation42_spill] sm:$0xff] }
0x1465   :  { %6687 = vpow2.f32 %v6296_v49 }
0x1466   :  { %6689 = vtanh.f32 %v5534_v15 }
0x1467   :  { %6691 = vpow2.f32 %v6297_v47 }
0x1470   :  { %v6686_v19 = vpop.eup %6685 }
0x1471   :  { %v5539_v43 = vadd.f32 1.0, %v6686_v19  ;;  %v5566_v19 = vpop.permute.xlu0 %5565 }
0x1472   :  { %v6688_v48 = vpop.eup %6687  ;;  %vm5567_vm10 = vcmp.eq.s32.totalorder %v5566_v19, 1  ;;  %v12436_v19 = vld [vmem:[#allocation30_spill] sm:$0xff] }
0x1473   :  { %6693 = vrcp.f32 %v5539_v43  ;;  %v5545_v37 = vadd.f32 1.0, %v6688_v48  ;;  %v6690_v38 = vpop.eup %6689  ;;  %v12426_v43 = vld [vmem:[#allocation45_spill] sm:$0xff]  ;;  %v12427_v48 = vld [vmem:[#allocation43_spill] sm:$0xff] }
0x1474   :  { %v6692_v49 = vpop.eup %6691 }
0x1475   :  { %6695 = vrcp.f32 %v5545_v37  ;;  %v5552_v1 = vadd.f32 1.0, %v6692_v49  ;;  %v12428_v37 = vld [vmem:[#allocation11_spill] sm:$0xff]  ;;  %v12430_v49 = vld [vmem:[#allocation25_spill] sm:$0xff] }
0x1477   :  { %6697 = vrcp.f32 %v5552_v1  ;;  %v12434_v1 = vld [vmem:[#allocation18_spill] sm:$0xff] }
0x1480   :  { %v6694_v6 = vpop.eup %6693 }
0x1481   :  { %v5556_v8 = vmul.f32 %v6694_v6, %v6690_v38  ;;  %v12429_v38 = vld [vmem:[#allocation16_spill] sm:$0xff] }
0x1482   :  { %v6696_v11 = vpop.eup %6695  ;;  %v12431_v6 = vld [vmem:[#allocation12_spill] sm:$0xff] }
0x1483   :  { %v5555_v24 = vmul.f32 %v6696_v11, %v11136_v61  ;;  %v12421_v61 = vld [vmem:[#allocation40_spill] sm:$0xff]  ;;  %v12433_v11 = vld [vmem:[#allocation31_spill] sm:$0xff] }
0x1484   :  { %v6698_v15 = vpop.eup %6697 }
0x1485   :  { %v11324_v0 = vadd.f32 %v5556_v8, %v5555_v24  ;;  %v12432_v8 = vld [vmem:[#allocation26_spill] sm:$0xff]  ;;  %v12435_v24 = vld [vmem:[#allocation19_spill] sm:$0xff] }
0x1487   :  { %6699 = vtanh.f32 %v11324_v0 }
0x1494   :  { %v6700_v20 = vpop.eup %6699 }
0x1495   :  { %v5559_v47 = vmul.f32 %v6700_v20, %v6698_v15  ;;  %v12437_v15 = vld [vmem:[#allocation17_spill] sm:$0xff] }
0x1496   :  { %v12438_v20 = vld [vmem:[#allocation57_spill] sm:$0xff] }
0x1497   :  { %v11328_v3 = vsel %vm5567_vm10, %v5559_v47, %v11140_v45  ;;  %5638 = vmatmul.mubr.f32.vlgmr.msra.gmra.mxu0 %v5559_v47  ;;  %5709 = vmatmul.mubr.f32.vlgmr.msra.gmra.mxu1 %v5559_v47  ;;  %v12422_v45 = vld [vmem:[#allocation41_spill] sm:$0xff]  ;;  %v12439_v47 = vld [vmem:[#allocation23_spill] sm:$0xff] }
0x1498   :  { %5757 = vmatpush1.msra.mxu0 %v10842_v54  ;;  %5828 = vmatpush1.msra.mxu1 %v10848_v60 }
0x1499   :  { %5758 = vmatprep.subr.mxu0 %v10854_v27  ;;  %5829 = vmatprep.subr.mxu1 %v10860_v52 }
0x149a   :  { %5759 = vmatpush1.msra.mxu0 %v10866_v17  ;;  %5830 = vmatpush1.msra.mxu1 %v10872_v56 }
0x149b   :  { %5760 = vmatprep.subr.mxu0 %v10878_v4  ;;  %5831 = vmatprep.subr.mxu1 %v10884_v57 }
0x149c   :  { %5761 = vmatpush1.msra.mxu0 %v10890_v7  ;;  %5832 = vmatpush1.msra.mxu1 %v10896_v46 }
0x149d   :  { %5762 = vmatprep.subr.mxu0 %v10902_v5  ;;  %5833 = vmatprep.subr.mxu1 %v10908_v58 }
0x149e   :  { %5763 = vmatpush1.msra.mxu0 %v10914_v26  ;;  %5834 = vmatpush1.msra.mxu1 %v10920_v34 }
0x149f   :  { %5764 = vmatprep.subr.mxu0 %v10926_v63  ;;  %5835 = vmatprep.subr.mxu1 %v10932_v30 }
0x14a0   :  { %5765 = vmatpush1.msra.mxu0 %v10938_v29  ;;  %5836 = vmatpush1.msra.mxu1 %v10944_v25 }
0x14a1   :  { %5766 = vmatprep.subr.mxu0 %v10950_v14  ;;  %5837 = vmatprep.subr.mxu1 %v10956_v50 }
0x14a2   :  { %5767 = vmatpush1.msra.mxu0 %v10962_v32  ;;  %5838 = vmatpush1.msra.mxu1 %v10968_v21 }
0x14a3   :  { %5768 = vmatprep.subr.mxu0 %v10974_v41  ;;  %5839 = vmatprep.subr.mxu1 %v10980_v31 }
0x14a4   :  { %5769 = vmatpush1.msra.mxu0 %v10986_v10  ;;  %5840 = vmatpush1.msra.mxu1 %v10992_v59 }
0x14a5   :  { %5770 = vmatprep.subr.mxu0 %v10998_v12  ;;  %5841 = vmatprep.subr.mxu1 %v11004_v18 }
0x14a6   :  { %5771 = vmatpush1.msra.mxu0 %v11010_v22  ;;  %5842 = vmatpush1.msra.mxu1 %v11016_v2 }
0x14a7   :  { %5772 = vmatprep.subr.mxu0 %v11022_v28  ;;  %5843 = vmatprep.subr.mxu1 %v12389_v36 }
0x14a8   :  { %5773 = vmatpush1.msra.mxu0 %v12390_v13  ;;  %5844 = vmatpush1.msra.mxu1 %v12391_v51 }
0x14a9   :  { %5774 = vmatprep.subr.mxu0 %v12392_v40  ;;  %5845 = vmatprep.subr.mxu1 %v12393_v42 }
0x14aa   :  { %5775 = vmatpush1.msra.mxu0 %v12394_v9  ;;  %5846 = vmatpush1.msra.mxu1 %v12395_v55 }
0x14ab   :  { %5776 = vmatprep.subr.mxu0 %v11070_v16  ;;  %5847 = vmatprep.subr.mxu1 %v11076_v35 }
0x14ac   :  { %5777 = vmatpush1.msra.mxu0 %v12421_v61  ;;  %5848 = vmatpush1.msra.mxu1 %v12422_v45 }
0x14ad   :  { %5778 = vmatprep.subr.mxu0 %v12423_v62  ;;  %5849 = vmatprep.subr.mxu1 %v12424_v23  ;;  %v12452_v62 = vld [vmem:[#allocation52_spill] sm:$0xff] }
0x14ae   :  { %5779 = vmatpush1.msra.mxu0 %v12425_v39  ;;  %5850 = vmatpush1.msra.mxu1 %v12426_v43 }
0x14af   :  { %5780 = vmatprep.subr.mxu0 %v12427_v48  ;;  %5851 = vmatprep.subr.mxu1 %v12428_v37 }
0x14b0   :  { %5781 = vmatpush1.msra.mxu0 %v12429_v38  ;;  %5852 = vmatpush1.msra.mxu1 %v12430_v49  ;;  %v12440_v38 = vld [vmem:[#allocation15_spill] sm:$0xff]  ;;  %v12441_v49 = vld [vmem:[#allocation32_spill] sm:$0xff] }
0x14b1   :  { %5782 = vmatprep.subr.mxu0 %v12431_v6  ;;  %5853 = vmatprep.subr.mxu1 %v12432_v8  ;;  %v12442_v6 = vmov 0.0   ;;  %v12443_v8 = vld [vmem:[#allocation36_spill] sm:$0xff] }
0x14b2   :  { %5783 = vmatpush1.msra.mxu0 %v12433_v11  ;;  %5854 = vmatpush1.msra.mxu1 %v12434_v1  ;;  %v12444_v1 = vld [vmem:[#allocation39_spill] sm:$0xff] }
0x14b3   :  { %5784 = vmatprep.subr.mxu0 %v12435_v24  ;;  %5855 = vmatprep.subr.mxu1 %v12436_v19  ;;  %v12445_v24 = vld [vmem:[#allocation21_spill] sm:$0xff]  ;;  %v12446_v19 = vld [vmem:[#allocation35_spill] sm:$0xff] }
0x14b4   :  { %5785 = vmatpush1.msra.mxu0 %v12437_v15  ;;  %5856 = vmatpush1.msra.mxu1 %v12438_v20  ;;  %vm5928_vm11 = vcmp.eq.s32.totalorder %v12446_v19, 7  ;;  %v12447_v15 = vmov 0   ;;  %v12449_v11 = vld [vmem:[#allocation55_spill] sm:$0xff]  ;;  %v12451_v19 = vld [vmem:[#allocation20_spill] sm:$0xff] }
0x14b5   :  { %5786 = vmatprep.subr.mxu0 %v12439_v47  ;;  %5857 = vmatprep.subr.mxu1 %v12440_v38  ;;  %v5929_v20 = vsel %vm5928_vm11, 1, %v12447_v15  ;;  %v12448_v47 = vld [vmem:[#allocation59_spill] sm:$0xff]  ;;  %v4539_v15 = vadd.f32 %v12451_v19, %v12339_v33 }
0x14b6   :  { %5787 = vmatpush1.msra.mxu0 %v12441_v49  ;;  %5820 = vmatprep.mubr.f32.mxu0 %v12442_v6  ;;  %v4424_v38 = vadd.f32 %v12449_v11, %v12448_v47  ;;  %v12450_v49 = vld [vmem:[#allocation62_spill] sm:$0xff]  ;;  %v4537_v11 = vadd.f32 %v12452_v62, %v10663_v44 }
0x14b7   :  { %5858 = vmatpush1.msra.mxu1 %v12443_v8  ;;  %5891 = vmatprep.mubr.f32.mxu1 %v12442_v6  ;;  %v4426_v48 = vadd.f32 %v12450_v49, %v10646_v53 }
0x14b8   :  { %5939 = vmatprep.subr.mxu0 %v12444_v1  ;;  %6010 = vmatprep.subr.mxu1 %v12445_v24 }
0x14b9   :  { %5931 = vperm.xlu0 %6363, %v5929_v20  }
0x1557   :  { %v5639_v37 = vpop.f32.mrf.mxu0  ;;  %v5710_v1 = vpop.f32.mrf.mxu1 }
0x1558   :  { %v5715_v43 = vadd.f32 %v5639_v37, %v4424_v38  ;;  %v5717_v47 = vadd.f32 %v5710_v1, %v4537_v11 }
0x1559   :  { %v5641_v8 = vpop.f32.mrf.mxu0  ;;  %v5712_v24 = vpop.f32.mrf.mxu1 }
0x155a   :  { %v6298_v39 = vmul.f32 -1.442695, %v5715_v43  ;;  %v5716_v6 = vadd.f32 %v5641_v8, %v4426_v48  ;;  %v5718_v20 = vadd.f32 %v5712_v24, %v4539_v15  ;;  %v12482_v24 = vld [vmem:[#allocation22_spill] sm:$0xff] }
0x155c   :  { %6701 = vpow2.f32 %v6298_v39  ;;  %v6299_v23 = vmul.f32 -1.442695, %v5716_v6  ;;  %v6300_v45 = vmul.f32 -1.442695, %v5718_v20  ;;  %v4543_v20 = vadd.f32 %v12482_v24, %v10663_v44 }
0x155e   :  { %6703 = vpow2.f32 %v6299_v23 }
0x155f   :  { %6705 = vtanh.f32 %v5717_v47 }
0x1560   :  { %6707 = vpow2.f32 %v6300_v45 }
0x1569   :  { %v6702_v61 = vpop.eup %6701 }
0x156a   :  { %v5722_v49 = vadd.f32 1.0, %v6702_v61  ;;  %v5749_v61 = vpop.permute.xlu1 %5748 }
0x156b   :  { %v6704_v37 = vpop.eup %6703  ;;  %vm5750_vm12 = vcmp.eq.s32.totalorder %v5749_v61, 1 }
0x156c   :  { %6709 = vrcp.f32 %v5722_v49  ;;  %v5728_v39 = vadd.f32 1.0, %v6704_v37  ;;  %v6706_v43 = vpop.eup %6705 }
0x156d   :  { %v6708_v23 = vpop.eup %6707 }
0x156e   :  { %6711 = vrcp.f32 %v5728_v39  ;;  %v5735_v8 = vadd.f32 1.0, %v6708_v23 }
0x1570   :  { %6713 = vrcp.f32 %v5735_v8 }
0x1579   :  { %v6710_v48 = vpop.eup %6709 }
0x157a   :  { %v5739_v38 = vmul.f32 %v6710_v48, %v6706_v43 }
0x157b   :  { %v6712_v6 = vpop.eup %6711 }
0x157c   :  { %v5738_v19 = vmul.f32 %v6712_v6, %v11324_v0 }
0x157d   :  { %v6714_v62 = vpop.eup %6713 }
0x157e   :  { %v11407_v15 = vadd.f32 %v5739_v38, %v5738_v19 }
0x1580   :  { %6715 = vtanh.f32 %v11407_v15 }
0x158d   :  { %v6716_v47 = vpop.eup %6715 }
0x158e   :  { %v5742_v45 = vmul.f32 %v6716_v47, %v6714_v62 }
0x1590   :  { %v11411_v1 = vsel %vm5750_vm12, %v5742_v45, %v11328_v3  ;;  %5821 = vmatmul.mubr.f32.vlgmr.msra.gmra.mxu0 %v5742_v45  ;;  %5892 = vmatmul.mubr.f32.vlgmr.msra.gmra.mxu1 %v5742_v45  ;;  %v5932_v45 = vpop.permute.xlu0 %5931 }
0x1591   :  { %5940 = vmatpush1.msra.mxu0 %v10842_v54  ;;  %6011 = vmatpush1.msra.mxu1 %v10848_v60  ;;  %v12453_v54 = vld [vmem:[#allocation40_spill] sm:$0xff]  ;;  %v12454_v60 = vld [vmem:[#allocation41_spill] sm:$0xff]  ;;  %vm5933_vm14 = vcmp.eq.s32.totalorder %v5932_v45, 1 }
0x1592   :  { %5941 = vmatprep.subr.mxu0 %v10854_v27  ;;  %6012 = vmatprep.subr.mxu1 %v10860_v52  ;;  %v12455_v27 = vld [vmem:[#allocation14_spill] sm:$0xff] }
0x1593   :  { %5942 = vmatpush1.msra.mxu0 %v10866_v17  ;;  %6013 = vmatpush1.msra.mxu1 %v10872_v56  ;;  %v12456_v52 = vld [vmem:[#allocation42_spill] sm:$0xff]  ;;  %v12457_v17 = vld [vmem:[#allocation44_spill] sm:$0xff]  ;;  %v12458_v56 = vld [vmem:[#allocation45_spill] sm:$0xff] }
0x1594   :  { %5943 = vmatprep.subr.mxu0 %v10878_v4  ;;  %6014 = vmatprep.subr.mxu1 %v10884_v57  ;;  %v12459_v4 = vld [vmem:[#allocation43_spill] sm:$0xff] }
0x1595   :  { %5944 = vmatpush1.msra.mxu0 %v10890_v7  ;;  %6015 = vmatpush1.msra.mxu1 %v10896_v46  ;;  %v12460_v57 = vld [vmem:[#allocation11_spill] sm:$0xff]  ;;  %v12461_v7 = vld [vmem:[#allocation16_spill] sm:$0xff]  ;;  %v12462_v46 = vld [vmem:[#allocation25_spill] sm:$0xff] }
0x1596   :  { %5945 = vmatprep.subr.mxu0 %v10902_v5  ;;  %6016 = vmatprep.subr.mxu1 %v10908_v58  ;;  %v12463_v5 = vld [vmem:[#allocation12_spill] sm:$0xff]  ;;  %v12464_v58 = vld [vmem:[#allocation26_spill] sm:$0xff] }
0x1597   :  { %5946 = vmatpush1.msra.mxu0 %v10914_v26  ;;  %6017 = vmatpush1.msra.mxu1 %v10920_v34  ;;  %v12465_v26 = vld [vmem:[#allocation31_spill] sm:$0xff]  ;;  %v12466_v34 = vld [vmem:[#allocation18_spill] sm:$0xff] }
0x1598   :  { %5947 = vmatprep.subr.mxu0 %v10926_v63  ;;  %6018 = vmatprep.subr.mxu1 %v10932_v30  ;;  %v12467_v63 = vld [vmem:[#allocation19_spill] sm:$0xff]  ;;  %v12468_v30 = vld [vmem:[#allocation30_spill] sm:$0xff] }
0x1599   :  { %5948 = vmatpush1.msra.mxu0 %v10938_v29  ;;  %6019 = vmatpush1.msra.mxu1 %v10944_v25  ;;  %v12469_v29 = vld [vmem:[#allocation17_spill] sm:$0xff] }
0x159a   :  { %5949 = vmatprep.subr.mxu0 %v10950_v14  ;;  %6020 = vmatprep.subr.mxu1 %v10956_v50  ;;  %v12470_v25 = vld [vmem:[#allocation57_spill] sm:$0xff]  ;;  %v12471_v14 = vld [vmem:[#allocation23_spill] sm:$0xff] }
0x159b   :  { %5950 = vmatpush1.msra.mxu0 %v10962_v32  ;;  %6021 = vmatpush1.msra.mxu1 %v10968_v21  ;;  %v12472_v50 = vld [vmem:[#allocation15_spill] sm:$0xff]  ;;  %v12473_v32 = vld [vmem:[#allocation32_spill] sm:$0xff]  ;;  %v12474_v21 = vmov 0.0  }
0x159c   :  { %5951 = vmatprep.subr.mxu0 %v10974_v41  ;;  %6022 = vmatprep.subr.mxu1 %v10980_v31  ;;  %v12475_v41 = vld [vmem:[#allocation36_spill] sm:$0xff]  ;;  %v12476_v31 = vld [vmem:[#allocation35_spill] sm:$0xff] }
0x159d   :  { %5952 = vmatpush1.msra.mxu0 %v10986_v10  ;;  %6023 = vmatpush1.msra.mxu1 %v10992_v59  ;;  %vm6111_vm13 = vcmp.eq.s32.totalorder %v12476_v31, 8  ;;  %v12477_v10 = vmov 0  }
0x159e   :  { %5953 = vmatprep.subr.mxu0 %v10998_v12  ;;  %6024 = vmatprep.subr.mxu1 %v11004_v18  ;;  %v6112_v59 = vsel %vm6111_vm13, 1, %v12477_v10  ;;  %v12478_v12 = vld [vmem:[#allocation59_spill] sm:$0xff]  ;;  %v12479_v18 = vld [vmem:[#allocation24_spill] sm:$0xff] }
0x159f   :  { %5954 = vmatpush1.msra.mxu0 %v11010_v22  ;;  %6025 = vmatpush1.msra.mxu1 %v11016_v2  ;;  %v4430_v22 = vadd.f32 %v12479_v18, %v12478_v12 }
0x15a0   :  { %5955 = vmatprep.subr.mxu0 %v11022_v28  ;;  %6026 = vmatprep.subr.mxu1 %v12389_v36  ;;  %v12480_v28 = vld [vmem:[#allocation56_spill] sm:$0xff] }
0x15a1   :  { %5956 = vmatpush1.msra.mxu0 %v12390_v13  ;;  %6027 = vmatpush1.msra.mxu1 %v12391_v51 }
0x15a2   :  { %5957 = vmatprep.subr.mxu0 %v12392_v40  ;;  %6028 = vmatprep.subr.mxu1 %v12393_v42 }
0x15a3   :  { %5958 = vmatpush1.msra.mxu0 %v12394_v9  ;;  %6029 = vmatpush1.msra.mxu1 %v12395_v55  ;;  %v12481_v55 = vld [vmem:[#allocation60_spill] sm:$0xff] }
0x15a4   :  { %5959 = vmatprep.subr.mxu0 %v11070_v16  ;;  %6030 = vmatprep.subr.mxu1 %v11076_v35  ;;  %v4432_v35 = vadd.f32 %v12480_v28, %v10646_v53  ;;  %v4545_v0 = vadd.f32 %v12481_v55, %v12339_v33 }
0x15a5   :  { %5960 = vmatpush1.msra.mxu0 %v12453_v54  ;;  %6031 = vmatpush1.msra.mxu1 %v12454_v60 }
0x15a6   :  { %5961 = vmatprep.subr.mxu0 %v12455_v27  ;;  %6032 = vmatprep.subr.mxu1 %v12456_v52 }
0x15a7   :  { %5962 = vmatpush1.msra.mxu0 %v12457_v17  ;;  %6033 = vmatpush1.msra.mxu1 %v12458_v56  ;;  %v6140_v17 = vld [vmem:[%s11584_s9 + $0x78] sm:$0xff]  ;;  %v6137_v56 = vld [vmem:[%s11584_s9 + $0x60] sm:$0xff] }
0x15a8   :  { %5963 = vmatprep.subr.mxu0 %v12459_v4  ;;  %6034 = vmatprep.subr.mxu1 %v12460_v57  ;;  %v6136_v4 = vld [vmem:[%s11584_s9 + $0x58] sm:$0xff]  ;;  %v6135_v57 = vld [vmem:[%s11584_s9 + $0x50] sm:$0xff] }
0x15a9   :  { %5964 = vmatpush1.msra.mxu0 %v12461_v7  ;;  %6035 = vmatpush1.msra.mxu1 %v12462_v46  ;;  %v6134_v7 = vld [vmem:[%s11584_s9 + $0x48] sm:$0xff]  ;;  %v6133_v46 = vld [vmem:[%s11584_s9 + $0x40] sm:$0xff] }
0x15aa   :  { %5965 = vmatprep.subr.mxu0 %v12463_v5  ;;  %6036 = vmatprep.subr.mxu1 %v12464_v58  ;;  %v6132_v5 = vld [vmem:[%s11584_s9 + $0x38] sm:$0xff]  ;;  %v6131_v58 = vld [vmem:[%s11584_s9 + $0x30] sm:$0xff] }
0x15ab   :  { %5966 = vmatpush1.msra.mxu0 %v12465_v26  ;;  %6037 = vmatpush1.msra.mxu1 %v12466_v34  ;;  %v6130_v26 = vld [vmem:[%s11584_s9 + $0x28] sm:$0xff]  ;;  %v6129_v34 = vld [vmem:[%s11584_s9 + $0x20] sm:$0xff] }
0x15ac   :  { %5967 = vmatprep.subr.mxu0 %v12467_v63  ;;  %6038 = vmatprep.subr.mxu1 %v12468_v30  ;;  %v6128_v63 = vld [vmem:[%s11584_s9 + $0x18] sm:$0xff]  ;;  %v6127_v30 = vld [vmem:[%s11584_s9 + $0x10] sm:$0xff] }
0x15ad   :  { %5968 = vmatpush1.msra.mxu0 %v12469_v29  ;;  %6039 = vmatpush1.msra.mxu1 %v12470_v25  ;;  %v6126_v29 = vld [vmem:[%s11584_s9 + $0x8] sm:$0xff]  ;;  %v6125_v25 = vld [vmem:[%s11584_s9] sm:$0xff] }
0x15ae   :  { %5969 = vmatprep.subr.mxu0 %v12471_v14  ;;  %6040 = vmatprep.subr.mxu1 %v12472_v50  ;;  %v12483_v14 = vld [vmem:[#allocation58_spill] sm:$0xff] }
0x15af   :  { %5970 = vmatpush1.msra.mxu0 %v12473_v32  ;;  %6003 = vmatprep.mubr.f32.mxu0 %v12474_v21  ;;  %v4436_v50 = vadd.f32 %v12483_v14, %v12478_v12 }
0x15b0   :  { %6041 = vmatpush1.msra.mxu1 %v12475_v41  ;;  %6074 = vmatprep.mubr.f32.mxu1 %v12474_v21  ;;  %v12484_v41 = vld [vmem:[#allocation63_spill] sm:$0xff] }
0x15b1   :  { %6325 = vmatprep.subr.mxu0 %v12474_v21  ;;  %6114 = vperm.xlu1 %6364, %v6112_v59   ;;  %v4438_v31 = vadd.f32 %v12484_v41, %v10646_v53 }
0x1650   :  { %v5822_v2 = vpop.f32.mrf.mxu0  ;;  %v5893_v40 = vpop.f32.mrf.mxu1 }
0x1651   :  { %v5898_v16 = vadd.f32 %v5822_v2, %v4430_v22  ;;  %v5900_v11 = vadd.f32 %v5893_v40, %v4543_v20 }
0x1652   :  { %v5824_v36 = vpop.f32.mrf.mxu0  ;;  %v5895_v9 = vpop.f32.mrf.mxu1 }
0x1653   :  { %v6301_v13 = vmul.f32 -1.442695, %v5898_v16  ;;  %v5899_v51 = vadd.f32 %v5824_v36, %v4432_v35  ;;  %v5901_v3 = vadd.f32 %v5895_v9, %v4545_v0  ;;  %v12485_v16 = vld [vmem:[#allocation64_spill] sm:$0xff] }
0x1655   :  { %6717 = vpow2.f32 %v6301_v13  ;;  %v6302_v42 = vmul.f32 -1.442695, %v5899_v51  ;;  %v6303_v49 = vmul.f32 -1.442695, %v5901_v3  ;;  %v12486_v13 = vld [vmem:[#allocation49_spill] sm:$0xff] }
0x1656   :  { %v4549_v12 = vadd.f32 %v12486_v13, %v10663_v44 }
0x1657   :  { %6719 = vpow2.f32 %v6302_v42 }
0x1658   :  { %6721 = vtanh.f32 %v5900_v11 }
0x1659   :  { %6723 = vpow2.f32 %v6303_v49 }
0x1662   :  { %v6718_v37 = vpop.eup %6717 }
0x1663   :  { %v5905_v39 = vadd.f32 1.0, %v6718_v37 }
0x1664   :  { %v6720_v43 = vpop.eup %6719 }
0x1665   :  { %6725 = vrcp.f32 %v5905_v39  ;;  %v5911_v23 = vadd.f32 1.0, %v6720_v43  ;;  %v6722_v48 = vpop.eup %6721  ;;  %v6115_v39 = vpop.permute.xlu1 %6114 }
0x1666   :  { %v6724_v38 = vpop.eup %6723  ;;  %vm6116_vm0 = vcmp.eq.s32.totalorder %v6115_v39, 1 }
0x1667   :  { %6727 = vrcp.f32 %v5911_v23  ;;  %v5918_v61 = vadd.f32 1.0, %v6724_v38  ;;  %v6307_v38 = vld [vmem:[%s11585_s10] ss:$0 sm:$0xff] }
0x1669   :  { %6729 = vrcp.f32 %v5918_v61 }
0x1672   :  { %v6726_v6 = vpop.eup %6725 }
0x1673   :  { %v5922_v8 = vmul.f32 %v6726_v6, %v6722_v48 }
0x1674   :  { %v6728_v19 = vpop.eup %6727 }
0x1675   :  { %v5921_v62 = vmul.f32 %v6728_v19, %v11407_v15  ;;  %v6139_v15 = vld [vmem:[%s11584_s9 + $0x70] sm:$0xff] }
0x1676   :  { %v6730_v54 = vpop.eup %6729 }
0x1677   :  { %v11489_v47 = vadd.f32 %v5922_v8, %v5921_v62 }
0x1679   :  { %6731 = vtanh.f32 %v11489_v47 }
0x1686   :  { %v6732_v60 = vpop.eup %6731 }
0x1687   :  { %v5925_v27 = vmul.f32 %v6732_v60, %v6730_v54 }
0x1689   :  { %v11493_v52 = vsel %vm5933_vm14, %v5925_v27, %v11411_v1  ;;  %6004 = vmatmul.mubr.f32.vlgmr.msra.gmra.mxu0 %v5925_v27  ;;  %6075 = vmatmul.mubr.f32.vlgmr.msra.gmra.mxu1 %v5925_v27  ;;  %v6138_v1 = vld [vmem:[%s11584_s9 + $0x68] sm:$0xff] }
0x168a   :  { %6326 = vmatpush3.msra.mxu0 %v6140_v17  ;;  %6357 = vmatprep.mubr.msk.f32.mxu0 %vm6820_vm15, %v12474_v21 }
0x168b   :  { %6327 = vmatprep.subr.mxu0 %v12474_v21 }
0x168c   :  { %6328 = vmatpush3.msra.mxu0 %v6139_v15 }
0x168d   :  { %6329 = vmatprep.subr.mxu0 %v12474_v21 }
0x168e   :  { %6330 = vmatpush3.msra.mxu0 %v6138_v1 }
0x168f   :  { %6331 = vmatprep.subr.mxu0 %v12474_v21 }
0x1690   :  { %6332 = vmatpush3.msra.mxu0 %v6137_v56 }
0x1691   :  { %6333 = vmatprep.subr.mxu0 %v12474_v21 }
0x1692   :  { %6334 = vmatpush3.msra.mxu0 %v6136_v4 }
0x1693   :  { %6335 = vmatprep.subr.mxu0 %v12474_v21 }
0x1694   :  { %6336 = vmatpush3.msra.mxu0 %v6135_v57 }
0x1695   :  { %6337 = vmatprep.subr.mxu0 %v12474_v21 }
0x1696   :  { %6338 = vmatpush3.msra.mxu0 %v6134_v7 }
0x1697   :  { %6339 = vmatprep.subr.mxu0 %v12474_v21 }
0x1698   :  { %6340 = vmatpush3.msra.mxu0 %v6133_v46 }
0x1699   :  { %6341 = vmatprep.subr.mxu0 %v12474_v21 }
0x169a   :  { %6342 = vmatpush3.msra.mxu0 %v6132_v5 }
0x169b   :  { %6343 = vmatprep.subr.mxu0 %v12474_v21 }
0x169c   :  { %6344 = vmatpush3.msra.mxu0 %v6131_v58 }
0x169d   :  { %6345 = vmatprep.subr.mxu0 %v12474_v21 }
0x169e   :  { %6346 = vmatpush3.msra.mxu0 %v6130_v26 }
0x169f   :  { %6347 = vmatprep.subr.mxu0 %v12474_v21 }
0x16a0   :  { %6348 = vmatpush3.msra.mxu0 %v6129_v34 }
0x16a1   :  { %6349 = vmatprep.subr.mxu0 %v12474_v21 }
0x16a2   :  { %6350 = vmatpush3.msra.mxu0 %v6128_v63 }
0x16a3   :  { %6351 = vmatprep.subr.mxu0 %v12474_v21 }
0x16a4   :  { %6352 = vmatpush3.msra.mxu0 %v6127_v30 }
0x16a5   :  { %6353 = vmatprep.subr.mxu0 %v12474_v21 }
0x16a6   :  { %6354 = vmatpush3.msra.mxu0 %v6126_v29 }
0x16a7   :  { %6355 = vmatprep.subr.mxu0 %v12474_v21  ;;  %v4551_v21 = vadd.f32 %v12485_v16, %v12339_v33 }
0x16a8   :  { %6356 = vmatpush3.msra.mxu0 %v6125_v25 }
0x1749   :  { %v6005_v32 = vpop.f32.mrf.mxu0  ;;  %v6076_v2 = vpop.f32.mrf.mxu1 }
0x174a   :  { %v6081_v10 = vadd.f32 %v6005_v32, %v4436_v50  ;;  %v6083_v51 = vadd.f32 %v6076_v2, %v4549_v12 }
0x174b   :  { %v6007_v59 = vpop.f32.mrf.mxu0  ;;  %v6078_v35 = vpop.f32.mrf.mxu1 }
0x174c   :  { %v6304_v18 = vmul.f32 -1.442695, %v6081_v10  ;;  %v6082_v22 = vadd.f32 %v6007_v59, %v4438_v31  ;;  %v6084_v36 = vadd.f32 %v6078_v35, %v4551_v21 }
0x174e   :  { %6733 = vpow2.f32 %v6304_v18  ;;  %v6305_v28 = vmul.f32 -1.442695, %v6082_v22  ;;  %v6306_v40 = vmul.f32 -1.442695, %v6084_v36 }
0x1750   :  { %6735 = vpow2.f32 %v6305_v28 }
0x1751   :  { %6737 = vtanh.f32 %v6083_v51 }
0x1752   :  { %6739 = vpow2.f32 %v6306_v40 }
0x175b   :  { %v6734_v42 = vpop.eup %6733 }
0x175c   :  { %v6088_v53 = vadd.f32 1.0, %v6734_v42 }
0x175d   :  { %v6736_v9 = vpop.eup %6735 }
0x175e   :  { %6741 = vrcp.f32 %v6088_v53  ;;  %v6094_v55 = vadd.f32 1.0, %v6736_v9  ;;  %v6738_v0 = vpop.eup %6737 }
0x175f   :  { %v6740_v3 = vpop.eup %6739 }
0x1760   :  { %6743 = vrcp.f32 %v6094_v55  ;;  %v6101_v33 = vadd.f32 1.0, %v6740_v3 }
0x1762   :  { %6745 = vrcp.f32 %v6101_v33 }
0x176b   :  { %v6742_v24 = vpop.eup %6741 }
0x176c   :  { %v6105_v20 = vmul.f32 %v6742_v24, %v6738_v0 }
0x176d   :  { %v6744_v11 = vpop.eup %6743 }
0x176e   :  { %v6104_v49 = vmul.f32 %v6744_v11, %v11489_v47 }
0x176f   :  { %v6746_v44 = vpop.eup %6745 }
0x1770   :  { %v6106_v37 = vadd.f32 %v6105_v20, %v6104_v49 }
0x1772   :  { %6747 = vtanh.f32 %v6106_v37 }
0x177f   :  { %v6748_v43 = vpop.eup %6747 }
0x1780   :  { %v6108_v23 = vmul.f32 %v6748_v43, %v6746_v44 }
0x1782   :  { %v6117_v48 = vsel %vm6116_vm0, %v6108_v23, %v11493_v52 }
0x1783   :  { %6358 = vmatmul.mubr.f32.vlgmr.msra.gmra.mxu0 %v6117_v48 }
0x1843   :  { %v6214_v6 = vpop.f32.mrf.mxu0 }
0x1844   :  { %v6215_v8 = vadd.f32 %v6307_v38, %v6214_v6 }
0x1845   :  { %v6359_v19 = vpop.f32.mrf.mxu0 }
0x1846   :  { %6218 = vmax.xlane.f32.xlu0 %v6215_v8 }
0x18cf   :  { %v6219_v61 = vpop.xlane.xlu0 %6218 }
0x18d0   :  { %v6220_v62 = vsub.f32 %v6215_v8, %v6219_v61 }
0x18d2   :  { %v6221_v47 = vmul.f32 1.442695, %v6220_v62 }
0x18d4   :  { %6749 = vpow2.f32 %v6221_v47 }
0x18e1   :  { %v6750_v45 = vpop.eup %6749 }
0x18e2   :  { %6223 = vadd.xlane.f32.xlu1 %v6750_v45 }
0x196b   :  { %v6224_v54 = vpop.xlane.xlu1 %6223 }
0x196c   :  { %6751 = vlog2.f32 %v6224_v54 }
0x1979   :  { %v6752_v60 = vpop.eup %6751 }
0x197a   :  { %v6226_v27 = vmul.f32 0.6931472, %v6752_v60 }
0x197c   :  { %v6227_v52 = vadd.f32 %v6226_v27, %v6219_v61 }
0x197e   :  { %v6228_v17 = vsub.f32 %v6215_v8, %v6227_v52 }
0x1980   :  { %6230 = vst.msk [vmem:[%s11586_s11] sm:$0xff] %vm6229_vm1, %v6228_v17 }

</bundles_post_ra>
